<compile_context>
chip_gen: v6e
topology: v6e:2x2x1
jax: 0.10.0
libtpu: 0.0.40
codegen_flags: <defaults>
</compile_context>

<pallas_src>
import functools

import numpy as np
import jax
import jax.numpy as jnp
from jax.experimental import pallas as pl
from jax.experimental.pallas import tpu as pltpu

N_EDGE_TYPE = 7  # matches GraphConvBnRelu(n_edge_type=7, avg_degree=7)

# Edge-type / stencil direction table, shared by the reference graph builder
# and the Pallas-path voxel stencil: type 0 = self, types 1..6 = face neighbors.
DIRS = ((0, 0, 0),
        (-1, 0, 0), (1, 0, 0),
        (0, -1, 0), (0, 1, 0),
        (0, 0, -1), (0, 0, 1))


# ----------------------------------------------------------------------------
# Pallas kernel: fused  (x @ W) * bn_scale + bn_shift  (+ReLU)  (+8-child pool)
# ----------------------------------------------------------------------------
def _mm_bn_act_kernel(x_ref, w_ref, s_ref, b_ref, o_ref, *, relu, pool8):
    # bf16 x bf16 -> f32 accumulation on the MXU; BN/ReLU epilogue in f32.
    acc = jnp.dot(x_ref[...], w_ref[...], preferred_element_type=jnp.float32)
    y = acc * s_ref[...] + b_ref[...]
    if relu:
        y = jnp.maximum(y, 0.0)
    if pool8:
        # OctreeMaxPool fused into the epilogue: rows are ordered so that every
        # group of 8 consecutive rows holds the 8 children of one coarse node.
        tm, n = y.shape
        y = jnp.max(y.reshape(tm // 8, 8, n), axis=1)
    o_ref[...] = y.astype(o_ref.dtype)


def _pick_tile(m, cap, align):
    """Largest t with t % align == 0, t <= cap, m % t == 0; or t == m if m <= cap."""
    if m <= cap:
        return m
    t = (cap // align) * align
    while t >= align:
        if m % t == 0:
            return t
        t -= align
    raise ValueError(f"no valid row tile for m={m}, cap={cap}, align={align}")


def matmul_bn_act(x, w, scale, shift, *, relu, pool8=False,
                  out_dtype=jnp.bfloat16, tile_cap=2048):
    """maybe_pool8(maybe_relu((x @ w) * scale + shift)).

    x:(M,K), w:(K,N), scale/shift:(N,). Inputs are cast to bf16 (full MXU rate,
    half the HBM read bytes); accumulation and the BN/ReLU epilogue stay f32.
    pool8=True additionally reduces each group of 8 consecutive output rows
    with max before the store, producing (M//8, N).
    """
    M, K = x.shape
    K2, N = w.shape
    assert K == K2
    group = 8 if pool8 else 1
    assert M % group == 0
    tm = _pick_tile(M, cap=tile_cap, align=8 * group)
    # Guard against silent tail-dropping (review correctness item).
    assert M % tm == 0 and tm % group == 0, (M, tm, group)
    tmo, mo = tm // group, M // group

    xq = x.astype(jnp.bfloat16)
    wq = w.astype(jnp.bfloat16)
    kernel = functools.partial(_mm_bn_act_kernel, relu=relu, pool8=pool8)
    return pl.pallas_call(
        kernel,
        out_shape=jax.ShapeDtypeStruct((mo, N), out_dtype),
        grid_spec=pltpu.PrefetchScalarGridSpec(
            num_scalar_prefetch=0,
            grid=(M // tm,),
            in_specs=[
                pl.BlockSpec((tm, K), lambda i: (i, 0)),
                pl.BlockSpec((K, N), lambda i: (0, 0)),   # grid-invariant weight
                pl.BlockSpec((1, N), lambda i: (0, 0)),   # folded-BN scale
                pl.BlockSpec((1, N), lambda i: (0, 0)),   # folded-BN shift
            ],
            out_specs=pl.BlockSpec((tmo, N), lambda i: (i, 0)),
        ),
        compiler_params=pltpu.CompilerParams(
            dimension_semantics=("parallel",),
            # Explicit VMEM budget: largest kernel here uses < 3 MiB, so this is
            # generous yet safe on v7x (64 MiB physical) / v6e / v5e.
            vmem_limit_bytes=32 * 1024 * 1024,
        ),
    )(xq, wq,
      scale.reshape(1, N).astype(jnp.float32),
      shift.reshape(1, N).astype(jnp.float32))


# ----------------------------------------------------------------------------
# Voxel-stencil aggregation (replaces gather + segment_sum on the Pallas path)
# ----------------------------------------------------------------------------
def stencil_aggregate(grid):
    """Self + 6 face-neighbor aggregation on one full-octree level.

    grid: (B, n, n, n, C) features in voxel-linear order (x major, z fastest).
    Returns (B*n^3, 7*C) with rows ordered "parent-major, child-octant-minor":
    8 consecutive rows = the 8 children of one depth-(d-1) cell, so the max
    pool can be fused into the matmul kernel, and the pooled output comes back
    in voxel-linear order at depth d-1.  No gather / scatter anywhere.
    """
    B, n, _, _, C = grid.shape
    m = n // 2
    gp = jnp.pad(grid, ((0, 0), (1, 1), (1, 1), (1, 1), (0, 0)))
    nbrs = [gp[:, 1 + dx:1 + dx + n, 1 + dy:1 + dy + n, 1 + dz:1 + dz + n, :]
            for dx, dy, dz in DIRS]
    agg = jnp.stack(nbrs, axis=-2)                            # (B, X, Y, Z, 7, C)
    agg = agg.reshape(B, m, 2, m, 2, m, 2, N_EDGE_TYPE, C)
    agg = jnp.transpose(agg, (0, 1, 3, 5, 2, 4, 6, 7, 8))     # parents major, octants minor
    return agg.reshape(B * m * m * m * 8, N_EDGE_TYPE * C)


# ----------------------------------------------------------------------------
# Octree / graph bookkeeping (synthetic, deterministic; host-side glue)
# ----------------------------------------------------------------------------
def _morton_decode(idx, depth):
    x = np.zeros_like(idx)
    y = np.zeros_like(idx)
    z = np.zeros_like(idx)
    for b in range(depth):
        x |= ((idx >> (3 * b + 2)) & 1) << b
        y |= ((idx >> (3 * b + 1)) & 1) << b
        z |= ((idx >> (3 * b + 0)) & 1) << b
    return x, y, z


def _morton_encode(x, y, z, depth):
    k = np.zeros_like(x)
    for b in range(depth):
        k |= ((x >> b) & 1) << (3 * b + 2)
        k |= ((y >> b) & 1) << (3 * b + 1)
        k |= ((z >> b) & 1) << (3 * b + 0)
    return k


def _voxel_to_morton_perm(depth):
    """perm[voxel_linear_index] = morton_index  (x major, z fastest)."""
    n = 2 ** depth
    v = np.arange(n)
    xs, ys, zs = np.meshgrid(v, v, v, indexing="ij")
    return _morton_encode(xs.ravel(), ys.ravel(), zs.ravel(), depth)


def build_graph(d, batch):
    """Full-octree dual graph at depth d: self edge (type 0) + 6 face neighbors."""
    n = 2 ** d
    npts = n ** 3
    idx = np.arange(npts, dtype=np.int64)
    x, y, z = _morton_decode(idx, d)
    rows, cols, types = [idx], [idx], [np.zeros(npts, np.int64)]
    for t, (dx, dy, dz) in enumerate(DIRS[1:], start=1):
        nx, ny, nz = x + dx, y + dy, z + dz
        ok = (nx >= 0) & (nx < n) & (ny >= 0) & (ny < n) & (nz >= 0) & (nz < n)
        nk = _morton_encode(nx[ok], ny[ok], nz[ok], d)
        rows.append(idx[ok])
        cols.append(nk)
        types.append(np.full(int(ok.sum()), t, np.int64))
    row = np.concatenate(rows)
    col = np.concatenate(cols)
    et = np.concatenate(types)
    row_all = np.concatenate([row + s * npts for s in range(batch)])
    col_all = np.concatenate([col + s * npts for s in range(batch)])
    et_all = np.tile(et, batch)
    return {
        "edge_idx": jnp.asarray(np.stack([row_all, col_all]), jnp.int32),
        "edge_type": jnp.asarray(et_all, jnp.int32),
    }


def full_octree2voxel(x, batch, depth=2):
    """ocnn.FullOctree2Voxel(2) + flatten (reference path): Morton -> voxel order."""
    n_per = 8 ** depth
    perm = _voxel_to_morton_perm(depth)                  # voxel -> morton
    data = x.reshape(batch, n_per, -1)[:, perm, :]       # (B, 64, C) voxel-linear
    data = jnp.transpose(data, (0, 2, 1))                # (B, C, 64) channel-major
    return data.reshape(batch, -1)


# ----------------------------------------------------------------------------
# Model
# ----------------------------------------------------------------------------
def fold_bn(gamma, beta, mean, var, eps=1e-5):
    scale = gamma / jnp.sqrt(var + eps)
    shift = beta - mean * scale
    return scale, shift


def init_params(key, depth, channel_in, nout):
    channels = [2 ** max(9 - i, 2) for i in range(depth + 1)]
    channels.append(channel_in)
    params = {"convs": [], "header": {}}
    for d in range(depth, 2, -1):
        c_in, c_out = channels[d + 1], channels[d]
        key, k1, k2, k3, k4, k5 = jax.random.split(key, 6)
        w = jax.random.normal(k1, (N_EDGE_TYPE * c_in, c_out), jnp.float32)
        w = w / np.sqrt(N_EDGE_TYPE * c_in)
        gamma = 1.0 + 0.1 * jax.random.normal(k2, (c_out,), jnp.float32)
        beta = 0.1 * jax.random.normal(k3, (c_out,), jnp.float32)
        mean = 0.1 * jax.random.normal(k4, (c_out,), jnp.float32)
        var = 1.0 + 0.1 * jax.random.uniform(k5, (c_out,), jnp.float32)
        params["convs"].append({"w": w, "bn": fold_bn(gamma, beta, mean, var)})
    fin, fmid = channels[3] * 64, channels[2]
    key, k1, k2, k3, k4, k5, k6, k7 = jax.random.split(key, 8)
    w1 = jax.random.normal(k1, (fin, fmid), jnp.float32) / np.sqrt(fin)
    gamma = 1.0 + 0.1 * jax.random.normal(k2, (fmid,), jnp.float32)
    beta = 0.1 * jax.random.normal(k3, (fmid,), jnp.float32)
    mean = 0.1 * jax.random.normal(k4, (fmid,), jnp.float32)
    var = 1.0 + 0.1 * jax.random.uniform(k5, (fmid,), jnp.float32)
    w2 = jax.random.normal(k6, (fmid, nout), jnp.float32) / np.sqrt(fmid)
    b2 = 0.1 * jax.random.normal(k7, (nout,), jnp.float32)
    params["header"] = {"w1": w1, "bn1": fold_bn(gamma, beta, mean, var),
                        "w2": w2, "b2": b2}
    return params


def graph_lenet_forward(params, feature, depth, batch):
    """Pallas forward.  feature: (batch * 8**depth, channel_in), octree (Morton) order."""
    n = 2 ** depth
    c_in = feature.shape[-1]
    # Morton (octree) node order -> voxel-linear grid, once, up front.
    perm = jnp.asarray(_voxel_to_morton_perm(depth), jnp.int32)
    data = feature.reshape(batch, n ** 3, c_in)[:, perm, :]
    data = data.reshape(batch, n, n, n, c_in)
    for i, d in enumerate(range(depth, 2, -1)):
        cv = params["convs"][i]
        agg = stencil_aggregate(data)                         # (B*8^d, 7*C_in)
        out = matmul_bn_act(agg, cv["w"], cv["bn"][0], cv["bn"][1],
                            relu=True, pool8=True, out_dtype=jnp.bfloat16)
        m = 2 ** (d - 1)
        data = out.reshape(batch, m, m, m, -1)                # voxel grid, depth d-1
    # ocnn.FullOctree2Voxel(2) + flatten: already voxel-linear -> pure reshape.
    data = jnp.transpose(data.reshape(batch, 64, -1), (0, 2, 1)).reshape(batch, -1)
    h = params["header"]
    # Dropout(p=0.5): eval-mode identity.
    data = matmul_bn_act(data, h["w1"], h["bn1"][0], h["bn1"][1],
                         relu=True, out_dtype=jnp.bfloat16)            # FcBnRelu
    data = matmul_bn_act(data, h["w2"], jnp.ones_like(h["b2"]), h["b2"],
                         relu=False, out_dtype=jnp.float32)            # final Linear
    return data


# ----------------------------------------------------------------------------
# Pure-JAX reference: spec-faithful edge-list GraphConv (gather + segment_sum),
# Morton-order pooling and FullOctree2Voxel.  Matmuls mirror the kernels'
# bf16-input / f32-accumulate numerics so the check isolates implementation
# differences (stencil vs. graph, Pallas vs. XLA) rather than dtype.
# ----------------------------------------------------------------------------
def _mm_affine_ref(x, w, scale, shift, relu):
    y = jnp.dot(x.astype(jnp.bfloat16), w.astype(jnp.bfloat16),
                preferred_element_type=jnp.float32) * scale + shift
    return jnp.maximum(y, 0.0) if relu else y


def graph_conv_bn_relu_ref(x, edge_idx, edge_type, weight, bn_scale, bn_shift):
    n, c_in = x.shape
    col_feat = x[edge_idx[1]]                               # gather source feats (E, Cin)
    seg = edge_idx[0] * N_EDGE_TYPE + edge_type             # (E,)
    agg = jax.ops.segment_sum(col_feat, seg, num_segments=n * N_EDGE_TYPE)
    agg = agg.reshape(n, N_EDGE_TYPE * c_in)
    return _mm_affine_ref(agg, weight, bn_scale, bn_shift, True)


def octree_max_pool_ref(x):
    n, c = x.shape
    return jnp.max(x.reshape(n // 8, 8, c), axis=1)


def graph_lenet_forward_ref(params, feature, graphs, depth, batch):
    data = feature
    for i, d in enumerate(range(depth, 2, -1)):
        g = graphs[d]
        cv = params["convs"][i]
        data = graph_conv_bn_relu_ref(data, g["edge_idx"], g["edge_type"],
                                      cv["w"], cv["bn"][0], cv["bn"][1])
        data = octree_max_pool_ref(data)                 # octree depth d -> d-1
    data = full_octree2voxel(data, batch, depth=2)       # (batch, channels[3]*64)
    h = params["header"]
    data = _mm_affine_ref(data, h["w1"], h["bn1"][0], h["bn1"][1], True)
    data = _mm_affine_ref(data, h["w2"], jnp.ones_like(h["b2"]), h["b2"], False)
    return data


# ----------------------------------------------------------------------------
if __name__ == "__main__":
    depth, channel_in, nout, batch = 4, 4, 8, 2

    key = jax.random.PRNGKey(0)
    key, kf = jax.random.split(key)
    n_nodes = batch * 8 ** depth
    # Octree feature at self.depth; PyTorch layout would be (1, channel_in, N, 1),
    # here stored node-major (N, channel_in) in Morton (octree) node order.
    feature = jax.random.normal(kf, (n_nodes, channel_in), jnp.float32)

    params = init_params(key, depth, channel_in, nout)

    fwd = jax.jit(functools.partial(graph_lenet_forward, depth=depth, batch=batch))
    out = jax.block_until_ready(fwd(params, feature))
    assert out.shape == (batch, nout)

    # Reference check: explicit dual-octree edge list + segment_sum formulation.
    # Tolerance covers f32-accumulation-order / rare bf16 re-rounding differences
    # only; any layout/stencil/pooling bug would be O(1).
    graphs = {d: build_graph(d, batch) for d in range(depth, 2, -1)}
    ref = graph_lenet_forward_ref(params, feature, graphs, depth, batch)
    np.testing.assert_allclose(np.asarray(out), np.asarray(ref), rtol=1e-2, atol=1e-2)

    print("KERNEL_OK")
</pallas_src>

<mosaic_0001>
module attributes {stable_mosaic.version = 11 : i64} {
  func.func @_mm_bn_act_kernel(%arg0: i32, %arg1: memref<2048x28xbf16, #tpu.memory_space<vmem>>, %arg2: memref<28x32xbf16, #tpu.memory_space<vmem>>, %arg3: memref<1x32xf32, #tpu.memory_space<vmem>>, %arg4: memref<1x32xf32, #tpu.memory_space<vmem>>, %arg5: memref<256x32xbf16, #tpu.memory_space<vmem>>) attributes {dimension_semantics = [#tpu.dimension_semantics<parallel>], iteration_bounds = array<i64: 4>, scalar_prefetch = 0 : i64, scratch_operands = 0 : i64, tpu.core_type = #tpu.core_type<tc>, window_params = [{transform_indices = @transform_0, window_bounds = array<i64: 2048, 28>}, {pipeline_mode = #tpu.pipeline_mode<synchronous>, transform_indices = @transform_1, window_bounds = array<i64: 28, 32>}, {pipeline_mode = #tpu.pipeline_mode<synchronous>, transform_indices = @transform_2, window_bounds = array<i64: 1, 32>}, {pipeline_mode = #tpu.pipeline_mode<synchronous>, transform_indices = @transform_3, window_bounds = array<i64: 1, 32>}, {transform_indices = @transform_4, window_bounds = array<i64: 256, 32>}]} {
    %c0 = arith.constant 0 : index
    %c0_0 = arith.constant 0 : index
    %0 = vector.load %arg1[%c0, %c0_0] : memref<2048x28xbf16, #tpu.memory_space<vmem>>, vector<2048x28xbf16>
    %c0_1 = arith.constant 0 : index
    %c0_2 = arith.constant 0 : index
    %1 = vector.load %arg2[%c0_1, %c0_2] : memref<28x32xbf16, #tpu.memory_space<vmem>>, vector<28x32xbf16>
    %cst = arith.constant dense<0.000000e+00> : vector<2048x32xf32>
    %2 = tpu.matmul %0, %1, %cst {dimension_numbers = #tpu.dot_dimension_numbers<[1], [0], [0], [1], [0, 0, 1, 1], [], []>} : vector<2048x28xbf16>, vector<28x32xbf16>, vector<2048x32xf32> -> vector<2048x32xf32>
    %c0_3 = arith.constant 0 : index
    %c0_4 = arith.constant 0 : index
    %3 = vector.load %arg3[%c0_3, %c0_4] : memref<1x32xf32, #tpu.memory_space<vmem>>, vector<1x32xf32>
    %4 = vector.broadcast %3 : vector<1x32xf32> to vector<2048x32xf32>
    %5 = arith.mulf %2, %4 : vector<2048x32xf32>
    %c0_5 = arith.constant 0 : index
    %c0_6 = arith.constant 0 : index
    %6 = vector.load %arg4[%c0_5, %c0_6] : memref<1x32xf32, #tpu.memory_space<vmem>>, vector<1x32xf32>
    %7 = vector.broadcast %6 : vector<1x32xf32> to vector<2048x32xf32>
    %8 = arith.addf %5, %7 : vector<2048x32xf32>
    %cst_7 = arith.constant 0.000000e+00 : f32
    %9 = vector.broadcast %cst_7 : f32 to vector<2048x32xf32>
    %10 = arith.maximumf %8, %9 : vector<2048x32xf32>
    %11 = vector.shape_cast %10 : vector<2048x32xf32> to vector<256x8x32xf32>
    %cst_8 = arith.constant dense<0xFF800000> : vector<256x32xf32>
    %12 = vector.multi_reduction <maximumf>, %11, %cst_8 [1] : vector<256x8x32xf32> to vector<256x32xf32>
    %13 = arith.truncf %12 : vector<256x32xf32> to vector<256x32xbf16>
    %c0_9 = arith.constant 0 : index
    %c0_10 = arith.constant 0 : index
    %14 = vector.load %arg5[%c0_9, %c0_10] : memref<256x32xbf16, #tpu.memory_space<vmem>>, vector<256x32xbf16>
    tpu.vector_store %arg5[%c0_9, %c0_10], %13 {strides = array<i32>} : memref<256x32xbf16, #tpu.memory_space<vmem>>, vector<256x32xbf16>,
    return
  }
  func.func @transform_0(%arg0: i32) -> (i32, i32) {
    %c0_i32 = arith.constant 0 : i32
    %c0_i32_0 = arith.constant 0 : i32
    return %arg0, %c0_i32 : i32, i32
  }
  func.func @transform_1(%arg0: i32) -> (i32, i32) {
    %c0_i32 = arith.constant 0 : i32
    %c0_i32_0 = arith.constant 0 : i32
    %c0_i32_1 = arith.constant 0 : i32
    return %c0_i32, %c0_i32_0 : i32, i32
  }
  func.func @transform_2(%arg0: i32) -> (i32, i32) {
    %c0_i32 = arith.constant 0 : i32
    %c0_i32_0 = arith.constant 0 : i32
    %c0_i32_1 = arith.constant 0 : i32
    return %c0_i32, %c0_i32_0 : i32, i32
  }
  func.func @transform_3(%arg0: i32) -> (i32, i32) {
    %c0_i32 = arith.constant 0 : i32
    %c0_i32_0 = arith.constant 0 : i32
    %c0_i32_1 = arith.constant 0 : i32
    return %c0_i32, %c0_i32_0 : i32, i32
  }
  func.func @transform_4(%arg0: i32) -> (i32, i32) {
    %c0_i32 = arith.constant 0 : i32
    %c0_i32_0 = arith.constant 0 : i32
    return %arg0, %c0_i32 : i32, i32
  }
}

module attributes {stable_mosaic.version = 11 : i64} {
  func.func @_mm_bn_act_kernel(%arg0: i32, %arg1: memref<1024x224xbf16, #tpu.memory_space<vmem>>, %arg2: memref<224x64xbf16, #tpu.memory_space<vmem>>, %arg3: memref<1x64xf32, #tpu.memory_space<vmem>>, %arg4: memref<1x64xf32, #tpu.memory_space<vmem>>, %arg5: memref<128x64xbf16, #tpu.memory_space<vmem>>) attributes {dimension_semantics = [#tpu.dimension_semantics<parallel>], iteration_bounds = array<i64: 1>, scalar_prefetch = 0 : i64, scratch_operands = 0 : i64, tpu.core_type = #tpu.core_type<tc>, window_params = [{transform_indices = @transform_0, window_bounds = array<i64: 1024, 224>}, {pipeline_mode = #tpu.pipeline_mode<synchronous>, transform_indices = @transform_1, window_bounds = array<i64: 224, 64>}, {pipeline_mode = #tpu.pipeline_mode<synchronous>, transform_indices = @transform_2, window_bounds = array<i64: 1, 64>}, {pipeline_mode = #tpu.pipeline_mode<synchronous>, transform_indices = @transform_3, window_bounds = array<i64: 1, 64>}, {transform_indices = @transform_4, window_bounds = array<i64: 128, 64>}]} {
    %c0 = arith.constant 0 : index
    %c0_0 = arith.constant 0 : index
    %0 = vector.load %arg1[%c0, %c0_0] : memref<1024x224xbf16, #tpu.memory_space<vmem>>, vector<1024x224xbf16>
    %c0_1 = arith.constant 0 : index
    %c0_2 = arith.constant 0 : index
    %1 = vector.load %arg2[%c0_1, %c0_2] : memref<224x64xbf16, #tpu.memory_space<vmem>>, vector<224x64xbf16>
    %cst = arith.constant dense<0.000000e+00> : vector<1024x64xf32>
    %2 = tpu.matmul %0, %1, %cst {dimension_numbers = #tpu.dot_dimension_numbers<[1], [0], [0], [1], [0, 0, 1, 1], [], []>} : vector<1024x224xbf16>, vector<224x64xbf16>, vector<1024x64xf32> -> vector<1024x64xf32>
    %c0_3 = arith.constant 0 : index
    %c0_4 = arith.constant 0 : index
    %3 = vector.load %arg3[%c0_3, %c0_4] : memref<1x64xf32, #tpu.memory_space<vmem>>, vector<1x64xf32>
    %4 = vector.broadcast %3 : vector<1x64xf32> to vector<1024x64xf32>
    %5 = arith.mulf %2, %4 : vector<1024x64xf32>
    %c0_5 = arith.constant 0 : index
    %c0_6 = arith.constant 0 : index
    %6 = vector.load %arg4[%c0_5, %c0_6] : memref<1x64xf32, #tpu.memory_space<vmem>>, vector<1x64xf32>
    %7 = vector.broadcast %6 : vector<1x64xf32> to vector<1024x64xf32>
    %8 = arith.addf %5, %7 : vector<1024x64xf32>
    %cst_7 = arith.constant 0.000000e+00 : f32
    %9 = vector.broadcast %cst_7 : f32 to vector<1024x64xf32>
    %10 = arith.maximumf %8, %9 : vector<1024x64xf32>
    %11 = vector.shape_cast %10 : vector<1024x64xf32> to vector<128x8x64xf32>
    %cst_8 = arith.constant dense<0xFF800000> : vector<128x64xf32>
    %12 = vector.multi_reduction <maximumf>, %11, %cst_8 [1] : vector<128x8x64xf32> to vector<128x64xf32>
    %13 = arith.truncf %12 : vector<128x64xf32> to vector<128x64xbf16>
    %c0_9 = arith.constant 0 : index
    %c0_10 = arith.constant 0 : index
    %14 = vector.load %arg5[%c0_9, %c0_10] : memref<128x64xbf16, #tpu.memory_space<vmem>>, vector<128x64xbf16>
    tpu.vector_store %arg5[%c0_9, %c0_10], %13 {strides = array<i32>} : memref<128x64xbf16, #tpu.memory_space<vmem>>, vector<128x64xbf16>,
    return
  }
  func.func @transform_0(%arg0: i32) -> (i32, i32) {
    %c0_i32 = arith.constant 0 : i32
    %c0_i32_0 = arith.constant 0 : i32
    return %arg0, %c0_i32 : i32, i32
  }
  func.func @transform_1(%arg0: i32) -> (i32, i32) {
    %c0_i32 = arith.constant 0 : i32
    %c0_i32_0 = arith.constant 0 : i32
    %c0_i32_1 = arith.constant 0 : i32
    return %c0_i32, %c0_i32_0 : i32, i32
  }
  func.func @transform_2(%arg0: i32) -> (i32, i32) {
    %c0_i32 = arith.constant 0 : i32
    %c0_i32_0 = arith.constant 0 : i32
    %c0_i32_1 = arith.constant 0 : i32
    return %c0_i32, %c0_i32_0 : i32, i32
  }
  func.func @transform_3(%arg0: i32) -> (i32, i32) {
    %c0_i32 = arith.constant 0 : i32
    %c0_i32_0 = arith.constant 0 : i32
    %c0_i32_1 = arith.constant 0 : i32
    return %c0_i32, %c0_i32_0 : i32, i32
  }
  func.func @transform_4(%arg0: i32) -> (i32, i32) {
    %c0_i32 = arith.constant 0 : i32
    %c0_i32_0 = arith.constant 0 : i32
    return %arg0, %c0_i32 : i32, i32
  }
}

module attributes {stable_mosaic.version = 11 : i64} {
  func.func @_mm_bn_act_kernel(%arg0: i32, %arg1: memref<2x4096xbf16, #tpu.memory_space<vmem>>, %arg2: memref<4096x128xbf16, #tpu.memory_space<vmem>>, %arg3: memref<1x128xf32, #tpu.memory_space<vmem>>, %arg4: memref<1x128xf32, #tpu.memory_space<vmem>>, %arg5: memref<2x128xbf16, #tpu.memory_space<vmem>>) attributes {dimension_semantics = [#tpu.dimension_semantics<parallel>], iteration_bounds = array<i64: 1>, scalar_prefetch = 0 : i64, scratch_operands = 0 : i64, tpu.core_type = #tpu.core_type<tc>, window_params = [{transform_indices = @transform_0, window_bounds = array<i64: 2, 4096>}, {pipeline_mode = #tpu.pipeline_mode<synchronous>, transform_indices = @transform_1, window_bounds = array<i64: 4096, 128>}, {pipeline_mode = #tpu.pipeline_mode<synchronous>, transform_indices = @transform_2, window_bounds = array<i64: 1, 128>}, {pipeline_mode = #tpu.pipeline_mode<synchronous>, transform_indices = @transform_3, window_bounds = array<i64: 1, 128>}, {transform_indices = @transform_4, window_bounds = array<i64: 2, 128>}]} {
    %c0 = arith.constant 0 : index
    %c0_0 = arith.constant 0 : index
    %0 = vector.load %arg1[%c0, %c0_0] : memref<2x4096xbf16, #tpu.memory_space<vmem>>, vector<2x4096xbf16>
    %c0_1 = arith.constant 0 : index
    %c0_2 = arith.constant 0 : index
    %1 = vector.load %arg2[%c0_1, %c0_2] : memref<4096x128xbf16, #tpu.memory_space<vmem>>, vector<4096x128xbf16>
    %cst = arith.constant dense<0.000000e+00> : vector<2x128xf32>
    %2 = tpu.matmul %0, %1, %cst {dimension_numbers = #tpu.dot_dimension_numbers<[1], [0], [0], [1], [0, 0, 1, 1], [], []>} : vector<2x4096xbf16>, vector<4096x128xbf16>, vector<2x128xf32> -> vector<2x128xf32>
    %c0_3 = arith.constant 0 : index
    %c0_4 = arith.constant 0 : index
    %3 = vector.load %arg3[%c0_3, %c0_4] : memref<1x128xf32, #tpu.memory_space<vmem>>, vector<1x128xf32>
    %4 = vector.broadcast %3 : vector<1x128xf32> to vector<2x128xf32>
    %5 = arith.mulf %2, %4 : vector<2x128xf32>
    %c0_5 = arith.constant 0 : index
    %c0_6 = arith.constant 0 : index
    %6 = vector.load %arg4[%c0_5, %c0_6] : memref<1x128xf32, #tpu.memory_space<vmem>>, vector<1x128xf32>
    %7 = vector.broadcast %6 : vector<1x128xf32> to vector<2x128xf32>
    %8 = arith.addf %5, %7 : vector<2x128xf32>
    %cst_7 = arith.constant 0.000000e+00 : f32
    %9 = vector.broadcast %cst_7 : f32 to vector<2x128xf32>
    %10 = arith.maximumf %8, %9 : vector<2x128xf32>
    %11 = arith.truncf %10 : vector<2x128xf32> to vector<2x128xbf16>
    %c0_8 = arith.constant 0 : index
    %c0_9 = arith.constant 0 : index
    %12 = vector.load %arg5[%c0_8, %c0_9] : memref<2x128xbf16, #tpu.memory_space<vmem>>, vector<2x128xbf16>
    tpu.vector_store %arg5[%c0_8, %c0_9], %11 {strides = array<i32>} : memref<2x128xbf16, #tpu.memory_space<vmem>>, vector<2x128xbf16>,
    return
  }
  func.func @transform_0(%arg0: i32) -> (i32, i32) {
    %c0_i32 = arith.constant 0 : i32
    %c0_i32_0 = arith.constant 0 : i32
    return %arg0, %c0_i32 : i32, i32
  }
  func.func @transform_1(%arg0: i32) -> (i32, i32) {
    %c0_i32 = arith.constant 0 : i32
    %c0_i32_0 = arith.constant 0 : i32
    %c0_i32_1 = arith.constant 0 : i32
    return %c0_i32, %c0_i32_0 : i32, i32
  }
  func.func @transform_2(%arg0: i32) -> (i32, i32) {
    %c0_i32 = arith.constant 0 : i32
    %c0_i32_0 = arith.constant 0 : i32
    %c0_i32_1 = arith.constant 0 : i32
    return %c0_i32, %c0_i32_0 : i32, i32
  }
  func.func @transform_3(%arg0: i32) -> (i32, i32) {
    %c0_i32 = arith.constant 0 : i32
    %c0_i32_0 = arith.constant 0 : i32
    %c0_i32_1 = arith.constant 0 : i32
    return %c0_i32, %c0_i32_0 : i32, i32
  }
  func.func @transform_4(%arg0: i32) -> (i32, i32) {
    %c0_i32 = arith.constant 0 : i32
    %c0_i32_0 = arith.constant 0 : i32
    return %arg0, %c0_i32 : i32, i32
  }
}

module attributes {stable_mosaic.version = 11 : i64} {
  func.func @_mm_bn_act_kernel(%arg0: i32, %arg1: memref<2x128xbf16, #tpu.memory_space<vmem>>, %arg2: memref<128x8xbf16, #tpu.memory_space<vmem>>, %arg3: memref<1x8xf32, #tpu.memory_space<vmem>>, %arg4: memref<1x8xf32, #tpu.memory_space<vmem>>, %arg5: memref<2x8xf32, #tpu.memory_space<vmem>>) attributes {dimension_semantics = [#tpu.dimension_semantics<parallel>], iteration_bounds = array<i64: 1>, scalar_prefetch = 0 : i64, scratch_operands = 0 : i64, tpu.core_type = #tpu.core_type<tc>, window_params = [{transform_indices = @transform_0, window_bounds = array<i64: 2, 128>}, {pipeline_mode = #tpu.pipeline_mode<synchronous>, transform_indices = @transform_1, window_bounds = array<i64: 128, 8>}, {pipeline_mode = #tpu.pipeline_mode<synchronous>, transform_indices = @transform_2, window_bounds = array<i64: 1, 8>}, {pipeline_mode = #tpu.pipeline_mode<synchronous>, transform_indices = @transform_3, window_bounds = array<i64: 1, 8>}, {transform_indices = @transform_4, window_bounds = array<i64: 2, 8>}]} {
    %c0 = arith.constant 0 : index
    %c0_0 = arith.constant 0 : index
    %0 = vector.load %arg1[%c0, %c0_0] : memref<2x128xbf16, #tpu.memory_space<vmem>>, vector<2x128xbf16>
    %c0_1 = arith.constant 0 : index
    %c0_2 = arith.constant 0 : index
    %1 = vector.load %arg2[%c0_1, %c0_2] : memref<128x8xbf16, #tpu.memory_space<vmem>>, vector<128x8xbf16>
    %cst = arith.constant dense<0.000000e+00> : vector<2x8xf32>
    %2 = tpu.matmul %0, %1, %cst {dimension_numbers = #tpu.dot_dimension_numbers<[1], [0], [0], [1], [0, 0, 1, 1], [], []>} : vector<2x128xbf16>, vector<128x8xbf16>, vector<2x8xf32> -> vector<2x8xf32>
    %c0_3 = arith.constant 0 : index
    %c0_4 = arith.constant 0 : index
    %3 = vector.load %arg3[%c0_3, %c0_4] : memref<1x8xf32, #tpu.memory_space<vmem>>, vector<1x8xf32>
    %4 = vector.broadcast %3 : vector<1x8xf32> to vector<2x8xf32>
    %5 = arith.mulf %2, %4 : vector<2x8xf32>
    %c0_5 = arith.constant 0 : index
    %c0_6 = arith.constant 0 : index
    %6 = vector.load %arg4[%c0_5, %c0_6] : memref<1x8xf32, #tpu.memory_space<vmem>>, vector<1x8xf32>
    %7 = vector.broadcast %6 : vector<1x8xf32> to vector<2x8xf32>
    %8 = arith.addf %5, %7 : vector<2x8xf32>
    %c0_7 = arith.constant 0 : index
    %c0_8 = arith.constant 0 : index
    %9 = vector.load %arg5[%c0_7, %c0_8] : memref<2x8xf32, #tpu.memory_space<vmem>>, vector<2x8xf32>
    tpu.vector_store %arg5[%c0_7, %c0_8], %8 {strides = array<i32>} : memref<2x8xf32, #tpu.memory_space<vmem>>, vector<2x8xf32>,
    return
  }
  func.func @transform_0(%arg0: i32) -> (i32, i32) {
    %c0_i32 = arith.constant 0 : i32
    %c0_i32_0 = arith.constant 0 : i32
    return %arg0, %c0_i32 : i32, i32
  }
  func.func @transform_1(%arg0: i32) -> (i32, i32) {
    %c0_i32 = arith.constant 0 : i32
    %c0_i32_0 = arith.constant 0 : i32
    %c0_i32_1 = arith.constant 0 : i32
    return %c0_i32, %c0_i32_0 : i32, i32
  }
  func.func @transform_2(%arg0: i32) -> (i32, i32) {
    %c0_i32 = arith.constant 0 : i32
    %c0_i32_0 = arith.constant 0 : i32
    %c0_i32_1 = arith.constant 0 : i32
    return %c0_i32, %c0_i32_0 : i32, i32
  }
  func.func @transform_3(%arg0: i32) -> (i32, i32) {
    %c0_i32 = arith.constant 0 : i32
    %c0_i32_0 = arith.constant 0 : i32
    %c0_i32_1 = arith.constant 0 : i32
    return %c0_i32, %c0_i32_0 : i32, i32
  }
  func.func @transform_4(%arg0: i32) -> (i32, i32) {
    %c0_i32 = arith.constant 0 : i32
    %c0_i32_0 = arith.constant 0 : i32
    return %arg0, %c0_i32 : i32, i32
  }
}

</mosaic_0001>

<bundles_post_ra>
// kernel: graph_lenet_forward.4
= control target key start
LH: loop header
LB: loop body
LE: loop exit
PB: predicated region body
PF: predicated region fallthrough
CT: control target
= control target key end

     0   :  { %s8160_s15 = smov 0   ;;  %s10133_s0 = inlined_call_operand.vmem [shape: bf16[8192,28], index: 0, kind: input, shape index: {}]   ;;  %s10134_s1 = inlined_call_operand.vmem [shape: bf16[28,32], index: 1, kind: input, shape index: {}]   ;;  %s10135_s2 = inlined_call_operand.vmem [shape: f32[1,32], index: 2, kind: input, shape index: {}]   ;;  %s10136_s3 = inlined_call_operand.vmem [shape: f32[1,32], index: 3, kind: input, shape index: {}]   ;;  %s10137_s4 = inlined_call_operand.vmem [shape: bf16[1024,32], index: 4, kind: output, shape index: {}]  }
   0x1 LB: > { %s6798_s16 = sadd.s32 4294967295, %s8133_s15   ;;  %p6802_p0 = scmp.ge.s32.totalorder %s8133_s15, 1  ;;  %s8133_s15 = sphi %s8160_s15, %s14_s15  }
   0x2   : > { %p163_p1 = scmp.lt.s32.totalorder %s8133_s15, 5 }
   0x4   : > { %p164_p2 = pnand %p6802_p0, %p163_p1 }
   0x5   : > { %s6803_s21 = sshll.u32 (!%p164_p2), %s6798_s16, 8  ;;  %s8538_s30 = sshll.u32 (!%p164_p2), %s6798_s16, 5 }
   0x6   : > { %167 = sbr.rel (%p164_p2) target bundleno = 1054 (0x41e), region = 36  ;;  %p190_p3 = scmp.lt.s32.totalorder (!%p164_p2), %s6803_s21, 1023 }
   0x7   : > { %p196_p4 = scmp.lt.s32.totalorder (!%p164_p2), %s8538_s30, 127 }
   0xb   : > { %v7985_v0 = vld [vmem:[%s10134_s1 + $0x8] sm:$0x3f]   ;;  %vm1498_vm0 = vcmask 1045504   ;;  %v7986_v1 = vld [vmem:[%s10134_s1] sm:$0xff]   ;;  %s10139_s21 = smov (!%p190_p3, %s6803_s21), 1023  ;;  %vm1113_vm1 = vcmask 228352  }
   0xc   : > { %7975 = vmatprep.subr.msk.bf16.mxu0 %vm1498_vm0, %v7985_v0  ;;  %7976 = vmatprep.subr.msk.bf16.mxu1 %vm1498_vm0, %v7985_v0  ;;  %v1500_v2 = vsel %vm1498_vm0, %v7985_v0, 0  ;;  %s6804_s22 = sshll.u32 %s10139_s21, 2  ;;  %vm3341_vm2 = vcmask 261120   ;;  %vm6414_vm3 = vcmask 1041409   ;;  %vm6416_vm4 = vcmask 1042434   ;;  %s10141_s30 = smov (!%p196_p4, %s8538_s30), 127 }
   0xd   : > { %7712 = vmatpush3.bf16.msra.mxu0 %v1500_v2  ;;  %7973 = vmatpush3.bf16.msra.mxu1 %v1500_v2  ;;  %s8179_s25 = scalar_lea.vmem %s10133_s0, %s6804_s22  ;;  %vm6418_vm5 = vcmask 1043459   ;;  %vm6420_vm6 = vcmask 1044484   ;;  %vm6422_vm7 = vcmask 1045509   ;;  %vm6424_vm8 = vcmask 1046534   ;;  %s6806_s5 = sshll.u32 %s10141_s30, 2 }
   0xe   : > { %7713 = vmatprep.subr.bf16.mxu0 %v7986_v1  ;;  %7972 = vmatprep.subr.bf16.mxu1 %v7986_v1  ;;  %v7987_v3 = vld [vmem:[%s8179_s25] sm:$0xff]   ;;  %v7989_v5 = vld [vmem:[%s8179_s25 + $0x8] sm:$0xff]   ;;  %v7991_v7 = vld [vmem:[%s8179_s25 + $0x10] sm:$0xff]   ;;  %vm6426_vm9 = vcmask 1047559   ;;  %vm6709_vm10 = vcmask 257024   ;;  %s8607_s8 = scalar_lea.vmem %s10137_s4, %s6806_s5 }
   0xf   : > { %v7988_v4 = vld [vmem:[%s8179_s25 + $0x200] sm:$0xff]   ;;  %7715 = vmatprep.mubr.msk.bf16.mxu0 %vm1113_vm1, %v7987_v3  ;;  %v7990_v6 = vld [vmem:[%s8179_s25 + $0x208] sm:$0xff]   ;;  %v7992_v8 = vld [vmem:[%s8179_s25 + $0x210] sm:$0xff]  }
  0x10   : > { %7843 = vmatprep.mubr.msk.bf16.mxu1 %vm1113_vm1, %v7988_v4  ;;  %v7993_v9 = vld [vmem:[%s8179_s25 + $0x18] sm:$0xff]   ;;  %v7995_v11 = vld [vmem:[%s8179_s25 + $0x20] sm:$0xff]   ;;  %v7997_v13 = vld [vmem:[%s8179_s25 + $0x28] sm:$0xff]  }
  0x11   : > { %7714 = vmatpush3.bf16.msra.mxu0 %v7986_v1  ;;  %7974 = vmatpush3.bf16.msra.mxu1 %v7986_v1  ;;  %v7994_v10 = vld [vmem:[%s8179_s25 + $0x218] sm:$0xff]   ;;  %v7996_v12 = vld [vmem:[%s8179_s25 + $0x220] sm:$0xff]   ;;  %v7998_v14 = vld [vmem:[%s8179_s25 + $0x228] sm:$0xff]  }
  0x12   : > { %v7999_v15 = vld [vmem:[%s8179_s25 + $0x30] sm:$0xff]   ;;  %v8001_v17 = vld [vmem:[%s8179_s25 + $0x38] sm:$0xff]   ;;  %v8003_v19 = vld [vmem:[%s8179_s25 + $0x40] sm:$0xff]  }
  0x13   : > { %v8000_v16 = vld [vmem:[%s8179_s25 + $0x230] sm:$0xff]   ;;  %v8002_v18 = vld [vmem:[%s8179_s25 + $0x238] sm:$0xff]   ;;  %v8004_v20 = vld [vmem:[%s8179_s25 + $0x240] sm:$0xff]  }
  0x14   : > { %7716 = vmatmul.mubr.msk.bf16.vlgmr.msra.gmra.mxu0 %vm1113_vm1, %v7989_v5  ;;  %7844 = vmatmul.mubr.msk.bf16.vlgmr.msra.gmra.mxu1 %vm1113_vm1, %v7990_v6  ;;  %v8005_v21 = vld [vmem:[%s8179_s25 + $0x48] sm:$0xff]   ;;  %v8007_v23 = vld [vmem:[%s8179_s25 + $0x50] sm:$0xff]   ;;  %v8009_v25 = vld [vmem:[%s8179_s25 + $0x58] sm:$0xff]  }
  0x15   : > { %7719 = vmatprep.mubr.msk.bf16.mxu0 %vm1113_vm1, %v7991_v7  ;;  %7847 = vmatprep.mubr.msk.bf16.mxu1 %vm1113_vm1, %v7992_v8  ;;  %v8006_v22 = vld [vmem:[%s8179_s25 + $0x248] sm:$0xff]   ;;  %v8008_v24 = vld [vmem:[%s8179_s25 + $0x250] sm:$0xff]   ;;  %v8010_v26 = vld [vmem:[%s8179_s25 + $0x258] sm:$0xff]  }
  0x16   : > { %v8011_v27 = vld [vmem:[%s8179_s25 + $0x60] sm:$0xff]   ;;  %v8013_v29 = vld [vmem:[%s8179_s25 + $0x68] sm:$0xff]   ;;  %v8015_v31 = vld [vmem:[%s8179_s25 + $0x70] sm:$0xff]  }
  0x17   : > { %v8012_v28 = vld [vmem:[%s8179_s25 + $0x260] sm:$0xff]   ;;  %v8014_v30 = vld [vmem:[%s8179_s25 + $0x268] sm:$0xff]   ;;  %v8016_v32 = vld [vmem:[%s8179_s25 + $0x270] sm:$0xff]  }
  0x18   : > { %v8017_v33 = vld [vmem:[%s8179_s25 + $0x78] sm:$0xff]   ;;  %v8019_v35 = vld [vmem:[%s8179_s25 + $0x80] sm:$0xff]   ;;  %v8021_v37 = vld [vmem:[%s8179_s25 + $0x88] sm:$0xff]  }
  0x19   : > { %v8018_v34 = vld [vmem:[%s8179_s25 + $0x278] sm:$0xff]   ;;  %v8020_v36 = vld [vmem:[%s8179_s25 + $0x280] sm:$0xff]   ;;  %v8022_v38 = vld [vmem:[%s8179_s25 + $0x288] sm:$0xff]  }
  0x1a   : > { %v8023_v39 = vld [vmem:[%s8179_s25 + $0x90] sm:$0xff]   ;;  %v8025_v41 = vld [vmem:[%s8179_s25 + $0x98] sm:$0xff]   ;;  %v8027_v43 = vld [vmem:[%s8179_s25 + $0xa0] sm:$0xff]  }
  0x1b   : > { %v8024_v40 = vld [vmem:[%s8179_s25 + $0x290] sm:$0xff]   ;;  %v8026_v42 = vld [vmem:[%s8179_s25 + $0x298] sm:$0xff]   ;;  %v8028_v44 = vld [vmem:[%s8179_s25 + $0x2a0] sm:$0xff]  }
  0x1c   : > { %7720 = vmatmul.mubr.msk.bf16.gmra.mxu0 %vm1113_vm1, %v7993_v9  ;;  %7848 = vmatmul.mubr.msk.bf16.gmra.mxu1 %vm1113_vm1, %v7994_v10  ;;  %v8029_v45 = vld [vmem:[%s8179_s25 + $0xa8] sm:$0xff]   ;;  %v8031_v47 = vld [vmem:[%s8179_s25 + $0xb0] sm:$0xff]   ;;  %v8033_v49 = vld [vmem:[%s8179_s25 + $0xb8] sm:$0xff]  }
  0x1d   : > { %7723 = vmatprep.mubr.msk.bf16.mxu0 %vm1113_vm1, %v7995_v11  ;;  %7851 = vmatprep.mubr.msk.bf16.mxu1 %vm1113_vm1, %v7996_v12  ;;  %v8030_v46 = vld [vmem:[%s8179_s25 + $0x2a8] sm:$0xff]   ;;  %v8032_v48 = vld [vmem:[%s8179_s25 + $0x2b0] sm:$0xff]   ;;  %v8034_v50 = vld [vmem:[%s8179_s25 + $0x2b8] sm:$0xff]  }
  0x1e   : > { %v8035_v51 = vld [vmem:[%s8179_s25 + $0xc0] sm:$0xff]   ;;  %v8037_v53 = vld [vmem:[%s8179_s25 + $0xc8] sm:$0xff]   ;;  %v8039_v55 = vld [vmem:[%s8179_s25 + $0xd0] sm:$0xff]  }
  0x1f   : > { %v8036_v52 = vld [vmem:[%s8179_s25 + $0x2c0] sm:$0xff]   ;;  %v8038_v54 = vld [vmem:[%s8179_s25 + $0x2c8] sm:$0xff]   ;;  %v8040_v56 = vld [vmem:[%s8179_s25 + $0x2d0] sm:$0xff]  }
  0x20   : > { %v8041_v57 = vld [vmem:[%s8179_s25 + $0xd8] sm:$0xff]   ;;  %v8043_v59 = vld [vmem:[%s8179_s25 + $0xe0] sm:$0xff]   ;;  %v8045_v61 = vld [vmem:[%s8179_s25 + $0xe8] sm:$0xff]  }
  0x21   : > { %v8042_v58 = vld [vmem:[%s8179_s25 + $0x2d8] sm:$0xff]   ;;  %v8044_v60 = vld [vmem:[%s8179_s25 + $0x2e0] sm:$0xff]   ;;  %v8046_v62 = vld [vmem:[%s8179_s25 + $0x2e8] sm:$0xff]  }
  0x22   : > { %v8047_v63 = vld [vmem:[%s8179_s25 + $0xf0] sm:$0xff]   ;;  %v8049_v1 = vld [vmem:[%s8179_s25 + $0xf8] sm:$0xff]   ;;  %v8051_v3 = vld [vmem:[%s8179_s25 + $0x100] sm:$0xff]  }
  0x23   : > { %v8048_v0 = vld [vmem:[%s8179_s25 + $0x2f0] sm:$0xff]   ;;  %v8050_v2 = vld [vmem:[%s8179_s25 + $0x2f8] sm:$0xff]   ;;  %v8052_v4 = vld [vmem:[%s8179_s25 + $0x300] sm:$0xff]  }
  0x24   : > { %7724 = vmatmul.mubr.msk.bf16.gmra.mxu0 %vm1113_vm1, %v7997_v13  ;;  %7852 = vmatmul.mubr.msk.bf16.gmra.mxu1 %vm1113_vm1, %v7998_v14  ;;  %v8053_v5 = vld [vmem:[%s8179_s25 + $0x108] sm:$0xff]   ;;  %v8055_v7 = vld [vmem:[%s8179_s25 + $0x110] sm:$0xff]   ;;  %v8057_v9 = vld [vmem:[%s8179_s25 + $0x118] sm:$0xff]  }
  0x25   : > { %7727 = vmatprep.mubr.msk.bf16.mxu0 %vm1113_vm1, %v7999_v15  ;;  %7855 = vmatprep.mubr.msk.bf16.mxu1 %vm1113_vm1, %v8000_v16  ;;  %v8054_v6 = vld [vmem:[%s8179_s25 + $0x308] sm:$0xff]   ;;  %v8056_v8 = vld [vmem:[%s8179_s25 + $0x310] sm:$0xff]   ;;  %v8058_v10 = vld [vmem:[%s8179_s25 + $0x318] sm:$0xff]  }
  0x26   : > { %v8059_v11 = vld [vmem:[%s8179_s25 + $0x120] sm:$0xff]   ;;  %v8061_v13 = vld [vmem:[%s8179_s25 + $0x128] sm:$0xff]   ;;  %v8063_v15 = vld [vmem:[%s8179_s25 + $0x130] sm:$0xff]  }
  0x27   : > { %v8060_v12 = vld [vmem:[%s8179_s25 + $0x320] sm:$0xff]   ;;  %v8062_v14 = vld [vmem:[%s8179_s25 + $0x328] sm:$0xff]   ;;  %v8064_v16 = vld [vmem:[%s8179_s25 + $0x330] sm:$0xff]  }
  0x2c   : > { %7728 = vmatmul.mubr.msk.bf16.gmra.mxu0 %vm1113_vm1, %v8001_v17  ;;  %7856 = vmatmul.mubr.msk.bf16.gmra.mxu1 %vm1113_vm1, %v8002_v18  ;;  %v8065_v17 = vld [vmem:[%s8179_s25 + $0x138] sm:$0xff]  }
  0x2d   : > { %7731 = vmatprep.mubr.msk.bf16.mxu0 %vm1113_vm1, %v8003_v19  ;;  %7859 = vmatprep.mubr.msk.bf16.mxu1 %vm1113_vm1, %v8004_v20  ;;  %v8066_v18 = vld [vmem:[%s8179_s25 + $0x338] sm:$0xff]   ;;  %v8067_v19 = vld [vmem:[%s8179_s25 + $0x140] sm:$0xff]  }
  0x2e   : > { %v8068_v20 = vld [vmem:[%s8179_s25 + $0x340] sm:$0xff]  }
  0x34   : > { %7732 = vmatmul.mubr.msk.bf16.gmra.mxu0 %vm1113_vm1, %v8005_v21  ;;  %7860 = vmatmul.mubr.msk.bf16.gmra.mxu1 %vm1113_vm1, %v8006_v22  ;;  %v8069_v21 = vld [vmem:[%s8179_s25 + $0x148] sm:$0xff]  }
  0x35   : > { %7735 = vmatprep.mubr.msk.bf16.mxu0 %vm1113_vm1, %v8007_v23  ;;  %7863 = vmatprep.mubr.msk.bf16.mxu1 %vm1113_vm1, %v8008_v24  ;;  %v8070_v22 = vld [vmem:[%s8179_s25 + $0x348] sm:$0xff]   ;;  %v8071_v23 = vld [vmem:[%s8179_s25 + $0x150] sm:$0xff]  }
  0x36   : > { %v8072_v24 = vld [vmem:[%s8179_s25 + $0x350] sm:$0xff]  }
  0x3c   : > { %7736 = vmatmul.mubr.msk.bf16.gmra.mxu0 %vm1113_vm1, %v8009_v25  ;;  %7864 = vmatmul.mubr.msk.bf16.gmra.mxu1 %vm1113_vm1, %v8010_v26  ;;  %v8073_v25 = vld [vmem:[%s8179_s25 + $0x158] sm:$0xff]  }
  0x3d   : > { %7739 = vmatprep.mubr.msk.bf16.mxu0 %vm1113_vm1, %v8011_v27  ;;  %7867 = vmatprep.mubr.msk.bf16.mxu1 %vm1113_vm1, %v8012_v28  ;;  %v8074_v26 = vld [vmem:[%s8179_s25 + $0x358] sm:$0xff]   ;;  %v8075_v27 = vld [vmem:[%s8179_s25 + $0x160] sm:$0xff]  }
  0x3e   : > { %v8076_v28 = vld [vmem:[%s8179_s25 + $0x360] sm:$0xff]  }
  0x44   : > { %7740 = vmatmul.mubr.msk.bf16.gmra.mxu0 %vm1113_vm1, %v8013_v29  ;;  %7868 = vmatmul.mubr.msk.bf16.gmra.mxu1 %vm1113_vm1, %v8014_v30  ;;  %v8077_v29 = vld [vmem:[%s8179_s25 + $0x168] sm:$0xff]  }
  0x45   : > { %7743 = vmatprep.mubr.msk.bf16.mxu0 %vm1113_vm1, %v8015_v31  ;;  %7871 = vmatprep.mubr.msk.bf16.mxu1 %vm1113_vm1, %v8016_v32  ;;  %v8078_v30 = vld [vmem:[%s8179_s25 + $0x368] sm:$0xff]   ;;  %v8079_v31 = vld [vmem:[%s8179_s25 + $0x170] sm:$0xff]  }
  0x46   : > { %v8080_v32 = vld [vmem:[%s8179_s25 + $0x370] sm:$0xff]  }
  0x4c   : > { %7744 = vmatmul.mubr.msk.bf16.gmra.mxu0 %vm1113_vm1, %v8017_v33  ;;  %7872 = vmatmul.mubr.msk.bf16.gmra.mxu1 %vm1113_vm1, %v8018_v34  ;;  %v8081_v33 = vld [vmem:[%s8179_s25 + $0x178] sm:$0xff]  }
  0x4d   : > { %7747 = vmatprep.mubr.msk.bf16.mxu0 %vm1113_vm1, %v8019_v35  ;;  %7875 = vmatprep.mubr.msk.bf16.mxu1 %vm1113_vm1, %v8020_v36  ;;  %v8082_v34 = vld [vmem:[%s8179_s25 + $0x378] sm:$0xff]   ;;  %v8083_v35 = vld [vmem:[%s8179_s25 + $0x180] sm:$0xff]  }
  0x4e   : > { %v8084_v36 = vld [vmem:[%s8179_s25 + $0x380] sm:$0xff]  }
  0x54   : > { %7748 = vmatmul.mubr.msk.bf16.gmra.mxu0 %vm1113_vm1, %v8021_v37  ;;  %7876 = vmatmul.mubr.msk.bf16.gmra.mxu1 %vm1113_vm1, %v8022_v38  ;;  %v8085_v37 = vld [vmem:[%s8179_s25 + $0x188] sm:$0xff]  }
  0x55   : > { %7751 = vmatprep.mubr.msk.bf16.mxu0 %vm1113_vm1, %v8023_v39  ;;  %7879 = vmatprep.mubr.msk.bf16.mxu1 %vm1113_vm1, %v8024_v40  ;;  %v8086_v38 = vld [vmem:[%s8179_s25 + $0x388] sm:$0xff]   ;;  %v8087_v39 = vld [vmem:[%s8179_s25 + $0x190] sm:$0xff]   ;;  %v8383_v40 = vld [vmem:[%s10135_s2] ss:$0 sm:$0xff] }
  0x5c   : > { %7752 = vmatmul.mubr.msk.bf16.gmra.mxu0 %vm1113_vm1, %v8025_v41  ;;  %7880 = vmatmul.mubr.msk.bf16.gmra.mxu1 %vm1113_vm1, %v8026_v42  ;;  %v8088_v41 = vld [vmem:[%s8179_s25 + $0x390] sm:$0xff]  }
  0x5d   : > { %7755 = vmatprep.mubr.msk.bf16.mxu0 %vm1113_vm1, %v8027_v43  ;;  %7883 = vmatprep.mubr.msk.bf16.mxu1 %vm1113_vm1, %v8028_v44  ;;  %v8389_v43 = vld [vmem:[%s10136_s3] ss:$0 sm:$0xff] }
  0x64   : > { %7756 = vmatmul.mubr.msk.bf16.gmra.mxu0 %vm1113_vm1, %v8029_v45  ;;  %7884 = vmatmul.mubr.msk.bf16.gmra.mxu1 %vm1113_vm1, %v8030_v46 }
  0x65   : > { %7759 = vmatprep.mubr.msk.bf16.mxu0 %vm1113_vm1, %v8031_v47  ;;  %7887 = vmatprep.mubr.msk.bf16.mxu1 %vm1113_vm1, %v8032_v48 }
  0x6c   : > { %7760 = vmatmul.mubr.msk.bf16.gmra.mxu0 %vm1113_vm1, %v8033_v49  ;;  %7888 = vmatmul.mubr.msk.bf16.gmra.mxu1 %vm1113_vm1, %v8034_v50 }
  0x6d   : > { %7763 = vmatprep.mubr.msk.bf16.mxu0 %vm1113_vm1, %v8035_v51  ;;  %7891 = vmatprep.mubr.msk.bf16.mxu1 %vm1113_vm1, %v8036_v52 }
  0x74   : > { %7764 = vmatmul.mubr.msk.bf16.gmra.mxu0 %vm1113_vm1, %v8037_v53  ;;  %7892 = vmatmul.mubr.msk.bf16.gmra.mxu1 %vm1113_vm1, %v8038_v54  ;;  %v8089_v54 = vld [vmem:[%s8179_s25 + $0x198] sm:$0xff]  }
  0x75   : > { %7767 = vmatprep.mubr.msk.bf16.mxu0 %vm1113_vm1, %v8039_v55  ;;  %7895 = vmatprep.mubr.msk.bf16.mxu1 %vm1113_vm1, %v8040_v56 }
  0x7c   : > { %7768 = vmatmul.mubr.msk.bf16.gmra.mxu0 %vm1113_vm1, %v8041_v57  ;;  %7896 = vmatmul.mubr.msk.bf16.gmra.mxu1 %vm1113_vm1, %v8042_v58 }
  0x7d   : > { %7771 = vmatprep.mubr.msk.bf16.mxu0 %vm1113_vm1, %v8043_v59  ;;  %7899 = vmatprep.mubr.msk.bf16.mxu1 %vm1113_vm1, %v8044_v60  ;;  %v8090_v59 = vld [vmem:[%s8179_s25 + $0x398] sm:$0xff]   ;;  %v8091_v60 = vld [vmem:[%s8179_s25 + $0x1a0] sm:$0xff]  }
  0x84   : > { %7772 = vmatmul.mubr.msk.bf16.gmra.mxu0 %vm1113_vm1, %v8045_v61  ;;  %7900 = vmatmul.mubr.msk.bf16.gmra.mxu1 %vm1113_vm1, %v8046_v62 }
  0x85   : > { %7775 = vmatprep.mubr.msk.bf16.mxu0 %vm1113_vm1, %v8047_v63  ;;  %7903 = vmatprep.mubr.msk.bf16.mxu1 %vm1113_vm1, %v8048_v0 }
  0x8c   : > { %7776 = vmatmul.mubr.msk.bf16.gmra.mxu0 %vm1113_vm1, %v8049_v1  ;;  %7904 = vmatmul.mubr.msk.bf16.gmra.mxu1 %vm1113_vm1, %v8050_v2  ;;  %v8092_v1 = vld [vmem:[%s8179_s25 + $0x3a0] sm:$0xff]  }
  0x8d   : > { %7779 = vmatprep.mubr.msk.bf16.mxu0 %vm1113_vm1, %v8051_v3  ;;  %7907 = vmatprep.mubr.msk.bf16.mxu1 %vm1113_vm1, %v8052_v4 }
  0x94   : > { %7780 = vmatmul.mubr.msk.bf16.gmra.mxu0 %vm1113_vm1, %v8053_v5  ;;  %7908 = vmatmul.mubr.msk.bf16.gmra.mxu1 %vm1113_vm1, %v8054_v6 }
  0x95   : > { %7783 = vmatprep.mubr.msk.bf16.mxu0 %vm1113_vm1, %v8055_v7  ;;  %7911 = vmatprep.mubr.msk.bf16.mxu1 %vm1113_vm1, %v8056_v8 }
  0x9c   : > { %7784 = vmatmul.mubr.msk.bf16.gmra.mxu0 %vm1113_vm1, %v8057_v9  ;;  %7912 = vmatmul.mubr.msk.bf16.gmra.mxu1 %vm1113_vm1, %v8058_v10 }
  0x9d   : > { %7787 = vmatprep.mubr.msk.bf16.mxu0 %vm1113_vm1, %v8059_v11  ;;  %7915 = vmatprep.mubr.msk.bf16.mxu1 %vm1113_vm1, %v8060_v12 }
  0xa4   : > { %7788 = vmatmul.mubr.msk.bf16.gmra.mxu0 %vm1113_vm1, %v8061_v13  ;;  %7916 = vmatmul.mubr.msk.bf16.gmra.mxu1 %vm1113_vm1, %v8062_v14 }
  0xa5   : > { %7791 = vmatprep.mubr.msk.bf16.mxu0 %vm1113_vm1, %v8063_v15  ;;  %7919 = vmatprep.mubr.msk.bf16.mxu1 %vm1113_vm1, %v8064_v16 }
  0xac   : > { %7792 = vmatmul.mubr.msk.bf16.gmra.mxu0 %vm1113_vm1, %v8065_v17  ;;  %7920 = vmatmul.mubr.msk.bf16.gmra.mxu1 %vm1113_vm1, %v8066_v18 }
  0xad   : > { %7795 = vmatprep.mubr.msk.bf16.mxu0 %vm1113_vm1, %v8067_v19  ;;  %7923 = vmatprep.mubr.msk.bf16.mxu1 %vm1113_vm1, %v8068_v20 }
  0xb4   : > { %7796 = vmatmul.mubr.msk.bf16.gmra.mxu0 %vm1113_vm1, %v8069_v21  ;;  %7924 = vmatmul.mubr.msk.bf16.gmra.mxu1 %vm1113_vm1, %v8070_v22 }
  0xb5   : > { %7799 = vmatprep.mubr.msk.bf16.mxu0 %vm1113_vm1, %v8071_v23  ;;  %7927 = vmatprep.mubr.msk.bf16.mxu1 %vm1113_vm1, %v8072_v24 }
  0xbc   : > { %7800 = vmatmul.mubr.msk.bf16.gmra.mxu0 %vm1113_vm1, %v8073_v25  ;;  %7928 = vmatmul.mubr.msk.bf16.gmra.mxu1 %vm1113_vm1, %v8074_v26 }
  0xbd   : > { %7803 = vmatprep.mubr.msk.bf16.mxu0 %vm1113_vm1, %v8075_v27  ;;  %7931 = vmatprep.mubr.msk.bf16.mxu1 %vm1113_vm1, %v8076_v28  ;;  %v8093_v28 = vld [vmem:[%s8179_s25 + $0x1a8] sm:$0xff]  }
  0xc4   : > { %7804 = vmatmul.mubr.msk.bf16.gmra.mxu0 %vm1113_vm1, %v8077_v29  ;;  %7932 = vmatmul.mubr.msk.bf16.gmra.mxu1 %vm1113_vm1, %v8078_v30 }
  0xc5   : > { %7807 = vmatprep.mubr.msk.bf16.mxu0 %vm1113_vm1, %v8079_v31  ;;  %7935 = vmatprep.mubr.msk.bf16.mxu1 %vm1113_vm1, %v8080_v32 }
  0xcc   : > { %7808 = vmatmul.mubr.msk.bf16.gmra.mxu0 %vm1113_vm1, %v8081_v33  ;;  %7936 = vmatmul.mubr.msk.bf16.gmra.mxu1 %vm1113_vm1, %v8082_v34  ;;  %v8094_v34 = vld [vmem:[%s8179_s25 + $0x3a8] sm:$0xff]  }
  0xcd   : > { %7811 = vmatprep.mubr.msk.bf16.mxu0 %vm1113_vm1, %v8083_v35  ;;  %7939 = vmatprep.mubr.msk.bf16.mxu1 %vm1113_vm1, %v8084_v36  ;;  %v8095_v35 = vld [vmem:[%s8179_s25 + $0x1b0] sm:$0xff]  }
  0xd4   : > { %v7717_v42 = vpop.f32.mrf.mxu0  ;;  %7812 = vmatmul.mubr.msk.bf16.gmra.mxu0 %vm1113_vm1, %v8085_v37  ;;  %v7845_v45 = vpop.f32.mrf.mxu1  ;;  %7940 = vmatmul.mubr.msk.bf16.gmra.mxu1 %vm1113_vm1, %v8086_v38 }
  0xd5   : > { %v2568_v44 = vmul.f32 %v7717_v42, %v8383_v40  ;;  %7815 = vmatprep.mubr.msk.bf16.mxu0 %vm1113_vm1, %v8087_v39  ;;  %v2696_v46 = vmul.f32 %v7845_v45, %v8383_v40  ;;  %7943 = vmatprep.mubr.msk.bf16.mxu1 %vm1113_vm1, %v8088_v41  ;;  %v8096_v41 = vld [vmem:[%s8179_s25 + $0x3b0] sm:$0xff]  }
  0xd6   : > { %v1536_v47 = vpop.f32.mrf.mxu0  ;;  %v2048_v50 = vpop.f32.mrf.mxu1 }
  0xd7   : > { %v2831_v48 = vadd.f32 %v8389_v43, %v2568_v44  ;;  %v2566_v49 = vmul.f32 %v8383_v40, %v1536_v47  ;;  %v2959_v51 = vadd.f32 %v8389_v43, %v2696_v46  ;;  %v2694_v52 = vmul.f32 %v8383_v40, %v2048_v50 }
  0xd8   : > { %v7718_v53 = vpop.f32.mrf.mxu0  ;;  %v7846_v58 = vpop.f32.mrf.mxu1 }
  0xd9   : > { %v3087_v55 = vmax.f32 %v2831_v48, 0.0  ;;  %v2829_v56 = vadd.f32 %v8389_v43, %v2566_v49  ;;  %v2569_v57 = vmul.f32 %v7718_v53, %v8383_v40  ;;  %v3215_v61 = vmax.f32 %v2959_v51, 0.0 }
  0xda   : > { %v2957_v62 = vadd.f32 %v8389_v43, %v2694_v52  ;;  %v2697_v63 = vmul.f32 %v7846_v58, %v8383_v40  ;;  %v1539_v0 = vpop.f32.mrf.mxu0  ;;  %v2051_v14 = vpop.f32.mrf.mxu1 }
  0xdb   : > { %v3356_v2 = vsel %vm3341_vm2, %v3087_v55, -inf  ;;  %v3085_v3 = vmax.f32 %v2829_v56, 0.0  ;;  %v2832_v4 = vadd.f32 %v8389_v43, %v2569_v57  ;;  %v2567_v5 = vmul.f32 %v8383_v40, %v1539_v0 }
  0xdc   : > { %v3357_v6 = vrot.slane %v3356_v2, 4  ;;  %v4252_v7 = vsel %vm3341_vm2, %v3215_v61, -inf  ;;  %v3213_v8 = vmax.f32 %v2957_v62, 0.0  ;;  %v2960_v9 = vadd.f32 %v8389_v43, %v2697_v63  ;;  %7816 = vmatmul.mubr.msk.bf16.gmra.mxu0 %vm1113_vm1, %v8089_v54  ;;  %7944 = vmatmul.mubr.msk.bf16.gmra.mxu1 %vm1113_vm1, %v8090_v59  ;;  %v8423_v27 = vpop.f32.mrf.mxu0  ;;  %v8427_v33 = vpop.f32.mrf.mxu1 }
  0xdd   : > { %v4253_v10 = vrot.slane %v4252_v7, 4  ;;  %v3342_v11 = vsel %vm3341_vm2, %v3085_v3, -inf  ;;  %v3088_v12 = vmax.f32 %v2832_v4, 0.0  ;;  %v2830_v13 = vadd.f32 %v8389_v43, %v2567_v5  ;;  %7819 = vmatprep.mubr.msk.bf16.mxu0 %vm1113_vm1, %v8091_v60  ;;  %7947 = vmatprep.mubr.msk.bf16.mxu1 %vm1113_vm1, %v8092_v1 }
  0xde   : > { %v3358_v15 = vmax.f32 %v3356_v2, %v3357_v6  ;;  %v3343_v16 = vrot.slane %v3342_v11, 4  ;;  %v4238_v17 = vsel %vm3341_vm2, %v3213_v8, -inf  ;;  %v3216_v18 = vmax.f32 %v2960_v9, 0.0  ;;  %v1552_v51 = vpop.f32.mrf.mxu0  ;;  %v2064_v56 = vpop.f32.mrf.mxu1  ;;  %v8097_v6 = vld [vmem:[%s8179_s25 + $0x1b8] sm:$0xff]  }
  0xdf   : > { %v4254_v19 = vmax.f32 %v4252_v7, %v4253_v10  ;;  %v4239_v20 = vrot.slane %v4238_v17, 4  ;;  %v3363_v21 = vsel %vm3341_vm2, %v3088_v12, -inf  ;;  %v3086_v22 = vmax.f32 %v2830_v13, 0.0  ;;  %v8098_v12 = vld [vmem:[%s8179_s25 + $0x3b8] sm:$0xff]   ;;  %v8099_v13 = vld [vmem:[%s8179_s25 + $0x1c0] sm:$0xff]  }
  0xe0   : > { %v3359_v23 = vrot.slane %v3358_v15, 2  ;;  %v3344_v24 = vmax.f32 %v3342_v11, %v3343_v16  ;;  %v3364_v25 = vrot.slane %v3363_v21, 4  ;;  %v4259_v26 = vsel %vm3341_vm2, %v3216_v18, -inf  ;;  %v7722_v5 = vpop.f32.mrf.mxu0  ;;  %v7850_v11 = vpop.f32.mrf.mxu1 }
  0xe1   : > { %v4255_v29 = vrot.slane %v4254_v19, 2  ;;  %v4240_v30 = vmax.f32 %v4238_v17, %v4239_v20  ;;  %v4260_v31 = vrot.slane %v4259_v26, 4  ;;  %v3349_v32 = vsel %vm3341_vm2, %v3086_v22, -inf  ;;  %v8100_v17 = vld [vmem:[%s8179_s25 + $0x3c0] sm:$0xff]  }
  0xe2   : > { %v3360_v36 = vmax.f32 %v3358_v15, %v3359_v23  ;;  %v3345_v37 = vrot.slane %v3344_v24, 2  ;;  %v3365_v38 = vmax.f32 %v3363_v21, %v3364_v25  ;;  %v3350_v39 = vrot.slane %v3349_v32, 4  ;;  %v1555_v25 = vpop.f32.mrf.mxu0 }
  0xe3   : > { %v4256_v42 = vmax.f32 %v4254_v19, %v4255_v29  ;;  %v4241_v44 = vrot.slane %v4240_v30, 2  ;;  %v4261_v45 = vmax.f32 %v4259_v26, %v4260_v31  ;;  %v2695_v46 = vmul.f32 %v8383_v40, %v2051_v14  ;;  %v8452_v31 = vpop.f32.mrf.mxu1 }
  0xe4   : > { %v3361_v47 = vrot.slane %v3360_v36, 1  ;;  %v3346_v48 = vmax.f32 %v3344_v24, %v3345_v37  ;;  %v3366_v49 = vrot.slane %v3365_v38, 2  ;;  %v3351_v50 = vmax.f32 %v3349_v32, %v3350_v39  ;;  %7820 = vmatmul.mubr.msk.bf16.gmra.mxu0 %vm1113_vm1, %v8093_v28  ;;  %7948 = vmatmul.mubr.msk.bf16.gmra.mxu1 %vm1113_vm1, %v8094_v34 }
  0xe5   : > { %v4257_v52 = vrot.slane %v4256_v42, 1  ;;  %v4242_v53 = vmax.f32 %v4240_v30, %v4241_v44  ;;  %v4262_v54 = vrot.slane %v4261_v45, 2  ;;  %v2958_v55 = vadd.f32 %v8389_v43, %v2695_v46  ;;  %7823 = vmatprep.mubr.msk.bf16.mxu0 %vm1113_vm1, %v8095_v35  ;;  %7951 = vmatprep.mubr.msk.bf16.mxu1 %vm1113_vm1, %v8096_v41  ;;  %v8101_v46 = vld [vmem:[%s8179_s25 + $0x1c8] sm:$0xff]  }
  0xe6   : > { %v3362_v57 = vmax.f32 %v3360_v36, %v3361_v47  ;;  %v3347_v58 = vrot.slane %v3346_v48, 1  ;;  %v3367_v59 = vmax.f32 %v3365_v38, %v3366_v49  ;;  %v3352_v60 = vrot.slane %v3351_v50, 2 }
  0xe7   : > { %v4258_v61 = vmax.f32 %v4256_v42, %v4257_v52  ;;  %v4243_v62 = vrot.slane %v4242_v53, 1  ;;  %v4263_v63 = vmax.f32 %v4261_v45, %v4262_v54  ;;  %v3214_v0 = vmax.f32 %v2958_v55, 0.0  ;;  %v8467_v45 = vpop.f32.mrf.mxu0  ;;  %v8102_v52 = vld [vmem:[%s8179_s25 + $0x3c8] sm:$0xff]  }
  0xe8   : > { %v7327_v1 = vpack.c.bf16 %v3362_v57, %v3362_v57  ;;  %v3348_v2 = vmax.f32 %v3346_v48, %v3347_v58  ;;  %v3368_v3 = vrot.slane %v3367_v59, 1  ;;  %v3353_v4 = vmax.f32 %v3351_v50, %v3352_v60  ;;  %v8104_v58 = vld [vmem:[%s8179_s25 + $0x3d0] sm:$0xff]  }
  0xe9   : > { %v7455_v7 = vpack.c.bf16 %v4258_v61, %v4258_v61  ;;  %v4244_v8 = vmax.f32 %v4242_v53, %v4243_v62  ;;  %v4264_v9 = vrot.slane %v4263_v63, 1  ;;  %v4245_v10 = vsel %vm3341_vm2, %v3214_v0, -inf  ;;  %v8103_v53 = vld [vmem:[%s8179_s25 + $0x1d0] sm:$0xff]  }
  0xea   : > { %v7325_v14 = vpack.c.bf16 %v3348_v2, %v3348_v2  ;;  %v3369_v15 = vmax.f32 %v3367_v59, %v3368_v3  ;;  %v3354_v16 = vrot.slane %v3353_v4, 1  ;;  %v4246_v20 = vrot.slane %v4245_v10, 4  ;;  %v8483_v3 = vpop.f32.mrf.mxu0 }
  0xeb   : > { %v7453_v18 = vpack.c.bf16 %v4244_v8, %v4244_v8  ;;  %v8443_v19 = vmax.f32 %v4263_v63, %v4264_v9  ;;  %v6160_v21 = vunpack.c.l.b16 %v7327_v1  ;;  %v8445_v22 = vunpack.c.l.b16 %v7455_v7 }
  0xec   : > { %v3355_v23 = vmax.f32 %v3353_v4, %v3354_v16  ;;  %v2572_v24 = vmul.f32 %v8423_v27, %v8383_v40  ;;  %7824 = vmatmul.mubr.msk.bf16.gmra.mxu0 %vm1113_vm1, %v8097_v6  ;;  %v6158_v26 = vunpack.c.l.b16 %v7325_v14  ;;  %v7328_v28 = vpack.c.bf16 %v3369_v15, %v3369_v15  ;;  %7952 = vmatmul.mubr.msk.bf16.gmra.mxu1 %vm1113_vm1, %v8098_v12 }
  0xed   : > { %v4247_v29 = vmax.f32 %v4245_v10, %v4246_v20  ;;  %v2700_v30 = vmul.f32 %v8427_v33, %v8383_v40  ;;  %7827 = vmatprep.mubr.msk.bf16.mxu0 %vm1113_vm1, %v8099_v13  ;;  %v8456_v32 = vunpack.c.l.b16 %v7453_v18  ;;  %v2570_v35 = vmul.f32 %v8383_v40, %v1552_v51  ;;  %7955 = vmatprep.mubr.msk.bf16.mxu1 %vm1113_vm1, %v8100_v17  ;;  %v8472_v51 = vpop.f32.mrf.mxu1 }
  0xee   : > { %v7326_v34 = vpack.c.bf16 %v3355_v23, %v3355_v23  ;;  %v2835_v27 = vadd.f32 %v8389_v43, %v2572_v24  ;;  %v7456_v33 = vpack.c.bf16 %v8443_v19, %v8443_v19  ;;  %v2698_v38 = vmul.f32 %v8383_v40, %v2064_v56  ;;  %v8496_v23 = vpop.f32.mrf.mxu0  ;;  %v8105_v24 = vld [vmem:[%s8179_s25 + $0x1d8] sm:$0xff]  }
  0xef   : > { %v4248_v36 = vrot.slane %v4247_v29, 2  ;;  %v2963_v37 = vadd.f32 %v8389_v43, %v2700_v30  ;;  %v2833_v42 = vadd.f32 %v8389_v43, %v2570_v35  ;;  %v2573_v44 = vmul.f32 %v7722_v5, %v8383_v40  ;;  %v8486_v8 = vpop.f32.mrf.mxu1 }
  0xf0   : > { %v6159_v39 = vunpack.c.l.b16 %v7326_v34  ;;  %v3091_v41 = vmax.f32 %v2835_v27, 0.0  ;;  %v2961_v49 = vadd.f32 %v8389_v43, %v2698_v38  ;;  %v2701_v50 = vmul.f32 %v7850_v11, %v8383_v40  ;;  %v8106_v34 = vld [vmem:[%s8179_s25 + $0x3d8] sm:$0xff]   ;;  %v8107_v27 = vld [vmem:[%s8179_s25 + $0x1e0] sm:$0xff]  }
  0xf1   : > { %v4249_v47 = vmax.f32 %v4247_v29, %v4248_v36  ;;  %v3219_v48 = vmax.f32 %v2963_v37, 0.0  ;;  %v3089_v56 = vmax.f32 %v2833_v42, 0.0  ;;  %v2836_v57 = vadd.f32 %v8389_v43, %v2573_v44  ;;  %v8499_v30 = vpop.f32.mrf.mxu1 }
  0xf2   : > { %v6415_v54 = vsel %vm6414_vm3, %v6159_v39, %v6158_v26  ;;  %v3384_v55 = vsel %vm3341_vm2, %v3091_v41, -inf  ;;  %v6161_v59 = vunpack.c.l.b16 %v7328_v28  ;;  %v3217_v2 = vmax.f32 %v2961_v49, 0.0  ;;  %v8108_v39 = vld [vmem:[%s8179_s25 + $0x3e0] sm:$0xff]  }
  0xf3   : > { %v4250_v60 = vrot.slane %v4249_v47, 1  ;;  %v3385_v61 = vrot.slane %v3384_v55, 4  ;;  %v4280_v62 = vsel %vm3341_vm2, %v3219_v48, -inf  ;;  %v6417_v63 = vsel %vm6416_vm4, %v6160_v21, %v6415_v54 }
  0xf4   : > { %v4281_v0 = vrot.slane %v4280_v62, 4  ;;  %v3370_v1 = vsel %vm3341_vm2, %v3089_v56, -inf  ;;  %7828 = vmatmul.mubr.msk.bf16.gmra.mxu0 %vm1113_vm1, %v8101_v46  ;;  %v3092_v7 = vmax.f32 %v2836_v57, 0.0  ;;  %7956 = vmatmul.mubr.msk.bf16.gmra.mxu1 %vm1113_vm1, %v8102_v52  ;;  %v4266_v10 = vsel %vm3341_vm2, %v3217_v2, -inf  ;;  %v8510_v52 = vpop.f32.mrf.mxu0 }
  0xf5   : > { %v4251_v4 = vmax.f32 %v4249_v47, %v4250_v60  ;;  %v3386_v5 = vmax.f32 %v3384_v55, %v3385_v61  ;;  %v3371_v6 = vrot.slane %v3370_v1, 4  ;;  %7831 = vmatprep.mubr.msk.bf16.mxu0 %vm1113_vm1, %v8103_v53  ;;  %v2964_v11 = vadd.f32 %v8389_v43, %v2701_v50  ;;  %7959 = vmatprep.mubr.msk.bf16.mxu1 %vm1113_vm1, %v8104_v58 }
  0xf6   : > { %v4282_v9 = vmax.f32 %v4280_v62, %v4281_v0  ;;  %v2571_v12 = vmul.f32 %v8383_v40, %v1555_v25  ;;  %v4267_v16 = vrot.slane %v4266_v10, 4  ;;  %v3391_v18 = vsel %vm3341_vm2, %v3092_v7, -inf }
  0xf7   : > { %v7454_v13 = vpack.c.bf16 %v4251_v4, %v4251_v4  ;;  %v3387_v14 = vrot.slane %v3386_v5, 2  ;;  %v3372_v15 = vmax.f32 %v3370_v1, %v3371_v6  ;;  %v3220_v20 = vmax.f32 %v2964_v11, 0.0  ;;  %v8524_v4 = vpop.f32.mrf.mxu0  ;;  %v8110_v11 = vld [vmem:[%s8179_s25 + $0x3e8] sm:$0xff]  }
  0xf8   : > { %v4283_v17 = vrot.slane %v4282_v9, 2  ;;  %v2834_v21 = vadd.f32 %v8389_v43, %v2571_v12  ;;  %v4268_v29 = vmax.f32 %v4266_v10, %v4267_v16  ;;  %v3392_v36 = vrot.slane %v3391_v18, 4  ;;  %v8111_v12 = vld [vmem:[%s8179_s25 + $0x1f0] sm:$0xff]  }
  0xf9   : > { %v6287_v26 = vunpack.c.l.b16 %v7454_v13  ;;  %v3388_v25 = vmax.f32 %v3386_v5, %v3387_v14  ;;  %v3373_v28 = vrot.slane %v3372_v15, 2  ;;  %v4287_v37 = vsel %vm3341_vm2, %v3220_v20, -inf  ;;  %v8109_v5 = vld [vmem:[%s8179_s25 + $0x1e8] sm:$0xff]  }
  0xfa   : > { %v4284_v35 = vmax.f32 %v4282_v9, %v4283_v17  ;;  %v3090_v38 = vmax.f32 %v2834_v21, 0.0  ;;  %v6289_v41 = vunpack.c.l.b16 %v7456_v33  ;;  %v4269_v46 = vrot.slane %v4268_v29, 2  ;;  %v8514_v33 = vpop.f32.mrf.mxu1 }
  0xfb   : > { %v3389_v42 = vrot.slane %v3388_v25, 1  ;;  %v3374_v44 = vmax.f32 %v3372_v15, %v3373_v28  ;;  %v6533_v47 = vsel %vm6414_vm3, %v6287_v26, %v8456_v32  ;;  %v3393_v49 = vmax.f32 %v3391_v18, %v3392_v36 }
  0xfc   : > { %v4285_v48 = vrot.slane %v4284_v35, 1  ;;  %v4288_v50 = vrot.slane %v4287_v37, 4  ;;  %7832 = vmatmul.mubr.msk.bf16.gmra.mxu0 %vm1113_vm1, %v8105_v24  ;;  %v6419_v55 = vsel %vm6418_vm5, %v6161_v59, %v6417_v63  ;;  %v4270_v19 = vmax.f32 %v4268_v29, %v4269_v46  ;;  %7960 = vmatmul.mubr.msk.bf16.gmra.mxu1 %vm1113_vm1, %v8106_v34  ;;  %v8544_v29 = vpop.f32.mrf.mxu0 }
  0xfd   : > { %v3390_v53 = vmax.f32 %v3388_v25, %v3389_v42  ;;  %v3375_v54 = vrot.slane %v3374_v44, 1  ;;  %7835 = vmatprep.mubr.msk.bf16.mxu0 %vm1113_vm1, %v8107_v27  ;;  %v3394_v56 = vrot.slane %v3393_v49, 2  ;;  %v3377_v58 = vsel %vm3341_vm2, %v3090_v38, -inf  ;;  %7963 = vmatprep.mubr.msk.bf16.mxu1 %vm1113_vm1, %v8108_v39 }
  0xfe   : > { %v4286_v32 = vmax.f32 %v4284_v35, %v4285_v48  ;;  %v4289_v57 = vmax.f32 %v4287_v37, %v4288_v50  ;;  %v6534_v60 = vsel %vm6416_vm4, %v8445_v22, %v6533_v47  ;;  %v4271_v61 = vrot.slane %v4270_v19, 1  ;;  %v8527_v22 = vpop.f32.mrf.mxu1 }
  0xff   : > { %v3376_v59 = vmax.f32 %v3374_v44, %v3375_v54  ;;  %v3378_v62 = vrot.slane %v3377_v58, 4  ;;  %v7331_v63 = vpack.c.bf16 %v3390_v53, %v3390_v53  ;;  %v3395_v0 = vmax.f32 %v3393_v49, %v3394_v56  ;;  %v8567_v53 = vpop.f32.mrf.mxu0  ;;  %v8113_v54 = vld [vmem:[%s8179_s25 + $0x1f8] sm:$0xff]  }
 0x100   : > { %v4290_v1 = vrot.slane %v4289_v57, 2  ;;  %v2699_v2 = vmul.f32 %v8383_v40, %v8452_v31  ;;  %v7459_v6 = vpack.c.bf16 %v4286_v32, %v4286_v32  ;;  %v4272_v9 = vmax.f32 %v4270_v19, %v4271_v61  ;;  %v8112_v31 = vld [vmem:[%s8179_s25 + $0x3f0] sm:$0xff]   ;;  %v8552_v36 = vpop.f32.mrf.mxu1 }
 0x101   : > { %v7329_v7 = vpack.c.bf16 %v3376_v59, %v3376_v59  ;;  %v3379_v10 = vmax.f32 %v3377_v58, %v3378_v62  ;;  %v8532_v13 = vsel %vm6418_vm5, %v6289_v41, %v6534_v60  ;;  %v3396_v14 = vrot.slane %v3395_v0, 1  ;;  %v8114_v58 = vld [vmem:[%s8179_s25 + $0x3f8] sm:$0xff]  }
 0x102   : > { %v4291_v15 = vmax.f32 %v4289_v57, %v4290_v1  ;;  %v2962_v16 = vadd.f32 %v8389_v43, %v2699_v2  ;;  %v7457_v18 = vpack.c.bf16 %v4272_v9, %v4272_v9  ;;  %v2576_v21 = vmul.f32 %v8467_v45, %v8383_v40  ;;  %v8573_v57 = vpop.f32.mrf.mxu1 }
 0x103   : > { %v6162_v17 = vunpack.c.l.b16 %v7329_v7  ;;  %v3380_v20 = vrot.slane %v3379_v10, 2  ;;  %v3397_v24 = vmax.f32 %v3395_v0, %v3396_v14  ;;  %v2704_v28 = vmul.f32 %v8472_v51, %v8383_v40  ;;  %v8590_v7 = vpop.f32.mrf.mxu0 }
 0x104   : > { %v4292_v26 = vrot.slane %v4291_v15, 1  ;;  %v3218_v25 = vmax.f32 %v2962_v16, 0.0  ;;  %7836 = vmatmul.mubr.msk.bf16.gmra.mxu0 %vm1113_vm1, %v8109_v5  ;;  %v8547_v34 = vunpack.c.l.b16 %v7331_v63  ;;  %v8549_v27 = vunpack.c.l.b16 %v7459_v6  ;;  %7964 = vmatmul.mubr.msk.bf16.gmra.mxu1 %vm1113_vm1, %v8110_v11  ;;  %v8593_v14 = vpop.f32.mrf.mxu1 }
 0x105   : > { %v3381_v35 = vmax.f32 %v3379_v10, %v3380_v20  ;;  %v2839_v45 = vadd.f32 %v8389_v43, %v2576_v21  ;;  %7839 = vmatprep.mubr.msk.bf16.mxu0 %vm1113_vm1, %v8111_v12  ;;  %v7332_v37 = vpack.c.bf16 %v3397_v24, %v3397_v24  ;;  %v2967_v39 = vadd.f32 %v8389_v43, %v2704_v28 }
 0x106   : > { %v8556_v51 = vmax.f32 %v4291_v15, %v4292_v26  ;;  %v4273_v38 = vsel %vm3341_vm2, %v3218_v25, -inf  ;;  %7967 = vmatprep.mubr.msk.bf16.mxu1 %vm1113_vm1, %v8112_v31  ;;  %v6421_v41 = vsel %vm6420_vm6, %v6162_v17, %v6419_v55  ;;  %v8563_v47 = vunpack.c.l.b16 %v7457_v18 }
 0x107   : > { %v3382_v42 = vrot.slane %v3381_v35, 1  ;;  %v4274_v44 = vrot.slane %v4273_v38, 4  ;;  %v3095_v46 = vmax.f32 %v2839_v45, 0.0  ;;  %v6165_v48 = vunpack.c.l.b16 %v7332_v37 }
 0x108   : > { %v3223_v49 = vmax.f32 %v2967_v39, 0.0  ;;  %v2574_v50 = vmul.f32 %v8383_v40, %v8483_v3  ;;  %v2702_v56 = vmul.f32 %v8383_v40, %v8486_v8  ;;  %v7460_v60 = vpack.c.bf16 %v8556_v51, %v8556_v51 }
 0x109   : > { %v3383_v19 = vmax.f32 %v3381_v35, %v3382_v42  ;;  %v4275_v32 = vmax.f32 %v4273_v38, %v4274_v44  ;;  %v3412_v55 = vsel %vm3341_vm2, %v3095_v46, -inf  ;;  %v2577_v5 = vmul.f32 %v8496_v23, %v8383_v40 }
 0x10a   : > { %v3413_v3 = vrot.slane %v3412_v55, 4  ;;  %v4308_v59 = vsel %vm3341_vm2, %v3223_v49, -inf  ;;  %v2837_v61 = vadd.f32 %v8389_v43, %v2574_v50  ;;  %v2965_v8 = vadd.f32 %v8389_v43, %v2702_v56 }
 0x10b   : > { %v7330_v62 = vpack.c.bf16 %v3383_v19, %v3383_v19  ;;  %v4276_v63 = vrot.slane %v4275_v32, 2  ;;  %v4309_v0 = vrot.slane %v4308_v59, 4  ;;  %v2705_v6 = vmul.f32 %v8499_v30, %v8383_v40 }
 0x10c   : > { %v3414_v1 = vmax.f32 %v3412_v55, %v3413_v3  ;;  %v3093_v2 = vmax.f32 %v2837_v61, 0.0  ;;  %7840 = vmatmul.mubr.msk.bf16.gmra.mxu0 %vm1113_vm1, %v8113_v54  ;;  %v3221_v12 = vmax.f32 %v2965_v8, 0.0  ;;  %7968 = vmatmul.mubr.msk.bf16.gmra.mxu1 %vm1113_vm1, %v8114_v58  ;;  %v2840_v23 = vadd.f32 %v8389_v43, %v2577_v5 }
 0x10d   : > { %v6163_v9 = vunpack.c.l.b16 %v7330_v62  ;;  %v4277_v10 = vmax.f32 %v4275_v32, %v4276_v63  ;;  %v4310_v11 = vmax.f32 %v4308_v59, %v4309_v0  ;;  %v2968_v30 = vadd.f32 %v8389_v43, %v2705_v6 }
 0x10e   : > { %v3415_v15 = vrot.slane %v3414_v1, 2  ;;  %v3398_v16 = vsel %vm3341_vm2, %v3093_v2, -inf  ;;  %v4294_v26 = vsel %vm3341_vm2, %v3221_v12, -inf  ;;  %v3096_v25 = vmax.f32 %v2840_v23, 0.0 }
 0x10f   : > { %v6423_v31 = vsel %vm6422_vm7, %v6163_v9, %v6421_v41  ;;  %v4278_v17 = vrot.slane %v4277_v10, 1  ;;  %v4311_v18 = vrot.slane %v4310_v11, 2  ;;  %v3399_v20 = vrot.slane %v3398_v16, 4 }
 0x110   : > { %v6425_v21 = vsel %vm6424_vm8, %v8547_v34, %v6423_v31  ;;  %v3416_v24 = vmax.f32 %v3414_v1, %v3415_v15  ;;  %v4295_v39 = vrot.slane %v4294_v26, 4  ;;  %v3419_v34 = vsel %vm3341_vm2, %v3096_v25, -inf }
 0x111   : > { %v6427_v28 = vsel %vm6426_vm9, %v6165_v48, %v6425_v21  ;;  %v4279_v35 = vmax.f32 %v4277_v10, %v4278_v17  ;;  %v4312_v45 = vmax.f32 %v4310_v11, %v4311_v18  ;;  %v3400_v37 = vmax.f32 %v3398_v16, %v3399_v20 }
 0x112   : > { %v6645_v51 = vpack.c.b16 %v6427_v28, %v6427_v28  ;;  %v3417_v38 = vrot.slane %v3416_v24, 1  ;;  %v3420_v46 = vrot.slane %v3419_v34, 4  ;;  %v4296_v50 = vmax.f32 %v4294_v26, %v4295_v39 }
 0x113   : > { %v7458_v41 = vpack.c.bf16 %v4279_v35, %v4279_v35  ;;  %v4313_v42 = vrot.slane %v4312_v45, 1  ;;  %v3401_v44 = vrot.slane %v3400_v37, 2  ;;  %v3224_v54 = vmax.f32 %v2968_v30, 0.0 }
 0x114   : > { %6710 = vst.msk [vmem:[%s8607_s8] sm:$0xf] %vm6709_vm10, %v6645_v51  ;;  %v3418_v49 = vmax.f32 %v3416_v24, %v3417_v38  ;;  %v2575_v48 = vmul.f32 %v8383_v40, %v8510_v52  ;;  %v3421_v56 = vmax.f32 %v3419_v34, %v3420_v46  ;;  %v6536_v58 = vsel %vm6420_vm6, %v8563_v47, %v8532_v13 }
 0x115   : > { %v6291_v19 = vunpack.c.l.b16 %v7458_v41  ;;  %v4314_v32 = vmax.f32 %v4312_v45, %v4313_v42  ;;  %v3402_v55 = vmax.f32 %v3400_v37, %v3401_v44  ;;  %v4297_v3 = vrot.slane %v4296_v50, 2 }
 0x116   : > { %v4315_v59 = vsel %vm3341_vm2, %v3224_v54, -inf  ;;  %v2838_v61 = vadd.f32 %v8389_v43, %v2575_v48  ;;  %v6293_v62 = vunpack.c.l.b16 %v7460_v60  ;;  %v3422_v8 = vrot.slane %v3421_v56, 2 }
 0x117   : > { %v6537_v63 = vsel %vm6422_vm7, %v6291_v19, %v6536_v58  ;;  %v3403_v0 = vrot.slane %v3402_v55, 1  ;;  %v7335_v1 = vpack.c.bf16 %v3418_v49, %v3418_v49  ;;  %v4298_v2 = vmax.f32 %v4296_v50, %v4297_v3 }
 0x118   : > { %v6538_v52 = vsel %vm6424_vm8, %v8549_v27, %v6537_v63  ;;  %v4316_v5 = vrot.slane %v4315_v59, 4  ;;  %v7463_v13 = vpack.c.bf16 %v4314_v32, %v4314_v32  ;;  %v3423_v9 = vmax.f32 %v3421_v56, %v3422_v8 }
 0x119   : > { %v6539_v6 = vsel %vm6426_vm9, %v6293_v62, %v6538_v52  ;;  %v3404_v47 = vmax.f32 %v3402_v55, %v3403_v0  ;;  %v4299_v11 = vrot.slane %v4298_v2, 1  ;;  %v3094_v60 = vmax.f32 %v2838_v61, 0.0 }
 0x11a   : > { %v6661_v10 = vpack.c.b16 %v6539_v6, %v6539_v6  ;;  %v4317_v12 = vmax.f32 %v4315_v59, %v4316_v5  ;;  %v3424_v16 = vrot.slane %v3423_v9, 1  ;;  %v2703_v23 = vmul.f32 %v8383_v40, %v8514_v33 }
 0x11b   : > { %v7333_v15 = vpack.c.bf16 %v3404_v47, %v3404_v47  ;;  %v2580_v27 = vmul.f32 %v8524_v4, %v8383_v40  ;;  %v4300_v30 = vmax.f32 %v4298_v2, %v4299_v11  ;;  %v3405_v17 = vsel %vm3341_vm2, %v3094_v60, -inf }
 0x11c   : > { %6726 = vst.msk [vmem:[%s8607_s8 + $0x40] sm:$0xf] %vm6709_vm10, %v6661_v10  ;;  %v4318_v31 = vrot.slane %v4317_v12, 2  ;;  %v2708_v18 = vmul.f32 %v8527_v22, %v8383_v40  ;;  %v8633_v20 = vunpack.c.l.b16 %v7335_v1  ;;  %v8635_v21 = vmax.f32 %v3423_v9, %v3424_v16 }
 0x11d   : > { %v3406_v24 = vrot.slane %v3405_v17, 4  ;;  %v2966_v26 = vadd.f32 %v8389_v43, %v2703_v23  ;;  %v8638_v33 = vunpack.c.l.b16 %v7463_v13  ;;  %v2843_v4 = vadd.f32 %v8389_v43, %v2580_v27 }
 0x11e   : > { %v4319_v25 = vmax.f32 %v4317_v12, %v4318_v31  ;;  %v2971_v28 = vadd.f32 %v8389_v43, %v2708_v18  ;;  %v6166_v35 = vunpack.c.l.b16 %v7333_v15  ;;  %v2578_v22 = vmul.f32 %v8383_v40, %v8544_v29 }
 0x11f   : > { %v3407_v45 = vmax.f32 %v3405_v17, %v3406_v24  ;;  %v3222_v37 = vmax.f32 %v2966_v26, 0.0  ;;  %v7461_v51 = vpack.c.bf16 %v4300_v30, %v4300_v30  ;;  %v3099_v39 = vmax.f32 %v2843_v4, 0.0 }
 0x120   : > { %v4320_v38 = vrot.slane %v4319_v25, 1  ;;  %v3227_v34 = vmax.f32 %v2971_v28, 0.0  ;;  %v7336_v41 = vpack.c.bf16 %v8635_v21, %v8635_v21  ;;  %v2841_v46 = vadd.f32 %v8389_v43, %v2578_v22 }
 0x121   : > { %v3408_v42 = vrot.slane %v3407_v45, 2  ;;  %v4301_v44 = vsel %vm3341_vm2, %v3222_v37, -inf  ;;  %v3440_v54 = vsel %vm3341_vm2, %v3099_v39, -inf  ;;  %v6294_v56 = vunpack.c.l.b16 %v7461_v51 }
 0x122   : > { %v4321_v49 = vmax.f32 %v4319_v25, %v4320_v38  ;;  %v4302_v50 = vrot.slane %v4301_v44, 4  ;;  %v4336_v48 = vsel %vm3341_vm2, %v3227_v34, -inf  ;;  %v3441_v29 = vrot.slane %v3440_v54, 4 }
 0x123   : > { %v3409_v19 = vmax.f32 %v3407_v45, %v3408_v42  ;;  %v4337_v32 = vrot.slane %v4336_v48, 4  ;;  %v3097_v55 = vmax.f32 %v2841_v46, 0.0  ;;  %v2706_v3 = vmul.f32 %v8383_v40, %v8552_v36 }
 0x124   : > { %v4303_v58 = vmax.f32 %v4301_v44, %v4302_v50  ;;  %v2581_v59 = vmul.f32 %v8567_v53, %v8383_v40  ;;  %v3442_v62 = vmax.f32 %v3440_v54, %v3441_v29  ;;  %v7464_v8 = vpack.c.bf16 %v4321_v49, %v4321_v49 }
 0x125   : > { %v3410_v61 = vrot.slane %v3409_v19, 1  ;;  %v4338_v63 = vmax.f32 %v4336_v48, %v4337_v32  ;;  %v3426_v0 = vsel %vm3341_vm2, %v3097_v55, -inf  ;;  %v2969_v2 = vadd.f32 %v8389_v43, %v2706_v3  ;;  %v7733_v55 = vpop.f32.mrf.mxu0 }
 0x126   : > { %v4304_v52 = vrot.slane %v4303_v58, 2  ;;  %v3427_v1 = vrot.slane %v3426_v0, 4  ;;  %v3443_v6 = vrot.slane %v3442_v62, 2  ;;  %v2844_v47 = vadd.f32 %v8389_v43, %v2581_v59 }
 0x127   : > { %v3411_v5 = vmax.f32 %v3409_v19, %v3410_v61  ;;  %v4339_v13 = vrot.slane %v4338_v63, 2  ;;  %v3225_v10 = vmax.f32 %v2969_v2, 0.0  ;;  %v2709_v53 = vmul.f32 %v8573_v57, %v8383_v40 }
 0x128   : > { %v4305_v9 = vmax.f32 %v4303_v58, %v4304_v52  ;;  %v3428_v36 = vmax.f32 %v3426_v0, %v3427_v1  ;;  %v3444_v12 = vmax.f32 %v3442_v62, %v3443_v6  ;;  %v3100_v15 = vmax.f32 %v2844_v47, 0.0  ;;  %v7861_v0 = vpop.f32.mrf.mxu1 }
 0x129   : > { %v7334_v11 = vpack.c.bf16 %v3411_v5, %v3411_v5  ;;  %v4340_v60 = vmax.f32 %v4338_v63, %v4339_v13  ;;  %v4322_v27 = vsel %vm3341_vm2, %v3225_v10, -inf  ;;  %v2972_v30 = vadd.f32 %v8389_v43, %v2709_v53  ;;  %v1600_v13 = vpop.f32.mrf.mxu0 }
 0x12a   : > { %v4306_v16 = vrot.slane %v4305_v9, 1  ;;  %v3429_v23 = vrot.slane %v3428_v36, 2  ;;  %v3445_v17 = vrot.slane %v3444_v12, 1  ;;  %v4323_v21 = vrot.slane %v4322_v27, 4 }
 0x12b   : > { %v6167_v31 = vunpack.c.l.b16 %v7334_v11  ;;  %v4341_v18 = vrot.slane %v4340_v60, 1  ;;  %v3447_v25 = vsel %vm3341_vm2, %v3100_v15, -inf  ;;  %v3228_v4 = vmax.f32 %v2972_v30, 0.0 }
 0x12c   : > { %v4307_v24 = vmax.f32 %v4305_v9, %v4306_v16  ;;  %v3430_v26 = vmax.f32 %v3428_v36, %v3429_v23  ;;  %v3446_v28 = vmax.f32 %v3444_v12, %v3445_v17  ;;  %v4324_v37 = vmax.f32 %v4322_v27, %v4323_v21 }
 0x12d   : > { %v6428_v57 = vsel %vm6414_vm3, %v6167_v31, %v6166_v35  ;;  %v4342_v45 = vmax.f32 %v4340_v60, %v4341_v18  ;;  %v3448_v39 = vrot.slane %v3447_v25, 4  ;;  %v6169_v34 = vunpack.c.l.b16 %v7336_v41 }
 0x12e   : > { %v6429_v22 = vsel %vm6416_vm4, %v8633_v20, %v6428_v57  ;;  %v7462_v51 = vpack.c.bf16 %v4307_v24, %v4307_v24  ;;  %v3431_v38 = vrot.slane %v3430_v26, 1  ;;  %v7339_v42 = vpack.c.bf16 %v3446_v28, %v3446_v28  ;;  %v2112_v28 = vpop.f32.mrf.mxu1 }
 0x12f   : > { %v7467_v44 = vpack.c.bf16 %v4342_v45, %v4342_v45  ;;  %v4325_v46 = vrot.slane %v4324_v37, 2  ;;  %v3449_v54 = vmax.f32 %v3447_v25, %v3448_v39  ;;  %v4343_v48 = vsel %vm3341_vm2, %v3228_v4, -inf  ;;  %v7734_v45 = vpop.f32.mrf.mxu0 }
 0x130   : > { %v6295_v49 = vunpack.c.l.b16 %v7462_v51  ;;  %v3432_v50 = vmax.f32 %v3430_v26, %v3431_v38  ;;  %v6297_v19 = vunpack.c.l.b16 %v7464_v8  ;;  %v6430_v35 = vsel %vm6418_vm5, %v6169_v34, %v6429_v22 }
 0x131   : > { %v4326_v29 = vmax.f32 %v4324_v37, %v4325_v46  ;;  %v4344_v32 = vrot.slane %v4343_v48, 4  ;;  %v3450_v3 = vrot.slane %v3449_v54, 2  ;;  %v2579_v41 = vmul.f32 %v8383_v40, %v8590_v7 }
 0x132   : > { %v6540_v20 = vsel %vm6414_vm3, %v6295_v49, %v6294_v56  ;;  %v7337_v58 = vpack.c.bf16 %v3432_v50, %v3432_v50  ;;  %v8670_v59 = vunpack.c.l.b16 %v7339_v42  ;;  %v2707_v63 = vmul.f32 %v8383_v40, %v8593_v14 }
 0x133   : > { %v4327_v61 = vrot.slane %v4326_v29, 1  ;;  %v4345_v62 = vmax.f32 %v4343_v48, %v4344_v32  ;;  %v6541_v8 = vsel %vm6416_vm4, %v8638_v33, %v6540_v20  ;;  %v8676_v52 = vunpack.c.l.b16 %v7467_v44  ;;  %v8710_v20 = vld [vmem:[%s10136_s3] ss:$0 sm:$0xff] }
 0x134   : > { %v3451_v1 = vmax.f32 %v3449_v54, %v3450_v3  ;;  %v2842_v56 = vadd.f32 %v8389_v43, %v2579_v41  ;;  %v2970_v7 = vadd.f32 %v8389_v43, %v2707_v63  ;;  %v2584_v6 = vmul.f32 %v7733_v55, %v8383_v40 }
 0x135   : > { %v4328_v2 = vmax.f32 %v4326_v29, %v4327_v61  ;;  %v4346_v5 = vrot.slane %v4345_v62, 2  ;;  %v6170_v47 = vunpack.c.l.b16 %v7337_v58  ;;  %v2712_v14 = vmul.f32 %v7861_v0, %v8383_v40  ;;  %v7862_v29 = vpop.f32.mrf.mxu1 }
 0x136   : > { %v3452_v9 = vrot.slane %v3451_v1, 1  ;;  %v3098_v36 = vmax.f32 %v2842_v56, 0.0  ;;  %v3226_v33 = vmax.f32 %v2970_v7, 0.0  ;;  %v2847_v11 = vadd.f32 %v8389_v43, %v2584_v6 }
 0x137   : > { %v7465_v10 = vpack.c.bf16 %v4328_v2, %v4328_v2  ;;  %v4347_v53 = vmax.f32 %v4345_v62, %v4346_v5  ;;  %v2975_v15 = vadd.f32 %v8389_v43, %v2712_v14  ;;  %v2582_v16 = vmul.f32 %v8383_v40, %v1600_v13 }
 0x138   : > { %v8683_v12 = vmax.f32 %v3451_v1, %v3452_v9  ;;  %v3433_v60 = vsel %vm3341_vm2, %v3098_v36, -inf  ;;  %v4329_v31 = vsel %vm3341_vm2, %v3226_v33, -inf  ;;  %v6542_v17 = vsel %vm6418_vm5, %v6297_v19, %v6541_v8 }
 0x139   : > { %v6298_v23 = vunpack.c.l.b16 %v7465_v10  ;;  %v4348_v27 = vrot.slane %v4347_v53, 1  ;;  %v3434_v30 = vrot.slane %v3433_v60, 4  ;;  %v4330_v18 = vrot.slane %v4329_v31, 4 }
 0x13a   : > { %v3103_v21 = vmax.f32 %v2847_v11, 0.0  ;;  %v3231_v24 = vmax.f32 %v2975_v15, 0.0  ;;  %v8691_v26 = vsel %vm6420_vm6, %v6170_v47, %v6430_v35  ;;  %v2845_v57 = vadd.f32 %v8389_v43, %v2582_v16  ;;  %v8702_v43 = vld [vmem:[%s10135_s2] ss:$0 sm:$0xff] }
 0x13b   : > { %v4349_v25 = vmax.f32 %v4347_v53, %v4348_v27  ;;  %v3435_v4 = vmax.f32 %v3433_v60, %v3434_v30  ;;  %v7340_v40 = vpack.c.bf16 %v8683_v12, %v8683_v12  ;;  %v4331_v37 = vmax.f32 %v4329_v31, %v4330_v18  ;;  %v1603_v31 = vpop.f32.mrf.mxu0 }
 0x13c   : > { %v3468_v22 = vsel %vm3341_vm2, %v3103_v21, -inf  ;;  %v4364_v51 = vsel %vm3341_vm2, %v3231_v24, -inf  ;;  %v6543_v38 = vsel %vm6420_vm6, %v6298_v23, %v6542_v17  ;;  %v3101_v46 = vmax.f32 %v2845_v57, 0.0 }
 0x13d   : > { %v3436_v39 = vrot.slane %v3435_v4, 2  ;;  %v3469_v34 = vrot.slane %v3468_v22, 4  ;;  %v4365_v42 = vrot.slane %v4364_v51, 4  ;;  %v4332_v44 = vrot.slane %v4331_v37, 2 }
 0x13e   : > { %v2710_v49 = vmul.f32 %v8702_v43, %v2112_v28  ;;  %v2585_v50 = vmul.f32 %v8702_v43, %v7734_v45  ;;  %v7468_v54 = vpack.c.bf16 %v4349_v25, %v4349_v25  ;;  %v3454_v55 = vsel %vm3341_vm2, %v3101_v46, -inf  ;;  %v2115_v25 = vpop.f32.mrf.mxu1 }
 0x13f   : > { %v3437_v48 = vmax.f32 %v3435_v4, %v3436_v39  ;;  %v3470_v19 = vmax.f32 %v3468_v22, %v3469_v34  ;;  %v4366_v35 = vmax.f32 %v4364_v51, %v4365_v42  ;;  %v4333_v32 = vmax.f32 %v4331_v37, %v4332_v44 }
 0x140   : > { %v2973_v58 = vadd.f32 %v8710_v20, %v2710_v49  ;;  %v2848_v3 = vadd.f32 %v8710_v20, %v2585_v50  ;;  %v3455_v63 = vrot.slane %v3454_v55, 4  ;;  %v2713_v56 = vmul.f32 %v8702_v43, %v7862_v29 }
 0x141   : > { %v3438_v41 = vrot.slane %v3437_v48, 1  ;;  %v3471_v61 = vrot.slane %v3470_v19, 2  ;;  %v4367_v62 = vrot.slane %v4366_v35, 2  ;;  %v4334_v0 = vrot.slane %v4333_v32, 1 }
 0x142   : > { %v3229_v8 = vmax.f32 %v2973_v58, 0.0  ;;  %v3104_v1 = vmax.f32 %v2848_v3, 0.0  ;;  %v3456_v6 = vmax.f32 %v3454_v55, %v3455_v63  ;;  %v2976_v36 = vadd.f32 %v8710_v20, %v2713_v56 }
 0x143   : > { %v3439_v2 = vmax.f32 %v3437_v48, %v3438_v41  ;;  %v3472_v5 = vmax.f32 %v3470_v19, %v3471_v61  ;;  %v4368_v7 = vmax.f32 %v4366_v35, %v4367_v62  ;;  %v4335_v13 = vmax.f32 %v4333_v32, %v4334_v0 }
 0x144   : > { %v4350_v47 = vsel %vm3341_vm2, %v3229_v8, -inf  ;;  %v3475_v9 = vsel %vm3341_vm2, %v3104_v1, -inf  ;;  %v3457_v33 = vrot.slane %v3456_v6, 2  ;;  %v3232_v15 = vmax.f32 %v2976_v36, 0.0 }
 0x145   : > { %v7338_v14 = vpack.c.bf16 %v3439_v2, %v3439_v2  ;;  %v3473_v10 = vrot.slane %v3472_v5, 1  ;;  %v4369_v53 = vrot.slane %v4368_v7, 1  ;;  %v7466_v11 = vpack.c.bf16 %v4335_v13, %v4335_v13 }
 0x146   : > { %v4351_v12 = vrot.slane %v4350_v47, 4  ;;  %v3476_v60 = vrot.slane %v3475_v9, 4  ;;  %v6173_v16 = vunpack.c.l.b16 %v7340_v40  ;;  %v3458_v30 = vmax.f32 %v3456_v6, %v3457_v33 }
 0x147   : > { %v6171_v23 = vunpack.c.l.b16 %v7338_v14  ;;  %v3474_v27 = vmax.f32 %v3472_v5, %v3473_v10  ;;  %v6301_v17 = vunpack.c.l.b16 %v7468_v54  ;;  %v6299_v18 = vunpack.c.l.b16 %v7466_v11  ;;  %v7865_v54 = vpop.f32.mrf.mxu1 }
 0x148   : > { %v4352_v21 = vmax.f32 %v4350_v47, %v4351_v12  ;;  %v3477_v24 = vmax.f32 %v3475_v9, %v3476_v60  ;;  %v4370_v57 = vmax.f32 %v4368_v7, %v4369_v53  ;;  %v3459_v28 = vrot.slane %v3458_v30, 1 }
 0x149   : > { %v6432_v4 = vsel %vm6422_vm7, %v6171_v23, %v8691_v26  ;;  %v4371_v45 = vsel %vm3341_vm2, %v3232_v15, -inf  ;;  %v6544_v40 = vsel %vm6422_vm7, %v6299_v18, %v6543_v38  ;;  %v7343_v42 = vpack.c.bf16 %v3474_v27, %v3474_v27  ;;  %v7737_v26 = vpop.f32.mrf.mxu0  ;;  %v2128_v53 = vpop.f32.mrf.mxu1 }
 0x14a   : > { %v6433_v37 = vsel %vm6424_vm8, %v8670_v59, %v6432_v4  ;;  %v4353_v22 = vrot.slane %v4352_v21, 2  ;;  %v3478_v51 = vrot.slane %v3477_v24, 2  ;;  %v6545_v34 = vsel %vm6424_vm8, %v8676_v52, %v6544_v40 }
 0x14b   : > { %v6434_v39 = vsel %vm6426_vm9, %v6173_v16, %v6433_v37  ;;  %v6546_v46 = vsel %vm6426_vm9, %v6301_v17, %v6545_v34  ;;  %v3460_v49 = vmax.f32 %v3458_v30, %v3459_v28  ;;  %v4372_v38 = vrot.slane %v4371_v45, 4  ;;  %v1616_v61 = vpop.f32.mrf.mxu0 }
 0x14c   : > { %v6646_v44 = vpack.c.b16 %v6434_v39, %v6434_v39  ;;  %v4354_v50 = vmax.f32 %v4352_v21, %v4353_v22  ;;  %v6662_v59 = vpack.c.b16 %v6546_v46, %v6546_v46  ;;  %v3479_v48 = vmax.f32 %v3477_v24, %v3478_v51 }
 0x14d   : > { %v2583_v19 = vmul.f32 %v8702_v43, %v1603_v31  ;;  %v7471_v35 = vpack.c.bf16 %v4370_v57, %v4370_v57  ;;  %v2711_v52 = vmul.f32 %v8702_v43, %v2115_v25  ;;  %v2588_v32 = vmul.f32 %v8702_v43, %v7737_v26  ;;  %v7738_v30 = vpop.f32.mrf.mxu0 }
 0x14e   : > { %6711 = vst.msk [vmem:[%s8607_s8 + $0x4] sm:$0xf] %vm6709_vm10, %v6646_v44  ;;  %v4355_v29 = vrot.slane %v4354_v50, 1  ;;  %6727 = vst.msk [vmem:[%s8607_s8 + $0x44] sm:$0xf] %vm6709_vm10, %v6662_v59  ;;  %v7341_v55 = vpack.c.bf16 %v3460_v49, %v3460_v49  ;;  %v4373_v58 = vmax.f32 %v4371_v45, %v4372_v38  ;;  %v2716_v41 = vmul.f32 %v8702_v43, %v7865_v54 }
 0x14f   : > { %v2846_v3 = vadd.f32 %v8710_v20, %v2583_v19  ;;  %v8737_v62 = vunpack.c.l.b16 %v7343_v42  ;;  %v3480_v63 = vrot.slane %v3479_v48, 1  ;;  %v2974_v0 = vadd.f32 %v8710_v20, %v2711_v52 }
 0x150   : > { %v2851_v8 = vadd.f32 %v8710_v20, %v2588_v32  ;;  %v8741_v1 = vmax.f32 %v4354_v50, %v4355_v29  ;;  %v4374_v56 = vrot.slane %v4373_v58, 2  ;;  %v2979_v5 = vadd.f32 %v8710_v20, %v2716_v41 }
 0x151   : > { %v3102_v2 = vmax.f32 %v2846_v3, 0.0  ;;  %v8744_v7 = vunpack.c.l.b16 %v7471_v35  ;;  %v3230_v6 = vmax.f32 %v2974_v0, 0.0  ;;  %v2586_v47 = vmul.f32 %v8702_v43, %v1616_v61 }
 0x152   : > { %v3107_v13 = vmax.f32 %v2851_v8, 0.0  ;;  %v8747_v9 = vunpack.c.l.b16 %v7341_v55  ;;  %v4375_v36 = vmax.f32 %v4373_v58, %v4374_v56  ;;  %v3235_v10 = vmax.f32 %v2979_v5, 0.0 }
 0x153   : > { %v3461_v14 = vsel %vm3341_vm2, %v3102_v2, -inf  ;;  %v8750_v33 = vmax.f32 %v3479_v48, %v3480_v63  ;;  %v4357_v12 = vsel %vm3341_vm2, %v3230_v6, -inf  ;;  %v7469_v15 = vpack.c.bf16 %v8741_v1, %v8741_v1  ;;  %v7866_v48 = vpop.f32.mrf.mxu1 }
 0x154   : > { %v3462_v11 = vrot.slane %v3461_v14, 4  ;;  %v3496_v60 = vsel %vm3341_vm2, %v3107_v13, -inf  ;;  %v4376_v16 = vrot.slane %v4375_v36, 1  ;;  %v4358_v23 = vrot.slane %v4357_v12, 4 }
 0x155   : > { %v3497_v27 = vrot.slane %v3496_v60, 4  ;;  %v4392_v17 = vsel %vm3341_vm2, %v3235_v10, -inf  ;;  %v2849_v18 = vadd.f32 %v8710_v20, %v2586_v47  ;;  %v2714_v21 = vmul.f32 %v8702_v43, %v2128_v53  ;;  %v1619_v53 = vpop.f32.mrf.mxu0 }
 0x156   : > { %v3463_v31 = vmax.f32 %v3461_v14, %v3462_v11  ;;  %v4377_v24 = vmax.f32 %v4375_v36, %v4376_v16  ;;  %v4359_v25 = vmax.f32 %v4357_v12, %v4358_v23  ;;  %v4393_v57 = vrot.slane %v4392_v17, 4  ;;  %v2131_v16 = vpop.f32.mrf.mxu1 }
 0x157   : > { %v3498_v4 = vmax.f32 %v3496_v60, %v3497_v27  ;;  %v3105_v45 = vmax.f32 %v2849_v18, 0.0  ;;  %v2977_v37 = vadd.f32 %v8710_v20, %v2714_v21  ;;  %v2589_v40 = vmul.f32 %v8702_v43, %v7738_v30 }
 0x158   : > { %v3464_v28 = vrot.slane %v3463_v31, 2  ;;  %v7344_v22 = vpack.c.bf16 %v8750_v33, %v8750_v33  ;;  %v4360_v51 = vrot.slane %v4359_v25, 2  ;;  %v4394_v34 = vmax.f32 %v4392_v17, %v4393_v57 }
 0x159   : > { %v3499_v39 = vrot.slane %v3498_v4, 2  ;;  %v3482_v26 = vsel %vm3341_vm2, %v3105_v45, -inf  ;;  %v3233_v44 = vmax.f32 %v2977_v37, 0.0  ;;  %v2852_v46 = vadd.f32 %v8710_v20, %v2589_v40  ;;  %v7741_v45 = vpop.f32.mrf.mxu0 }
 0x15a   : > { %v3465_v42 = vmax.f32 %v3463_v31, %v3464_v28  ;;  %v7472_v49 = vpack.c.bf16 %v4377_v24, %v4377_v24  ;;  %v4361_v50 = vmax.f32 %v4359_v25, %v4360_v51  ;;  %v4395_v59 = vrot.slane %v4394_v34, 2  ;;  %v7869_v51 = vpop.f32.mrf.mxu1 }
 0x15b   : > { %v3500_v54 = vmax.f32 %v3498_v4, %v3499_v39  ;;  %v3483_v19 = vrot.slane %v3482_v26, 4  ;;  %v4378_v35 = vsel %vm3341_vm2, %v3233_v44, -inf  ;;  %v3108_v29 = vmax.f32 %v2852_v46, 0.0 }
 0x15c   : > { %v3466_v38 = vrot.slane %v3465_v42, 1  ;;  %v4362_v52 = vrot.slane %v4361_v50, 1  ;;  %v4396_v55 = vmax.f32 %v4394_v34, %v4395_v59  ;;  %v4379_v58 = vrot.slane %v4378_v35, 4 }
 0x15d   : > { %v3501_v32 = vrot.slane %v3500_v54, 1  ;;  %v3484_v41 = vmax.f32 %v3482_v26, %v3483_v19  ;;  %v3503_v61 = vsel %vm3341_vm2, %v3108_v29, -inf  ;;  %v2717_v63 = vmul.f32 %v8702_v43, %v7866_v48 }
 0x15e   : > { %v3467_v3 = vmax.f32 %v3465_v42, %v3466_v38  ;;  %v4363_v0 = vmax.f32 %v4361_v50, %v4362_v52  ;;  %v4397_v1 = vrot.slane %v4396_v55, 1  ;;  %v4380_v56 = vmax.f32 %v4378_v35, %v4379_v58  ;;  %v1632_v35 = vpop.f32.mrf.mxu0 }
 0x15f   : > { %v3502_v8 = vmax.f32 %v3500_v54, %v3501_v32  ;;  %v3485_v5 = vrot.slane %v3484_v41, 2  ;;  %v3504_v6 = vrot.slane %v3503_v61, 4  ;;  %v2980_v13 = vadd.f32 %v8710_v20, %v2717_v63 }
 0x160   : > { %v7342_v2 = vpack.c.bf16 %v3467_v3, %v3467_v3  ;;  %v7470_v47 = vpack.c.bf16 %v4363_v0, %v4363_v0  ;;  %v4398_v14 = vmax.f32 %v4396_v55, %v4397_v1  ;;  %v4381_v10 = vrot.slane %v4380_v56, 2 }
 0x161   : > { %v7347_v36 = vpack.c.bf16 %v3502_v8, %v3502_v8  ;;  %v3486_v11 = vmax.f32 %v3484_v41, %v3485_v5  ;;  %v3505_v12 = vmax.f32 %v3503_v61, %v3504_v6  ;;  %v3236_v60 = vmax.f32 %v2980_v13, 0.0 }
 0x162   : > { %v6175_v33 = vunpack.c.l.b16 %v7342_v2  ;;  %v6302_v23 = vunpack.c.l.b16 %v7469_v15  ;;  %v6177_v27 = vunpack.c.l.b16 %v7344_v22  ;;  %v6303_v30 = vunpack.c.l.b16 %v7470_v47  ;;  %v7742_v47 = vpop.f32.mrf.mxu0 }
 0x163   : > { %v4382_v31 = vmax.f32 %v4380_v56, %v4381_v10  ;;  %v3487_v18 = vrot.slane %v3486_v11, 1  ;;  %v3506_v21 = vrot.slane %v3505_v12, 2  ;;  %v4399_v24 = vsel %vm3341_vm2, %v3236_v60, -inf  ;;  %v2144_v56 = vpop.f32.mrf.mxu1 }
 0x164   : > { %v6435_v17 = vsel %vm6414_vm3, %v6175_v33, %v8747_v9  ;;  %v6305_v25 = vunpack.c.l.b16 %v7472_v49  ;;  %v6547_v4 = vsel %vm6414_vm3, %v6303_v30, %v6302_v23  ;;  %v8773_v57 = vunpack.c.l.b16 %v7347_v36 }
 0x165   : > { %v4383_v28 = vrot.slane %v4382_v31, 1  ;;  %v6436_v15 = vsel %vm6416_vm4, %v8737_v62, %v6435_v17  ;;  %v7475_v37 = vpack.c.bf16 %v4398_v14, %v4398_v14  ;;  %v3488_v40 = vmax.f32 %v3486_v11, %v3487_v18 }
 0x166   : > { %v3507_v22 = vmax.f32 %v3505_v12, %v3506_v21  ;;  %v6548_v9 = vsel %vm6416_vm4, %v8744_v7, %v6547_v4  ;;  %v4400_v34 = vrot.slane %v4399_v24, 4  ;;  %v2587_v42 = vmul.f32 %v8702_v43, %v1619_v53 }
 0x167   : > { %v4384_v39 = vmax.f32 %v4382_v31, %v4383_v28  ;;  %v7345_v26 = vpack.c.bf16 %v3488_v40, %v3488_v40  ;;  %v2715_v46 = vmul.f32 %v8702_v43, %v2131_v16  ;;  %v2592_v49 = vmul.f32 %v8702_v43, %v7741_v45 }
 0x168   : > { %v3508_v44 = vrot.slane %v3507_v22, 1  ;;  %v4401_v54 = vmax.f32 %v4399_v24, %v4400_v34  ;;  %v2850_v62 = vadd.f32 %v8710_v20, %v2587_v42  ;;  %v2720_v59 = vmul.f32 %v8702_v43, %v7869_v51  ;;  %v7870_v34 = vpop.f32.mrf.mxu1 }
 0x169   : > { %v7473_v50 = vpack.c.bf16 %v4384_v39, %v4384_v39  ;;  %v8784_v48 = vunpack.c.l.b16 %v7475_v37  ;;  %v6178_v38 = vunpack.c.l.b16 %v7345_v26  ;;  %v2978_v7 = vadd.f32 %v8710_v20, %v2715_v46 }
 0x16a   : > { %v2855_v19 = vadd.f32 %v8710_v20, %v2592_v49  ;;  %v6437_v29 = vsel %vm6418_vm5, %v6177_v27, %v6436_v15  ;;  %v4402_v52 = vrot.slane %v4401_v54, 2  ;;  %v3106_v32 = vmax.f32 %v2850_v62, 0.0 }
 0x16b   : > { %v2983_v55 = vadd.f32 %v8710_v20, %v2720_v59  ;;  %v6549_v58 = vsel %vm6418_vm5, %v6305_v25, %v6548_v9  ;;  %v3509_v3 = vmax.f32 %v3507_v22, %v3508_v44  ;;  %v3234_v41 = vmax.f32 %v2978_v7, 0.0 }
 0x16c   : > { %v3111_v61 = vmax.f32 %v2855_v19, 0.0  ;;  %v6306_v63 = vunpack.c.l.b16 %v7473_v50  ;;  %v4403_v0 = vmax.f32 %v4401_v54, %v4402_v52  ;;  %v3489_v8 = vsel %vm3341_vm2, %v3106_v32, -inf }
 0x16d   : > { %v3239_v1 = vmax.f32 %v2983_v55, 0.0  ;;  %v8793_v2 = vsel %vm6420_vm6, %v6178_v38, %v6437_v29  ;;  %v3490_v5 = vrot.slane %v3489_v8, 4  ;;  %v4385_v6 = vsel %vm3341_vm2, %v3234_v41, -inf }
 0x16e   : > { %v3524_v13 = vsel %vm3341_vm2, %v3111_v61, -inf  ;;  %v4404_v36 = vrot.slane %v4403_v0, 1  ;;  %v4386_v14 = vrot.slane %v4385_v6, 4  ;;  %v2590_v12 = vmul.f32 %v8702_v43, %v1632_v35 }
 0x16f   : > { %v3525_v10 = vrot.slane %v3524_v13, 4  ;;  %v4420_v53 = vsel %vm3341_vm2, %v3239_v1, -inf  ;;  %v3491_v33 = vmax.f32 %v3489_v8, %v3490_v5  ;;  %v2718_v60 = vmul.f32 %v8702_v43, %v2144_v56 }
 0x170   : > { %v4421_v11 = vrot.slane %v4420_v53, 4  ;;  %v7348_v16 = vpack.c.bf16 %v3509_v3, %v3509_v3  ;;  %v4387_v23 = vmax.f32 %v4385_v6, %v4386_v14  ;;  %v2593_v30 = vmul.f32 %v8702_v43, %v7742_v47  ;;  %v2147_v47 = vpop.f32.mrf.mxu1 }
 0x171   : > { %v3526_v27 = vmax.f32 %v3524_v13, %v3525_v10  ;;  %v3492_v31 = vrot.slane %v3491_v33, 2  ;;  %v2853_v18 = vadd.f32 %v8710_v20, %v2590_v12  ;;  %v2981_v21 = vadd.f32 %v8710_v20, %v2718_v60  ;;  %v1635_v13 = vpop.f32.mrf.mxu0 }
 0x172   : > { %v4422_v17 = vmax.f32 %v4420_v53, %v4421_v11  ;;  %v4405_v24 = vmax.f32 %v4403_v0, %v4404_v36  ;;  %v4388_v25 = vrot.slane %v4387_v23, 2  ;;  %v2856_v28 = vadd.f32 %v8710_v20, %v2593_v30 }
 0x173   : > { %v3527_v4 = vrot.slane %v3526_v27, 2  ;;  %v3493_v45 = vmax.f32 %v3491_v33, %v3492_v31  ;;  %v3109_v37 = vmax.f32 %v2853_v18, 0.0  ;;  %v3237_v40 = vmax.f32 %v2981_v21, 0.0  ;;  %v7745_v21 = vpop.f32.mrf.mxu0 }
 0x174   : > { %v4423_v15 = vrot.slane %v4422_v17, 2  ;;  %v6550_v22 = vsel %vm6420_vm6, %v6306_v63, %v6549_v58  ;;  %v4389_v51 = vmax.f32 %v4387_v23, %v4388_v25  ;;  %v3112_v39 = vmax.f32 %v2856_v28, 0.0 }
 0x175   : > { %v3528_v9 = vmax.f32 %v3526_v27, %v3527_v4  ;;  %v3494_v42 = vrot.slane %v3493_v45, 1  ;;  %v3510_v44 = vsel %vm3341_vm2, %v3109_v37, -inf  ;;  %v4406_v46 = vsel %vm3341_vm2, %v3237_v40, -inf }
 0x176   : > { %v4424_v26 = vmax.f32 %v4422_v17, %v4423_v15  ;;  %v4390_v49 = vrot.slane %v4389_v51, 1  ;;  %v3511_v54 = vrot.slane %v3510_v44, 4  ;;  %v4407_v62 = vrot.slane %v4406_v46, 4 }
 0x177   : > { %v3529_v50 = vrot.slane %v3528_v9, 1  ;;  %v7476_v59 = vpack.c.bf16 %v4405_v24, %v4405_v24  ;;  %v3495_v38 = vmax.f32 %v3493_v45, %v3494_v42  ;;  %v3531_v7 = vsel %vm3341_vm2, %v3112_v39, -inf  ;;  %v7873_v24 = vpop.f32.mrf.mxu1 }
 0x178   : > { %v2721_v19 = vmul.f32 %v8702_v43, %v7870_v34  ;;  %v4391_v35 = vmax.f32 %v4389_v51, %v4390_v49  ;;  %v4425_v29 = vrot.slane %v4424_v26, 1  ;;  %v3512_v52 = vmax.f32 %v3510_v44, %v3511_v54 }
 0x179   : > { %v4408_v32 = vmax.f32 %v4406_v46, %v4407_v62  ;;  %v7346_v55 = vpack.c.bf16 %v3495_v38, %v3495_v38  ;;  %v3530_v58 = vmax.f32 %v3528_v9, %v3529_v50  ;;  %v3532_v3 = vrot.slane %v3531_v7, 4  ;;  %v2160_v44 = vpop.f32.mrf.mxu1 }
 0x17a   : > { %v2984_v41 = vadd.f32 %v8710_v20, %v2721_v19  ;;  %v6181_v61 = vunpack.c.l.b16 %v7348_v16  ;;  %v7474_v63 = vpack.c.bf16 %v4391_v35, %v4391_v35  ;;  %v3513_v0 = vrot.slane %v3512_v52, 2 }
 0x17b   : > { %v4409_v8 = vrot.slane %v4408_v32, 2  ;;  %v6309_v1 = vunpack.c.l.b16 %v7476_v59  ;;  %v6179_v56 = vunpack.c.l.b16 %v7346_v55  ;;  %v3533_v5 = vmax.f32 %v3531_v7, %v3532_v3 }
 0x17c   : > { %v3240_v6 = vmax.f32 %v2984_v41, 0.0  ;;  %v6307_v36 = vunpack.c.l.b16 %v7474_v63  ;;  %v4426_v14 = vmax.f32 %v4424_v26, %v4425_v29  ;;  %v3514_v10 = vmax.f32 %v3512_v52, %v3513_v0  ;;  %v1648_v26 = vpop.f32.mrf.mxu0 }
 0x17d   : > { %v4410_v53 = vmax.f32 %v4408_v32, %v4409_v8  ;;  %v6439_v33 = vsel %vm6422_vm7, %v6179_v56, %v8793_v2  ;;  %v7351_v11 = vpack.c.bf16 %v3530_v58, %v3530_v58  ;;  %v3534_v12 = vrot.slane %v3533_v5, 2 }
 0x17e   : > { %v4427_v60 = vsel %vm3341_vm2, %v3240_v6, -inf  ;;  %v6440_v16 = vsel %vm6424_vm8, %v8773_v57, %v6439_v33  ;;  %v6551_v23 = vsel %vm6422_vm7, %v6307_v36, %v6550_v22  ;;  %v3515_v27 = vrot.slane %v3514_v10, 1  ;;  %v7746_v8 = vpop.f32.mrf.mxu0 }
 0x17f   : > { %v4411_v30 = vrot.slane %v4410_v53, 1  ;;  %v6441_v31 = vsel %vm6426_vm9, %v6181_v61, %v6440_v16  ;;  %v6552_v17 = vsel %vm6424_vm8, %v8784_v48, %v6551_v23  ;;  %v3535_v18 = vmax.f32 %v3533_v5, %v3534_v12 }
 0x180   : > { %v4428_v2 = vrot.slane %v4427_v60, 4  ;;  %v6647_v25 = vpack.c.b16 %v6441_v31, %v6441_v31  ;;  %v6553_v4 = vsel %vm6426_vm9, %v6309_v1, %v6552_v17  ;;  %v7479_v28 = vpack.c.bf16 %v4426_v14, %v4426_v14 }
 0x181   : > { %v3516_v57 = vmax.f32 %v3514_v10, %v3515_v27  ;;  %v6663_v45 = vpack.c.b16 %v6553_v4, %v6553_v4  ;;  %v8820_v15 = vmax.f32 %v4410_v53, %v4411_v30  ;;  %v2591_v40 = vmul.f32 %v8702_v43, %v1635_v13 }
 0x182   : > { %v4429_v37 = vmax.f32 %v4427_v60, %v4428_v2  ;;  %6712 = vst.msk [vmem:[%s8607_s8 + $0x8] sm:$0xf] %vm6709_vm10, %v6647_v25  ;;  %v3536_v22 = vrot.slane %v3535_v18, 1  ;;  %v2719_v48 = vmul.f32 %v8702_v43, %v2147_v47  ;;  %v2596_v51 = vmul.f32 %v8702_v43, %v7745_v21 }
 0x183   : > { %6728 = vst.msk [vmem:[%s8607_s8 + $0x48] sm:$0xf] %vm6709_vm10, %v6663_v45  ;;  %v7349_v9 = vpack.c.bf16 %v3516_v57, %v3516_v57  ;;  %v2854_v34 = vadd.f32 %v8710_v20, %v2591_v40  ;;  %v2724_v42 = vmul.f32 %v8702_v43, %v7873_v24  ;;  %v8831_v46 = vunpack.c.l.b16 %v7351_v11 }
 0x184   : > { %v4430_v39 = vrot.slane %v4429_v37, 2  ;;  %v8833_v49 = vunpack.c.l.b16 %v7479_v28  ;;  %v2982_v50 = vadd.f32 %v8710_v20, %v2719_v48  ;;  %v2859_v54 = vadd.f32 %v8710_v20, %v2596_v51 }
 0x185   : > { %v7477_v62 = vpack.c.bf16 %v8820_v15, %v8820_v15  ;;  %v3110_v38 = vmax.f32 %v2854_v34, 0.0  ;;  %v2987_v7 = vadd.f32 %v8710_v20, %v2724_v42  ;;  %v2594_v29 = vmul.f32 %v8702_v43, %v1648_v26 }
 0x186   : > { %v4431_v59 = vmax.f32 %v4429_v37, %v4430_v39  ;;  %v3238_v19 = vmax.f32 %v2982_v50, 0.0  ;;  %v3115_v35 = vmax.f32 %v2859_v54, 0.0  ;;  %v2722_v52 = vmul.f32 %v8702_v43, %v2160_v44 }
 0x187   : > { %v8842_v32 = vunpack.c.l.b16 %v7349_v9  ;;  %v8844_v55 = vmax.f32 %v3535_v18, %v3536_v22  ;;  %v3517_v58 = vsel %vm3341_vm2, %v3110_v38, -inf  ;;  %v3243_v3 = vmax.f32 %v2987_v7, 0.0  ;;  %v7874_v18 = vpop.f32.mrf.mxu1 }
 0x188   : > { %v3518_v41 = vrot.slane %v3517_v58, 4  ;;  %v4413_v61 = vsel %vm3341_vm2, %v3238_v19, -inf  ;;  %v3552_v63 = vsel %vm3341_vm2, %v3115_v35, -inf  ;;  %v2857_v0 = vadd.f32 %v8710_v20, %v2594_v29 }
 0x189   : > { %v4432_v1 = vrot.slane %v4431_v59, 1  ;;  %v4414_v56 = vrot.slane %v4413_v61, 4  ;;  %v3553_v5 = vrot.slane %v3552_v63, 4  ;;  %v4448_v6 = vsel %vm3341_vm2, %v3243_v3, -inf }
 0x18a   : > { %v3519_v13 = vmax.f32 %v3517_v58, %v3518_v41  ;;  %v4449_v47 = vrot.slane %v4448_v6, 4  ;;  %v3113_v36 = vmax.f32 %v2857_v0, 0.0  ;;  %v2985_v14 = vadd.f32 %v8710_v20, %v2722_v52 }
 0x18b   : > { %v7352_v10 = vpack.c.bf16 %v8844_v55, %v8844_v55  ;;  %v4415_v53 = vmax.f32 %v4413_v61, %v4414_v56  ;;  %v3554_v33 = vmax.f32 %v3552_v63, %v3553_v5  ;;  %v2597_v11 = vmul.f32 %v8702_v43, %v7746_v8  ;;  %v1651_v55 = vpop.f32.mrf.mxu0  ;;  %v2163_v56 = vpop.f32.mrf.mxu1 }
 0x18c   : > { %v3520_v12 = vrot.slane %v3519_v13, 2  ;;  %v4450_v60 = vmax.f32 %v4448_v6, %v4449_v47  ;;  %v3538_v16 = vsel %vm3341_vm2, %v3113_v36, -inf  ;;  %v3241_v23 = vmax.f32 %v2985_v14, 0.0 }
 0x18d   : > { %v4433_v27 = vmax.f32 %v4431_v59, %v4432_v1  ;;  %v4416_v30 = vrot.slane %v4415_v53, 2  ;;  %v3555_v31 = vrot.slane %v3554_v33, 2  ;;  %v3539_v17 = vrot.slane %v3538_v16, 4 }
 0x18e   : > { %v3521_v2 = vmax.f32 %v3519_v13, %v3520_v12  ;;  %v4451_v21 = vrot.slane %v4450_v60, 2  ;;  %v4434_v24 = vsel %vm3341_vm2, %v3241_v23, -inf  ;;  %v2860_v25 = vadd.f32 %v8710_v20, %v2597_v11  ;;  %v7749_v11 = vpop.f32.mrf.mxu0 }
 0x18f   : > { %v4417_v4 = vmax.f32 %v4415_v53, %v4416_v30  ;;  %v3556_v28 = vmax.f32 %v3554_v33, %v3555_v31  ;;  %v3540_v57 = vmax.f32 %v3538_v16, %v3539_v17  ;;  %v4435_v45 = vrot.slane %v4434_v24, 4  ;;  %v7877_v31 = vpop.f32.mrf.mxu1 }
 0x190   : > { %v3522_v37 = vrot.slane %v3521_v2, 1  ;;  %v4452_v40 = vmax.f32 %v4450_v60, %v4451_v21  ;;  %v3116_v22 = vmax.f32 %v2860_v25, 0.0  ;;  %v2725_v48 = vmul.f32 %v8702_v43, %v7874_v18 }
 0x191   : > { %v4418_v51 = vrot.slane %v4417_v4, 1  ;;  %v3557_v9 = vrot.slane %v3556_v28, 1  ;;  %v3541_v39 = vrot.slane %v3540_v57, 2  ;;  %v4436_v34 = vmax.f32 %v4434_v24, %v4435_v45 }
 0x192   : > { %v3523_v42 = vmax.f32 %v3521_v2, %v3522_v37  ;;  %v4453_v26 = vrot.slane %v4452_v40, 1  ;;  %v3559_v44 = vsel %vm3341_vm2, %v3116_v22, -inf  ;;  %v2988_v50 = vadd.f32 %v8710_v20, %v2725_v48  ;;  %v2176_v48 = vpop.f32.mrf.mxu1 }
 0x193   : > { %v4419_v54 = vmax.f32 %v4417_v4, %v4418_v51  ;;  %v3558_v59 = vmax.f32 %v3556_v28, %v3557_v9  ;;  %v3542_v38 = vmax.f32 %v3540_v57, %v3541_v39  ;;  %v4437_v7 = vrot.slane %v4436_v34, 2  ;;  %v1664_v4 = vpop.f32.mrf.mxu0 }
 0x194   : > { %v7480_v19 = vpack.c.bf16 %v4433_v27, %v4433_v27  ;;  %v7350_v35 = vpack.c.bf16 %v3523_v42, %v3523_v42  ;;  %v3560_v29 = vrot.slane %v3559_v44, 4  ;;  %v3244_v52 = vmax.f32 %v2988_v50, 0.0 }
 0x195   : > { %v7478_v58 = vpack.c.bf16 %v4419_v54, %v4419_v54  ;;  %v4454_v3 = vmax.f32 %v4452_v40, %v4453_v26  ;;  %v3543_v41 = vrot.slane %v3542_v38, 1  ;;  %v4438_v61 = vmax.f32 %v4436_v34, %v4437_v7 }
 0x196   : > { %v6310_v63 = vunpack.c.l.b16 %v7477_v62  ;;  %v6183_v0 = vunpack.c.l.b16 %v7350_v35  ;;  %v3561_v8 = vmax.f32 %v3559_v44, %v3560_v29  ;;  %v4455_v1 = vsel %vm3341_vm2, %v3244_v52, -inf }
 0x197   : > { %v6311_v5 = vunpack.c.l.b16 %v7478_v58  ;;  %v7355_v6 = vpack.c.bf16 %v3558_v59, %v3558_v59  ;;  %v3544_v13 = vmax.f32 %v3542_v38, %v3543_v41  ;;  %v4439_v47 = vrot.slane %v4438_v61, 1 }
 0x198   : > { %v6185_v36 = vunpack.c.l.b16 %v7352_v10  ;;  %v6442_v14 = vsel %vm6414_vm3, %v6183_v0, %v8842_v32  ;;  %v3562_v53 = vrot.slane %v3561_v8, 2  ;;  %v4456_v33 = vrot.slane %v4455_v1, 4 }
 0x199   : > { %v6313_v12 = vunpack.c.l.b16 %v7480_v19  ;;  %v6554_v15 = vsel %vm6414_vm3, %v6311_v5, %v6310_v63  ;;  %v7483_v62 = vpack.c.bf16 %v4454_v3, %v4454_v3  ;;  %v7353_v60 = vpack.c.bf16 %v3544_v13, %v3544_v13 }
 0x19a   : > { %v6443_v16 = vsel %vm6416_vm4, %v8831_v46, %v6442_v14  ;;  %v4440_v23 = vmax.f32 %v4438_v61, %v4439_v47  ;;  %v3563_v27 = vmax.f32 %v3561_v8, %v3562_v53  ;;  %v4457_v30 = vmax.f32 %v4455_v1, %v4456_v33  ;;  %v7878_v47 = vpop.f32.mrf.mxu1 }
 0x19b   : > { %v6555_v10 = vsel %vm6416_vm4, %v8833_v49, %v6554_v15  ;;  %v8872_v17 = vunpack.c.l.b16 %v7355_v6  ;;  %v6186_v32 = vunpack.c.l.b16 %v7353_v60  ;;  %v2595_v18 = vmul.f32 %v8702_v43, %v1651_v55  ;;  %v7750_v55 = vpop.f32.mrf.mxu0 }
 0x19c   : > { %v3564_v2 = vrot.slane %v3563_v27, 1  ;;  %v4458_v21 = vrot.slane %v4457_v30, 2  ;;  %v2723_v24 = vmul.f32 %v8702_v43, %v2163_v56  ;;  %v2600_v25 = vmul.f32 %v8702_v43, %v7749_v11 }
 0x19d   : > { %v8877_v46 = vunpack.c.l.b16 %v7483_v62  ;;  %v6444_v28 = vsel %vm6418_vm5, %v6185_v36, %v6443_v16  ;;  %v2858_v57 = vadd.f32 %v8710_v20, %v2595_v18  ;;  %v2728_v49 = vmul.f32 %v8702_v43, %v7877_v31 }
 0x19e   : > { %v7481_v45 = vpack.c.bf16 %v4440_v23, %v4440_v23  ;;  %v4459_v37 = vmax.f32 %v4457_v30, %v4458_v21  ;;  %v2986_v40 = vadd.f32 %v8710_v20, %v2723_v24  ;;  %v2863_v22 = vadd.f32 %v8710_v20, %v2600_v25 }
 0x19f   : > { %v8885_v51 = vsel %vm6418_vm5, %v6313_v12, %v6555_v10  ;;  %v3114_v9 = vmax.f32 %v2858_v57, 0.0  ;;  %v2991_v39 = vadd.f32 %v8710_v20, %v2728_v49  ;;  %v2598_v34 = vmul.f32 %v8702_v43, %v1664_v4 }
 0x1a0   : > { %v8890_v42 = vsel %vm6420_vm6, %v6186_v32, %v6444_v28  ;;  %v8892_v26 = vmax.f32 %v3563_v27, %v3564_v2  ;;  %v3242_v44 = vmax.f32 %v2986_v40, 0.0  ;;  %v3119_v50 = vmax.f32 %v2863_v22, 0.0 }
 0x1a1   : > { %v3545_v54 = vsel %vm3341_vm2, %v3114_v9, -inf  ;;  %v3247_v59 = vmax.f32 %v2991_v39, 0.0  ;;  %v2861_v38 = vadd.f32 %v8710_v20, %v2598_v34  ;;  %v2726_v7 = vmul.f32 %v8702_v43, %v2176_v48  ;;  %v1667_v39 = vpop.f32.mrf.mxu0 }
 0x1a2   : > { %v6314_v19 = vunpack.c.l.b16 %v7481_v45  ;;  %v4460_v35 = vrot.slane %v4459_v37, 1  ;;  %v3546_v29 = vrot.slane %v3545_v54, 4  ;;  %v4441_v52 = vsel %vm3341_vm2, %v3242_v44, -inf }
 0x1a3   : > { %v4442_v58 = vrot.slane %v4441_v52, 4  ;;  %v3580_v3 = vsel %vm3341_vm2, %v3119_v50, -inf  ;;  %v4476_v41 = vsel %vm3341_vm2, %v3247_v59, -inf  ;;  %v3117_v61 = vmax.f32 %v2861_v38, 0.0 }
 0x1a4   : > { %v7356_v63 = vpack.c.bf16 %v8892_v26, %v8892_v26  ;;  %v3547_v0 = vmax.f32 %v3545_v54, %v3546_v29  ;;  %v3581_v8 = vrot.slane %v3580_v3, 4  ;;  %v4477_v1 = vrot.slane %v4476_v41, 4 }
 0x1a5   : > { %v4443_v56 = vmax.f32 %v4441_v52, %v4442_v58  ;;  %v3566_v5 = vsel %vm3341_vm2, %v3117_v61, -inf  ;;  %v2989_v6 = vadd.f32 %v8710_v20, %v2726_v7  ;;  %v2601_v13 = vmul.f32 %v8702_v43, %v7750_v55 }
 0x1a6   : > { %v4461_v36 = vmax.f32 %v4459_v37, %v4460_v35  ;;  %v3548_v14 = vrot.slane %v3547_v0, 2  ;;  %v3582_v53 = vmax.f32 %v3580_v3, %v3581_v8  ;;  %v4478_v33 = vmax.f32 %v4476_v41, %v4477_v1  ;;  %v2179_v35 = vpop.f32.mrf.mxu1 }
 0x1a7   : > { %v4444_v11 = vrot.slane %v4443_v56, 2  ;;  %v3567_v12 = vrot.slane %v3566_v5, 4  ;;  %v3245_v15 = vmax.f32 %v2989_v6, 0.0  ;;  %v2864_v62 = vadd.f32 %v8710_v20, %v2601_v13 }
 0x1a8   : > { %v3549_v60 = vmax.f32 %v3547_v0, %v3548_v14  ;;  %v3583_v16 = vrot.slane %v3582_v53, 2  ;;  %v4479_v23 = vrot.slane %v4478_v33, 2  ;;  %v2729_v27 = vmul.f32 %v8702_v43, %v7878_v47  ;;  %v7753_v0 = vpop.f32.mrf.mxu0  ;;  %v7881_v47 = vpop.f32.mrf.mxu1 }
 0x1a9   : > { %v4445_v30 = vmax.f32 %v4443_v56, %v4444_v11  ;;  %v3568_v31 = vmax.f32 %v3566_v5, %v3567_v12  ;;  %v4462_v10 = vsel %vm3341_vm2, %v3245_v15, -inf  ;;  %v3120_v32 = vmax.f32 %v2864_v62, 0.0 }
 0x1aa   : > { %v3550_v18 = vrot.slane %v3549_v60, 1  ;;  %v3584_v2 = vmax.f32 %v3582_v53, %v3583_v16  ;;  %v4480_v21 = vmax.f32 %v4478_v33, %v4479_v23  ;;  %v4463_v24 = vrot.slane %v4462_v10, 4  ;;  %v1680_v12 = vpop.f32.mrf.mxu0  ;;  %v8931_v16 = vld [vmem:[%s10135_s2] ss:$0 sm:$0xff] }
 0x1ab   : > { %v4446_v25 = vrot.slane %v4445_v30, 1  ;;  %v3569_v4 = vrot.slane %v3568_v31, 2  ;;  %v3587_v28 = vsel %vm3341_vm2, %v3120_v32, -inf  ;;  %v2992_v57 = vadd.f32 %v8710_v20, %v2729_v27 }
 0x1ac   : > { %v3551_v49 = vmax.f32 %v3549_v60, %v3550_v18  ;;  %v3585_v45 = vrot.slane %v3584_v2, 1  ;;  %v4481_v37 = vrot.slane %v4480_v21, 1  ;;  %v4464_v40 = vmax.f32 %v4462_v10, %v4463_v24  ;;  %v2192_v10 = vpop.f32.mrf.mxu1 }
 0x1ad   : > { %v4447_v43 = vmax.f32 %v4445_v30, %v4446_v25  ;;  %v3570_v22 = vmax.f32 %v3568_v31, %v3569_v4  ;;  %v3588_v48 = vrot.slane %v3587_v28, 4  ;;  %v3248_v9 = vmax.f32 %v2992_v57, 0.0 }
 0x1ae   : > { %v7484_v34 = vpack.c.bf16 %v4461_v36, %v4461_v36  ;;  %v7354_v26 = vpack.c.bf16 %v3551_v49, %v3551_v49  ;;  %v3586_v44 = vmax.f32 %v3584_v2, %v3585_v45  ;;  %v4465_v50 = vrot.slane %v4464_v40, 2  ;;  %v8948_v2 = vld [vmem:[%s10136_s3] ss:$0 sm:$0xff] }
 0x1af   : > { %v7482_v54 = vpack.c.bf16 %v4447_v43, %v4447_v43  ;;  %v3571_v59 = vrot.slane %v3570_v22, 1  ;;  %v3589_v38 = vmax.f32 %v3587_v28, %v3588_v48  ;;  %v4483_v7 = vsel %vm3341_vm2, %v3248_v9, -inf }
 0x1b0   : > { %v6557_v20 = vsel %vm6420_vm6, %v6314_v19, %v8885_v51  ;;  %v6187_v29 = vunpack.c.l.b16 %v7354_v26  ;;  %v8913_v52 = vmax.f32 %v4480_v21, %v4481_v37  ;;  %v4466_v55 = vmax.f32 %v4464_v40, %v4465_v50  ;;  %v7754_v50 = vpop.f32.mrf.mxu0 }
 0x1b1   : > { %v6315_v58 = vunpack.c.l.b16 %v7482_v54  ;;  %v3572_v3 = vmax.f32 %v3570_v22, %v3571_v59  ;;  %v3590_v41 = vrot.slane %v3589_v38, 2  ;;  %v4484_v61 = vrot.slane %v4483_v7, 4 }
 0x1b2   : > { %v6189_v8 = vunpack.c.l.b16 %v7356_v63  ;;  %v6317_v1 = vunpack.c.l.b16 %v7484_v34  ;;  %v6446_v56 = vsel %vm6422_vm7, %v6187_v29, %v8890_v42  ;;  %v7359_v5 = vpack.c.bf16 %v3586_v44, %v3586_v44 }
 0x1b3   : > { %v6447_v6 = vsel %vm6424_vm8, %v8872_v17, %v6446_v56  ;;  %v6558_v51 = vsel %vm6422_vm7, %v6315_v58, %v6557_v20  ;;  %v4467_v19 = vrot.slane %v4466_v55, 1  ;;  %v3591_v13 = vmax.f32 %v3589_v38, %v3590_v41 }
 0x1b4   : > { %v6448_v36 = vsel %vm6426_vm9, %v6189_v8, %v6447_v6  ;;  %v6559_v14 = vsel %vm6424_vm8, %v8877_v46, %v6558_v51  ;;  %v7357_v63 = vpack.c.bf16 %v3572_v3, %v3572_v3  ;;  %v4485_v53 = vmax.f32 %v4483_v7, %v4484_v61 }
 0x1b5   : > { %v6648_v33 = vpack.c.b16 %v6448_v36, %v6448_v36  ;;  %v6560_v42 = vsel %vm6426_vm9, %v6317_v1, %v6559_v14  ;;  %v7487_v17 = vpack.c.bf16 %v8913_v52, %v8913_v52  ;;  %v3592_v11 = vrot.slane %v3591_v13, 1 }
 0x1b6   : > { %v6664_v15 = vpack.c.b16 %v6560_v42, %v6560_v42  ;;  %v8926_v62 = vunpack.c.l.b16 %v7359_v5  ;;  %v4486_v60 = vrot.slane %v4485_v53, 2  ;;  %v2599_v46 = vmul.f32 %v8931_v16, %v1667_v39  ;;  %v7882_v5 = vpop.f32.mrf.mxu1 }
 0x1b7   : > { %6713 = vst.msk [vmem:[%s8607_s8 + $0xc] sm:$0xf] %vm6709_vm10, %v6648_v33  ;;  %v8936_v23 = vmax.f32 %v4466_v55, %v4467_v19  ;;  %v2727_v27 = vmul.f32 %v8931_v16, %v2179_v35  ;;  %v2604_v30 = vmul.f32 %v8931_v16, %v7753_v0  ;;  %v2732_v31 = vmul.f32 %v8931_v16, %v7881_v47 }
 0x1b8   : > { %6729 = vst.msk [vmem:[%s8607_s8 + $0x4c] sm:$0xf] %vm6709_vm10, %v6664_v15  ;;  %v8943_v32 = vunpack.c.l.b16 %v7357_v63  ;;  %v4487_v18 = vmax.f32 %v4485_v53, %v4486_v60  ;;  %v2862_v21 = vadd.f32 %v8948_v2, %v2599_v46  ;;  %v2602_v24 = vmul.f32 %v8931_v16, %v1680_v12 }
 0x1b9   : > { %v8952_v25 = vmax.f32 %v3591_v13, %v3592_v11  ;;  %v2990_v4 = vadd.f32 %v8948_v2, %v2727_v27  ;;  %v2867_v28 = vadd.f32 %v8948_v2, %v2604_v30  ;;  %v2995_v57 = vadd.f32 %v8948_v2, %v2732_v31 }
 0x1ba   : > { %v4488_v49 = vrot.slane %v4487_v18, 1  ;;  %v3118_v45 = vmax.f32 %v2862_v21, 0.0  ;;  %v2865_v37 = vadd.f32 %v8948_v2, %v2602_v24  ;;  %v2730_v40 = vmul.f32 %v8931_v16, %v2192_v10 }
 0x1bb   : > { %v7485_v43 = vpack.c.bf16 %v8936_v23, %v8936_v23  ;;  %v3246_v22 = vmax.f32 %v2990_v4, 0.0  ;;  %v3123_v48 = vmax.f32 %v2867_v28, 0.0  ;;  %v3251_v9 = vmax.f32 %v2995_v57, 0.0 }
 0x1bc   : > { %v8961_v39 = vmax.f32 %v4487_v18, %v4488_v49  ;;  %v3573_v34 = vsel %vm3341_vm2, %v3118_v45, -inf  ;;  %v3121_v26 = vmax.f32 %v2865_v37, 0.0  ;;  %v2993_v44 = vadd.f32 %v8948_v2, %v2730_v40 }
 0x1bd   : > { %v3574_v54 = vrot.slane %v3573_v34, 4  ;;  %v4469_v59 = vsel %vm3341_vm2, %v3246_v22, -inf  ;;  %v3608_v38 = vsel %vm3341_vm2, %v3123_v48, -inf  ;;  %v4504_v7 = vsel %vm3341_vm2, %v3251_v9, -inf  ;;  %v1683_v9 = vpop.f32.mrf.mxu0 }
 0x1be   : > { %v7360_v35 = vpack.c.bf16 %v8952_v25, %v8952_v25  ;;  %v4470_v20 = vrot.slane %v4469_v59, 4  ;;  %v3609_v29 = vrot.slane %v3608_v38, 4  ;;  %v4505_v55 = vrot.slane %v4504_v7, 4 }
 0x1bf   : > { %v3575_v58 = vmax.f32 %v3573_v34, %v3574_v54  ;;  %v3594_v3 = vsel %vm3341_vm2, %v3121_v26, -inf  ;;  %v3249_v41 = vmax.f32 %v2993_v44, 0.0  ;;  %v2605_v61 = vmul.f32 %v8931_v16, %v7754_v50  ;;  %v2195_v54 = vpop.f32.mrf.mxu1 }
 0x1c0   : > { %v7488_v0 = vpack.c.bf16 %v8961_v39, %v8961_v39  ;;  %v4471_v8 = vmax.f32 %v4469_v59, %v4470_v20  ;;  %v3610_v1 = vmax.f32 %v3608_v38, %v3609_v29  ;;  %v4506_v56 = vmax.f32 %v4504_v7, %v4505_v55 }
 0x1c1   : > { %v3576_v6 = vrot.slane %v3575_v58, 2  ;;  %v3595_v51 = vrot.slane %v3594_v3, 4  ;;  %v4490_v19 = vsel %vm3341_vm2, %v3249_v41, -inf  ;;  %v2868_v13 = vadd.f32 %v8948_v2, %v2605_v61 }
 0x1c2   : > { %v4472_v47 = vrot.slane %v4471_v8, 2  ;;  %v3611_v36 = vrot.slane %v3610_v1, 2  ;;  %v4507_v14 = vrot.slane %v4506_v56, 2  ;;  %v4491_v63 = vrot.slane %v4490_v19, 4 }
 0x1c3   : > { %v3577_v53 = vmax.f32 %v3575_v58, %v3576_v6  ;;  %v3596_v33 = vmax.f32 %v3594_v3, %v3595_v51  ;;  %v3124_v42 = vmax.f32 %v2868_v13, 0.0  ;;  %v2733_v11 = vmul.f32 %v8931_v16, %v7882_v5  ;;  %v7885_v13 = vpop.f32.mrf.mxu1 }
 0x1c4   : > { %v4473_v12 = vmax.f32 %v4471_v8, %v4472_v47  ;;  %v3612_v15 = vmax.f32 %v3610_v1, %v3611_v36  ;;  %v4508_v60 = vmax.f32 %v4506_v56, %v4507_v14  ;;  %v4492_v46 = vmax.f32 %v4490_v19, %v4491_v63  ;;  %v7757_v56 = vpop.f32.mrf.mxu0 }
 0x1c5   : > { %v3578_v27 = vrot.slane %v3577_v53, 1  ;;  %v3597_v30 = vrot.slane %v3596_v33, 2  ;;  %v3615_v31 = vsel %vm3341_vm2, %v3124_v42, -inf  ;;  %v2996_v10 = vadd.f32 %v8948_v2, %v2733_v11  ;;  %v2208_v39 = vpop.f32.mrf.mxu1 }
 0x1c6   : > { %v4474_v18 = vrot.slane %v4473_v12, 1  ;;  %v3613_v21 = vrot.slane %v3612_v15, 1  ;;  %v4509_v24 = vrot.slane %v4508_v60, 1  ;;  %v4493_v4 = vrot.slane %v4492_v46, 2  ;;  %v1696_v42 = vpop.f32.mrf.mxu0 }
 0x1c7   : > { %v3579_v28 = vmax.f32 %v3577_v53, %v3578_v27  ;;  %v3598_v57 = vmax.f32 %v3596_v33, %v3597_v30  ;;  %v3616_v49 = vrot.slane %v3615_v31, 4  ;;  %v3252_v45 = vmax.f32 %v2996_v10, 0.0 }
 0x1c8   : > { %v4475_v37 = vmax.f32 %v4473_v12, %v4474_v18  ;;  %v3614_v40 = vmax.f32 %v3612_v15, %v3613_v21  ;;  %v4510_v22 = vmax.f32 %v4508_v60, %v4509_v24  ;;  %v4494_v48 = vmax.f32 %v4492_v46, %v4493_v4 }
 0x1c9   : > { %v7358_v34 = vpack.c.bf16 %v3579_v28, %v3579_v28  ;;  %v3599_v26 = vrot.slane %v3598_v57, 1  ;;  %v3617_v44 = vmax.f32 %v3615_v31, %v3616_v49  ;;  %v4511_v50 = vsel %vm3341_vm2, %v3252_v45, -inf  ;;  %v7758_v28 = vpop.f32.mrf.mxu0 }
 0x1ca   : > { %v7486_v59 = vpack.c.bf16 %v4475_v37, %v4475_v37  ;;  %v7363_v38 = vpack.c.bf16 %v3614_v40, %v3614_v40  ;;  %v7491_v7 = vpack.c.bf16 %v4510_v22, %v4510_v22  ;;  %v4495_v20 = vrot.slane %v4494_v48, 1 }
 0x1cb   : > { %v6191_v29 = vunpack.c.l.b16 %v7358_v34  ;;  %v3600_v55 = vmax.f32 %v3598_v57, %v3599_v26  ;;  %v3618_v58 = vrot.slane %v3617_v44, 2  ;;  %v4512_v3 = vrot.slane %v4511_v50, 4 }
 0x1cc   : > { %v6320_v41 = vunpack.c.l.b16 %v7487_v17  ;;  %v6318_v61 = vunpack.c.l.b16 %v7485_v43  ;;  %v6319_v8 = vunpack.c.l.b16 %v7486_v59  ;;  %v4496_v1 = vmax.f32 %v4494_v48, %v4495_v20 }
 0x1cd   : > { %v6449_v5 = vsel %vm6414_vm3, %v6191_v29, %v8943_v32  ;;  %v7361_v6 = vpack.c.bf16 %v3600_v55, %v3600_v55  ;;  %v3619_v51 = vmax.f32 %v3617_v44, %v3618_v58  ;;  %v4513_v19 = vmax.f32 %v4511_v50, %v4512_v3 }
 0x1ce   : > { %v6450_v47 = vsel %vm6416_vm4, %v8926_v62, %v6449_v5  ;;  %v6561_v52 = vsel %vm6414_vm3, %v6319_v8, %v6318_v61  ;;  %v7489_v17 = vpack.c.bf16 %v4496_v1, %v4496_v1  ;;  %v2603_v36 = vmul.f32 %v8931_v16, %v1683_v9  ;;  %v7886_v1 = vpop.f32.mrf.mxu1 }
 0x1cf   : > { %v6193_v23 = vunpack.c.l.b16 %v7360_v35  ;;  %v6321_v32 = vunpack.c.l.b16 %v7488_v0  ;;  %v8998_v43 = vunpack.c.l.b16 %v7363_v38  ;;  %v9000_v14 = vunpack.c.l.b16 %v7491_v7 }
 0x1d0   : > { %v6562_v63 = vsel %vm6416_vm4, %v6320_v41, %v6561_v52  ;;  %v6194_v62 = vunpack.c.l.b16 %v7361_v6  ;;  %v4514_v53 = vrot.slane %v4513_v19, 2  ;;  %v2866_v33 = vadd.f32 %v8948_v2, %v2603_v36 }
 0x1d1   : > { %v6451_v11 = vsel %vm6418_vm5, %v6193_v23, %v6450_v47  ;;  %v3620_v12 = vrot.slane %v3619_v51, 1  ;;  %v2731_v25 = vmul.f32 %v8931_v16, %v2195_v54  ;;  %v2608_v35 = vmul.f32 %v8931_v16, %v7757_v56 }
 0x1d2   : > { %v6322_v0 = vunpack.c.l.b16 %v7489_v17  ;;  %v4515_v15 = vmax.f32 %v4513_v19, %v4514_v53  ;;  %v3122_v60 = vmax.f32 %v2866_v33, 0.0  ;;  %v2736_v46 = vmul.f32 %v8931_v16, %v7885_v13 }
 0x1d3   : > { %v6563_v27 = vsel %vm6418_vm5, %v6321_v32, %v6562_v63  ;;  %v2994_v30 = vadd.f32 %v8948_v2, %v2731_v25  ;;  %v2871_v31 = vadd.f32 %v8948_v2, %v2608_v35  ;;  %v2606_v10 = vmul.f32 %v8931_v16, %v1696_v42 }
 0x1d4   : > { %v9013_v18 = vsel %vm6420_vm6, %v6194_v62, %v6451_v11  ;;  %v3601_v21 = vsel %vm3341_vm2, %v3122_v60, -inf  ;;  %v2999_v24 = vadd.f32 %v8948_v2, %v2736_v46  ;;  %v2734_v4 = vmul.f32 %v8931_v16, %v2208_v39 }
 0x1d5   : > { %v9018_v57 = vmax.f32 %v3619_v51, %v3620_v12  ;;  %v3602_v49 = vrot.slane %v3601_v21, 4  ;;  %v3250_v45 = vmax.f32 %v2994_v30, 0.0  ;;  %v3127_v37 = vmax.f32 %v2871_v31, 0.0 }
 0x1d6   : > { %v4516_v40 = vrot.slane %v4515_v15, 1  ;;  %v3255_v22 = vmax.f32 %v2999_v24, 0.0  ;;  %v2869_v48 = vadd.f32 %v8948_v2, %v2606_v10  ;;  %v2997_v9 = vadd.f32 %v8948_v2, %v2734_v4  ;;  %v1699_v4 = vpop.f32.mrf.mxu0 }
 0x1d7   : > { %v3603_v34 = vmax.f32 %v3601_v21, %v3602_v49  ;;  %v4497_v26 = vsel %vm3341_vm2, %v3250_v45, -inf  ;;  %v3636_v44 = vsel %vm3341_vm2, %v3127_v37, -inf  ;;  %v2609_v50 = vmul.f32 %v8931_v16, %v7758_v28  ;;  %v2211_v28 = vpop.f32.mrf.mxu1 }
 0x1d8   : > { %v9026_v54 = vsel %vm6420_vm6, %v6322_v0, %v6563_v27  ;;  %v4498_v59 = vrot.slane %v4497_v26, 4  ;;  %v3637_v38 = vrot.slane %v3636_v44, 4  ;;  %v4532_v7 = vsel %vm3341_vm2, %v3255_v22, -inf }
 0x1d9   : > { %v3604_v20 = vrot.slane %v3603_v34, 2  ;;  %v4533_v29 = vrot.slane %v4532_v7, 4  ;;  %v3125_v55 = vmax.f32 %v2869_v48, 0.0  ;;  %v3253_v58 = vmax.f32 %v2997_v9, 0.0 }
 0x1da   : > { %v4517_v3 = vmax.f32 %v4515_v15, %v4516_v40  ;;  %v4499_v41 = vmax.f32 %v4497_v26, %v4498_v59  ;;  %v3638_v61 = vmax.f32 %v3636_v44, %v3637_v38  ;;  %v2872_v8 = vadd.f32 %v8948_v2, %v2609_v50 }
 0x1db   : > { %v3605_v56 = vmax.f32 %v3603_v34, %v3604_v20  ;;  %v4534_v5 = vmax.f32 %v4532_v7, %v4533_v29  ;;  %v3622_v6 = vsel %vm3341_vm2, %v3125_v55, -inf  ;;  %v4518_v51 = vsel %vm3341_vm2, %v3253_v58, -inf  ;;  %v7761_v29 = vpop.f32.mrf.mxu0  ;;  %v7889_v55 = vpop.f32.mrf.mxu1 }
 0x1dc   : > { %v4500_v19 = vrot.slane %v4499_v41, 2  ;;  %v3639_v13 = vrot.slane %v3638_v61, 2  ;;  %v3623_v47 = vrot.slane %v3622_v6, 4  ;;  %v4519_v52 = vrot.slane %v4518_v51, 4 }
 0x1dd   : > { %v3606_v17 = vrot.slane %v3605_v56, 1  ;;  %v4535_v36 = vrot.slane %v4534_v5, 2  ;;  %v3128_v23 = vmax.f32 %v2872_v8, 0.0  ;;  %v2737_v32 = vmul.f32 %v8931_v16, %v7886_v1 }
 0x1de   : > { %v4501_v63 = vmax.f32 %v4499_v41, %v4500_v19  ;;  %v3640_v62 = vmax.f32 %v3638_v61, %v3639_v13  ;;  %v3624_v53 = vmax.f32 %v3622_v6, %v3623_v47  ;;  %v4520_v33 = vmax.f32 %v4518_v51, %v4519_v52  ;;  %v1712_v52 = vpop.f32.mrf.mxu0 }
 0x1df   : > { %v3607_v42 = vmax.f32 %v3605_v56, %v3606_v17  ;;  %v4536_v11 = vmax.f32 %v4534_v5, %v4535_v36  ;;  %v3643_v12 = vsel %vm3341_vm2, %v3128_v23, -inf  ;;  %v3000_v25 = vadd.f32 %v8948_v2, %v2737_v32  ;;  %v2224_v17 = vpop.f32.mrf.mxu1 }
 0x1e0   : > { %v7364_v35 = vpack.c.bf16 %v9018_v57, %v9018_v57  ;;  %v4502_v39 = vrot.slane %v4501_v63, 1  ;;  %v3625_v0 = vrot.slane %v3624_v53, 2  ;;  %v4521_v15 = vrot.slane %v4520_v33, 2 }
 0x1e1   : > { %v7362_v60 = vpack.c.bf16 %v3607_v42, %v3607_v42  ;;  %v3641_v46 = vrot.slane %v3640_v62, 1  ;;  %v3644_v27 = vrot.slane %v3643_v12, 4  ;;  %v3256_v30 = vmax.f32 %v3000_v25, 0.0 }
 0x1e2   : > { %v4503_v31 = vmax.f32 %v4501_v63, %v4502_v39  ;;  %v4537_v10 = vrot.slane %v4536_v11, 1  ;;  %v3626_v21 = vmax.f32 %v3624_v53, %v3625_v0  ;;  %v4522_v24 = vmax.f32 %v4520_v33, %v4521_v15 }
 0x1e3   : > { %v7492_v49 = vpack.c.bf16 %v4517_v3, %v4517_v3  ;;  %v6195_v45 = vunpack.c.l.b16 %v7362_v60  ;;  %v3645_v37 = vmax.f32 %v3643_v12, %v3644_v27  ;;  %v4539_v40 = vsel %vm3341_vm2, %v3256_v30, -inf }
 0x1e4   : > { %v6197_v22 = vunpack.c.l.b16 %v7364_v35  ;;  %v7490_v57 = vpack.c.bf16 %v4503_v31, %v4503_v31  ;;  %v3627_v48 = vrot.slane %v3626_v21, 1  ;;  %v4523_v9 = vrot.slane %v4522_v24, 1  ;;  %v7762_v31 = vpop.f32.mrf.mxu0 }
 0x1e5   : > { %v6453_v34 = vsel %vm6422_vm7, %v6195_v45, %v9013_v18  ;;  %v9040_v26 = vmax.f32 %v3640_v62, %v3641_v46  ;;  %v3646_v44 = vrot.slane %v3645_v37, 2  ;;  %v4540_v50 = vrot.slane %v4539_v40, 4 }
 0x1e6   : > { %v6454_v59 = vsel %vm6424_vm8, %v8998_v43, %v6453_v34  ;;  %v6323_v38 = vunpack.c.l.b16 %v7490_v57  ;;  %v9044_v7 = vmax.f32 %v4536_v11, %v4537_v10  ;;  %v3628_v20 = vmax.f32 %v3626_v21, %v3627_v48 }
 0x1e7   : > { %v6325_v58 = vunpack.c.l.b16 %v7492_v49  ;;  %v6455_v3 = vsel %vm6426_vm9, %v6197_v22, %v6454_v59  ;;  %v4524_v41 = vmax.f32 %v4522_v24, %v4523_v9  ;;  %v3647_v61 = vmax.f32 %v3645_v37, %v3646_v44 }
 0x1e8   : > { %v6649_v18 = vpack.c.b16 %v6455_v3, %v6455_v3  ;;  %v6565_v8 = vsel %vm6422_vm7, %v6323_v38, %v9026_v54  ;;  %v7365_v1 = vpack.c.bf16 %v3628_v20, %v3628_v20  ;;  %v4541_v56 = vmax.f32 %v4539_v40, %v4540_v50 }
 0x1e9   : > { %v6566_v43 = vsel %vm6424_vm8, %v9000_v14, %v6565_v8  ;;  %v7367_v5 = vpack.c.bf16 %v9040_v26, %v9040_v26  ;;  %v3648_v6 = vrot.slane %v3647_v61, 1  ;;  %v2607_v51 = vmul.f32 %v8931_v16, %v1699_v4 }
 0x1ea   : > { %6714 = vst.msk [vmem:[%s8607_s8 + $0x10] sm:$0xf] %vm6709_vm10, %v6649_v18  ;;  %v6567_v19 = vsel %vm6426_vm9, %v6325_v58, %v6566_v43  ;;  %v7495_v13 = vpack.c.bf16 %v9044_v7, %v9044_v7  ;;  %v4542_v54 = vrot.slane %v4541_v56, 2  ;;  %v2735_v47 = vmul.f32 %v8931_v16, %v2211_v28 }
 0x1eb   : > { %v6665_v14 = vpack.c.b16 %v6567_v19, %v6567_v19  ;;  %v9060_v36 = vunpack.c.l.b16 %v7365_v1  ;;  %v7493_v23 = vpack.c.bf16 %v4524_v41, %v4524_v41  ;;  %v2870_v32 = vadd.f32 %v8948_v2, %v2607_v51 }
 0x1ec   : > { %v4543_v63 = vmax.f32 %v4541_v56, %v4542_v54  ;;  %v2998_v62 = vadd.f32 %v8948_v2, %v2735_v47  ;;  %v2612_v53 = vmul.f32 %v8931_v16, %v7761_v29  ;;  %v2740_v33 = vmul.f32 %v8931_v16, %v7889_v55  ;;  %v7890_v55 = vpop.f32.mrf.mxu1 }
 0x1ed   : > { %6730 = vst.msk [vmem:[%s8607_s8 + $0x50] sm:$0xf] %vm6709_vm10, %v6665_v14  ;;  %v9068_v42 = vmax.f32 %v3647_v61, %v3648_v6  ;;  %v3126_v11 = vmax.f32 %v2870_v32, 0.0  ;;  %v2610_v12 = vmul.f32 %v8931_v16, %v1712_v52  ;;  %v2738_v25 = vmul.f32 %v8931_v16, %v2224_v17 }
 0x1ee   : > { %v4544_v35 = vrot.slane %v4543_v63, 1  ;;  %v3254_v39 = vmax.f32 %v2998_v62, 0.0  ;;  %v2875_v0 = vadd.f32 %v8948_v2, %v2612_v53  ;;  %v3003_v15 = vadd.f32 %v8948_v2, %v2740_v33 }
 0x1ef   : > { %v9074_v60 = vunpack.c.l.b16 %v7493_v23  ;;  %v3629_v46 = vsel %vm3341_vm2, %v3126_v11, -inf  ;;  %v2873_v27 = vadd.f32 %v8948_v2, %v2610_v12  ;;  %v3001_v30 = vadd.f32 %v8948_v2, %v2738_v25 }
 0x1f0   : > { %v9079_v10 = vmax.f32 %v4543_v63, %v4544_v35  ;;  %v3630_v21 = vrot.slane %v3629_v46, 4  ;;  %v4525_v24 = vsel %vm3341_vm2, %v3254_v39, -inf  ;;  %v3131_v4 = vmax.f32 %v2875_v0, 0.0  ;;  %v1715_v0 = vpop.f32.mrf.mxu0 }
 0x1f1   : > { %v4526_v28 = vrot.slane %v4525_v24, 4  ;;  %v3259_v49 = vmax.f32 %v3003_v15, 0.0  ;;  %v3129_v45 = vmax.f32 %v2873_v27, 0.0  ;;  %v3257_v37 = vmax.f32 %v3001_v30, 0.0 }
 0x1f2   : > { %v7368_v40 = vpack.c.bf16 %v9068_v42, %v9068_v42  ;;  %v3631_v22 = vmax.f32 %v3629_v46, %v3630_v21  ;;  %v3664_v57 = vsel %vm3341_vm2, %v3131_v4, -inf  ;;  %v2613_v48 = vmul.f32 %v8931_v16, %v7762_v31 }
 0x1f3   : > { %v4527_v9 = vmax.f32 %v4525_v24, %v4526_v28  ;;  %v3665_v34 = vrot.slane %v3664_v57, 4  ;;  %v4560_v44 = vsel %vm3341_vm2, %v3259_v49, -inf  ;;  %v3650_v50 = vsel %vm3341_vm2, %v3129_v45, -inf }
 0x1f4   : > { %v7496_v59 = vpack.c.bf16 %v9079_v10, %v9079_v10  ;;  %v3632_v38 = vrot.slane %v3631_v22, 2  ;;  %v4561_v20 = vrot.slane %v4560_v44, 4  ;;  %v3651_v29 = vrot.slane %v3650_v50, 4 }
 0x1f5   : > { %v4528_v58 = vrot.slane %v4527_v9, 2  ;;  %v3666_v3 = vmax.f32 %v3664_v57, %v3665_v34  ;;  %v4546_v41 = vsel %vm3341_vm2, %v3257_v37, -inf  ;;  %v2876_v61 = vadd.f32 %v8948_v2, %v2613_v48  ;;  %v2227_v37 = vpop.f32.mrf.mxu1  ;;  %v7765_v34 = vpop.f32.mrf.mxu0 }
 0x1f6   : > { %v3633_v18 = vmax.f32 %v3631_v22, %v3632_v38  ;;  %v4562_v8 = vmax.f32 %v4560_v44, %v4561_v20  ;;  %v3652_v1 = vmax.f32 %v3650_v50, %v3651_v29  ;;  %v4547_v56 = vrot.slane %v4546_v41, 4 }
 0x1f7   : > { %v4529_v43 = vmax.f32 %v4527_v9, %v4528_v58  ;;  %v3667_v6 = vrot.slane %v3666_v3, 2  ;;  %v3132_v51 = vmax.f32 %v2876_v61, 0.0  ;;  %v2741_v19 = vmul.f32 %v8931_v16, %v7890_v55 }
 0x1f8   : > { %v3634_v54 = vrot.slane %v3633_v18, 1  ;;  %v4563_v47 = vrot.slane %v4562_v8, 2  ;;  %v3653_v52 = vrot.slane %v3652_v1, 2  ;;  %v4548_v17 = vmax.f32 %v4546_v41, %v4547_v56 }
 0x1f9   : > { %v4530_v14 = vrot.slane %v4529_v43, 1  ;;  %v3668_v23 = vmax.f32 %v3666_v3, %v3667_v6  ;;  %v3671_v32 = vsel %vm3341_vm2, %v3132_v51, -inf  ;;  %v3004_v63 = vadd.f32 %v8948_v2, %v2741_v19 }
 0x1fa   : > { %v3635_v62 = vmax.f32 %v3633_v18, %v3634_v54  ;;  %v4564_v53 = vmax.f32 %v4562_v8, %v4563_v47  ;;  %v3654_v33 = vmax.f32 %v3652_v1, %v3653_v52  ;;  %v4549_v11 = vrot.slane %v4548_v17, 2  ;;  %v1728_v18 = vpop.f32.mrf.mxu0 }
 0x1fb   : > { %v4531_v12 = vmax.f32 %v4529_v43, %v4530_v14  ;;  %v3669_v25 = vrot.slane %v3668_v23, 1  ;;  %v3672_v35 = vrot.slane %v3671_v32, 4  ;;  %v3260_v39 = vmax.f32 %v3004_v63, 0.0 }
 0x1fc   : > { %v7366_v15 = vpack.c.bf16 %v3635_v62, %v3635_v62  ;;  %v4565_v46 = vrot.slane %v4564_v53, 1  ;;  %v3655_v27 = vrot.slane %v3654_v33, 1  ;;  %v4550_v30 = vmax.f32 %v4548_v17, %v4549_v11 }
 0x1fd   : > { %v7494_v31 = vpack.c.bf16 %v4531_v12, %v4531_v12  ;;  %v3670_v10 = vmax.f32 %v3668_v23, %v3669_v25  ;;  %v3673_v21 = vmax.f32 %v3671_v32, %v3672_v35  ;;  %v4567_v24 = vsel %vm3341_vm2, %v3260_v39, -inf  ;;  %v7766_v35 = vpop.f32.mrf.mxu0 }
 0x1fe   : > { %v6199_v4 = vunpack.c.l.b16 %v7366_v15  ;;  %v9096_v28 = vmax.f32 %v4564_v53, %v4565_v46  ;;  %v3656_v49 = vmax.f32 %v3654_v33, %v3655_v27  ;;  %v4551_v45 = vrot.slane %v4550_v30, 1 }
 0x1ff   : > { %v6327_v22 = vunpack.c.l.b16 %v7494_v31  ;;  %v7371_v57 = vpack.c.bf16 %v3670_v10, %v3670_v10  ;;  %v3674_v48 = vrot.slane %v3673_v21, 2  ;;  %v4568_v9 = vrot.slane %v4567_v24, 4 }
 0x200   : > { %v6200_v44 = vunpack.c.l.b16 %v7367_v5  ;;  %v6456_v50 = vsel %vm6414_vm3, %v6199_v4, %v9060_v36  ;;  %v7369_v38 = vpack.c.bf16 %v3656_v49, %v3656_v49  ;;  %v6328_v20 = vunpack.c.l.b16 %v7495_v13  ;;  %v7893_v5 = vpop.f32.mrf.mxu1 }
 0x201   : > { %v6568_v29 = vsel %vm6414_vm3, %v6327_v22, %v9074_v60  ;;  %v4552_v55 = vmax.f32 %v4550_v30, %v4551_v45  ;;  %v3675_v58 = vmax.f32 %v3673_v21, %v3674_v48  ;;  %v6201_v3 = vunpack.c.l.b16 %v7368_v40 }
 0x202   : > { %v6329_v41 = vunpack.c.l.b16 %v7496_v59  ;;  %v7499_v26 = vpack.c.bf16 %v9096_v28, %v9096_v28  ;;  %v6457_v36 = vsel %vm6416_vm4, %v6200_v44, %v6456_v50  ;;  %v6569_v61 = vsel %vm6416_vm4, %v6328_v20, %v6568_v29  ;;  %v2240_v47 = vpop.f32.mrf.mxu1 }
 0x203   : > { %v9115_v7 = vunpack.c.l.b16 %v7371_v57  ;;  %v4569_v13 = vmax.f32 %v4567_v24, %v4568_v9  ;;  %v9117_v60 = vunpack.c.l.b16 %v7369_v38  ;;  %v2611_v8 = vmul.f32 %v8931_v16, %v1715_v0 }
 0x204   : > { %v2739_v42 = vmul.f32 %v8931_v16, %v2227_v37  ;;  %v2616_v40 = vmul.f32 %v8931_v16, %v7765_v34  ;;  %v7497_v59 = vpack.c.bf16 %v4552_v55, %v4552_v55  ;;  %v3676_v1 = vrot.slane %v3675_v58, 1  ;;  %v7894_v55 = vpop.f32.mrf.mxu1 }
 0x205   : > { %v4570_v56 = vrot.slane %v4569_v13, 2  ;;  %v2744_v43 = vmul.f32 %v8931_v16, %v7893_v5  ;;  %v2874_v6 = vadd.f32 %v8948_v2, %v2611_v8  ;;  %v2614_v54 = vmul.f32 %v8931_v16, %v1728_v18 }
 0x206   : > { %v3002_v51 = vadd.f32 %v8948_v2, %v2739_v42  ;;  %v2879_v19 = vadd.f32 %v8948_v2, %v2616_v40  ;;  %v9128_v52 = vsel %vm6418_vm5, %v6201_v3, %v6457_v36  ;;  %v9131_v17 = vsel %vm6418_vm5, %v6329_v41, %v6569_v61 }
 0x207   : > { %v4571_v14 = vmax.f32 %v4569_v13, %v4570_v56  ;;  %v3007_v23 = vadd.f32 %v8948_v2, %v2744_v43  ;;  %v3130_v32 = vmax.f32 %v2874_v6, 0.0  ;;  %v2877_v53 = vadd.f32 %v8948_v2, %v2614_v54 }
 0x208   : > { %v3258_v63 = vmax.f32 %v3002_v51, 0.0  ;;  %v3135_v62 = vmax.f32 %v2879_v19, 0.0  ;;  %v9135_v33 = vunpack.c.l.b16 %v7497_v59  ;;  %v9137_v11 = vmax.f32 %v3675_v58, %v3676_v1 }
 0x209   : > { %v3263_v12 = vmax.f32 %v3007_v23, 0.0  ;;  %v2742_v25 = vmul.f32 %v8931_v16, %v2240_v47  ;;  %v3657_v39 = vsel %vm3341_vm2, %v3130_v32, -inf  ;;  %v3133_v46 = vmax.f32 %v2877_v53, 0.0 }
 0x20a   : > { %v4553_v0 = vsel %vm3341_vm2, %v3258_v63, -inf  ;;  %v3692_v15 = vsel %vm3341_vm2, %v3135_v62, -inf  ;;  %v4572_v27 = vrot.slane %v4571_v14, 1  ;;  %v3658_v30 = vrot.slane %v3657_v39, 4  ;;  %v1731_v62 = vpop.f32.mrf.mxu0 }
 0x20b   : > { %v4554_v31 = vrot.slane %v4553_v0, 4  ;;  %v3693_v10 = vrot.slane %v3692_v15, 4  ;;  %v4588_v21 = vsel %vm3341_vm2, %v3263_v12, -inf  ;;  %v3678_v24 = vsel %vm3341_vm2, %v3133_v46, -inf }
 0x20c   : > { %v3005_v4 = vadd.f32 %v8948_v2, %v2742_v25  ;;  %v2617_v49 = vmul.f32 %v8931_v16, %v7766_v35  ;;  %v7372_v45 = vpack.c.bf16 %v9137_v11, %v9137_v11  ;;  %v3659_v37 = vmax.f32 %v3657_v39, %v3658_v30  ;;  %v2243_v35 = vpop.f32.mrf.mxu1 }
 0x20d   : > { %v4555_v22 = vmax.f32 %v4553_v0, %v4554_v31  ;;  %v3694_v57 = vmax.f32 %v3692_v15, %v3693_v10  ;;  %v4589_v48 = vrot.slane %v4588_v21, 4  ;;  %v3679_v9 = vrot.slane %v3678_v24, 4 }
 0x20e   : > { %v3261_v34 = vmax.f32 %v3005_v4, 0.0  ;;  %v2880_v44 = vadd.f32 %v8948_v2, %v2617_v49  ;;  %v4573_v50 = vmax.f32 %v4571_v14, %v4572_v27  ;;  %v3660_v38 = vrot.slane %v3659_v37, 2 }
 0x20f   : > { %v4556_v20 = vrot.slane %v4555_v22, 2  ;;  %v3695_v29 = vrot.slane %v3694_v57, 2  ;;  %v4590_v58 = vmax.f32 %v4588_v21, %v4589_v48  ;;  %v3680_v3 = vmax.f32 %v3678_v24, %v3679_v9  ;;  %v7897_v48 = vpop.f32.mrf.mxu1 }
 0x210   : > { %v4574_v41 = vsel %vm3341_vm2, %v3261_v34, -inf  ;;  %v3136_v5 = vmax.f32 %v2880_v44, 0.0  ;;  %v3661_v36 = vmax.f32 %v3659_v37, %v3660_v38  ;;  %v2745_v59 = vmul.f32 %v8931_v16, %v7894_v55 }
 0x211   : > { %v4557_v61 = vmax.f32 %v4555_v22, %v4556_v20  ;;  %v3696_v13 = vmax.f32 %v3694_v57, %v3695_v29  ;;  %v4575_v18 = vrot.slane %v4574_v41, 4  ;;  %v4591_v8 = vrot.slane %v4590_v58, 2 }
 0x212   : > { %v3681_v42 = vrot.slane %v3680_v3, 2  ;;  %v3699_v40 = vsel %vm3341_vm2, %v3136_v5, -inf  ;;  %v3662_v1 = vrot.slane %v3661_v36, 1  ;;  %v3008_v47 = vadd.f32 %v8948_v2, %v2745_v59 }
 0x213   : > { %v4558_v56 = vrot.slane %v4557_v61, 1  ;;  %v3697_v43 = vrot.slane %v3696_v13, 1  ;;  %v4576_v6 = vmax.f32 %v4574_v41, %v4575_v18  ;;  %v4592_v51 = vmax.f32 %v4590_v58, %v4591_v8  ;;  %v2256_v41 = vpop.f32.mrf.mxu1 }
 0x214   : > { %v3682_v19 = vmax.f32 %v3680_v3, %v3681_v42  ;;  %v3700_v54 = vrot.slane %v3699_v40, 4  ;;  %v3663_v14 = vmax.f32 %v3661_v36, %v3662_v1  ;;  %v7500_v53 = vpack.c.bf16 %v4573_v50, %v4573_v50 }
 0x215   : > { %v4559_v23 = vmax.f32 %v4557_v61, %v4558_v56  ;;  %v3698_v32 = vmax.f32 %v3696_v13, %v3697_v43  ;;  %v4577_v63 = vrot.slane %v4576_v6, 2  ;;  %v4593_v11 = vrot.slane %v4592_v51, 1 }
 0x216   : > { %v3683_v12 = vrot.slane %v3682_v19, 1  ;;  %v3264_v25 = vmax.f32 %v3008_v47, 0.0  ;;  %v6332_v39 = vunpack.c.l.b16 %v7499_v26  ;;  %v7370_v0 = vpack.c.bf16 %v3663_v14, %v3663_v14  ;;  %v7769_v26 = vpop.f32.mrf.mxu0 }
 0x217   : > { %v7498_v15 = vpack.c.bf16 %v4559_v23, %v4559_v23  ;;  %v3701_v46 = vmax.f32 %v3699_v40, %v3700_v54  ;;  %v6459_v27 = vsel %vm6420_vm6, %v9117_v60, %v9128_v52  ;;  %v6571_v30 = vsel %vm6420_vm6, %v9135_v33, %v9131_v17 }
 0x218   : > { %v7375_v31 = vpack.c.bf16 %v3698_v32, %v3698_v32  ;;  %v4595_v10 = vsel %vm3341_vm2, %v3264_v25, -inf  ;;  %v6203_v21 = vunpack.c.l.b16 %v7370_v0  ;;  %v9164_v4 = vmax.f32 %v4592_v51, %v4593_v11  ;;  %v1744_v29 = vpop.f32.mrf.mxu0 }
 0x219   : > { %v6331_v24 = vunpack.c.l.b16 %v7498_v15  ;;  %v4578_v28 = vmax.f32 %v4576_v6, %v4577_v63  ;;  %v6205_v49 = vunpack.c.l.b16 %v7372_v45  ;;  %v6333_v37 = vunpack.c.l.b16 %v7500_v53 }
 0x21a   : > { %v3684_v22 = vmax.f32 %v3682_v19, %v3683_v12  ;;  %v4596_v57 = vrot.slane %v4595_v10, 4  ;;  %v6460_v60 = vsel %vm6422_vm7, %v6203_v21, %v6459_v27  ;;  %v3702_v9 = vrot.slane %v3701_v46, 2  ;;  %v7770_v47 = vpop.f32.mrf.mxu0 }
 0x21b   : > { %v6572_v52 = vsel %vm6422_vm7, %v6331_v24, %v6571_v30  ;;  %v2615_v17 = vmul.f32 %v8931_v16, %v1731_v62  ;;  %v6461_v33 = vsel %vm6424_vm8, %v9115_v7, %v6460_v60  ;;  %v9172_v44 = vunpack.c.l.b16 %v7375_v31 }
 0x21c   : > { %v6573_v34 = vsel %vm6424_vm8, %v6332_v39, %v6572_v52  ;;  %v6462_v45 = vsel %vm6426_vm9, %v6205_v49, %v6461_v33  ;;  %v7503_v38 = vpack.c.bf16 %v9164_v4, %v9164_v4  ;;  %v4579_v20 = vrot.slane %v4578_v28, 1  ;;  %v7898_v52 = vpop.f32.mrf.mxu1 }
 0x21d   : > { %v6574_v50 = vsel %vm6426_vm9, %v6333_v37, %v6573_v34  ;;  %v6650_v55 = vpack.c.b16 %v6462_v45, %v6462_v45  ;;  %v4597_v3 = vmax.f32 %v4595_v10, %v4596_v57  ;;  %v2878_v7 = vadd.f32 %v8948_v2, %v2615_v17 }
 0x21e   : > { %v6666_v58 = vpack.c.b16 %v6574_v50, %v6574_v50  ;;  %v7373_v5 = vpack.c.bf16 %v3684_v22, %v3684_v22  ;;  %v3703_v36 = vmax.f32 %v3701_v46, %v3702_v9  ;;  %v2743_v61 = vmul.f32 %v8931_v16, %v2243_v35 }
 0x21f   : > { %v2620_v13 = vmul.f32 %v8931_v16, %v7769_v26  ;;  %6715 = vst.msk [vmem:[%s8607_s8 + $0x14] sm:$0xf] %vm6709_vm10, %v6650_v55  ;;  %v4598_v18 = vrot.slane %v4597_v3, 2  ;;  %v3134_v8 = vmax.f32 %v2878_v7, 0.0  ;;  %v2748_v42 = vmul.f32 %v8931_v16, %v7897_v48 }
 0x220   : > { %6731 = vst.msk [vmem:[%s8607_s8 + $0x54] sm:$0xf] %vm6709_vm10, %v6666_v58  ;;  %v2618_v40 = vmul.f32 %v8931_v16, %v1744_v29  ;;  %v9187_v59 = vmax.f32 %v4578_v28, %v4579_v20  ;;  %v3006_v1 = vadd.f32 %v8948_v2, %v2743_v61  ;;  %v2746_v43 = vmul.f32 %v8931_v16, %v2256_v41 }
 0x221   : > { %v2883_v56 = vadd.f32 %v8948_v2, %v2620_v13  ;;  %v4599_v6 = vmax.f32 %v4597_v3, %v4598_v18  ;;  %v3685_v51 = vsel %vm3341_vm2, %v3134_v8, -inf  ;;  %v3011_v19 = vadd.f32 %v8948_v2, %v2748_v42 }
 0x222   : > { %v2881_v54 = vadd.f32 %v8948_v2, %v2618_v40  ;;  %v9195_v14 = vunpack.c.l.b16 %v7373_v5  ;;  %v3686_v23 = vrot.slane %v3685_v51, 4  ;;  %v3262_v32 = vmax.f32 %v3006_v1, 0.0 }
 0x223   : > { %v3139_v63 = vmax.f32 %v2883_v56, 0.0  ;;  %v3704_v62 = vrot.slane %v3703_v36, 1  ;;  %v3267_v53 = vmax.f32 %v3011_v19, 0.0  ;;  %v3009_v12 = vadd.f32 %v8948_v2, %v2746_v43  ;;  %v9210_v56 = vld [vmem:[%s10136_s3] ss:$0 sm:$0xff] }
 0x224   : > { %v3137_v11 = vmax.f32 %v2881_v54, 0.0  ;;  %v3687_v25 = vmax.f32 %v3685_v51, %v3686_v23  ;;  %v4581_v35 = vsel %vm3341_vm2, %v3262_v32, -inf  ;;  %v2621_v0 = vmul.f32 %v8931_v16, %v7770_v47 }
 0x225   : > { %v3720_v39 = vsel %vm3341_vm2, %v3139_v63, -inf  ;;  %v4600_v15 = vrot.slane %v4599_v6, 1  ;;  %v4582_v46 = vrot.slane %v4581_v35, 4  ;;  %v4616_v30 = vsel %vm3341_vm2, %v3267_v53, -inf }
 0x226   : > { %v3721_v27 = vrot.slane %v3720_v39, 4  ;;  %v3688_v31 = vrot.slane %v3687_v25, 2  ;;  %v4617_v10 = vrot.slane %v4616_v30, 4  ;;  %v3706_v21 = vsel %vm3341_vm2, %v3137_v11, -inf }
 0x227   : > { %v3265_v24 = vmax.f32 %v3009_v12, 0.0  ;;  %v3705_v28 = vmax.f32 %v3703_v36, %v3704_v62  ;;  %v4583_v26 = vmax.f32 %v4581_v35, %v4582_v46  ;;  %v3707_v37 = vrot.slane %v3706_v21, 4 }
 0x228   : > { %v3722_v49 = vmax.f32 %v3720_v39, %v3721_v27  ;;  %v3689_v22 = vmax.f32 %v3687_v25, %v3688_v31  ;;  %v4618_v57 = vmax.f32 %v4616_v30, %v4617_v10  ;;  %v2884_v60 = vadd.f32 %v8948_v2, %v2621_v0  ;;  %v2259_v0 = vpop.f32.mrf.mxu1 }
 0x229   : > { %v4602_v48 = vsel %vm3341_vm2, %v3265_v24, -inf  ;;  %v4601_v9 = vmax.f32 %v4599_v6, %v4600_v15  ;;  %v4584_v17 = vrot.slane %v4583_v26, 2  ;;  %v3708_v34 = vmax.f32 %v3706_v21, %v3707_v37 }
 0x22a   : > { %v3723_v33 = vrot.slane %v3722_v49, 2  ;;  %v3690_v45 = vrot.slane %v3689_v22, 1  ;;  %v4619_v50 = vrot.slane %v4618_v57, 2  ;;  %v4603_v20 = vrot.slane %v4602_v48, 4 }
 0x22b   : > { %v3140_v29 = vmax.f32 %v2884_v60, 0.0  ;;  %v4585_v55 = vmax.f32 %v4583_v26, %v4584_v17  ;;  %v3709_v3 = vrot.slane %v3708_v34, 2  ;;  %v2749_v7 = vmul.f32 %v8931_v16, %v7898_v52  ;;  %v1747_v16 = vpop.f32.mrf.mxu0  ;;  %v9230_v26 = vld [vmem:[%s10135_s2] ss:$0 sm:$0xff] }
 0x22c   : > { %v3724_v58 = vmax.f32 %v3722_v49, %v3723_v33  ;;  %v3691_v41 = vmax.f32 %v3689_v22, %v3690_v45  ;;  %v4620_v5 = vmax.f32 %v4618_v57, %v4619_v50  ;;  %v4604_v36 = vmax.f32 %v4602_v48, %v4603_v20  ;;  %v7901_v22 = vpop.f32.mrf.mxu1 }
 0x22d   : > { %v3727_v61 = vsel %vm3341_vm2, %v3140_v29, -inf  ;;  %v4586_v2 = vrot.slane %v4585_v55, 1  ;;  %v3710_v18 = vmax.f32 %v3708_v34, %v3709_v3  ;;  %v3012_v43 = vadd.f32 %v9210_v56, %v2749_v7  ;;  %v7773_v15 = vpop.f32.mrf.mxu0 }
 0x22e   : > { %v3725_v13 = vrot.slane %v3724_v58, 1  ;;  %v3728_v8 = vrot.slane %v3727_v61, 4  ;;  %v7374_v42 = vpack.c.bf16 %v3691_v41, %v3691_v41  ;;  %v4621_v40 = vrot.slane %v4620_v5, 1 }
 0x22f   : > { %v4605_v1 = vrot.slane %v4604_v36, 2  ;;  %v7501_v6 = vpack.c.bf16 %v9187_v59, %v9187_v59  ;;  %v7376_v51 = vpack.c.bf16 %v3705_v28, %v3705_v28  ;;  %v4587_v19 = vmax.f32 %v4585_v55, %v4586_v2  ;;  %v1760_v57 = vpop.f32.mrf.mxu0 }
 0x230   : > { %v3711_v54 = vrot.slane %v3710_v18, 1  ;;  %v6207_v47 = vunpack.c.l.b16 %v7374_v42  ;;  %v3729_v32 = vmax.f32 %v3727_v61, %v3728_v8  ;;  %v3268_v63 = vmax.f32 %v3012_v43, 0.0 }
 0x231   : > { %v4606_v23 = vmax.f32 %v4604_v36, %v4605_v1  ;;  %v7504_v62 = vpack.c.bf16 %v4601_v9, %v4601_v9  ;;  %v7502_v53 = vpack.c.bf16 %v4587_v19, %v4587_v19  ;;  %v9215_v11 = vmax.f32 %v3724_v58, %v3725_v13  ;;  %v2272_v13 = vpop.f32.mrf.mxu1 }
 0x232   : > { %v3712_v12 = vmax.f32 %v3710_v18, %v3711_v54  ;;  %v6463_v25 = vsel %vm6414_vm3, %v6207_v47, %v9195_v14  ;;  %v9219_v35 = vmax.f32 %v4620_v5, %v4621_v40  ;;  %v4623_v59 = vsel %vm3341_vm2, %v3268_v63, -inf  ;;  %v7774_v18 = vpop.f32.mrf.mxu0 }
 0x233   : > { %v4607_v39 = vrot.slane %v4606_v23, 1  ;;  %v6336_v46 = vunpack.c.l.b16 %v7503_v38  ;;  %v6335_v27 = vunpack.c.l.b16 %v7502_v53  ;;  %v6334_v30 = vunpack.c.l.b16 %v7501_v6 }
 0x234   : > { %v6464_v31 = vsel %vm6416_vm4, %v9172_v44, %v6463_v25  ;;  %v7377_v10 = vpack.c.bf16 %v3712_v12, %v3712_v12  ;;  %v3730_v21 = vrot.slane %v3729_v32, 2  ;;  %v6209_v24 = vunpack.c.l.b16 %v7376_v51 }
 0x235   : > { %v6337_v14 = vunpack.c.l.b16 %v7504_v62  ;;  %v4624_v28 = vrot.slane %v4623_v59, 4  ;;  %v2619_v49 = vmul.f32 %v9230_v26, %v1747_v16  ;;  %v7379_v4 = vpack.c.bf16 %v9215_v11, %v9215_v11 }
 0x236   : > { %v7507_v38 = vpack.c.bf16 %v9219_v35, %v9219_v35  ;;  %v9237_v37 = vmax.f32 %v4606_v23, %v4607_v39  ;;  %v2747_v44 = vmul.f32 %v9230_v26, %v2259_v0  ;;  %v6575_v48 = vsel %vm6414_vm3, %v6335_v27, %v6334_v30 }
 0x237   : > { %v9242_v60 = vsel %vm6418_vm5, %v6209_v24, %v6464_v31  ;;  %v4625_v52 = vmax.f32 %v4623_v59, %v4624_v28  ;;  %v2882_v9 = vadd.f32 %v9210_v56, %v2619_v49  ;;  %v9245_v17 = vunpack.c.l.b16 %v7377_v10 }
 0x238   : > { %v3731_v33 = vmax.f32 %v3729_v32, %v3730_v21  ;;  %v3010_v34 = vadd.f32 %v9210_v56, %v2747_v44  ;;  %v2624_v45 = vmul.f32 %v9230_v26, %v7773_v15  ;;  %v2752_v29 = vmul.f32 %v9230_v26, %v7901_v22 }
 0x239   : > { %v4626_v50 = vrot.slane %v4625_v52, 2  ;;  %v3138_v20 = vmax.f32 %v2882_v9, 0.0  ;;  %v2622_v55 = vmul.f32 %v9230_v26, %v1760_v57  ;;  %v6576_v58 = vsel %vm6416_vm4, %v6336_v46, %v6575_v48 }
 0x23a   : > { %v7505_v3 = vpack.c.bf16 %v9237_v37, %v9237_v37  ;;  %v3266_v7 = vmax.f32 %v3010_v34, 0.0  ;;  %v2887_v41 = vadd.f32 %v9210_v56, %v2624_v45  ;;  %v3015_v61 = vadd.f32 %v9210_v56, %v2752_v29  ;;  %v7902_v37 = vpop.f32.mrf.mxu1 }
 0x23b   : > { %v4627_v5 = vmax.f32 %v4625_v52, %v4626_v50  ;;  %v3713_v36 = vsel %vm3341_vm2, %v3138_v20, -inf  ;;  %v2885_v2 = vadd.f32 %v9210_v56, %v2622_v55  ;;  %v3732_v8 = vrot.slane %v3731_v33, 1 }
 0x23c   : > { %v3714_v42 = vrot.slane %v3713_v36, 4  ;;  %v4609_v40 = vsel %vm3341_vm2, %v3266_v7, -inf  ;;  %v3143_v1 = vmax.f32 %v2887_v41, 0.0  ;;  %v6577_v43 = vsel %vm6418_vm5, %v6337_v14, %v6576_v58 }
 0x23d   : > { %v4610_v16 = vrot.slane %v4609_v40, 4  ;;  %v3271_v6 = vmax.f32 %v3015_v61, 0.0  ;;  %v3141_v51 = vmax.f32 %v2885_v2, 0.0  ;;  %v2750_v47 = vmul.f32 %v9230_v26, %v2272_v13 }
 0x23e   : > { %v3715_v19 = vmax.f32 %v3713_v36, %v3714_v42  ;;  %v3748_v54 = vsel %vm3341_vm2, %v3143_v1, -inf  ;;  %v2625_v23 = vmul.f32 %v9230_v26, %v7774_v18  ;;  %v4628_v32 = vrot.slane %v4627_v5, 1 }
 0x23f   : > { %v4611_v63 = vmax.f32 %v4609_v40, %v4610_v16  ;;  %v3749_v62 = vrot.slane %v3748_v54, 4  ;;  %v4644_v53 = vsel %vm3341_vm2, %v3271_v6, -inf  ;;  %v3734_v39 = vsel %vm3341_vm2, %v3141_v51, -inf  ;;  %v2275_v51 = vpop.f32.mrf.mxu1 }
 0x240   : > { %v3716_v12 = vrot.slane %v3715_v19, 2  ;;  %v4645_v25 = vrot.slane %v4644_v53, 4  ;;  %v3013_v59 = vadd.f32 %v9210_v56, %v2750_v47  ;;  %v3733_v0 = vmax.f32 %v3731_v33, %v3732_v8 }
 0x241   : > { %v4612_v15 = vrot.slane %v4611_v63, 2  ;;  %v3750_v46 = vmax.f32 %v3748_v54, %v3749_v62  ;;  %v3735_v27 = vrot.slane %v3734_v39, 4  ;;  %v2888_v21 = vadd.f32 %v9210_v56, %v2625_v23 }
 0x242   : > { %v3717_v30 = vmax.f32 %v3715_v19, %v3716_v12  ;;  %v4646_v31 = vmax.f32 %v4644_v53, %v4645_v25  ;;  %v3269_v10 = vmax.f32 %v3013_v59, 0.0  ;;  %v4629_v24 = vmax.f32 %v4627_v5, %v4628_v32  ;;  %v1763_v5 = vpop.f32.mrf.mxu0  ;;  %v7905_v25 = vpop.f32.mrf.mxu1 }
 0x243   : > { %v4613_v14 = vmax.f32 %v4611_v63, %v4612_v15  ;;  %v3751_v28 = vrot.slane %v3750_v46, 2  ;;  %v3736_v49 = vmax.f32 %v3734_v39, %v3735_v27  ;;  %v3144_v48 = vmax.f32 %v2888_v21, 0.0 }
 0x244   : > { %v3718_v44 = vrot.slane %v3717_v30, 1  ;;  %v4647_v22 = vrot.slane %v4646_v31, 2  ;;  %v4630_v57 = vsel %vm3341_vm2, %v3269_v10, -inf  ;;  %v6338_v52 = vunpack.c.l.b16 %v7505_v3 }
 0x245   : > { %v4614_v9 = vrot.slane %v4613_v14, 1  ;;  %v3752_v33 = vmax.f32 %v3750_v46, %v3751_v28  ;;  %v4631_v34 = vrot.slane %v4630_v57, 4  ;;  %v3737_v50 = vrot.slane %v3736_v49, 2 }
 0x246   : > { %v3719_v45 = vmax.f32 %v3717_v30, %v3718_v44  ;;  %v3755_v20 = vsel %vm3341_vm2, %v3144_v48, -inf  ;;  %v2753_v29 = vmul.f32 %v9230_v26, %v7902_v37  ;;  %v7380_v55 = vpack.c.bf16 %v3733_v0, %v3733_v0 }
 0x247   : > { %v4615_v58 = vmax.f32 %v4613_v14, %v4614_v9  ;;  %v4648_v7 = vmax.f32 %v4646_v31, %v4647_v22  ;;  %v4632_v41 = vmax.f32 %v4630_v57, %v4631_v34  ;;  %v7508_v36 = vpack.c.bf16 %v4629_v24, %v4629_v24 }
 0x248   : > { %v7378_v61 = vpack.c.bf16 %v3719_v45, %v3719_v45  ;;  %v3756_v2 = vrot.slane %v3755_v20, 4  ;;  %v3016_v13 = vadd.f32 %v9210_v56, %v2753_v29  ;;  %v6212_v3 = vunpack.c.l.b16 %v7379_v4  ;;  %v7777_v4 = vpop.f32.mrf.mxu0 }
 0x249   : > { %v6340_v18 = vunpack.c.l.b16 %v7507_v38  ;;  %v7506_v8 = vpack.c.bf16 %v4615_v58, %v4615_v58  ;;  %v3753_v42 = vrot.slane %v3752_v33, 1  ;;  %v6466_v40 = vsel %vm6420_vm6, %v9245_v17, %v9242_v60 }
 0x24a   : > { %v6211_v1 = vunpack.c.l.b16 %v7378_v61  ;;  %v3738_v16 = vmax.f32 %v3736_v49, %v3737_v50  ;;  %v3272_v6 = vmax.f32 %v3016_v13, 0.0  ;;  %v6578_v19 = vsel %vm6420_vm6, %v6338_v52, %v6577_v43  ;;  %v1776_v46 = vpop.f32.mrf.mxu0 }
 0x24b   : > { %v6339_v54 = vunpack.c.l.b16 %v7506_v8  ;;  %v4649_v47 = vrot.slane %v4648_v7, 1  ;;  %v4633_v11 = vrot.slane %v4632_v41, 2  ;;  %v6213_v23 = vunpack.c.l.b16 %v7380_v55 }
 0x24c   : > { %v6341_v32 = vunpack.c.l.b16 %v7508_v36  ;;  %v6467_v35 = vsel %vm6422_vm7, %v6211_v1, %v6466_v40  ;;  %v3757_v38 = vmax.f32 %v3755_v20, %v3756_v2  ;;  %v9284_v60 = vmax.f32 %v3752_v33, %v3753_v42  ;;  %v2288_v33 = vpop.f32.mrf.mxu1 }
 0x24d   : > { %v6468_v63 = vsel %vm6424_vm8, %v6212_v3, %v6467_v35  ;;  %v6579_v62 = vsel %vm6422_vm7, %v6339_v54, %v6578_v19  ;;  %v4651_v17 = vsel %vm3341_vm2, %v3272_v6, -inf  ;;  %v3739_v12 = vrot.slane %v3738_v16, 1 }
 0x24e   : > { %v6469_v43 = vsel %vm6426_vm9, %v6213_v23, %v6468_v63  ;;  %v6580_v53 = vsel %vm6424_vm8, %v6340_v18, %v6579_v62  ;;  %v9290_v0 = vmax.f32 %v4648_v7, %v4649_v47  ;;  %v4634_v15 = vmax.f32 %v4632_v41, %v4633_v11 }
 0x24f   : > { %v6651_v39 = vpack.c.b16 %v6469_v43, %v6469_v43  ;;  %v6581_v59 = vsel %vm6426_vm9, %v6341_v32, %v6580_v53  ;;  %v3758_v30 = vrot.slane %v3757_v38, 2  ;;  %v4652_v31 = vrot.slane %v4651_v17, 4 }
 0x250   : > { %v6667_v27 = vpack.c.b16 %v6581_v59, %v6581_v59  ;;  %v2623_v10 = vmul.f32 %v9230_v26, %v1763_v5  ;;  %v7383_v21 = vpack.c.bf16 %v9284_v60, %v9284_v60  ;;  %v2751_v24 = vmul.f32 %v9230_v26, %v2275_v51 }
 0x251   : > { %6716 = vst.msk [vmem:[%s8607_s8 + $0x18] sm:$0xf] %vm6709_vm10, %v6651_v39  ;;  %v2628_v14 = vmul.f32 %v9230_v26, %v7777_v4  ;;  %v2756_v28 = vmul.f32 %v9230_v26, %v7905_v25  ;;  %v9302_v49 = vmax.f32 %v3738_v16, %v3739_v12  ;;  %v4653_v37 = vmax.f32 %v4651_v17, %v4652_v31  ;;  %v7778_v16 = vpop.f32.mrf.mxu0 }
 0x252   : > { %6732 = vst.msk [vmem:[%s8607_s8 + $0x58] sm:$0xf] %vm6709_vm10, %v6667_v27  ;;  %v2886_v44 = vadd.f32 %v9210_v56, %v2623_v10  ;;  %v2626_v22 = vmul.f32 %v9230_v26, %v1776_v46  ;;  %v4635_v57 = vrot.slane %v4634_v15, 1  ;;  %v3014_v48 = vadd.f32 %v9210_v56, %v2751_v24 }
 0x253   : > { %v2891_v52 = vadd.f32 %v9210_v56, %v2628_v14  ;;  %v3019_v9 = vadd.f32 %v9210_v56, %v2756_v28  ;;  %v3759_v34 = vmax.f32 %v3757_v38, %v3758_v30  ;;  %v4654_v45 = vrot.slane %v4653_v37, 2 }
 0x254   : > { %v3142_v50 = vmax.f32 %v2886_v44, 0.0  ;;  %v2889_v20 = vadd.f32 %v9210_v56, %v2626_v22  ;;  %v7511_v29 = vpack.c.bf16 %v9290_v0, %v9290_v0  ;;  %v3270_v55 = vmax.f32 %v3014_v48, 0.0 }
 0x255   : > { %v3147_v58 = vmax.f32 %v2891_v52, 0.0  ;;  %v3275_v7 = vmax.f32 %v3019_v9, 0.0  ;;  %v4655_v41 = vmax.f32 %v4653_v37, %v4654_v45  ;;  %v2754_v61 = vmul.f32 %v9230_v26, %v2288_v33 }
 0x256   : > { %v3741_v5 = vsel %vm3341_vm2, %v3142_v50, -inf  ;;  %v3145_v36 = vmax.f32 %v2889_v20, 0.0  ;;  %v9314_v2 = vmax.f32 %v4634_v15, %v4635_v57  ;;  %v4637_v3 = vsel %vm3341_vm2, %v3270_v55, -inf  ;;  %v7906_v15 = vpop.f32.mrf.mxu1 }
 0x257   : > { %v3742_v13 = vrot.slane %v3741_v5, 4  ;;  %v3776_v18 = vsel %vm3341_vm2, %v3147_v58, -inf  ;;  %v3760_v8 = vrot.slane %v3759_v34, 1  ;;  %v4638_v42 = vrot.slane %v4637_v3, 4 }
 0x258   : > { %v3777_v40 = vrot.slane %v3776_v18, 4  ;;  %v4672_v1 = vsel %vm3341_vm2, %v3275_v7, -inf  ;;  %v3762_v19 = vsel %vm3341_vm2, %v3145_v36, -inf  ;;  %v3017_v54 = vadd.f32 %v9210_v56, %v2754_v61 }
 0x259   : > { %v3743_v6 = vmax.f32 %v3741_v5, %v3742_v13  ;;  %v4673_v51 = vrot.slane %v4672_v1, 4  ;;  %v4656_v47 = vrot.slane %v4655_v41, 1  ;;  %v4639_v11 = vmax.f32 %v4637_v3, %v4638_v42 }
 0x25a   : > { %v3778_v4 = vmax.f32 %v3776_v18, %v3777_v40  ;;  %v3763_v23 = vrot.slane %v3762_v19, 4  ;;  %v3273_v38 = vmax.f32 %v3017_v54, 0.0  ;;  %v2629_v63 = vmul.f32 %v9230_v26, %v7778_v16 }
 0x25b   : > { %v3744_v32 = vrot.slane %v3743_v6, 2  ;;  %v4674_v35 = vmax.f32 %v4672_v1, %v4673_v51  ;;  %v3761_v62 = vmax.f32 %v3759_v34, %v3760_v8  ;;  %v4640_v17 = vrot.slane %v4639_v11, 2  ;;  %v1779_v34 = vpop.f32.mrf.mxu0  ;;  %v2291_v1 = vpop.f32.mrf.mxu1 }
 0x25c   : > { %v3779_v43 = vrot.slane %v3778_v4, 2  ;;  %v3764_v53 = vmax.f32 %v3762_v19, %v3763_v23  ;;  %v4658_v39 = vsel %vm3341_vm2, %v3273_v38, -inf  ;;  %v2892_v59 = vadd.f32 %v9210_v56, %v2629_v63 }
 0x25d   : > { %v3745_v12 = vmax.f32 %v3743_v6, %v3744_v32  ;;  %v4675_v25 = vrot.slane %v4674_v35, 2  ;;  %v4657_v46 = vmax.f32 %v4655_v41, %v4656_v47  ;;  %v4641_v27 = vmax.f32 %v4639_v11, %v4640_v17  ;;  %v7781_v16 = vpop.f32.mrf.mxu0  ;;  %v7909_v17 = vpop.f32.mrf.mxu1 }
 0x25e   : > { %v3780_v30 = vmax.f32 %v3778_v4, %v3779_v43  ;;  %v3765_v31 = vrot.slane %v3764_v53, 2  ;;  %v4659_v14 = vrot.slane %v4658_v39, 4  ;;  %v3148_v28 = vmax.f32 %v2892_v59, 0.0 }
 0x25f   : > { %v3746_v10 = vrot.slane %v3745_v12, 1  ;;  %v4676_v24 = vmax.f32 %v4674_v35, %v4675_v25  ;;  %v4642_v37 = vrot.slane %v4641_v27, 1  ;;  %v2757_v57 = vmul.f32 %v9230_v26, %v7906_v15  ;;  %v1792_v43 = vpop.f32.mrf.mxu0 }
 0x260   : > { %v3781_v44 = vrot.slane %v3780_v30, 1  ;;  %v3766_v22 = vmax.f32 %v3764_v53, %v3765_v31  ;;  %v4660_v9 = vmax.f32 %v4658_v39, %v4659_v14  ;;  %v3783_v33 = vsel %vm3341_vm2, %v3148_v28, -inf }
 0x261   : > { %v3747_v48 = vmax.f32 %v3745_v12, %v3746_v10  ;;  %v4677_v52 = vrot.slane %v4676_v24, 1  ;;  %v4643_v45 = vmax.f32 %v4641_v27, %v4642_v37  ;;  %v3784_v55 = vrot.slane %v3783_v33, 4 }
 0x262   : > { %v3782_v50 = vmax.f32 %v3780_v30, %v3781_v44  ;;  %v3767_v20 = vrot.slane %v3766_v22, 1  ;;  %v4661_v41 = vrot.slane %v4660_v9, 2  ;;  %v3020_v5 = vadd.f32 %v9210_v56, %v2757_v57 }
 0x263   : > { %v7382_v58 = vpack.c.bf16 %v3747_v48, %v3747_v48  ;;  %v4678_v7 = vmax.f32 %v4676_v24, %v4677_v52  ;;  %v7381_v36 = vpack.c.bf16 %v9302_v49, %v9302_v49  ;;  %v7509_v61 = vpack.c.bf16 %v9314_v2, %v9314_v2 }
 0x264   : > { %v7384_v13 = vpack.c.bf16 %v3761_v62, %v3761_v62  ;;  %v7510_v3 = vpack.c.bf16 %v4643_v45, %v4643_v45  ;;  %v7512_v18 = vpack.c.bf16 %v4657_v46, %v4657_v46  ;;  %v7387_v8 = vpack.c.bf16 %v3782_v50, %v3782_v50 }
 0x265   : > { %v3768_v42 = vmax.f32 %v3766_v22, %v3767_v20  ;;  %v3276_v40 = vmax.f32 %v3020_v5, 0.0  ;;  %v6215_v6 = vunpack.c.l.b16 %v7382_v58  ;;  %v7515_v51 = vpack.c.bf16 %v4678_v7, %v4678_v7  ;;  %v2304_v7 = vpop.f32.mrf.mxu1 }
 0x266   : > { %v3785_v19 = vmax.f32 %v3783_v33, %v3784_v55  ;;  %v6216_v54 = vunpack.c.l.b16 %v7383_v21  ;;  %v6344_v49 = vunpack.c.l.b16 %v7511_v29  ;;  %v4662_v2 = vmax.f32 %v4660_v9, %v4661_v41  ;;  %v7782_v41 = vpop.f32.mrf.mxu0 }
 0x267   : > { %v4679_v47 = vsel %vm3341_vm2, %v3276_v40, -inf  ;;  %v6214_v11 = vunpack.c.l.b16 %v7381_v36  ;;  %v6342_v4 = vunpack.c.l.b16 %v7509_v61  ;;  %v6217_v23 = vunpack.c.l.b16 %v7384_v13 }
 0x268   : > { %v6343_v32 = vunpack.c.l.b16 %v7510_v3  ;;  %v6345_v35 = vunpack.c.l.b16 %v7512_v18  ;;  %v9338_v38 = vunpack.c.l.b16 %v7387_v8  ;;  %v7385_v63 = vpack.c.bf16 %v3768_v42, %v3768_v42 }
 0x269   : > { %v4680_v62 = vrot.slane %v4679_v47, 4  ;;  %v6470_v60 = vsel %vm6414_vm3, %v6215_v6, %v6214_v11  ;;  %v9341_v21 = vunpack.c.l.b16 %v7515_v51  ;;  %v3786_v0 = vrot.slane %v3785_v19, 2 }
 0x26a   : > { %v2627_v29 = vmul.f32 %v9230_v26, %v1779_v34  ;;  %v4663_v53 = vrot.slane %v4662_v2, 1  ;;  %v2755_v25 = vmul.f32 %v9230_v26, %v2291_v1  ;;  %v2632_v39 = vmul.f32 %v9230_v26, %v7781_v16 }
 0x26b   : > { %v4681_v12 = vmax.f32 %v4679_v47, %v4680_v62  ;;  %v6582_v59 = vsel %vm6414_vm3, %v6343_v32, %v6342_v4  ;;  %v2760_v46 = vmul.f32 %v9230_v26, %v7909_v17  ;;  %v2630_v27 = vmul.f32 %v9230_v26, %v1792_v43  ;;  %v7910_v32 = vpop.f32.mrf.mxu1 }
 0x26c   : > { %v2890_v15 = vadd.f32 %v9210_v56, %v2627_v29  ;;  %v6471_v30 = vsel %vm6416_vm4, %v6216_v54, %v6470_v60  ;;  %v3018_v10 = vadd.f32 %v9210_v56, %v2755_v25  ;;  %v2895_v24 = vadd.f32 %v9210_v56, %v2632_v39 }
 0x26d   : > { %v4682_v31 = vrot.slane %v4681_v12, 2  ;;  %v9353_v14 = vunpack.c.l.b16 %v7385_v63  ;;  %v3023_v37 = vadd.f32 %v9210_v56, %v2760_v46  ;;  %v2893_v44 = vadd.f32 %v9210_v56, %v2630_v27 }
 0x26e   : > { %v3146_v28 = vmax.f32 %v2890_v15, 0.0  ;;  %v6583_v22 = vsel %vm6416_vm4, %v6344_v49, %v6582_v59  ;;  %v3787_v57 = vmax.f32 %v3785_v19, %v3786_v0  ;;  %v3274_v48 = vmax.f32 %v3018_v10, 0.0 }
 0x26f   : > { %v3151_v52 = vmax.f32 %v2895_v24, 0.0  ;;  %v4664_v9 = vmax.f32 %v4662_v2, %v4663_v53  ;;  %v3279_v34 = vmax.f32 %v3023_v37, 0.0  ;;  %v3149_v45 = vmax.f32 %v2893_v44, 0.0 }
 0x270   : > { %v3769_v33 = vsel %vm3341_vm2, %v3146_v28, -inf  ;;  %v4683_v50 = vmax.f32 %v4681_v12, %v4682_v31  ;;  %v4665_v55 = vsel %vm3341_vm2, %v3274_v48, -inf  ;;  %v3788_v3 = vrot.slane %v3787_v57, 1 }
 0x271   : > { %v3770_v20 = vrot.slane %v3769_v33, 4  ;;  %v3804_v58 = vsel %vm3341_vm2, %v3151_v52, -inf  ;;  %v4666_v5 = vrot.slane %v4665_v55, 4  ;;  %v4700_v61 = vsel %vm3341_vm2, %v3279_v34, -inf }
 0x272   : > { %v3805_v36 = vrot.slane %v3804_v58, 4  ;;  %v3790_v13 = vsel %vm3341_vm2, %v3149_v45, -inf  ;;  %v4701_v8 = vrot.slane %v4700_v61, 4  ;;  %v2758_v16 = vmul.f32 %v9230_v26, %v2304_v7 }
 0x273   : > { %v3771_v18 = vmax.f32 %v3769_v33, %v3770_v20  ;;  %v3791_v42 = vrot.slane %v3790_v13, 4  ;;  %v4667_v40 = vmax.f32 %v4665_v55, %v4666_v5  ;;  %v2633_v6 = vmul.f32 %v9230_v26, %v7782_v41  ;;  %v2307_v41 = vpop.f32.mrf.mxu1 }
 0x274   : > { %v3806_v1 = vmax.f32 %v3804_v58, %v3805_v36  ;;  %v6472_v51 = vsel %vm6418_vm5, %v6217_v23, %v6471_v30  ;;  %v4684_v19 = vrot.slane %v4683_v50, 1  ;;  %v4702_v49 = vmax.f32 %v4700_v61, %v4701_v8 }
 0x275   : > { %v3772_v54 = vrot.slane %v3771_v18, 2  ;;  %v7513_v2 = vpack.c.bf16 %v4664_v9, %v4664_v9  ;;  %v4668_v47 = vrot.slane %v4667_v40, 2  ;;  %v3021_v11 = vadd.f32 %v9210_v56, %v2758_v16 }
 0x276   : > { %v2896_v4 = vadd.f32 %v9210_v56, %v2633_v6  ;;  %v6584_v63 = vsel %vm6418_vm5, %v6345_v35, %v6583_v22  ;;  %v3789_v62 = vmax.f32 %v3787_v57, %v3788_v3  ;;  %v3792_v43 = vmax.f32 %v3790_v13, %v3791_v42  ;;  %v1795_v22 = vpop.f32.mrf.mxu0 }
 0x277   : > { %v3773_v17 = vmax.f32 %v3771_v18, %v3772_v54  ;;  %v4669_v60 = vmax.f32 %v4667_v40, %v4668_v47  ;;  %v3807_v0 = vrot.slane %v3806_v1, 2  ;;  %v3277_v29 = vmax.f32 %v3021_v11, 0.0 }
 0x278   : > { %v3152_v53 = vmax.f32 %v2896_v4, 0.0  ;;  %v4685_v23 = vmax.f32 %v4683_v50, %v4684_v19  ;;  %v4703_v25 = vrot.slane %v4702_v49, 2  ;;  %v2761_v39 = vmul.f32 %v9230_v26, %v7910_v32  ;;  %v7785_v3 = vpop.f32.mrf.mxu0 }
 0x279   : > { %v3774_v12 = vrot.slane %v3773_v17, 1  ;;  %v6346_v59 = vunpack.c.l.b16 %v7513_v2  ;;  %v4670_v15 = vrot.slane %v4669_v60, 1  ;;  %v4686_v46 = vsel %vm3341_vm2, %v3277_v29, -inf  ;;  %v7913_v2 = vpop.f32.mrf.mxu1 }
 0x27a   : > { %v3811_v27 = vsel %vm3341_vm2, %v3152_v53, -inf  ;;  %v7388_v30 = vpack.c.bf16 %v3789_v62, %v3789_v62  ;;  %v3793_v31 = vrot.slane %v3792_v43, 2  ;;  %v4687_v10 = vrot.slane %v4686_v46, 4  ;;  %v1808_v32 = vpop.f32.mrf.mxu0 }
 0x27b   : > { %v3775_v35 = vmax.f32 %v3773_v17, %v3774_v12  ;;  %v4671_v24 = vmax.f32 %v4669_v60, %v4670_v15  ;;  %v3808_v28 = vmax.f32 %v3806_v1, %v3807_v0  ;;  %v3812_v37 = vrot.slane %v3811_v27, 4 }
 0x27c   : > { %v3024_v44 = vadd.f32 %v9210_v56, %v2761_v39  ;;  %v7516_v57 = vpack.c.bf16 %v4685_v23, %v4685_v23  ;;  %v4704_v52 = vmax.f32 %v4702_v49, %v4703_v25  ;;  %v4688_v9 = vmax.f32 %v4686_v46, %v4687_v10 }
 0x27d   : > { %v7386_v48 = vpack.c.bf16 %v3775_v35, %v3775_v35  ;;  %v6473_v33 = vsel %vm6420_vm6, %v9353_v14, %v6472_v51  ;;  %v7514_v34 = vpack.c.bf16 %v4671_v24, %v4671_v24  ;;  %v3813_v45 = vmax.f32 %v3811_v27, %v3812_v37  ;;  %v2320_v27 = vpop.f32.mrf.mxu1 }
 0x27e   : > { %v3280_v50 = vmax.f32 %v3024_v44, 0.0  ;;  %v6585_v20 = vsel %vm6420_vm6, %v6346_v59, %v6584_v63  ;;  %v3794_v58 = vmax.f32 %v3792_v43, %v3793_v31  ;;  %v4689_v7 = vrot.slane %v4688_v9, 2 }
 0x27f   : > { %v6219_v55 = vunpack.c.l.b16 %v7386_v48  ;;  %v6221_v5 = vunpack.c.l.b16 %v7388_v30  ;;  %v6347_v36 = vunpack.c.l.b16 %v7514_v34  ;;  %v3809_v61 = vrot.slane %v3808_v28, 1 }
 0x280   : > { %v4707_v13 = vsel %vm3341_vm2, %v3280_v50, -inf  ;;  %v6349_v18 = vunpack.c.l.b16 %v7516_v57  ;;  %v4705_v42 = vrot.slane %v4704_v52, 1  ;;  %v3814_v14 = vrot.slane %v3813_v45, 2  ;;  %v7786_v50 = vpop.f32.mrf.mxu0 }
 0x281   : > { %v6474_v8 = vsel %vm6422_vm7, %v6219_v55, %v6473_v33  ;;  %v6586_v1 = vsel %vm6422_vm7, %v6347_v36, %v6585_v20  ;;  %v4690_v16 = vmax.f32 %v4688_v9, %v4689_v7  ;;  %v4708_v6 = vrot.slane %v4707_v13, 4 }
 0x282   : > { %v6475_v40 = vsel %vm6424_vm8, %v9338_v38, %v6474_v8  ;;  %v6587_v19 = vsel %vm6424_vm8, %v9341_v21, %v6586_v1  ;;  %v3795_v54 = vrot.slane %v3794_v58, 1  ;;  %v2631_v49 = vmul.f32 %v9230_v26, %v1795_v22 }
 0x283   : > { %v6476_v51 = vsel %vm6426_vm9, %v6221_v5, %v6475_v40  ;;  %v6588_v11 = vsel %vm6426_vm9, %v6349_v18, %v6587_v19  ;;  %v9386_v4 = vmax.f32 %v3808_v28, %v3809_v61  ;;  %v4709_v38 = vmax.f32 %v4707_v13, %v4708_v6 }
 0x284   : > { %v6652_v47 = vpack.c.b16 %v6476_v51, %v6476_v51  ;;  %v6668_v63 = vpack.c.b16 %v6588_v11, %v6588_v11  ;;  %v3815_v62 = vmax.f32 %v3813_v45, %v3814_v14  ;;  %v2894_v17 = vadd.f32 %v9210_v56, %v2631_v49 }
 0x285   : > { %v2759_v43 = vmul.f32 %v9230_v26, %v2307_v41  ;;  %v4691_v21 = vrot.slane %v4690_v16, 1  ;;  %v4710_v60 = vrot.slane %v4709_v38, 2  ;;  %v2636_v0 = vmul.f32 %v9230_v26, %v7785_v3 }
 0x286   : > { %6717 = vst.msk [vmem:[%s8607_s8 + $0x1c] sm:$0xf] %vm6709_vm10, %v6652_v47  ;;  %v2764_v29 = vmul.f32 %v9230_v26, %v7913_v2  ;;  %6733 = vst.msk [vmem:[%s8607_s8 + $0x5c] sm:$0xf] %vm6709_vm10, %v6668_v63  ;;  %v9396_v53 = vmax.f32 %v4704_v52, %v4705_v42  ;;  %v3150_v23 = vmax.f32 %v2894_v17, 0.0  ;;  %v2634_v25 = vmul.f32 %v9230_v26, %v1808_v32 }
 0x287   : > { %v3022_v12 = vadd.f32 %v9210_v56, %v2759_v43  ;;  %v9400_v39 = vmax.f32 %v3794_v58, %v3795_v54  ;;  %v4711_v59 = vmax.f32 %v4709_v38, %v4710_v60  ;;  %v2899_v15 = vadd.f32 %v9210_v56, %v2636_v0 }
 0x288   : > { %v3027_v46 = vadd.f32 %v9210_v56, %v2764_v29  ;;  %v7391_v30 = vpack.c.bf16 %v9386_v4, %v9386_v4  ;;  %v3797_v35 = vsel %vm3341_vm2, %v3150_v23, -inf  ;;  %v2897_v10 = vadd.f32 %v9210_v56, %v2634_v25 }
 0x289   : > { %v3278_v31 = vmax.f32 %v3022_v12, 0.0  ;;  %v9408_v24 = vmax.f32 %v4690_v16, %v4691_v21  ;;  %v3816_v28 = vrot.slane %v3815_v62, 1  ;;  %v3798_v37 = vrot.slane %v3797_v35, 4  ;;  %v7914_v16 = vpop.f32.mrf.mxu1 }
 0x28a   : > { %v3155_v44 = vmax.f32 %v2899_v15, 0.0  ;;  %v3283_v57 = vmax.f32 %v3027_v46, 0.0  ;;  %v3153_v48 = vmax.f32 %v2897_v10, 0.0  ;;  %v2762_v52 = vmul.f32 %v9230_v26, %v2320_v27  ;;  %v1811_v27 = vpop.f32.mrf.mxu0 }
 0x28b   : > { %v4693_v22 = vsel %vm3341_vm2, %v3278_v31, -inf  ;;  %v4712_v9 = vrot.slane %v4711_v59, 1  ;;  %v3799_v33 = vmax.f32 %v3797_v35, %v3798_v37  ;;  %v3817_v41 = vmax.f32 %v3815_v62, %v3816_v28 }
 0x28c   : > { %v4694_v34 = vrot.slane %v4693_v22, 4  ;;  %v3832_v45 = vsel %vm3341_vm2, %v3155_v44, -inf  ;;  %v4728_v55 = vsel %vm3341_vm2, %v3283_v57, -inf  ;;  %v3818_v58 = vsel %vm3341_vm2, %v3153_v48, -inf }
 0x28d   : > { %v3833_v20 = vrot.slane %v3832_v45, 4  ;;  %v3025_v7 = vadd.f32 %v9210_v56, %v2762_v52  ;;  %v3800_v5 = vrot.slane %v3799_v33, 2  ;;  %v4729_v61 = vrot.slane %v4728_v55, 4 }
 0x28e   : > { %v4695_v36 = vmax.f32 %v4693_v22, %v4694_v34  ;;  %v3819_v3 = vrot.slane %v3818_v58, 4  ;;  %v2637_v8 = vmul.f32 %v9230_v26, %v7786_v50  ;;  %v4713_v42 = vmax.f32 %v4711_v59, %v4712_v9  ;;  %v2323_v9 = vpop.f32.mrf.mxu1  ;;  %v7789_v50 = vpop.f32.mrf.mxu0 }
 0x28f   : > { %v3834_v13 = vmax.f32 %v3832_v45, %v3833_v20  ;;  %v3281_v18 = vmax.f32 %v3025_v7, 0.0  ;;  %v3801_v14 = vmax.f32 %v3799_v33, %v3800_v5  ;;  %v4730_v1 = vmax.f32 %v4728_v55, %v4729_v61 }
 0x290   : > { %v4696_v40 = vrot.slane %v4695_v36, 2  ;;  %v3820_v51 = vmax.f32 %v3818_v58, %v3819_v3  ;;  %v2900_v54 = vadd.f32 %v9210_v56, %v2637_v8  ;;  %v2765_v62 = vmul.f32 %v9230_v26, %v7914_v16 }
 0x291   : > { %v3835_v6 = vrot.slane %v3834_v13, 2  ;;  %v4714_v19 = vsel %vm3341_vm2, %v3281_v18, -inf  ;;  %v3802_v49 = vrot.slane %v3801_v14, 1  ;;  %v4731_v47 = vrot.slane %v4730_v1, 2  ;;  %v7917_v18 = vpop.f32.mrf.mxu1 }
 0x292   : > { %v4697_v2 = vmax.f32 %v4695_v36, %v4696_v40  ;;  %v4715_v11 = vrot.slane %v4714_v19, 4  ;;  %v3821_v32 = vrot.slane %v3820_v51, 2  ;;  %v3156_v63 = vmax.f32 %v2900_v54, 0.0 }
 0x293   : > { %v3836_v38 = vmax.f32 %v3834_v13, %v3835_v6  ;;  %v3803_v17 = vmax.f32 %v3801_v14, %v3802_v49  ;;  %v4732_v21 = vmax.f32 %v4730_v1, %v4731_v47  ;;  %v3028_v12 = vadd.f32 %v9210_v56, %v2765_v62  ;;  %v1824_v14 = vpop.f32.mrf.mxu0 }
 0x294   : > { %v4698_v43 = vrot.slane %v4697_v2, 1  ;;  %v4716_v60 = vmax.f32 %v4714_v19, %v4715_v11  ;;  %v3822_v29 = vmax.f32 %v3820_v51, %v3821_v32  ;;  %v3839_v23 = vsel %vm3341_vm2, %v3156_v63, -inf  ;;  %v2336_v32 = vpop.f32.mrf.mxu1 }
 0x295   : > { %v3837_v0 = vrot.slane %v3836_v38, 1  ;;  %v7389_v25 = vpack.c.bf16 %v9400_v39, %v9400_v39  ;;  %v7390_v59 = vpack.c.bf16 %v3803_v17, %v3803_v17  ;;  %v4733_v46 = vrot.slane %v4732_v21, 1 }
 0x296   : > { %v4699_v15 = vmax.f32 %v4697_v2, %v4698_v43  ;;  %v7519_v35 = vpack.c.bf16 %v9396_v53, %v9396_v53  ;;  %v4717_v31 = vrot.slane %v4716_v60, 2  ;;  %v3840_v10 = vrot.slane %v3839_v23, 4 }
 0x297   : > { %v3284_v28 = vmax.f32 %v3028_v12, 0.0  ;;  %v7517_v37 = vpack.c.bf16 %v9408_v24, %v9408_v24  ;;  %v7392_v44 = vpack.c.bf16 %v3817_v41, %v3817_v41  ;;  %v6223_v22 = vunpack.c.l.b16 %v7390_v59 }
 0x298   : > { %v3823_v57 = vrot.slane %v3822_v29, 1  ;;  %v7520_v48 = vpack.c.bf16 %v4713_v42, %v4713_v42  ;;  %v9428_v52 = vmax.f32 %v3836_v38, %v3837_v0  ;;  %v3841_v39 = vmax.f32 %v3839_v23, %v3840_v10 }
 0x299   : > { %v6222_v33 = vunpack.c.l.b16 %v7389_v25  ;;  %v7518_v34 = vpack.c.bf16 %v4699_v15, %v4699_v15  ;;  %v9430_v45 = vmax.f32 %v4732_v21, %v4733_v46  ;;  %v4735_v53 = vsel %vm3341_vm2, %v3284_v28, -inf }
 0x29a   : > { %v6224_v20 = vunpack.c.l.b16 %v7391_v30  ;;  %v6352_v24 = vunpack.c.l.b16 %v7519_v35  ;;  %v4718_v55 = vmax.f32 %v4716_v60, %v4717_v31  ;;  %v6350_v58 = vunpack.c.l.b16 %v7517_v37  ;;  %v7790_v31 = vpop.f32.mrf.mxu0 }
 0x29b   : > { %v6225_v7 = vunpack.c.l.b16 %v7392_v44  ;;  %v6477_v41 = vsel %vm6414_vm3, %v6223_v22, %v6222_v33  ;;  %v9437_v5 = vmax.f32 %v3822_v29, %v3823_v57  ;;  %v9439_v36 = vunpack.c.l.b16 %v7520_v48 }
 0x29c   : > { %v7395_v61 = vpack.c.bf16 %v9428_v52, %v9428_v52  ;;  %v3842_v13 = vrot.slane %v3841_v39, 2  ;;  %v4736_v3 = vrot.slane %v4735_v53, 4  ;;  %v6351_v8 = vunpack.c.l.b16 %v7518_v34 }
 0x29d   : > { %v7523_v4 = vpack.c.bf16 %v9430_v45, %v9430_v45  ;;  %v2635_v30 = vmul.f32 %v9230_v26, %v1811_v27  ;;  %v2763_v42 = vmul.f32 %v9230_v26, %v2323_v9  ;;  %v6478_v40 = vsel %vm6416_vm4, %v6224_v20, %v6477_v41 }
 0x29e   : > { %v4719_v1 = vrot.slane %v4718_v55, 1  ;;  %v4737_v16 = vmax.f32 %v4735_v53, %v4736_v3  ;;  %v2640_v6 = vmul.f32 %v9230_v26, %v7789_v50  ;;  %v7393_v51 = vpack.c.bf16 %v9437_v5, %v9437_v5  ;;  %v7918_v3 = vpop.f32.mrf.mxu1 }
 0x29f   : > { %v2898_v19 = vadd.f32 %v9210_v56, %v2635_v30  ;;  %v3026_v54 = vadd.f32 %v9210_v56, %v2763_v42  ;;  %v2768_v49 = vmul.f32 %v9230_v26, %v7917_v18  ;;  %v3843_v2 = vmax.f32 %v3841_v39, %v3842_v13 }
 0x2a0   : > { %v4738_v47 = vrot.slane %v4737_v16, 2  ;;  %v2903_v11 = vadd.f32 %v9210_v56, %v2640_v6  ;;  %v2638_v38 = vmul.f32 %v9230_v26, %v1824_v14  ;;  %v6589_v63 = vsel %vm6414_vm3, %v6351_v8, %v6350_v58 }
 0x2a1   : > { %v3154_v62 = vmax.f32 %v2898_v19, 0.0  ;;  %v3282_v17 = vmax.f32 %v3026_v54, 0.0  ;;  %v3031_v43 = vadd.f32 %v9210_v56, %v2768_v49  ;;  %v9459_v21 = vsel %vm6418_vm5, %v6225_v7, %v6478_v40  ;;  %v9481_v19 = vld [vmem:[%s10135_s2] ss:$0 sm:$0xff] }
 0x2a2   : > { %v4739_v60 = vmax.f32 %v4737_v16, %v4738_v47  ;;  %v3159_v0 = vmax.f32 %v2903_v11, 0.0  ;;  %v2901_v29 = vadd.f32 %v9210_v56, %v2638_v38  ;;  %v2766_v59 = vmul.f32 %v9230_v26, %v2336_v32  ;;  %v9470_v56 = vld [vmem:[%s10136_s3] ss:$0 sm:$0xff] }
 0x2a3   : > { %v3825_v23 = vsel %vm3341_vm2, %v3154_v62, -inf  ;;  %v4721_v12 = vsel %vm3341_vm2, %v3282_v17, -inf  ;;  %v3287_v25 = vmax.f32 %v3031_v43, 0.0  ;;  %v4720_v15 = vmax.f32 %v4718_v55, %v4719_v1  ;;  %v1827_v62 = vpop.f32.mrf.mxu0 }
 0x2a4   : > { %v3844_v46 = vrot.slane %v3843_v2, 1  ;;  %v3826_v27 = vrot.slane %v3825_v23, 4  ;;  %v4722_v35 = vrot.slane %v4721_v12, 4  ;;  %v3860_v10 = vsel %vm3341_vm2, %v3159_v0, -inf }
 0x2a5   : > { %v4756_v28 = vsel %vm3341_vm2, %v3287_v25, -inf  ;;  %v3157_v37 = vmax.f32 %v2901_v29, 0.0  ;;  %v3029_v44 = vadd.f32 %v9470_v56, %v2766_v59  ;;  %v4740_v22 = vrot.slane %v4739_v60, 1  ;;  %v7793_v52 = vpop.f32.mrf.mxu0 }
 0x2a6   : > { %v3827_v57 = vmax.f32 %v3825_v23, %v3826_v27  ;;  %v4723_v48 = vmax.f32 %v4721_v12, %v4722_v35  ;;  %v3861_v39 = vrot.slane %v3860_v10, 4  ;;  %v4757_v9 = vrot.slane %v4756_v28, 4  ;;  %v2339_v27 = vpop.f32.mrf.mxu1 }
 0x2a7   : > { %v3846_v33 = vsel %vm3341_vm2, %v3157_v37, -inf  ;;  %v3285_v34 = vmax.f32 %v3029_v44, 0.0  ;;  %v2641_v53 = vmul.f32 %v9230_v26, %v7790_v31  ;;  %v6590_v50 = vsel %vm6416_vm4, %v6352_v24, %v6589_v63 }
 0x2a8   : > { %v3828_v20 = vrot.slane %v3827_v57, 2  ;;  %v4724_v55 = vrot.slane %v4723_v48, 2  ;;  %v3862_v58 = vmax.f32 %v3860_v10, %v3861_v39  ;;  %v7521_v7 = vpack.c.bf16 %v4720_v15, %v4720_v15 }
 0x2a9   : > { %v3845_v41 = vmax.f32 %v3843_v2, %v3844_v46  ;;  %v4742_v5 = vsel %vm3341_vm2, %v3285_v34, -inf  ;;  %v2904_v13 = vadd.f32 %v9470_v56, %v2641_v53  ;;  %v4758_v30 = vmax.f32 %v4756_v28, %v4757_v9  ;;  %v7921_v9 = vpop.f32.mrf.mxu1 }
 0x2aa   : > { %v3829_v18 = vmax.f32 %v3827_v57, %v3828_v20  ;;  %v4725_v8 = vmax.f32 %v4723_v48, %v4724_v55  ;;  %v3847_v42 = vrot.slane %v3846_v33, 4  ;;  %v4741_v14 = vmax.f32 %v4739_v60, %v4740_v22  ;;  %v1840_v20 = vpop.f32.mrf.mxu0 }
 0x2ab   : > { %v3863_v40 = vrot.slane %v3862_v58, 2  ;;  %v4743_v1 = vrot.slane %v4742_v5, 4  ;;  %v3160_v26 = vmax.f32 %v2904_v13, 0.0  ;;  %v6226_v16 = vunpack.c.l.b16 %v7393_v51 }
 0x2ac   : > { %v3830_v24 = vrot.slane %v3829_v18, 1  ;;  %v4726_v6 = vrot.slane %v4725_v8, 1  ;;  %v2769_v54 = vmul.f32 %v9481_v19, %v7918_v3  ;;  %v6354_v49 = vunpack.c.l.b16 %v7521_v7 }
 0x2ad   : > { %v6591_v2 = vsel %vm6418_vm5, %v9439_v36, %v6590_v50  ;;  %v7396_v47 = vpack.c.bf16 %v3845_v41, %v3845_v41  ;;  %v3867_v11 = vsel %vm3341_vm2, %v3160_v26, -inf  ;;  %v4759_v63 = vrot.slane %v4758_v30, 2 }
 0x2ae   : > { %v3831_v38 = vmax.f32 %v3829_v18, %v3830_v24  ;;  %v4727_v32 = vmax.f32 %v4725_v8, %v4726_v6  ;;  %v3848_v51 = vmax.f32 %v3846_v33, %v3847_v42  ;;  %v7524_v17 = vpack.c.bf16 %v4741_v14, %v4741_v14 }
 0x2af   : > { %v3864_v43 = vmax.f32 %v3862_v58, %v3863_v40  ;;  %v4744_v60 = vmax.f32 %v4742_v5, %v4743_v1  ;;  %v3032_v0 = vadd.f32 %v9470_v56, %v2769_v54  ;;  %v6228_v29 = vunpack.c.l.b16 %v7395_v61  ;;  %v2352_v40 = vpop.f32.mrf.mxu1 }
 0x2b0   : > { %v7394_v23 = vpack.c.bf16 %v3831_v38, %v3831_v38  ;;  %v7522_v12 = vpack.c.bf16 %v4727_v32, %v4727_v32  ;;  %v3868_v36 = vrot.slane %v3867_v11, 4  ;;  %v6356_v25 = vunpack.c.l.b16 %v7523_v4 }
 0x2b1   : > { %v6480_v59 = vsel %vm6420_vm6, %v6226_v16, %v9459_v21  ;;  %v6592_v15 = vsel %vm6420_vm6, %v6354_v49, %v6591_v2  ;;  %v3288_v46 = vmax.f32 %v3032_v0, 0.0  ;;  %v4760_v10 = vmax.f32 %v4758_v30, %v4759_v63 }
 0x2b2   : > { %v6227_v35 = vunpack.c.l.b16 %v7394_v23  ;;  %v6355_v31 = vunpack.c.l.b16 %v7522_v12  ;;  %v3849_v28 = vrot.slane %v3848_v51, 2  ;;  %v6229_v61 = vunpack.c.l.b16 %v7396_v47  ;;  %v7794_v47 = vpop.f32.mrf.mxu0 }
 0x2b3   : > { %v6357_v37 = vunpack.c.l.b16 %v7524_v17  ;;  %v3865_v44 = vrot.slane %v3864_v43, 1  ;;  %v4745_v22 = vrot.slane %v4744_v60, 2  ;;  %v3869_v4 = vmax.f32 %v3867_v11, %v3868_v36 }
 0x2b4   : > { %v6481_v57 = vsel %vm6422_vm7, %v6227_v35, %v6480_v59  ;;  %v6593_v45 = vsel %vm6422_vm7, %v6355_v31, %v6592_v15  ;;  %v4763_v21 = vsel %vm3341_vm2, %v3288_v46, -inf  ;;  %v4761_v53 = vrot.slane %v4760_v10, 1 }
 0x2b5   : > { %v6482_v48 = vsel %vm6424_vm8, %v6228_v29, %v6481_v57  ;;  %v6594_v39 = vsel %vm6424_vm8, %v6356_v25, %v6593_v45  ;;  %v3850_v50 = vmax.f32 %v3848_v51, %v3849_v28  ;;  %v9504_v7 = vmax.f32 %v3864_v43, %v3865_v44 }
 0x2b6   : > { %v6483_v33 = vsel %vm6426_vm9, %v6229_v61, %v6482_v48  ;;  %v6595_v34 = vsel %vm6426_vm9, %v6357_v37, %v6594_v39  ;;  %v4764_v41 = vrot.slane %v4763_v21, 4  ;;  %v9506_v5 = vmax.f32 %v4744_v60, %v4745_v22 }
 0x2b7   : > { %v6653_v55 = vpack.c.b16 %v6483_v33, %v6483_v33  ;;  %v6669_v58 = vpack.c.b16 %v6595_v34, %v6595_v34  ;;  %v3870_v13 = vrot.slane %v3869_v4, 2  ;;  %v2639_v3 = vmul.f32 %v9481_v19, %v1827_v62 }
 0x2b8   : > { %v2767_v18 = vmul.f32 %v9481_v19, %v2339_v27  ;;  %v4765_v8 = vmax.f32 %v4763_v21, %v4764_v41  ;;  %v2644_v30 = vmul.f32 %v9481_v19, %v7793_v52  ;;  %v2772_v42 = vmul.f32 %v9481_v19, %v7921_v9 }
 0x2b9   : > { %6718 = vst.msk [vmem:[%s8607_s8 + $0x20] sm:$0xf] %vm6709_vm10, %v6653_v55  ;;  %6734 = vst.msk [vmem:[%s8607_s8 + $0x60] sm:$0xf] %vm6709_vm10, %v6669_v58  ;;  %v2642_v14 = vmul.f32 %v9481_v19, %v1840_v20  ;;  %v9517_v1 = vmax.f32 %v4760_v10, %v4761_v53  ;;  %v3851_v26 = vrot.slane %v3850_v50, 1  ;;  %v2902_v16 = vadd.f32 %v9470_v56, %v2639_v3  ;;  %v7922_v58 = vpop.f32.mrf.mxu1 }
 0x2ba   : > { %v3030_v24 = vadd.f32 %v9470_v56, %v2767_v18  ;;  %v4766_v6 = vrot.slane %v4765_v8, 2  ;;  %v2907_v54 = vadd.f32 %v9470_v56, %v2644_v30  ;;  %v3035_v49 = vadd.f32 %v9470_v56, %v2772_v42 }
 0x2bb   : > { %v2905_v2 = vadd.f32 %v9470_v56, %v2642_v14  ;;  %v4747_v11 = vrot.slane %v9506_v5, 1  ;;  %v3158_v38 = vmax.f32 %v2902_v16, 0.0  ;;  %v2770_v63 = vmul.f32 %v9481_v19, %v2352_v40 }
 0x2bc   : > { %v3286_v32 = vmax.f32 %v3030_v24, 0.0  ;;  %v3871_v51 = vmax.f32 %v3869_v4, %v3870_v13  ;;  %v3163_v62 = vmax.f32 %v2907_v54, 0.0  ;;  %v3291_v17 = vmax.f32 %v3035_v49, 0.0 }
 0x2bd   : > { %v3161_v43 = vmax.f32 %v2905_v2, 0.0  ;;  %v3853_v60 = vsel %vm3341_vm2, %v3158_v38, -inf  ;;  %v3033_v29 = vadd.f32 %v9470_v56, %v2770_v63  ;;  %v2645_v23 = vmul.f32 %v9481_v19, %v7794_v47 }
 0x2be   : > { %v4749_v0 = vsel %vm3341_vm2, %v3286_v32, -inf  ;;  %v4767_v12 = vmax.f32 %v4765_v8, %v4766_v6  ;;  %v3854_v36 = vrot.slane %v3853_v60, 4  ;;  %v3888_v59 = vsel %vm3341_vm2, %v3163_v62, -inf  ;;  %v2355_v62 = vpop.f32.mrf.mxu1 }
 0x2bf   : > { %v4750_v25 = vrot.slane %v4749_v0, 4  ;;  %v3889_v15 = vrot.slane %v3888_v59, 4  ;;  %v4784_v46 = vsel %vm3341_vm2, %v3291_v17, -inf  ;;  %v3874_v27 = vsel %vm3341_vm2, %v3161_v43, -inf }
 0x2c0   : > { %v3289_v35 = vmax.f32 %v3033_v29, 0.0  ;;  %v3872_v31 = vrot.slane %v3871_v51, 1  ;;  %v3855_v10 = vmax.f32 %v3853_v60, %v3854_v36  ;;  %v4785_v52 = vrot.slane %v4784_v46, 4 }
 0x2c1   : > { %v4751_v28 = vmax.f32 %v4749_v0, %v4750_v25  ;;  %v3890_v61 = vmax.f32 %v3888_v59, %v3889_v15  ;;  %v3875_v37 = vrot.slane %v3874_v27, 4  ;;  %v2908_v22 = vadd.f32 %v9470_v56, %v2645_v23 }
 0x2c2   : > { %v4770_v44 = vsel %vm3341_vm2, %v3289_v35, -inf  ;;  %v4768_v57 = vrot.slane %v4767_v12, 1  ;;  %v3856_v45 = vrot.slane %v3855_v10, 2  ;;  %v4786_v21 = vmax.f32 %v4784_v46, %v4785_v52  ;;  %v7925_v35 = vpop.f32.mrf.mxu1 }
 0x2c3   : > { %v4752_v4 = vrot.slane %v4751_v28, 2  ;;  %v3891_v48 = vrot.slane %v3890_v61, 2  ;;  %v3876_v39 = vmax.f32 %v3874_v27, %v3875_v37  ;;  %v4771_v9 = vrot.slane %v4770_v44, 4 }
 0x2c4   : > { %v3164_v33 = vmax.f32 %v2908_v22, 0.0  ;;  %v3852_v34 = vmax.f32 %v3850_v50, %v3851_v26  ;;  %v3857_v53 = vmax.f32 %v3855_v10, %v3856_v45  ;;  %v4787_v55 = vrot.slane %v4786_v21, 2  ;;  %v1843_v50 = vpop.f32.mrf.mxu0 }
 0x2c5   : > { %v4753_v20 = vmax.f32 %v4751_v28, %v4752_v4  ;;  %v3892_v41 = vmax.f32 %v3890_v61, %v3891_v48  ;;  %v3877_v13 = vrot.slane %v3876_v39, 2  ;;  %v4772_v3 = vmax.f32 %v4770_v44, %v4771_v9 }
 0x2c6   : > { %v3895_v18 = vsel %vm3341_vm2, %v3164_v33, -inf  ;;  %v4748_v8 = vmax.f32 %v9506_v5, %v4747_v11  ;;  %v3858_v30 = vrot.slane %v3857_v53, 1  ;;  %v4788_v14 = vmax.f32 %v4786_v21, %v4787_v55  ;;  %v7797_v29 = vpop.f32.mrf.mxu0 }
 0x2c7   : > { %v4754_v42 = vrot.slane %v4753_v20, 1  ;;  %v3873_v40 = vmax.f32 %v3871_v51, %v3872_v31  ;;  %v4769_v16 = vmax.f32 %v4767_v12, %v4768_v57  ;;  %v3896_v24 = vrot.slane %v3895_v18, 4 }
 0x2c8   : > { %v2773_v6 = vmul.f32 %v9481_v19, %v7922_v58  ;;  %v3893_v26 = vrot.slane %v3892_v41, 1  ;;  %v3878_v54 = vmax.f32 %v3876_v39, %v3877_v13  ;;  %v4773_v49 = vrot.slane %v4772_v3, 2  ;;  %v1856_v61 = vpop.f32.mrf.mxu0 }
 0x2c9   : > { %v7399_v2 = vpack.c.bf16 %v9504_v7, %v9504_v7  ;;  %v3859_v47 = vmax.f32 %v3857_v53, %v3858_v30  ;;  %v4755_v38 = vmax.f32 %v4753_v20, %v4754_v42  ;;  %v7527_v5 = vpack.c.bf16 %v9517_v1, %v9517_v1  ;;  %v2368_v53 = vpop.f32.mrf.mxu1 }
 0x2ca   : > { %v3036_v32 = vadd.f32 %v9470_v56, %v2773_v6  ;;  %v7397_v11 = vpack.c.bf16 %v3852_v34, %v3852_v34  ;;  %v7525_v63 = vpack.c.bf16 %v4748_v8, %v4748_v8  ;;  %v4789_v51 = vrot.slane %v4788_v14, 1  ;;  %v7798_v13 = vpop.f32.mrf.mxu0 }
 0x2cb   : > { %v7400_v17 = vpack.c.bf16 %v3873_v40, %v3873_v40  ;;  %v7528_v43 = vpack.c.bf16 %v4769_v16, %v4769_v16  ;;  %v3897_v60 = vmax.f32 %v3895_v18, %v3896_v24  ;;  %v9543_v23 = vmax.f32 %v3892_v41, %v3893_v26 }
 0x2cc   : > { %v3292_v0 = vmax.f32 %v3036_v32, 0.0  ;;  %v3879_v12 = vrot.slane %v3878_v54, 1  ;;  %v4774_v7 = vmax.f32 %v4772_v3, %v4773_v49  ;;  %v7398_v36 = vpack.c.bf16 %v3859_v47, %v3859_v47 }
 0x2cd   : > { %v7526_v25 = vpack.c.bf16 %v4755_v38, %v4755_v38  ;;  %v9546_v15 = vunpack.c.l.b16 %v7399_v2  ;;  %v9548_v1 = vunpack.c.l.b16 %v7527_v5  ;;  %v6230_v46 = vunpack.c.l.b16 %v7397_v11 }
 0x2ce   : > { %v4791_v59 = vsel %vm3341_vm2, %v3292_v0, -inf  ;;  %v9550_v27 = vmax.f32 %v4788_v14, %v4789_v51  ;;  %v6358_v31 = vunpack.c.l.b16 %v7525_v63  ;;  %v9552_v10 = vunpack.c.l.b16 %v7400_v17 }
 0x2cf   : > { %v9554_v28 = vunpack.c.l.b16 %v7528_v43  ;;  %v3898_v52 = vrot.slane %v3897_v60, 2  ;;  %v7403_v37 = vpack.c.bf16 %v9543_v23, %v9543_v23  ;;  %v3880_v44 = vmax.f32 %v3878_v54, %v3879_v12 }
 0x2d0   : > { %v4775_v22 = vrot.slane %v4774_v7, 1  ;;  %v4792_v57 = vrot.slane %v4791_v59, 4  ;;  %v6231_v45 = vunpack.c.l.b16 %v7398_v36  ;;  %v6359_v4 = vunpack.c.l.b16 %v7526_v25 }
 0x2d1   : > { %v2643_v21 = vmul.f32 %v9481_v19, %v1843_v50  ;;  %v2771_v48 = vmul.f32 %v9481_v19, %v2355_v62  ;;  %v7531_v39 = vpack.c.bf16 %v9550_v27, %v9550_v27  ;;  %v2648_v33 = vmul.f32 %v9481_v19, %v7797_v29 }
 0x2d2   : > { %v4793_v9 = vmax.f32 %v4791_v59, %v4792_v57  ;;  %v2776_v34 = vmul.f32 %v9481_v19, %v7925_v35  ;;  %v3899_v20 = vmax.f32 %v3897_v60, %v3898_v52  ;;  %v2646_v41 = vmul.f32 %v9481_v19, %v1856_v61 }
 0x2d3   : > { %v2906_v55 = vadd.f32 %v9470_v56, %v2643_v21  ;;  %v3034_v58 = vadd.f32 %v9470_v56, %v2771_v48  ;;  %v7401_v3 = vpack.c.bf16 %v3880_v44, %v3880_v44  ;;  %v2911_v8 = vadd.f32 %v9470_v56, %v2648_v33  ;;  %v7926_v21 = vpop.f32.mrf.mxu1 }
 0x2d4   : > { %v4794_v18 = vrot.slane %v4793_v9, 2  ;;  %v3039_v30 = vadd.f32 %v9470_v56, %v2776_v34  ;;  %v2909_v40 = vadd.f32 %v9470_v56, %v2646_v41  ;;  %v2774_v16 = vmul.f32 %v9481_v19, %v2368_v53 }
 0x2d5   : > { %v3162_v42 = vmax.f32 %v2906_v55, 0.0  ;;  %v3290_v14 = vmax.f32 %v3034_v58, 0.0  ;;  %v4776_v24 = vmax.f32 %v4774_v7, %v4775_v22  ;;  %v3167_v6 = vmax.f32 %v2911_v8, 0.0 }
 0x2d6   : > { %v3295_v50 = vmax.f32 %v3039_v30, 0.0  ;;  %v2649_v26 = vmul.f32 %v9481_v19, %v7798_v13  ;;  %v3165_v2 = vmax.f32 %v2909_v40, 0.0  ;;  %v3037_v47 = vadd.f32 %v9470_v56, %v2774_v16 }
 0x2d7   : > { %v3881_v54 = vsel %vm3341_vm2, %v3162_v42, -inf  ;;  %v4777_v49 = vsel %vm3341_vm2, %v3290_v14, -inf  ;;  %v4795_v38 = vmax.f32 %v4793_v9, %v4794_v18  ;;  %v3916_v11 = vsel %vm3341_vm2, %v3167_v6, -inf  ;;  %v1859_v18 = vpop.f32.mrf.mxu0  ;;  %v2371_v42 = vpop.f32.mrf.mxu1 }
 0x2d8   : > { %v3882_v32 = vrot.slane %v3881_v54, 4  ;;  %v4778_v5 = vrot.slane %v4777_v49, 4  ;;  %v3917_v63 = vrot.slane %v3916_v11, 4  ;;  %v4812_v51 = vsel %vm3341_vm2, %v3295_v50, -inf }
 0x2d9   : > { %v3902_v62 = vsel %vm3341_vm2, %v3165_v2, -inf  ;;  %v3293_v17 = vmax.f32 %v3037_v47, 0.0  ;;  %v6484_v43 = vsel %vm6414_vm3, %v6231_v45, %v6230_v46  ;;  %v6596_v60 = vsel %vm6414_vm3, %v6359_v4, %v6358_v31  ;;  %v7801_v47 = vpop.f32.mrf.mxu0 }
 0x2da   : > { %v3883_v0 = vmax.f32 %v3881_v54, %v3882_v32  ;;  %v4779_v29 = vmax.f32 %v4777_v49, %v4778_v5  ;;  %v3900_v23 = vrot.slane %v3899_v20, 1  ;;  %v4813_v12 = vrot.slane %v4812_v51, 4 }
 0x2db   : > { %v4798_v7 = vsel %vm3341_vm2, %v3293_v17, -inf  ;;  %v2912_v36 = vadd.f32 %v9470_v56, %v2649_v26  ;;  %v4796_v25 = vrot.slane %v4795_v38, 1  ;;  %v3903_v52 = vrot.slane %v3902_v62, 4 }
 0x2dc   : > { %v3884_v59 = vrot.slane %v3883_v0, 2  ;;  %v4780_v35 = vrot.slane %v4779_v29, 2  ;;  %v6485_v61 = vsel %vm6416_vm4, %v9546_v15, %v6484_v43  ;;  %v6597_v46 = vsel %vm6416_vm4, %v9548_v1, %v6596_v60 }
 0x2dd   : > { %v6236_v44 = vunpack.c.l.b16 %v7403_v37  ;;  %v3918_v31 = vmax.f32 %v3916_v11, %v3917_v63  ;;  %v4799_v45 = vrot.slane %v4798_v7, 4  ;;  %v3168_v4 = vmax.f32 %v2912_v36, 0.0  ;;  %v7929_v63 = vpop.f32.mrf.mxu1  ;;  %v1872_v36 = vpop.f32.mrf.mxu0 }
 0x2de   : > { %v3885_v22 = vmax.f32 %v3883_v0, %v3884_v59  ;;  %v4781_v57 = vmax.f32 %v4779_v29, %v4780_v35  ;;  %v6234_v48 = vunpack.c.l.b16 %v7401_v3  ;;  %v7529_v9 = vpack.c.bf16 %v4776_v24, %v4776_v24 }
 0x2df   : > { %v3901_v33 = vmax.f32 %v3899_v20, %v3900_v23  ;;  %v4814_v34 = vmax.f32 %v4812_v51, %v4813_v12  ;;  %v4797_v53 = vmax.f32 %v4795_v38, %v4796_v25  ;;  %v3904_v41 = vmax.f32 %v3902_v62, %v3903_v52 }
 0x2e0   : > { %v3886_v55 = vrot.slane %v3885_v22, 1  ;;  %v4782_v58 = vrot.slane %v4781_v57, 1  ;;  %v6486_v15 = vsel %vm6418_vm5, %v9552_v10, %v6485_v61  ;;  %v6598_v1 = vsel %vm6418_vm5, %v9554_v28, %v6597_v46  ;;  %v2384_v61 = vpop.f32.mrf.mxu1 }
 0x2e1   : > { %v3919_v37 = vrot.slane %v3918_v31, 2  ;;  %v2777_v13 = vmul.f32 %v9481_v19, %v7926_v21  ;;  %v4800_v3 = vmax.f32 %v4798_v7, %v4799_v45  ;;  %v3923_v20 = vsel %vm3341_vm2, %v3168_v4, -inf }
 0x2e2   : > { %v3887_v8 = vmax.f32 %v3885_v22, %v3886_v55  ;;  %v4783_v30 = vmax.f32 %v4781_v57, %v4782_v58  ;;  %v6362_v14 = vunpack.c.l.b16 %v7529_v9  ;;  %v7404_v40 = vpack.c.bf16 %v3901_v33, %v3901_v33 }
 0x2e3   : > { %v4815_v16 = vrot.slane %v4814_v34, 2  ;;  %v3040_v24 = vadd.f32 %v9470_v56, %v2777_v13  ;;  %v7532_v6 = vpack.c.bf16 %v4797_v53, %v4797_v53  ;;  %v3905_v26 = vrot.slane %v3904_v41, 2  ;;  %v7802_v53 = vpop.f32.mrf.mxu0 }
 0x2e4   : > { %v7402_v10 = vpack.c.bf16 %v3887_v8, %v3887_v8  ;;  %v7530_v50 = vpack.c.bf16 %v4783_v30, %v4783_v30  ;;  %v6364_v28 = vunpack.c.l.b16 %v7531_v39  ;;  %v9596_v54 = vmax.f32 %v3918_v31, %v3919_v37 }
 0x2e5   : > { %v3924_v49 = vrot.slane %v3923_v20, 4  ;;  %v3296_v2 = vmax.f32 %v3040_v24, 0.0  ;;  %v6487_v38 = vsel %vm6420_vm6, %v6234_v48, %v6486_v15  ;;  %v4801_v11 = vrot.slane %v4800_v3, 2 }
 0x2e6   : > { %v6235_v32 = vunpack.c.l.b16 %v7402_v10  ;;  %v6363_v5 = vunpack.c.l.b16 %v7530_v50  ;;  %v6599_v51 = vsel %vm6420_vm6, %v6362_v14, %v6598_v1  ;;  %v6237_v62 = vunpack.c.l.b16 %v7404_v40 }
 0x2e7   : > { %v9600_v17 = vmax.f32 %v4814_v34, %v4815_v16  ;;  %v4819_v43 = vsel %vm3341_vm2, %v3296_v2, -inf  ;;  %v6365_v27 = vunpack.c.l.b16 %v7532_v6  ;;  %v9605_v0 = vmax.f32 %v3904_v41, %v3905_v26 }
 0x2e8   : > { %v6488_v39 = vsel %vm6422_vm7, %v6235_v32, %v6487_v38  ;;  %v6600_v60 = vsel %vm6422_vm7, %v6363_v5, %v6599_v51  ;;  %v3921_v12 = vrot.slane %v9596_v54, 1  ;;  %v3925_v7 = vmax.f32 %v3923_v20, %v3924_v49 }
 0x2e9   : > { %v6489_v29 = vsel %vm6424_vm8, %v6236_v44, %v6488_v39  ;;  %v6601_v23 = vsel %vm6424_vm8, %v6364_v28, %v6600_v60  ;;  %v9612_v35 = vmax.f32 %v4800_v3, %v4801_v11  ;;  %v4820_v52 = vrot.slane %v4819_v43, 4 }
 0x2ea   : > { %v6490_v25 = vsel %vm6426_vm9, %v6237_v62, %v6489_v29  ;;  %v6602_v59 = vsel %vm6426_vm9, %v6365_v27, %v6601_v23  ;;  %v4817_v44 = vrot.slane %v9600_v17, 1  ;;  %v2647_v22 = vmul.f32 %v9481_v19, %v1859_v18 }
 0x2eb   : > { %v6654_v46 = vpack.c.b16 %v6490_v25, %v6490_v25  ;;  %v6670_v31 = vpack.c.b16 %v6602_v59, %v6602_v59  ;;  %v3907_v57 = vrot.slane %v9605_v0, 1  ;;  %v4821_v45 = vmax.f32 %v4819_v43, %v4820_v52 }
 0x2ec   : > { %v2775_v4 = vmul.f32 %v9481_v19, %v2371_v42  ;;  %v2652_v21 = vmul.f32 %v9481_v19, %v7801_v47  ;;  %v2910_v48 = vadd.f32 %v9470_v56, %v2647_v22  ;;  %v2780_v9 = vmul.f32 %v9481_v19, %v7929_v63 }
 0x2ed   : > { %6719 = vst.msk [vmem:[%s8607_s8 + $0x24] sm:$0xf] %vm6709_vm10, %v6654_v46  ;;  %6735 = vst.msk [vmem:[%s8607_s8 + $0x64] sm:$0xf] %vm6709_vm10, %v6670_v31  ;;  %v2650_v33 = vmul.f32 %v9481_v19, %v1872_v36  ;;  %v2778_v34 = vmul.f32 %v9481_v19, %v2384_v61  ;;  %v4803_v55 = vrot.slane %v9612_v35, 1  ;;  %v3926_v58 = vrot.slane %v3925_v7, 2  ;;  %v7930_v46 = vpop.f32.mrf.mxu1 }
 0x2ee   : > { %v3038_v41 = vadd.f32 %v9470_v56, %v2775_v4  ;;  %v2915_v15 = vadd.f32 %v9470_v56, %v2652_v21  ;;  %v3166_v1 = vmax.f32 %v2910_v48, 0.0  ;;  %v3043_v37 = vadd.f32 %v9470_v56, %v2780_v9 }
 0x2ef   : > { %v2913_v13 = vadd.f32 %v9470_v56, %v2650_v33  ;;  %v3041_v18 = vadd.f32 %v9470_v56, %v2778_v34  ;;  %v4822_v8 = vrot.slane %v4821_v45, 2  ;;  %v2653_v20 = vmul.f32 %v9481_v19, %v7802_v53 }
 0x2f0   : > { %v3294_v30 = vmax.f32 %v3038_v41, 0.0  ;;  %v3171_v3 = vmax.f32 %v2915_v15, 0.0  ;;  %v3909_v42 = vsel %vm3341_vm2, %v3166_v1, -inf  ;;  %v3299_v14 = vmax.f32 %v3043_v37, 0.0  ;;  %v1875_v15 = vpop.f32.mrf.mxu0 }
 0x2f1   : > { %v3169_v40 = vmax.f32 %v2913_v13, 0.0  ;;  %v3297_v16 = vmax.f32 %v3041_v18, 0.0  ;;  %v3927_v24 = vmax.f32 %v3925_v7, %v3926_v58  ;;  %v3910_v6 = vrot.slane %v3909_v42, 4 }
 0x2f2   : > { %v4805_v10 = vsel %vm3341_vm2, %v3294_v30, -inf  ;;  %v3944_v50 = vsel %vm3341_vm2, %v3171_v3, -inf  ;;  %v4840_v49 = vsel %vm3341_vm2, %v3299_v14, -inf  ;;  %v4823_v47 = vmax.f32 %v4821_v45, %v4822_v8 }
 0x2f3   : > { %v4806_v26 = vrot.slane %v4805_v10, 4  ;;  %v3945_v28 = vrot.slane %v3944_v50, 4  ;;  %v3930_v2 = vsel %vm3341_vm2, %v3169_v40, -inf  ;;  %v3911_v38 = vmax.f32 %v3909_v42, %v3910_v6  ;;  %v7805_v42 = vpop.f32.mrf.mxu0 }
 0x2f4   : > { %v4841_v32 = vrot.slane %v4840_v49, 4  ;;  %v3931_v5 = vrot.slane %v3930_v2, 4  ;;  %v4826_v51 = vsel %vm3341_vm2, %v3297_v16, -inf  ;;  %v2916_v62 = vadd.f32 %v9470_v56, %v2653_v20 }
 0x2f5   : > { %v4807_v11 = vmax.f32 %v4805_v10, %v4806_v26  ;;  %v3946_v63 = vmax.f32 %v3944_v50, %v3945_v28  ;;  %v3928_v43 = vrot.slane %v3927_v24, 1  ;;  %v3912_v27 = vrot.slane %v3911_v38, 2 }
 0x2f6   : > { %v4842_v39 = vmax.f32 %v4840_v49, %v4841_v32  ;;  %v3932_v60 = vmax.f32 %v3930_v2, %v3931_v5  ;;  %v4827_v7 = vrot.slane %v4826_v51, 4  ;;  %v3172_v36 = vmax.f32 %v2916_v62, 0.0 }
 0x2f7   : > { %v4808_v29 = vrot.slane %v4807_v11, 2  ;;  %v3947_v23 = vrot.slane %v3946_v63, 2  ;;  %v4824_v25 = vrot.slane %v4823_v47, 1  ;;  %v3913_v59 = vmax.f32 %v3911_v38, %v3912_v27 }
 0x2f8   : > { %v4843_v52 = vrot.slane %v4842_v39, 2  ;;  %v3933_v61 = vrot.slane %v3932_v60, 2  ;;  %v4828_v45 = vmax.f32 %v4826_v51, %v4827_v7  ;;  %v3951_v4 = vsel %vm3341_vm2, %v3172_v36, -inf }
 0x2f9   : > { %v4809_v31 = vmax.f32 %v4807_v11, %v4808_v29  ;;  %v3948_v22 = vmax.f32 %v3946_v63, %v3947_v23  ;;  %v3922_v21 = vmax.f32 %v9596_v54, %v3921_v12  ;;  %v4818_v48 = vmax.f32 %v9600_v17, %v4817_v44  ;;  %v1888_v63 = vpop.f32.mrf.mxu0 }
 0x2fa   : > { %v3908_v9 = vmax.f32 %v9605_v0, %v3907_v57  ;;  %v3914_v33 = vrot.slane %v3913_v59, 1  ;;  %v4804_v34 = vmax.f32 %v9612_v35, %v4803_v55  ;;  %v3929_v53 = vmax.f32 %v3927_v24, %v3928_v43  ;;  %v2387_v57 = vpop.f32.mrf.mxu1 }
 0x2fb   : > { %v4844_v58 = vmax.f32 %v4842_v39, %v4843_v52  ;;  %v2781_v41 = vmul.f32 %v9481_v19, %v7930_v46  ;;  %v4825_v1 = vmax.f32 %v4823_v47, %v4824_v25  ;;  %v3934_v37 = vmax.f32 %v3932_v60, %v3933_v61 }
 0x2fc   : > { %v3952_v13 = vrot.slane %v3951_v4, 4  ;;  %v4810_v18 = vrot.slane %v4809_v31, 1  ;;  %v3949_v8 = vrot.slane %v3948_v22, 1  ;;  %v4829_v54 = vrot.slane %v4828_v45, 2  ;;  %v7933_v47 = vpop.f32.mrf.mxu1 }
 0x2fd   : > { %v3044_v12 = vadd.f32 %v9470_v56, %v2781_v41  ;;  %v7407_v30 = vpack.c.bf16 %v3922_v21, %v3922_v21  ;;  %v7535_v17 = vpack.c.bf16 %v4818_v48, %v4818_v48  ;;  %v7405_v44 = vpack.c.bf16 %v3908_v9, %v3908_v9 }
 0x2fe   : > { %v3915_v0 = vmax.f32 %v3913_v59, %v3914_v33  ;;  %v7533_v3 = vpack.c.bf16 %v4804_v34, %v4804_v34  ;;  %v7408_v35 = vpack.c.bf16 %v3929_v53, %v3929_v53  ;;  %v4845_v55 = vrot.slane %v4844_v58, 1  ;;  %v2400_v52 = vpop.f32.mrf.mxu1 }
 0x2ff   : > { %v3300_v20 = vmax.f32 %v3044_v12, 0.0  ;;  %v7536_v14 = vpack.c.bf16 %v4825_v1, %v4825_v1  ;;  %v3935_v40 = vrot.slane %v3934_v37, 1  ;;  %v3953_v16 = vmax.f32 %v3951_v4, %v3952_v13 }
 0x300   : > { %v4811_v24 = vmax.f32 %v4809_v31, %v4810_v18  ;;  %v3950_v6 = vmax.f32 %v3948_v22, %v3949_v8  ;;  %v4830_v10 = vmax.f32 %v4828_v45, %v4829_v54  ;;  %v9653_v26 = vunpack.c.l.b16 %v7407_v30  ;;  %v7806_v45 = vpop.f32.mrf.mxu0 }
 0x301   : > { %v4847_v50 = vsel %vm3341_vm2, %v3300_v20, -inf  ;;  %v9655_v28 = vunpack.c.l.b16 %v7535_v17  ;;  %v6238_v49 = vunpack.c.l.b16 %v7405_v44  ;;  %v7406_v2 = vpack.c.bf16 %v3915_v0, %v3915_v0 }
 0x302   : > { %v6366_v38 = vunpack.c.l.b16 %v7533_v3  ;;  %v9657_v32 = vunpack.c.l.b16 %v7408_v35  ;;  %v9659_v5 = vmax.f32 %v4844_v58, %v4845_v55  ;;  %v4848_v11 = vrot.slane %v4847_v50, 4 }
 0x303   : > { %v9661_v51 = vunpack.c.l.b16 %v7536_v14  ;;  %v3936_v62 = vmax.f32 %v3934_v37, %v3935_v40  ;;  %v3954_v43 = vrot.slane %v3953_v16, 2  ;;  %v2651_v27 = vmul.f32 %v9481_v19, %v1875_v15 }
 0x304   : > { %v7534_v39 = vpack.c.bf16 %v4811_v24, %v4811_v24  ;;  %v7411_v60 = vpack.c.bf16 %v3950_v6, %v3950_v6  ;;  %v4831_v29 = vrot.slane %v4830_v10, 1  ;;  %v4849_v23 = vmax.f32 %v4847_v50, %v4848_v11 }
 0x305   : > { %v6239_v7 = vunpack.c.l.b16 %v7406_v2  ;;  %v2914_v36 = vadd.f32 %v9470_v56, %v2651_v27  ;;  %v2779_v25 = vmul.f32 %v9481_v19, %v2387_v57  ;;  %v2656_v59 = vmul.f32 %v9481_v19, %v7805_v42 }
 0x306   : > { %v7539_v61 = vpack.c.bf16 %v9659_v5, %v9659_v5  ;;  %v4850_v46 = vrot.slane %v4849_v23, 2  ;;  %v2784_v31 = vmul.f32 %v9481_v19, %v7933_v47  ;;  %v2654_v22 = vmul.f32 %v9481_v19, %v1888_v63  ;;  %v7934_v63 = vpop.f32.mrf.mxu1 }
 0x307   : > { %v7409_v4 = vpack.c.bf16 %v3936_v62, %v3936_v62  ;;  %v3170_v21 = vmax.f32 %v2914_v36, 0.0  ;;  %v3042_v48 = vadd.f32 %v9470_v56, %v2779_v25  ;;  %v2919_v9 = vadd.f32 %v9470_v56, %v2656_v59 }
 0x308   : > { %v3955_v33 = vmax.f32 %v3953_v16, %v3954_v43  ;;  %v3047_v34 = vadd.f32 %v9470_v56, %v2784_v31  ;;  %v2917_v53 = vadd.f32 %v9470_v56, %v2654_v22  ;;  %v2782_v58 = vmul.f32 %v9481_v19, %v2400_v52  ;;  %v1891_v31 = vpop.f32.mrf.mxu0 }
 0x309   : > { %v3937_v41 = vsel %vm3341_vm2, %v3170_v21, -inf  ;;  %v3298_v15 = vmax.f32 %v3042_v48, 0.0  ;;  %v3175_v1 = vmax.f32 %v2919_v9, 0.0  ;;  %v2657_v37 = vmul.f32 %v9481_v19, %v7806_v45 }
 0x30a   : > { %v4851_v13 = vmax.f32 %v4849_v23, %v4850_v46  ;;  %v3938_v18 = vrot.slane %v3937_v41, 4  ;;  %v3303_v8 = vmax.f32 %v3047_v34, 0.0  ;;  %v3173_v54 = vmax.f32 %v2917_v53, 0.0 }
 0x30b   : > { %v4833_v12 = vsel %vm3341_vm2, %v3298_v15, -inf  ;;  %v3972_v30 = vsel %vm3341_vm2, %v3175_v1, -inf  ;;  %v3045_v17 = vadd.f32 %v9470_v56, %v2782_v58  ;;  %v2920_v44 = vadd.f32 %v9470_v56, %v2657_v37 }
 0x30c   : > { %v6367_v0 = vunpack.c.l.b16 %v7534_v39  ;;  %v9682_v57 = vunpack.c.l.b16 %v7411_v60  ;;  %v3939_v3 = vmax.f32 %v3937_v41, %v3938_v18  ;;  %v4834_v35 = vrot.slane %v4833_v12, 4  ;;  %v7809_v18 = vpop.f32.mrf.mxu0 }
 0x30d   : > { %v4832_v55 = vmax.f32 %v4830_v10, %v4831_v29  ;;  %v3956_v20 = vrot.slane %v3955_v33, 1  ;;  %v3973_v42 = vrot.slane %v3972_v30, 4  ;;  %v4868_v14 = vsel %vm3341_vm2, %v3303_v8, -inf }
 0x30e   : > { %v6491_v40 = vsel %vm6414_vm3, %v6239_v7, %v6238_v49  ;;  %v3940_v16 = vrot.slane %v3939_v3, 2  ;;  %v4835_v24 = vmax.f32 %v4833_v12, %v4834_v35  ;;  %v3958_v6 = vsel %vm3341_vm2, %v3173_v54, -inf }
 0x30f   : > { %v6242_v50 = vunpack.c.l.b16 %v7409_v4  ;;  %v4852_v2 = vrot.slane %v4851_v13, 1  ;;  %v3301_v47 = vmax.f32 %v3045_v17, 0.0  ;;  %v3176_v11 = vmax.f32 %v2920_v44, 0.0 }
 0x310   : > { %v6603_v62 = vsel %vm6414_vm3, %v6367_v0, %v6366_v38  ;;  %v3941_v43 = vmax.f32 %v3939_v3, %v3940_v16  ;;  %v4836_v27 = vrot.slane %v4835_v24, 2  ;;  %v4869_v10 = vrot.slane %v4868_v14, 4 }
 0x311   : > { %v6492_v39 = vsel %vm6416_vm4, %v9653_v26, %v6491_v40  ;;  %v3957_v60 = vmax.f32 %v3955_v33, %v3956_v20  ;;  %v3974_v29 = vmax.f32 %v3972_v30, %v3973_v42  ;;  %v3959_v49 = vrot.slane %v3958_v6, 4 }
 0x312   : > { %v7537_v23 = vpack.c.bf16 %v4832_v55, %v4832_v55  ;;  %v3942_v7 = vrot.slane %v3941_v43, 1  ;;  %v4837_v36 = vmax.f32 %v4835_v24, %v4836_v27  ;;  %v2785_v25 = vmul.f32 %v9481_v19, %v7934_v63 }
 0x313   : > { %v6604_v59 = vsel %vm6416_vm4, %v9655_v28, %v6603_v62  ;;  %v4853_v52 = vmax.f32 %v4851_v13, %v4852_v2  ;;  %v4854_v38 = vsel %vm3341_vm2, %v3301_v47, -inf  ;;  %v3979_v46 = vsel %vm3341_vm2, %v3176_v11, -inf  ;;  %v2403_v13 = vpop.f32.mrf.mxu1 }
 0x314   : > { %v3943_v22 = vmax.f32 %v3941_v43, %v3942_v7  ;;  %v4838_v45 = vrot.slane %v4837_v36, 1  ;;  %v4870_v26 = vmax.f32 %v4868_v14, %v4869_v10  ;;  %v3048_v4 = vadd.f32 %v9470_v56, %v2785_v25  ;;  %v1904_v14 = vpop.f32.mrf.mxu0 }
 0x315   : > { %v6493_v21 = vsel %vm6418_vm5, %v9657_v32, %v6492_v39  ;;  %v7412_v48 = vpack.c.bf16 %v3957_v60, %v3957_v60  ;;  %v3975_v9 = vrot.slane %v3974_v29, 2  ;;  %v3960_v33 = vmax.f32 %v3958_v6, %v3959_v49  ;;  %v7937_v42 = vpop.f32.mrf.mxu1 }
 0x316   : > { %v7410_v34 = vpack.c.bf16 %v3943_v22, %v3943_v22  ;;  %v4839_v53 = vmax.f32 %v4837_v36, %v4838_v45  ;;  %v4855_v28 = vrot.slane %v4854_v38, 4  ;;  %v3304_v58 = vmax.f32 %v3048_v4, 0.0  ;;  %v7810_v60 = vpop.f32.mrf.mxu0  ;;  %v9732_v36 = vld [vmem:[%s10136_s3] ss:$0 sm:$0xff] }
 0x317   : > { %v6372_v41 = vunpack.c.l.b16 %v7539_v61  ;;  %v6370_v15 = vunpack.c.l.b16 %v7537_v23  ;;  %v7540_v1 = vpack.c.bf16 %v4853_v52, %v4853_v52  ;;  %v3980_v37 = vrot.slane %v3979_v46, 4  ;;  %v2416_v39 = vpop.f32.mrf.mxu1 }
 0x318   : > { %v6605_v56 = vsel %vm6418_vm5, %v9661_v51, %v6604_v59  ;;  %v6243_v32 = vunpack.c.l.b16 %v7410_v34  ;;  %v7538_v8 = vpack.c.bf16 %v4839_v53, %v4839_v53  ;;  %v4871_v54 = vrot.slane %v4870_v26, 2 }
 0x319   : > { %v6494_v12 = vsel %vm6420_vm6, %v6242_v50, %v6493_v21  ;;  %v6245_v30 = vunpack.c.l.b16 %v7412_v48  ;;  %v9704_v17 = vmax.f32 %v3974_v29, %v3975_v9  ;;  %v4875_v44 = vsel %vm3341_vm2, %v3304_v58, -inf }
 0x31a   : > { %v6495_v5 = vsel %vm6422_vm7, %v6243_v32, %v6494_v12  ;;  %v6371_v61 = vunpack.c.l.b16 %v7538_v8  ;;  %v3961_v0 = vrot.slane %v3960_v33, 2  ;;  %v4856_v3 = vmax.f32 %v4854_v38, %v4855_v28  ;;  %v9740_v38 = vld [vmem:[%s10135_s2] ss:$0 sm:$0xff] }
 0x31b   : > { %v6606_v35 = vsel %vm6420_vm6, %v6370_v15, %v6605_v56  ;;  %v6373_v55 = vunpack.c.l.b16 %v7540_v1  ;;  %v6496_v51 = vsel %vm6424_vm8, %v9682_v57, %v6495_v5  ;;  %v3981_v20 = vmax.f32 %v3979_v46, %v3980_v37 }
 0x31c   : > { %v6497_v40 = vsel %vm6426_vm9, %v6245_v30, %v6496_v51  ;;  %v6607_v16 = vsel %vm6422_vm7, %v6371_v61, %v6606_v35  ;;  %v9713_v24 = vmax.f32 %v4870_v26, %v4871_v54  ;;  %v4876_v6 = vrot.slane %v4875_v44, 4  ;;  %v7938_v61 = vpop.f32.mrf.mxu1 }
 0x31d   : > { %v6655_v50 = vpack.c.b16 %v6497_v40, %v6497_v40  ;;  %v6608_v2 = vsel %vm6424_vm8, %v6372_v41, %v6607_v16  ;;  %v3977_v11 = vrot.slane %v9704_v17, 1  ;;  %v9718_v63 = vmax.f32 %v3960_v33, %v3961_v0 }
 0x31e   : > { %v6609_v47 = vsel %vm6426_vm9, %v6373_v55, %v6608_v2  ;;  %v4857_v57 = vrot.slane %v4856_v3, 2  ;;  %v2655_v43 = vmul.f32 %v9481_v19, %v1891_v31  ;;  %v2783_v27 = vmul.f32 %v9481_v19, %v2403_v13 }
 0x31f   : > { %6720 = vst.msk [vmem:[%s8607_s8 + $0x28] sm:$0xf] %vm6709_vm10, %v6655_v50  ;;  %v6671_v62 = vpack.c.b16 %v6609_v47, %v6609_v47  ;;  %v2660_v10 = vmul.f32 %v9481_v19, %v7809_v18  ;;  %v4873_v29 = vrot.slane %v9713_v24, 1  ;;  %v3982_v49 = vrot.slane %v3981_v20, 2 }
 0x320   : > { %v4877_v23 = vmax.f32 %v4875_v44, %v4876_v6  ;;  %v2788_v7 = vmul.f32 %v9481_v19, %v7937_v42  ;;  %v2918_v25 = vadd.f32 %v9732_v36, %v2655_v43  ;;  %v3046_v59 = vadd.f32 %v9732_v36, %v2783_v27 }
 0x321   : > { %6736 = vst.msk [vmem:[%s8607_s8 + $0x68] sm:$0xf] %vm6709_vm10, %v6671_v62  ;;  %v2923_v52 = vadd.f32 %v9732_v36, %v2660_v10  ;;  %v2658_v19 = vmul.f32 %v9740_v38, %v1904_v14  ;;  %v4858_v46 = vmax.f32 %v4856_v3, %v4857_v57  ;;  %v2786_v22 = vmul.f32 %v9740_v38, %v2416_v39 }
 0x322   : > { %v3051_v31 = vadd.f32 %v9732_v36, %v2788_v7  ;;  %v2661_v45 = vmul.f32 %v9740_v38, %v7810_v60  ;;  %v3174_v26 = vmax.f32 %v2918_v25, 0.0  ;;  %v3302_v4 = vmax.f32 %v3046_v59, 0.0 }
 0x323   : > { %v3179_v21 = vmax.f32 %v2923_v52, 0.0  ;;  %v2921_v48 = vadd.f32 %v9732_v36, %v2658_v19  ;;  %v4878_v9 = vrot.slane %v4877_v23, 2  ;;  %v3049_v34 = vadd.f32 %v9732_v36, %v2786_v22 }
 0x324   : > { %v3307_v33 = vmax.f32 %v3051_v31, 0.0  ;;  %v2924_v53 = vadd.f32 %v9732_v36, %v2661_v45  ;;  %v3965_v28 = vsel %vm3341_vm2, %v3174_v26, -inf  ;;  %v4861_v58 = vsel %vm3341_vm2, %v3302_v4, -inf  ;;  %v1907_v26 = vpop.f32.mrf.mxu0 }
 0x325   : > { %v4000_v41 = vsel %vm3341_vm2, %v3179_v21, -inf  ;;  %v3177_v15 = vmax.f32 %v2921_v48, 0.0  ;;  %v3983_v1 = vmax.f32 %v3981_v20, %v3982_v49  ;;  %v3966_v37 = vrot.slane %v3965_v28, 4 }
 0x326   : > { %v4862_v13 = vrot.slane %v4861_v58, 4  ;;  %v4001_v18 = vrot.slane %v4000_v41, 4  ;;  %v4896_v56 = vsel %vm3341_vm2, %v3307_v33, -inf  ;;  %v3305_v8 = vmax.f32 %v3049_v34, 0.0 }
 0x327   : > { %v3986_v32 = vsel %vm3341_vm2, %v3177_v15, -inf  ;;  %v3180_v54 = vmax.f32 %v2924_v53, 0.0  ;;  %v4879_v12 = vmax.f32 %v4877_v23, %v4878_v9  ;;  %v3967_v30 = vmax.f32 %v3965_v28, %v3966_v37  ;;  %v7813_v15 = vpop.f32.mrf.mxu0 }
 0x328   : > { %v4863_v44 = vmax.f32 %v4861_v58, %v4862_v13  ;;  %v4002_v5 = vmax.f32 %v4000_v41, %v4001_v18  ;;  %v4897_v0 = vrot.slane %v4896_v56, 4  ;;  %v3987_v3 = vrot.slane %v3986_v32, 4 }
 0x329   : > { %v4882_v35 = vsel %vm3341_vm2, %v3305_v8, -inf  ;;  %v4007_v55 = vsel %vm3341_vm2, %v3180_v54, -inf  ;;  %v3968_v51 = vrot.slane %v3967_v30, 2  ;;  %v3963_v40 = vrot.slane %v9718_v63, 1 }
 0x32a   : > { %v4864_v20 = vrot.slane %v4863_v44, 2  ;;  %v4003_v42 = vrot.slane %v4002_v5, 2  ;;  %v4883_v14 = vrot.slane %v4882_v35, 4  ;;  %v4859_v16 = vrot.slane %v4858_v46, 1 }
 0x32b   : > { %v3984_v6 = vrot.slane %v3983_v1, 1  ;;  %v2789_v50 = vmul.f32 %v9740_v38, %v7938_v61  ;;  %v4880_v2 = vrot.slane %v4879_v12, 1  ;;  %v4898_v47 = vmax.f32 %v4896_v56, %v4897_v0 }
 0x32c   : > { %v3988_v57 = vmax.f32 %v3986_v32, %v3987_v3  ;;  %v4008_v62 = vrot.slane %v4007_v55, 4  ;;  %v3978_v43 = vmax.f32 %v9704_v17, %v3977_v11  ;;  %v3969_v27 = vmax.f32 %v3967_v30, %v3968_v51 }
 0x32d   : > { %v4865_v10 = vmax.f32 %v4863_v44, %v4864_v20  ;;  %v3052_v39 = vadd.f32 %v9732_v36, %v2789_v50  ;;  %v4874_v60 = vmax.f32 %v9713_v24, %v4873_v29  ;;  %v4004_v49 = vmax.f32 %v4002_v5, %v4003_v42 }
 0x32e   : > { %v4884_v23 = vmax.f32 %v4882_v35, %v4883_v14  ;;  %v3964_v7 = vmax.f32 %v9718_v63, %v3963_v40  ;;  %v4860_v25 = vmax.f32 %v4858_v46, %v4859_v16  ;;  %v3985_v59 = vmax.f32 %v3983_v1, %v3984_v6  ;;  %v2419_v46 = vpop.f32.mrf.mxu1 }
 0x32f   : > { %v3308_v52 = vmax.f32 %v3052_v39, 0.0  ;;  %v4881_v19 = vmax.f32 %v4879_v12, %v4880_v2  ;;  %v4899_v31 = vrot.slane %v4898_v47, 2  ;;  %v3989_v22 = vrot.slane %v3988_v57, 2 }
 0x330   : > { %v4009_v45 = vmax.f32 %v4007_v55, %v4008_v62  ;;  %v7415_v4 = vpack.c.bf16 %v3978_v43, %v3978_v43  ;;  %v3970_v17 = vrot.slane %v3969_v27, 1  ;;  %v4866_v11 = vrot.slane %v4865_v10, 1  ;;  %v7941_v5 = vpop.f32.mrf.mxu1  ;;  %v1920_v55 = vpop.f32.mrf.mxu0 }
 0x331   : > { %v4903_v21 = vsel %vm3341_vm2, %v3308_v52, -inf  ;;  %v7543_v48 = vpack.c.bf16 %v4874_v60, %v4874_v60  ;;  %v4005_v9 = vrot.slane %v4004_v49, 1  ;;  %v4885_v24 = vrot.slane %v4884_v23, 2 }
 0x332   : > { %v7413_v29 = vpack.c.bf16 %v3964_v7, %v3964_v7  ;;  %v7541_v33 = vpack.c.bf16 %v4860_v25, %v4860_v25  ;;  %v7416_v34 = vpack.c.bf16 %v3985_v59, %v3985_v59  ;;  %v4904_v63 = vrot.slane %v4903_v21, 4  ;;  %v2432_v43 = vpop.f32.mrf.mxu1 }
 0x333   : > { %v7544_v53 = vpack.c.bf16 %v4881_v19, %v4881_v19  ;;  %v4900_v28 = vmax.f32 %v4898_v47, %v4899_v31  ;;  %v3990_v58 = vmax.f32 %v3988_v57, %v3989_v22  ;;  %v4010_v41 = vrot.slane %v4009_v45, 2 }
 0x334   : > { %v9765_v1 = vunpack.c.l.b16 %v7415_v4  ;;  %v3971_v37 = vmax.f32 %v3969_v27, %v3970_v17  ;;  %v4867_v13 = vmax.f32 %v4865_v10, %v4866_v11  ;;  %v9767_v18 = vunpack.c.l.b16 %v7543_v48 }
 0x335   : > { %v4006_v56 = vmax.f32 %v4004_v49, %v4005_v9  ;;  %v4886_v32 = vmax.f32 %v4884_v23, %v4885_v24  ;;  %v2659_v8 = vmul.f32 %v9740_v38, %v1907_v26  ;;  %v6246_v54 = vunpack.c.l.b16 %v7413_v29  ;;  %v7814_v49 = vpop.f32.mrf.mxu0 }
 0x336   : > { %v6374_v12 = vunpack.c.l.b16 %v7541_v33  ;;  %v9770_v30 = vunpack.c.l.b16 %v7416_v34  ;;  %v4905_v44 = vmax.f32 %v4903_v21, %v4904_v63  ;;  %v9772_v61 = vunpack.c.l.b16 %v7544_v53 }
 0x337   : > { %v4901_v0 = vrot.slane %v4900_v28, 1  ;;  %v3991_v3 = vrot.slane %v3990_v58, 1  ;;  %v4011_v35 = vmax.f32 %v4009_v45, %v4010_v41  ;;  %v7414_v51 = vpack.c.bf16 %v3971_v37, %v3971_v37 }
 0x338   : > { %v7542_v20 = vpack.c.bf16 %v4867_v13, %v4867_v13  ;;  %v2922_v42 = vadd.f32 %v9732_v36, %v2659_v8  ;;  %v2787_v14 = vmul.f32 %v9740_v38, %v2419_v46  ;;  %v7419_v40 = vpack.c.bf16 %v4006_v56, %v4006_v56 }
 0x339   : > { %v4887_v16 = vrot.slane %v4886_v32, 1  ;;  %v2664_v6 = vmul.f32 %v9740_v38, %v7813_v15  ;;  %v2792_v50 = vmul.f32 %v9740_v38, %v7941_v5  ;;  %v4906_v2 = vrot.slane %v4905_v44, 2 }
 0x33a   : > { %v3178_v47 = vmax.f32 %v2922_v42, 0.0  ;;  %v3050_v57 = vadd.f32 %v9732_v36, %v2787_v14  ;;  %v2662_v62 = vmul.f32 %v9740_v38, %v1920_v55  ;;  %v9780_v27 = vmax.f32 %v4900_v28, %v4901_v0 }
 0x33b   : > { %v3992_v10 = vmax.f32 %v3990_v58, %v3991_v3  ;;  %v2927_v39 = vadd.f32 %v9732_v36, %v2664_v6  ;;  %v3055_v60 = vadd.f32 %v9732_v36, %v2792_v50  ;;  %v6247_v23 = vunpack.c.l.b16 %v7414_v51  ;;  %v1923_v6 = vpop.f32.mrf.mxu0 }
 0x33c   : > { %v3993_v7 = vsel %vm3341_vm2, %v3178_v47, -inf  ;;  %v3306_v25 = vmax.f32 %v3050_v57, 0.0  ;;  %v2925_v59 = vadd.f32 %v9732_v36, %v2662_v62  ;;  %v6375_v52 = vunpack.c.l.b16 %v7542_v20 }
 0x33d   : > { %v3994_v19 = vrot.slane %v3993_v7, 4  ;;  %v3183_v31 = vmax.f32 %v2927_v39, 0.0  ;;  %v2790_v22 = vmul.f32 %v9740_v38, %v2432_v43  ;;  %v4907_v45 = vmax.f32 %v4905_v44, %v4906_v2  ;;  %v7942_v44 = vpop.f32.mrf.mxu1 }
 0x33e   : > { %v4889_v26 = vsel %vm3341_vm2, %v3306_v25, -inf  ;;  %v3311_v4 = vmax.f32 %v3055_v60, 0.0  ;;  %v2665_v17 = vmul.f32 %v9740_v38, %v7814_v49  ;;  %v4012_v11 = vrot.slane %v4011_v35, 1 }
 0x33f   : > { %v3995_v21 = vmax.f32 %v3993_v7, %v3994_v19  ;;  %v4890_v48 = vrot.slane %v4889_v26, 4  ;;  %v3181_v9 = vmax.f32 %v2925_v59, 0.0  ;;  %v9789_v24 = vunpack.c.l.b16 %v7419_v40  ;;  %v2435_v60 = vpop.f32.mrf.mxu1  ;;  %v7817_v59 = vpop.f32.mrf.mxu0 }
 0x340   : > { %v7547_v29 = vpack.c.bf16 %v9780_v27, %v9780_v27  ;;  %v4888_v33 = vmax.f32 %v4886_v32, %v4887_v16  ;;  %v4028_v34 = vsel %vm3341_vm2, %v3183_v31, -inf  ;;  %v6498_v63 = vsel %vm6414_vm3, %v6247_v23, %v6246_v54 }
 0x341   : > { %v3996_v46 = vrot.slane %v3995_v21, 2  ;;  %v4891_v53 = vmax.f32 %v4889_v26, %v4890_v48  ;;  %v3053_v28 = vadd.f32 %v9732_v36, %v2790_v22  ;;  %v6610_v58 = vsel %vm6414_vm3, %v6375_v52, %v6374_v12 }
 0x342   : > { %v4908_v41 = vrot.slane %v4907_v45, 1  ;;  %v4924_v15 = vsel %vm3341_vm2, %v3311_v4, -inf  ;;  %v2928_v37 = vadd.f32 %v9732_v36, %v2665_v17  ;;  %v4029_v8 = vrot.slane %v4028_v34, 4 }
 0x343   : > { %v3997_v13 = vmax.f32 %v3995_v21, %v3996_v46  ;;  %v4892_v56 = vrot.slane %v4891_v53, 2  ;;  %v4014_v32 = vsel %vm3341_vm2, %v3181_v9, -inf  ;;  %v6499_v54 = vsel %vm6416_vm4, %v9765_v1, %v6498_v63  ;;  %v7945_v9 = vpop.f32.mrf.mxu1  ;;  %v1936_v46 = vpop.f32.mrf.mxu0 }
 0x344   : > { %v7417_v5 = vpack.c.bf16 %v3992_v10, %v3992_v10  ;;  %v7545_v0 = vpack.c.bf16 %v4888_v33, %v4888_v33  ;;  %v4013_v3 = vmax.f32 %v4011_v35, %v4012_v11  ;;  %v4925_v12 = vrot.slane %v4924_v15, 4 }
 0x345   : > { %v3998_v55 = vrot.slane %v3997_v13, 1  ;;  %v4893_v51 = vmax.f32 %v4891_v53, %v4892_v56  ;;  %v3309_v20 = vmax.f32 %v3053_v28, 0.0  ;;  %v6611_v42 = vsel %vm6416_vm4, %v9767_v18, %v6610_v58 }
 0x346   : > { %v4909_v14 = vmax.f32 %v4907_v45, %v4908_v41  ;;  %v4015_v40 = vrot.slane %v4014_v32, 4  ;;  %v2793_v16 = vmul.f32 %v9740_v38, %v7942_v44  ;;  %v4030_v47 = vmax.f32 %v4028_v34, %v4029_v8  ;;  %v2448_v44 = vpop.f32.mrf.mxu1 }
 0x347   : > { %v3999_v50 = vmax.f32 %v3997_v13, %v3998_v55  ;;  %v4894_v2 = vrot.slane %v4893_v51, 1  ;;  %v3184_v57 = vmax.f32 %v2928_v37, 0.0  ;;  %v6250_v1 = vunpack.c.l.b16 %v7417_v5  ;;  %v7818_v55 = vpop.f32.mrf.mxu0 }
 0x348   : > { %v6500_v35 = vsel %vm6418_vm5, %v9770_v30, %v6499_v54  ;;  %v7420_v62 = vpack.c.bf16 %v4013_v3, %v4013_v3  ;;  %v3056_v43 = vadd.f32 %v9732_v36, %v2793_v16  ;;  %v4926_v39 = vmax.f32 %v4924_v15, %v4925_v12 }
 0x349   : > { %v7418_v27 = vpack.c.bf16 %v3999_v50, %v3999_v50  ;;  %v4895_v10 = vmax.f32 %v4893_v51, %v4894_v2  ;;  %v4910_v18 = vsel %vm3341_vm2, %v3309_v20, -inf  ;;  %v6378_v49 = vunpack.c.l.b16 %v7545_v0 }
 0x34a   : > { %v6612_v23 = vsel %vm6418_vm5, %v9772_v61, %v6611_v42  ;;  %v7548_v7 = vpack.c.bf16 %v4909_v14, %v4909_v14  ;;  %v4016_v25 = vmax.f32 %v4014_v32, %v4015_v40  ;;  %v4031_v31 = vrot.slane %v4030_v47, 2 }
 0x34b   : > { %v6251_v52 = vunpack.c.l.b16 %v7418_v27  ;;  %v7546_v19 = vpack.c.bf16 %v4895_v10, %v4895_v10  ;;  %v4035_v30 = vsel %vm3341_vm2, %v3184_v57, -inf  ;;  %v6380_v22 = vunpack.c.l.b16 %v7547_v29 }
 0x34c   : > { %v6501_v45 = vsel %vm6420_vm6, %v6250_v1, %v6500_v35  ;;  %v4911_v26 = vrot.slane %v4910_v18, 4  ;;  %v3312_v4 = vmax.f32 %v3056_v43, 0.0  ;;  %v6253_v17 = vunpack.c.l.b16 %v7420_v62 }
 0x34d   : > { %v6502_v11 = vsel %vm6422_vm7, %v6251_v52, %v6501_v45  ;;  %v6379_v21 = vunpack.c.l.b16 %v7546_v19  ;;  %v4927_v48 = vrot.slane %v4926_v39, 2  ;;  %v6613_v61 = vsel %vm6420_vm6, %v6378_v49, %v6612_v23 }
 0x34e   : > { %v6503_v33 = vsel %vm6424_vm8, %v9789_v24, %v6502_v11  ;;  %v4017_v34 = vrot.slane %v4016_v25, 2  ;;  %v4036_v63 = vrot.slane %v4035_v30, 4  ;;  %v6381_v29 = vunpack.c.l.b16 %v7548_v7 }
 0x34f   : > { %v6504_v53 = vsel %vm6426_vm9, %v6253_v17, %v6503_v33  ;;  %v6614_v28 = vsel %vm6422_vm7, %v6379_v21, %v6613_v61  ;;  %v9819_v58 = vmax.f32 %v4030_v47, %v4031_v31  ;;  %v4912_v37 = vmax.f32 %v4910_v18, %v4911_v26 }
 0x350   : > { %v6656_v41 = vpack.c.b16 %v6504_v53, %v6504_v53  ;;  %v6615_v15 = vsel %vm6424_vm8, %v6380_v22, %v6614_v28  ;;  %v4931_v13 = vsel %vm3341_vm2, %v3312_v4, -inf  ;;  %v9824_v56 = vmax.f32 %v4926_v39, %v4927_v48 }
 0x351   : > { %v6616_v24 = vsel %vm6426_vm9, %v6381_v29, %v6615_v15  ;;  %v2663_v8 = vmul.f32 %v9740_v38, %v1923_v6  ;;  %v2791_v32 = vmul.f32 %v9740_v38, %v2435_v60  ;;  %v4018_v5 = vmax.f32 %v4016_v25, %v4017_v34 }
 0x352   : > { %6721 = vst.msk [vmem:[%s8607_s8 + $0x2c] sm:$0xf] %vm6709_vm10, %v6656_v41  ;;  %v6672_v54 = vpack.c.b16 %v6616_v24, %v6616_v24  ;;  %v4037_v0 = vmax.f32 %v4035_v30, %v4036_v63  ;;  %v2668_v3 = vmul.f32 %v9740_v38, %v7817_v59  ;;  %v4932_v51 = vrot.slane %v4931_v13, 4  ;;  %v7946_v63 = vpop.f32.mrf.mxu1 }
 0x353   : > { %v2926_v12 = vadd.f32 %v9732_v36, %v2663_v8  ;;  %v3054_v20 = vadd.f32 %v9732_v36, %v2791_v32  ;;  %v2796_v42 = vmul.f32 %v9740_v38, %v7945_v9  ;;  %v4913_v14 = vrot.slane %v4912_v37, 2 }
 0x354   : > { %6737 = vst.msk [vmem:[%s8607_s8 + $0x6c] sm:$0xf] %vm6709_vm10, %v6672_v54  ;;  %v2931_v40 = vadd.f32 %v9732_v36, %v2668_v3  ;;  %v2666_v16 = vmul.f32 %v9740_v38, %v1936_v46  ;;  %v2794_v6 = vmul.f32 %v9740_v38, %v2448_v44  ;;  %v2669_v57 = vmul.f32 %v9740_v38, %v7818_v55 }
 0x355   : > { %v3182_v50 = vmax.f32 %v2926_v12, 0.0  ;;  %v3310_v2 = vmax.f32 %v3054_v20, 0.0  ;;  %v3059_v47 = vadd.f32 %v9732_v36, %v2796_v42  ;;  %v4038_v1 = vrot.slane %v4037_v0, 2 }
 0x356   : > { %v3187_v35 = vmax.f32 %v2931_v40, 0.0  ;;  %v2929_v62 = vadd.f32 %v9732_v36, %v2666_v16  ;;  %v3057_v43 = vadd.f32 %v9732_v36, %v2794_v6  ;;  %v4933_v27 = vmax.f32 %v4931_v13, %v4932_v51 }
 0x357   : > { %v4021_v10 = vsel %vm3341_vm2, %v3182_v50, -inf  ;;  %v4917_v39 = vsel %vm3341_vm2, %v3310_v2, -inf  ;;  %v3315_v18 = vmax.f32 %v3059_v47, 0.0  ;;  %v4914_v60 = vmax.f32 %v4912_v37, %v4913_v14 }
 0x358   : > { %v4022_v49 = vrot.slane %v4021_v10, 4  ;;  %v4918_v23 = vrot.slane %v4917_v39, 4  ;;  %v4056_v7 = vsel %vm3341_vm2, %v3187_v35, -inf  ;;  %v3185_v59 = vmax.f32 %v2929_v62, 0.0 }
 0x359   : > { %v4952_v25 = vsel %vm3341_vm2, %v3315_v18, -inf  ;;  %v3313_v52 = vmax.f32 %v3057_v43, 0.0  ;;  %v2932_v19 = vadd.f32 %v9732_v36, %v2669_v57  ;;  %v4057_v22 = vrot.slane %v4056_v7, 4 }
 0x35a   : > { %v4023_v31 = vmax.f32 %v4021_v10, %v4022_v49  ;;  %v4919_v30 = vmax.f32 %v4917_v39, %v4918_v23  ;;  %v4953_v45 = vrot.slane %v4952_v25, 4  ;;  %v4033_v26 = vrot.slane %v9819_v58, 1  ;;  %v2451_v39 = vpop.f32.mrf.mxu1 }
 0x35b   : > { %v4934_v4 = vrot.slane %v4933_v27, 2  ;;  %v4042_v21 = vsel %vm3341_vm2, %v3185_v59, -inf  ;;  %v4938_v48 = vsel %vm3341_vm2, %v3313_v52, -inf  ;;  %v4929_v9 = vrot.slane %v9824_v56, 1 }
 0x35c   : > { %v4024_v17 = vrot.slane %v4023_v31, 2  ;;  %v4920_v11 = vrot.slane %v4919_v30, 2  ;;  %v4019_v61 = vrot.slane %v4018_v5, 1  ;;  %v4915_v33 = vrot.slane %v4914_v60, 1 }
 0x35d   : > { %v4039_v34 = vmax.f32 %v4037_v0, %v4038_v1  ;;  %v4058_v46 = vmax.f32 %v4056_v7, %v4057_v22  ;;  %v4954_v29 = vmax.f32 %v4952_v25, %v4953_v45  ;;  %v3188_v53 = vmax.f32 %v2932_v19, 0.0 }
 0x35e   : > { %v4034_v28 = vmax.f32 %v9819_v58, %v4033_v26  ;;  %v4043_v41 = vrot.slane %v4042_v21, 4  ;;  %v4939_v15 = vrot.slane %v4938_v48, 4  ;;  %v4935_v37 = vmax.f32 %v4933_v27, %v4934_v4 }
 0x35f   : > { %v4025_v13 = vmax.f32 %v4023_v31, %v4024_v17  ;;  %v4921_v24 = vmax.f32 %v4919_v30, %v4920_v11  ;;  %v2797_v8 = vmul.f32 %v9740_v38, %v7946_v63  ;;  %v4930_v32 = vmax.f32 %v9824_v56, %v4929_v9 }
 0x360   : > { %v4020_v44 = vmax.f32 %v4018_v5, %v4019_v61  ;;  %v4916_v54 = vmax.f32 %v4914_v60, %v4915_v33  ;;  %v4040_v3 = vrot.slane %v4039_v34, 1  ;;  %v4059_v55 = vrot.slane %v4058_v46, 2  ;;  %v1939_v5 = vpop.f32.mrf.mxu0 }
 0x361   : > { %v4955_v0 = vrot.slane %v4954_v29, 2  ;;  %v4063_v51 = vsel %vm3341_vm2, %v3188_v53, -inf  ;;  %v3060_v12 = vadd.f32 %v9732_v36, %v2797_v8  ;;  %v7423_v20 = vpack.c.bf16 %v4034_v28, %v4034_v28 }
 0x362   : > { %v4044_v58 = vmax.f32 %v4042_v21, %v4043_v41  ;;  %v4940_v42 = vmax.f32 %v4938_v48, %v4939_v15  ;;  %v4936_v14 = vrot.slane %v4935_v37, 1  ;;  %v4026_v40 = vrot.slane %v4025_v13, 1  ;;  %v7821_v19 = vpop.f32.mrf.mxu0  ;;  %v7949_v21 = vpop.f32.mrf.mxu1 }
 0x363   : > { %v4922_v16 = vrot.slane %v4921_v24, 1  ;;  %v3316_v6 = vmax.f32 %v3060_v12, 0.0  ;;  %v7551_v50 = vpack.c.bf16 %v4930_v32, %v4930_v32  ;;  %v7421_v2 = vpack.c.bf16 %v4020_v44, %v4020_v44 }
 0x364   : > { %v4041_v47 = vmax.f32 %v4039_v34, %v4040_v3  ;;  %v4064_v56 = vrot.slane %v4063_v51, 4  ;;  %v7549_v57 = vpack.c.bf16 %v4916_v54, %v4916_v54  ;;  %v4060_v1 = vmax.f32 %v4058_v46, %v4059_v55  ;;  %v1952_v55 = vpop.f32.mrf.mxu0 }
 0x365   : > { %v4956_v35 = vmax.f32 %v4954_v29, %v4955_v0  ;;  %v4959_v62 = vsel %vm3341_vm2, %v3316_v6, -inf  ;;  %v9858_v43 = vunpack.c.l.b16 %v7423_v20  ;;  %v4045_v27 = vrot.slane %v4044_v58, 2 }
 0x366   : > { %v4941_v10 = vrot.slane %v4940_v42, 2  ;;  %v4937_v18 = vmax.f32 %v4935_v37, %v4936_v14  ;;  %v4027_v60 = vmax.f32 %v4025_v13, %v4026_v40  ;;  %v4923_v49 = vmax.f32 %v4921_v24, %v4922_v16 }
 0x367   : > { %v4960_v23 = vrot.slane %v4959_v62, 4  ;;  %v9860_v7 = vunpack.c.l.b16 %v7551_v50  ;;  %v6254_v25 = vunpack.c.l.b16 %v7421_v2  ;;  %v7424_v59 = vpack.c.bf16 %v4041_v47, %v4041_v47 }
 0x368   : > { %v4065_v52 = vmax.f32 %v4063_v51, %v4064_v56  ;;  %v6382_v31 = vunpack.c.l.b16 %v7549_v57  ;;  %v4061_v30 = vrot.slane %v4060_v1, 1  ;;  %v4957_v22 = vrot.slane %v4956_v35, 1 }
 0x369   : > { %v4961_v45 = vmax.f32 %v4959_v62, %v4960_v23  ;;  %v4046_v26 = vmax.f32 %v4044_v58, %v4045_v27  ;;  %v4942_v4 = vmax.f32 %v4940_v42, %v4941_v10  ;;  %v2667_v17 = vmul.f32 %v9740_v38, %v1939_v5  ;;  %v2464_v58 = vpop.f32.mrf.mxu1 }
 0x36a   : > { %v2795_v11 = vmul.f32 %v9740_v38, %v2451_v39  ;;  %v7552_v48 = vpack.c.bf16 %v4937_v18, %v4937_v18  ;;  %v7422_v9 = vpack.c.bf16 %v4027_v60, %v4027_v60  ;;  %v7550_v61 = vpack.c.bf16 %v4923_v49, %v4923_v49 }
 0x36b   : > { %v2672_v33 = vmul.f32 %v9740_v38, %v7821_v19  ;;  %v4066_v34 = vrot.slane %v4065_v52, 2  ;;  %v4962_v63 = vrot.slane %v4961_v45, 2  ;;  %v2930_v46 = vadd.f32 %v9732_v36, %v2667_v17  ;;  %v7950_v18 = vpop.f32.mrf.mxu1 }
 0x36c   : > { %v3058_v29 = vadd.f32 %v9732_v36, %v2795_v11  ;;  %v9867_v53 = vmax.f32 %v4060_v1, %v4061_v30  ;;  %v9869_v28 = vmax.f32 %v4956_v35, %v4957_v22  ;;  %v2800_v15 = vmul.f32 %v9740_v38, %v7949_v21  ;;  %v7822_v35 = vpop.f32.mrf.mxu0 }
 0x36d   : > { %v2935_v41 = vadd.f32 %v9732_v36, %v2672_v33  ;;  %v4047_v37 = vrot.slane %v4046_v26, 1  ;;  %v4943_v13 = vrot.slane %v4942_v4, 1  ;;  %v3186_v24 = vmax.f32 %v2930_v46, 0.0 }
 0x36e   : > { %v3314_v8 = vmax.f32 %v3058_v29, 0.0  ;;  %v6257_v32 = vunpack.c.l.b16 %v7424_v59  ;;  %v6385_v44 = vunpack.c.l.b16 %v7552_v48  ;;  %v6255_v54 = vunpack.c.l.b16 %v7422_v9  ;;  %v1955_v46 = vpop.f32.mrf.mxu0 }
 0x36f   : > { %v6383_v3 = vunpack.c.l.b16 %v7550_v61  ;;  %v4067_v0 = vmax.f32 %v4065_v52, %v4066_v34  ;;  %v4963_v51 = vmax.f32 %v4961_v45, %v4962_v63  ;;  %v4049_v12 = vsel %vm3341_vm2, %v3186_v24, -inf }
 0x370   : > { %v4945_v20 = vsel %vm3341_vm2, %v3314_v8, -inf  ;;  %v4050_v42 = vrot.slane %v4049_v12, 4  ;;  %v3191_v40 = vmax.f32 %v2935_v41, 0.0  ;;  %v3063_v16 = vadd.f32 %v9732_v36, %v2800_v15  ;;  %v2467_v15 = vpop.f32.mrf.mxu1 }
 0x371   : > { %v4946_v14 = vrot.slane %v4945_v20, 4  ;;  %v7427_v6 = vpack.c.bf16 %v9867_v53, %v9867_v53  ;;  %v7555_v50 = vpack.c.bf16 %v9869_v28, %v9869_v28  ;;  %v4048_v2 = vmax.f32 %v4046_v26, %v4047_v37 }
 0x372   : > { %v4944_v47 = vmax.f32 %v4942_v4, %v4943_v13  ;;  %v6505_v56 = vsel %vm6414_vm3, %v6255_v54, %v6254_v25  ;;  %v6617_v5 = vsel %vm6414_vm3, %v6383_v3, %v6382_v31  ;;  %v4051_v57 = vmax.f32 %v4049_v12, %v4050_v42 }
 0x373   : > { %v4947_v1 = vmax.f32 %v4945_v20, %v4946_v14  ;;  %v4068_v62 = vrot.slane %v4067_v0, 1  ;;  %v4964_v27 = vrot.slane %v4963_v51, 1  ;;  %v2670_v10 = vmul.f32 %v9740_v38, %v1952_v55  ;;  %v7825_v20 = vpop.f32.mrf.mxu0 }
 0x374   : > { %v2798_v39 = vmul.f32 %v9740_v38, %v2464_v58  ;;  %v4052_v60 = vrot.slane %v4051_v57, 2  ;;  %v4084_v23 = vsel %vm3341_vm2, %v3191_v40, -inf  ;;  %v3319_v59 = vmax.f32 %v3063_v16, 0.0  ;;  %v7953_v16 = vpop.f32.mrf.mxu1 }
 0x375   : > { %v4948_v49 = vrot.slane %v4947_v1, 2  ;;  %v6506_v25 = vsel %vm6416_vm4, %v9858_v43, %v6505_v56  ;;  %v6618_v52 = vsel %vm6416_vm4, %v9860_v7, %v6617_v5  ;;  %v7425_v19 = vpack.c.bf16 %v4048_v2, %v4048_v2 }
 0x376   : > { %v2673_v31 = vmul.f32 %v9740_v38, %v7822_v35  ;;  %v7553_v30 = vpack.c.bf16 %v4944_v47, %v4944_v47  ;;  %v4053_v22 = vmax.f32 %v4051_v57, %v4052_v60  ;;  %v2801_v26 = vmul.f32 %v9740_v38, %v7950_v18 }
 0x377   : > { %v4949_v45 = vmax.f32 %v4947_v1, %v4948_v49  ;;  %v4069_v4 = vmax.f32 %v4067_v0, %v4068_v62  ;;  %v4085_v17 = vrot.slane %v4084_v23, 4  ;;  %v2933_v11 = vadd.f32 %v9732_v36, %v2670_v10 }
 0x378   : > { %v3061_v21 = vadd.f32 %v9732_v36, %v2798_v39  ;;  %v4965_v48 = vmax.f32 %v4963_v51, %v4964_v27  ;;  %v4054_v9 = vrot.slane %v4053_v22, 1  ;;  %v4980_v61 = vsel %vm3341_vm2, %v3319_v59, -inf  ;;  %v1968_v39 = vpop.f32.mrf.mxu0  ;;  %v2480_v59 = vpop.f32.mrf.mxu1 }
 0x379   : > { %v4950_v43 = vrot.slane %v4949_v45, 1  ;;  %v6507_v7 = vsel %vm6418_vm5, %v6257_v32, %v6506_v25  ;;  %v6619_v33 = vsel %vm6418_vm5, %v6385_v44, %v6618_v52  ;;  %v2936_v34 = vadd.f32 %v9732_v36, %v2673_v31 }
 0x37a   : > { %v3064_v63 = vadd.f32 %v9732_v36, %v2801_v26  ;;  %v6258_v29 = vunpack.c.l.b16 %v7425_v19  ;;  %v6386_v53 = vunpack.c.l.b16 %v7553_v30  ;;  %v4055_v28 = vmax.f32 %v4053_v22, %v4054_v9 }
 0x37b   : > { %v4951_v41 = vmax.f32 %v4949_v45, %v4950_v43  ;;  %v4086_v37 = vmax.f32 %v4084_v23, %v4085_v17  ;;  %v4981_v13 = vrot.slane %v4980_v61, 4  ;;  %v3189_v24 = vmax.f32 %v2933_v11, 0.0 }
 0x37c   : > { %v3317_v8 = vmax.f32 %v3061_v21, 0.0  ;;  %v7428_v54 = vpack.c.bf16 %v4069_v4, %v4069_v4  ;;  %v7556_v3 = vpack.c.bf16 %v4965_v48, %v4965_v48  ;;  %v7426_v55 = vpack.c.bf16 %v4055_v28, %v4055_v28  ;;  %v7826_v48 = vpop.f32.mrf.mxu0 }
 0x37d   : > { %v7554_v32 = vpack.c.bf16 %v4951_v41, %v4951_v41  ;;  %v6260_v0 = vunpack.c.l.b16 %v7427_v6  ;;  %v6388_v44 = vunpack.c.l.b16 %v7555_v50  ;;  %v3192_v51 = vmax.f32 %v2936_v34, 0.0 }
 0x37e   : > { %v3320_v12 = vmax.f32 %v3064_v63, 0.0  ;;  %v6508_v58 = vsel %vm6420_vm6, %v6258_v29, %v6507_v7  ;;  %v6620_v42 = vsel %vm6420_vm6, %v6386_v53, %v6619_v33  ;;  %v6259_v14 = vunpack.c.l.b16 %v7426_v55 }
 0x37f   : > { %v6387_v40 = vunpack.c.l.b16 %v7554_v32  ;;  %v4087_v2 = vrot.slane %v4086_v37, 2  ;;  %v4982_v47 = vmax.f32 %v4980_v61, %v4981_v13  ;;  %v4070_v56 = vsel %vm3341_vm2, %v3189_v24, -inf }
 0x380   : > { %v4966_v5 = vsel %vm3341_vm2, %v3317_v8, -inf  ;;  %v6261_v57 = vunpack.c.l.b16 %v7428_v54  ;;  %v6389_v1 = vunpack.c.l.b16 %v7556_v3  ;;  %v6509_v6 = vsel %vm6422_vm7, %v6259_v14, %v6508_v58 }
 0x381   : > { %v6621_v50 = vsel %vm6422_vm7, %v6387_v40, %v6620_v42  ;;  %v6510_v35 = vsel %vm6424_vm8, %v6260_v0, %v6509_v6  ;;  %v4091_v27 = vsel %vm3341_vm2, %v3192_v51, -inf  ;;  %v4987_v10 = vsel %vm3341_vm2, %v3320_v12, -inf }
 0x382   : > { %v6622_v62 = vsel %vm6424_vm8, %v6388_v44, %v6621_v50  ;;  %v6511_v18 = vsel %vm6426_vm9, %v6261_v57, %v6510_v35  ;;  %v4071_v49 = vrot.slane %v4070_v56, 4  ;;  %v4967_v23 = vrot.slane %v4966_v5, 4 }
 0x383   : > { %v6623_v60 = vsel %vm6426_vm9, %v6389_v1, %v6622_v62  ;;  %v6657_v25 = vpack.c.b16 %v6511_v18, %v6511_v18  ;;  %v4088_v19 = vmax.f32 %v4086_v37, %v4087_v2  ;;  %v4983_v31 = vrot.slane %v4982_v47, 2  ;;  %v7954_v2 = vpop.f32.mrf.mxu1 }
 0x384   : > { %v6673_v52 = vpack.c.b16 %v6623_v60, %v6623_v60  ;;  %v4092_v30 = vrot.slane %v4091_v27, 4  ;;  %v4988_v22 = vrot.slane %v4987_v10, 4  ;;  %v2671_v45 = vmul.f32 %v9740_v38, %v1955_v46 }
 0x385   : > { %v2799_v26 = vmul.f32 %v9740_v38, %v2467_v15  ;;  %6722 = vst.msk [vmem:[%s8607_s8 + $0x30] sm:$0xf] %vm6709_vm10, %v6657_v25  ;;  %v2676_v4 = vmul.f32 %v9740_v38, %v7825_v20  ;;  %v2804_v17 = vmul.f32 %v9740_v38, %v7953_v16  ;;  %v2674_v11 = vmul.f32 %v9740_v38, %v1968_v39 }
 0x386   : > { %6738 = vst.msk [vmem:[%s8607_s8 + $0x70] sm:$0xf] %vm6709_vm10, %v6673_v52  ;;  %v2802_v21 = vmul.f32 %v9740_v38, %v2480_v59  ;;  %v4072_v9 = vmax.f32 %v4070_v56, %v4071_v49  ;;  %v4968_v43 = vmax.f32 %v4966_v5, %v4967_v23  ;;  %v2934_v61 = vadd.f32 %v9732_v36, %v2671_v45 }
 0x387   : > { %v3062_v7 = vadd.f32 %v9732_v36, %v2799_v26  ;;  %v2939_v33 = vadd.f32 %v9732_v36, %v2676_v4  ;;  %v3067_v34 = vadd.f32 %v9732_v36, %v2804_v17  ;;  %v2937_v63 = vadd.f32 %v9732_v36, %v2674_v11 }
 0x388   : > { %v3065_v46 = vadd.f32 %v9732_v36, %v2802_v21  ;;  %v4984_v29 = vmax.f32 %v4982_v47, %v4983_v31  ;;  %v3190_v53 = vmax.f32 %v2934_v61, 0.0  ;;  %v2677_v41 = vmul.f32 %v9740_v38, %v7826_v48 }
 0x389   : > { %v3318_v28 = vmax.f32 %v3062_v7, 0.0  ;;  %v4093_v15 = vmax.f32 %v4091_v27, %v4092_v30  ;;  %v4989_v37 = vmax.f32 %v4987_v10, %v4988_v22  ;;  %v3195_v13 = vmax.f32 %v2939_v33, 0.0 }
 0x38a   : > { %v3323_v24 = vmax.f32 %v3067_v34, 0.0  ;;  %v4073_v8 = vrot.slane %v4072_v9, 2  ;;  %v4077_v54 = vsel %vm3341_vm2, %v3190_v53, -inf  ;;  %v3193_v55 = vmax.f32 %v2937_v63, 0.0 }
 0x38b   : > { %v4973_v3 = vsel %vm3341_vm2, %v3318_v28, -inf  ;;  %v4078_v32 = vrot.slane %v4077_v54, 4  ;;  %v4112_v44 = vsel %vm3341_vm2, %v3195_v13, -inf  ;;  %v3321_v51 = vmax.f32 %v3065_v46, 0.0 }
 0x38c   : > { %v4974_v0 = vrot.slane %v4973_v3, 4  ;;  %v4969_v12 = vrot.slane %v4968_v43, 2  ;;  %v5008_v20 = vsel %vm3341_vm2, %v3323_v24, -inf  ;;  %v2940_v58 = vadd.f32 %v9732_v36, %v2677_v41  ;;  %v1971_v24 = vpop.f32.mrf.mxu0 }
 0x38d   : > { %v4094_v42 = vrot.slane %v4093_v15, 2  ;;  %v4990_v14 = vrot.slane %v4989_v37, 2  ;;  %v4079_v40 = vmax.f32 %v4077_v54, %v4078_v32  ;;  %v4089_v47 = vrot.slane %v4088_v19, 1  ;;  %v2483_v32 = vpop.f32.mrf.mxu1 }
 0x38e   : > { %v4975_v16 = vmax.f32 %v4973_v3, %v4974_v0  ;;  %v4985_v56 = vrot.slane %v4984_v29, 1  ;;  %v4113_v5 = vrot.slane %v4112_v44, 4  ;;  %v4074_v57 = vmax.f32 %v4072_v9, %v4073_v8 }
 0x38f   : > { %v5009_v1 = vrot.slane %v5008_v20, 4  ;;  %v4098_v6 = vsel %vm3341_vm2, %v3193_v55, -inf  ;;  %v4994_v50 = vsel %vm3341_vm2, %v3321_v51, -inf  ;;  %v4970_v35 = vmax.f32 %v4968_v43, %v4969_v12 }
 0x390   : > { %v4080_v62 = vrot.slane %v4079_v40, 2  ;;  %v3196_v27 = vmax.f32 %v2940_v58, 0.0  ;;  %v2805_v10 = vmul.f32 %v9740_v38, %v7954_v2  ;;  %v4095_v39 = vmax.f32 %v4093_v15, %v4094_v42 }
 0x391   : > { %v4991_v18 = vmax.f32 %v4989_v37, %v4990_v14  ;;  %v4976_v60 = vrot.slane %v4975_v16, 2  ;;  %v4090_v49 = vmax.f32 %v4088_v19, %v4089_v47  ;;  %v4114_v23 = vmax.f32 %v4112_v44, %v4113_v5  ;;  %v9945_v14 = vld [vmem:[%s10135_s2] ss:$0 sm:$0xff]  ;;  %v7829_v5 = vpop.f32.mrf.mxu0 }
 0x392   : > { %v4099_v59 = vrot.slane %v4098_v6, 4  ;;  %v4995_v25 = vrot.slane %v4994_v50, 4  ;;  %v4075_v52 = vrot.slane %v4074_v57, 1  ;;  %v5010_v31 = vmax.f32 %v5008_v20, %v5009_v1 }
 0x393   : > { %v3068_v30 = vadd.f32 %v9732_v36, %v2805_v10  ;;  %v4986_v22 = vmax.f32 %v4984_v29, %v4985_v56  ;;  %v4971_v45 = vrot.slane %v4970_v35, 1  ;;  %v4081_v26 = vmax.f32 %v4079_v40, %v4080_v62 }
 0x394   : > { %v4119_v4 = vsel %vm3341_vm2, %v3196_v27, -inf  ;;  %v4096_v17 = vrot.slane %v4095_v39, 1  ;;  %v4992_v11 = vrot.slane %v4991_v18, 1  ;;  %v4977_v21 = vmax.f32 %v4975_v16, %v4976_v60 }
 0x395   : > { %v3324_v38 = vmax.f32 %v3068_v30, 0.0  ;;  %v7431_v48 = vpack.c.bf16 %v4090_v49, %v4090_v49  ;;  %v4115_v9 = vrot.slane %v4114_v23, 2  ;;  %v4100_v43 = vmax.f32 %v4098_v6, %v4099_v59  ;;  %v7957_v59 = vpop.f32.mrf.mxu1 }
 0x396   : > { %v4996_v19 = vmax.f32 %v4994_v50, %v4995_v25  ;;  %v4076_v61 = vmax.f32 %v4074_v57, %v4075_v52  ;;  %v5011_v7 = vrot.slane %v5010_v31, 2  ;;  %v4120_v33 = vrot.slane %v4119_v4, 4  ;;  %v9952_v50 = vld [vmem:[%s10136_s3] ss:$0 sm:$0xff] }
 0x397   : > { %v5015_v34 = vsel %vm3341_vm2, %v3324_v38, -inf  ;;  %v7559_v63 = vpack.c.bf16 %v4986_v22, %v4986_v22  ;;  %v4972_v36 = vmax.f32 %v4970_v35, %v4971_v45  ;;  %v4082_v46 = vrot.slane %v4081_v26, 1  ;;  %v1984_v22 = vpop.f32.mrf.mxu0 }
 0x398   : > { %v4097_v29 = vmax.f32 %v4095_v39, %v4096_v17  ;;  %v4993_v53 = vmax.f32 %v4991_v18, %v4992_v11  ;;  %v4978_v28 = vrot.slane %v4977_v21, 1  ;;  %v5016_v41 = vrot.slane %v5015_v34, 4 }
 0x399   : > { %v4116_v15 = vmax.f32 %v4114_v23, %v4115_v9  ;;  %v4101_v37 = vrot.slane %v4100_v43, 2  ;;  %v4997_v13 = vrot.slane %v4996_v19, 2  ;;  %v9938_v8 = vunpack.c.l.b16 %v7431_v48 }
 0x39a   : > { %v7429_v54 = vpack.c.bf16 %v4076_v61, %v4076_v61  ;;  %v5012_v3 = vmax.f32 %v5010_v31, %v5011_v7  ;;  %v4121_v55 = vmax.f32 %v4119_v4, %v4120_v33  ;;  %v9940_v0 = vunpack.c.l.b16 %v7559_v63  ;;  %v2496_v7 = vpop.f32.mrf.mxu1 }
 0x39b   : > { %v7557_v44 = vpack.c.bf16 %v4972_v36, %v4972_v36  ;;  %v4083_v51 = vmax.f32 %v4081_v26, %v4082_v46  ;;  %v5017_v12 = vmax.f32 %v5015_v34, %v5016_v41  ;;  %v7432_v20 = vpack.c.bf16 %v4097_v29, %v4097_v29 }
 0x39c   : > { %v7560_v58 = vpack.c.bf16 %v4993_v53, %v4993_v53  ;;  %v4979_v42 = vmax.f32 %v4977_v21, %v4978_v28  ;;  %v2675_v40 = vmul.f32 %v9945_v14, %v1971_v24  ;;  %v4117_v16 = vrot.slane %v4116_v15, 1 }
 0x39d   : > { %v4102_v2 = vmax.f32 %v4100_v43, %v4101_v37  ;;  %v4998_v47 = vmax.f32 %v4996_v19, %v4997_v13  ;;  %v2803_v56 = vmul.f32 %v9945_v14, %v2483_v32  ;;  %v6262_v57 = vunpack.c.l.b16 %v7429_v54 }
 0x39e   : > { %v5013_v1 = vrot.slane %v5012_v3, 1  ;;  %v4122_v6 = vrot.slane %v4121_v55, 2  ;;  %v2938_v35 = vadd.f32 %v9952_v50, %v2675_v40  ;;  %v6390_v62 = vunpack.c.l.b16 %v7557_v44 }
 0x39f   : > { %v7430_v27 = vpack.c.bf16 %v4083_v51, %v4083_v51  ;;  %v5018_v10 = vrot.slane %v5017_v12, 2  ;;  %v3066_v39 = vadd.f32 %v9952_v50, %v2803_v56  ;;  %v6265_v18 = vunpack.c.l.b16 %v7432_v20  ;;  %v7830_v20 = vpop.f32.mrf.mxu0 }
 0x3a0   : > { %v9956_v60 = vunpack.c.l.b16 %v7560_v58  ;;  %v7558_v49 = vpack.c.bf16 %v4979_v42, %v4979_v42  ;;  %v3194_v23 = vmax.f32 %v2938_v35, 0.0  ;;  %v4118_v25 = vmax.f32 %v4116_v15, %v4117_v16 }
 0x3a1   : > { %v4103_v52 = vrot.slane %v4102_v2, 1  ;;  %v4999_v31 = vrot.slane %v4998_v47, 1  ;;  %v3322_v30 = vmax.f32 %v3066_v39, 0.0  ;;  %v9958_v45 = vmax.f32 %v5012_v3, %v5013_v1 }
 0x3a2   : > { %v4123_v26 = vmax.f32 %v4121_v55, %v4122_v6  ;;  %v4105_v4 = vsel %vm3341_vm2, %v3194_v23, -inf  ;;  %v2680_v17 = vmul.f32 %v9945_v14, %v7829_v5  ;;  %v6263_v11 = vunpack.c.l.b16 %v7430_v27 }
 0x3a3   : > { %v5019_v21 = vmax.f32 %v5017_v12, %v5018_v10  ;;  %v4106_v38 = vrot.slane %v4105_v4, 4  ;;  %v5001_v48 = vsel %vm3341_vm2, %v3322_v30, -inf  ;;  %v6391_v9 = vunpack.c.l.b16 %v7558_v49  ;;  %v1987_v49 = vpop.f32.mrf.mxu0 }
 0x3a4   : > { %v5002_v43 = vrot.slane %v5001_v48, 4  ;;  %v2808_v19 = vmul.f32 %v9945_v14, %v7957_v59  ;;  %v2678_v61 = vmul.f32 %v9945_v14, %v1984_v22  ;;  %v7435_v33 = vpack.c.bf16 %v4118_v25, %v4118_v25 }
 0x3a5   : > { %v4104_v34 = vmax.f32 %v4102_v2, %v4103_v52  ;;  %v5000_v63 = vmax.f32 %v4998_v47, %v4999_v31  ;;  %v4107_v36 = vmax.f32 %v4105_v4, %v4106_v38  ;;  %v7563_v46 = vpack.c.bf16 %v9958_v45, %v9958_v45  ;;  %v7958_v2 = vpop.f32.mrf.mxu1 }
 0x3a6   : > { %v4124_v29 = vrot.slane %v4123_v26, 1  ;;  %v5003_v53 = vmax.f32 %v5001_v48, %v5002_v43  ;;  %v2943_v28 = vadd.f32 %v9952_v50, %v2680_v17  ;;  %v6512_v41 = vsel %vm6414_vm3, %v6263_v11, %v6262_v57 }
 0x3a7   : > { %v5020_v15 = vrot.slane %v5019_v21, 1  ;;  %v4108_v37 = vrot.slane %v4107_v36, 2  ;;  %v2806_v13 = vmul.f32 %v9945_v14, %v2496_v7  ;;  %v6624_v24 = vsel %vm6414_vm3, %v6391_v9, %v6390_v62  ;;  %v2499_v52 = vpop.f32.mrf.mxu1  ;;  %v7833_v9 = vpop.f32.mrf.mxu0 }
 0x3a8   : > { %v5004_v54 = vrot.slane %v5003_v53, 2  ;;  %v3071_v3 = vadd.f32 %v9952_v50, %v2808_v19  ;;  %v2941_v55 = vadd.f32 %v9952_v50, %v2678_v61  ;;  %v6268_v32 = vunpack.c.l.b16 %v7435_v33 }
 0x3a9   : > { %v7433_v44 = vpack.c.bf16 %v4104_v34, %v4104_v34  ;;  %v7561_v51 = vpack.c.bf16 %v5000_v63, %v5000_v63  ;;  %v4109_v12 = vmax.f32 %v4107_v36, %v4108_v37  ;;  %v6513_v58 = vsel %vm6416_vm4, %v9938_v8, %v6512_v41  ;;  %v7961_v7 = vpop.f32.mrf.mxu1 }
 0x3aa   : > { %v4125_v42 = vmax.f32 %v4123_v26, %v4124_v29  ;;  %v5005_v40 = vmax.f32 %v5003_v53, %v5004_v54  ;;  %v3199_v16 = vmax.f32 %v2943_v28, 0.0  ;;  %v6625_v47 = vsel %vm6416_vm4, %v9940_v0, %v6624_v24 }
 0x3ab   : > { %v5021_v56 = vmax.f32 %v5019_v21, %v5020_v15  ;;  %v4110_v5 = vrot.slane %v4109_v12, 1  ;;  %v3069_v57 = vadd.f32 %v9952_v50, %v2806_v13  ;;  %v3327_v6 = vmax.f32 %v3071_v3, 0.0  ;;  %v2000_v13 = vpop.f32.mrf.mxu0 }
 0x3ac   : > { %v5006_v1 = vrot.slane %v5005_v40, 1  ;;  %v3197_v35 = vmax.f32 %v2941_v55, 0.0  ;;  %v2681_v62 = vmul.f32 %v9945_v14, %v7830_v20  ;;  %v6266_v27 = vunpack.c.l.b16 %v7433_v44 }
 0x3ad   : > { %v6514_v10 = vsel %vm6418_vm5, %v6265_v18, %v6513_v58  ;;  %v6394_v8 = vunpack.c.l.b16 %v7561_v51  ;;  %v4111_v39 = vmax.f32 %v4109_v12, %v4110_v5  ;;  %v7436_v23 = vpack.c.bf16 %v4125_v42, %v4125_v42 }
 0x3ae   : > { %v5007_v59 = vmax.f32 %v5005_v40, %v5006_v1  ;;  %v4140_v25 = vsel %vm3341_vm2, %v3199_v16, -inf  ;;  %v2809_v0 = vmul.f32 %v9945_v14, %v7958_v2  ;;  %v6626_v31 = vsel %vm6418_vm5, %v9956_v60, %v6625_v47 }
 0x3af   : > { %v7564_v30 = vpack.c.bf16 %v5021_v56, %v5021_v56  ;;  %v7434_v22 = vpack.c.bf16 %v4111_v39, %v4111_v39  ;;  %v3325_v45 = vmax.f32 %v3069_v57, 0.0  ;;  %v5036_v4 = vsel %vm3341_vm2, %v3327_v6, -inf }
 0x3b0   : > { %v7562_v26 = vpack.c.bf16 %v5007_v59, %v5007_v59  ;;  %v4126_v18 = vsel %vm3341_vm2, %v3197_v35, -inf  ;;  %v2944_v17 = vadd.f32 %v9952_v50, %v2681_v62  ;;  %v6396_v11 = vunpack.c.l.b16 %v7563_v46 }
 0x3b1   : > { %v6515_v21 = vsel %vm6420_vm6, %v6266_v27, %v6514_v10  ;;  %v6267_v38 = vunpack.c.l.b16 %v7434_v22  ;;  %v4141_v48 = vrot.slane %v4140_v25, 4  ;;  %v6627_v43 = vsel %vm6420_vm6, %v6394_v8, %v6626_v31  ;;  %v7834_v31 = vpop.f32.mrf.mxu0 }
 0x3b2   : > { %v6269_v19 = vunpack.c.l.b16 %v7436_v23  ;;  %v6395_v60 = vunpack.c.l.b16 %v7562_v26  ;;  %v3072_v61 = vadd.f32 %v9952_v50, %v2809_v0  ;;  %v6397_v33 = vunpack.c.l.b16 %v7564_v30 }
 0x3b3   : > { %v6516_v34 = vsel %vm6422_vm7, %v6267_v38, %v6515_v21  ;;  %v5037_v63 = vrot.slane %v5036_v4, 4  ;;  %v4127_v36 = vrot.slane %v4126_v18, 4  ;;  %v5022_v53 = vsel %vm3341_vm2, %v3325_v45, -inf }
 0x3b4   : > { %v6517_v29 = vsel %vm6424_vm8, %v6268_v32, %v6516_v34  ;;  %v6628_v46 = vsel %vm6422_vm7, %v6395_v60, %v6627_v43  ;;  %v3200_v28 = vmax.f32 %v2944_v17, 0.0  ;;  %v4142_v37 = vmax.f32 %v4140_v25, %v4141_v48  ;;  %v2512_v32 = vpop.f32.mrf.mxu1 }
 0x3b5   : > { %v6518_v41 = vsel %vm6426_vm9, %v6269_v19, %v6517_v29  ;;  %v6629_v15 = vsel %vm6424_vm8, %v6396_v11, %v6628_v46  ;;  %v3328_v3 = vmax.f32 %v3072_v61, 0.0  ;;  %v2679_v55 = vmul.f32 %v9945_v14, %v1987_v49 }
 0x3b6   : > { %v6658_v24 = vpack.c.b16 %v6518_v41, %v6518_v41  ;;  %v6630_v54 = vsel %vm6426_vm9, %v6397_v33, %v6629_v15  ;;  %v5038_v51 = vmax.f32 %v5036_v4, %v5037_v63  ;;  %v5023_v12 = vrot.slane %v5022_v53, 4  ;;  %v7962_v26 = vpop.f32.mrf.mxu1 }
 0x3b7   : > { %v6674_v44 = vpack.c.b16 %v6630_v54, %v6630_v54  ;;  %v2807_v20 = vmul.f32 %v9945_v14, %v2499_v52  ;;  %v4128_v58 = vmax.f32 %v4126_v18, %v4127_v36  ;;  %v4147_v42 = vsel %vm3341_vm2, %v3200_v28, -inf }
 0x3b8   : > { %6723 = vst.msk [vmem:[%s8607_s8 + $0x34] sm:$0xf] %vm6709_vm10, %v6658_v24  ;;  %v2942_v40 = vadd.f32 %v9952_v50, %v2679_v55  ;;  %v2682_v16 = vmul.f32 %v9945_v14, %v2000_v13  ;;  %v2684_v47 = vmul.f32 %v9945_v14, %v7833_v9  ;;  %v2810_v56 = vmul.f32 %v9945_v14, %v2512_v32 }
 0x3b9   : > { %6739 = vst.msk [vmem:[%s8607_s8 + $0x74] sm:$0xf] %vm6709_vm10, %v6674_v44  ;;  %v3070_v2 = vadd.f32 %v9952_v50, %v2807_v20  ;;  %v5043_v5 = vsel %vm3341_vm2, %v3328_v3, -inf  ;;  %v2812_v1 = vmul.f32 %v9945_v14, %v7961_v7  ;;  %v4143_v35 = vrot.slane %v4142_v37, 2 }
 0x3ba   : > { %v3198_v57 = vmax.f32 %v2942_v40, 0.0  ;;  %v2945_v6 = vadd.f32 %v9952_v50, %v2682_v16  ;;  %v5039_v62 = vrot.slane %v5038_v51, 2  ;;  %v4148_v27 = vrot.slane %v4147_v42, 4 }
 0x3bb   : > { %v3326_v10 = vmax.f32 %v3070_v2, 0.0  ;;  %v4129_v8 = vrot.slane %v4128_v58, 2  ;;  %v5024_v39 = vmax.f32 %v5022_v53, %v5023_v12  ;;  %v3073_v23 = vadd.f32 %v9952_v50, %v2810_v56 }
 0x3bc   : > { %v4133_v49 = vsel %vm3341_vm2, %v3198_v57, -inf  ;;  %v5044_v59 = vrot.slane %v5043_v5, 4  ;;  %v2947_v52 = vadd.f32 %v9952_v50, %v2684_v47  ;;  %v3075_v22 = vadd.f32 %v9952_v50, %v2812_v1 }
 0x3bd   : > { %v4134_v25 = vrot.slane %v4133_v49, 4  ;;  %v5029_v0 = vsel %vm3341_vm2, %v3326_v10, -inf  ;;  %v3201_v45 = vmax.f32 %v2945_v6, 0.0  ;;  %v4144_v4 = vmax.f32 %v4142_v37, %v4143_v35 }
 0x3be   : > { %v5030_v30 = vrot.slane %v5029_v0, 4  ;;  %v5040_v18 = vmax.f32 %v5038_v51, %v5039_v62  ;;  %v4149_v17 = vmax.f32 %v4147_v42, %v4148_v27  ;;  %v5025_v21 = vrot.slane %v5024_v39, 2 }
 0x3bf   : > { %v4135_v11 = vmax.f32 %v4133_v49, %v4134_v25  ;;  %v3329_v48 = vmax.f32 %v3073_v23, 0.0  ;;  %v2685_v9 = vmul.f32 %v9945_v14, %v7834_v31  ;;  %v4130_v43 = vmax.f32 %v4128_v58, %v4129_v8 }
 0x3c0   : > { %v5031_v38 = vmax.f32 %v5029_v0, %v5030_v30  ;;  %v5045_v19 = vmax.f32 %v5043_v5, %v5044_v59  ;;  %v3203_v60 = vmax.f32 %v2947_v52, 0.0  ;;  %v2813_v61 = vmul.f32 %v9945_v14, %v7962_v26  ;;  %v2003_v59 = vpop.f32.mrf.mxu0  ;;  %v2515_v26 = vpop.f32.mrf.mxu1 }
 0x3c1   : > { %v4136_v7 = vrot.slane %v4135_v11, 2  ;;  %v3331_v33 = vmax.f32 %v3075_v22, 0.0  ;;  %v4154_v34 = vsel %vm3341_vm2, %v3201_v45, -inf  ;;  %v2948_v63 = vadd.f32 %v9952_v50, %v2685_v9 }
 0x3c2   : > { %v4145_v36 = vrot.slane %v4144_v4, 1  ;;  %v5041_v29 = vrot.slane %v5040_v18, 1  ;;  %v4150_v46 = vrot.slane %v4149_v17, 2  ;;  %v5032_v53 = vrot.slane %v5031_v38, 2 }
 0x3c3   : > { %v5050_v28 = vsel %vm3341_vm2, %v3329_v48, -inf  ;;  %v3204_v41 = vmax.f32 %v2948_v63, 0.0  ;;  %v3076_v15 = vadd.f32 %v9952_v50, %v2813_v61  ;;  %v4131_v37 = vrot.slane %v4130_v43, 1 }
 0x3c4   : > { %v5026_v13 = vmax.f32 %v5024_v39, %v5025_v21  ;;  %v4168_v24 = vsel %vm3341_vm2, %v3203_v60, -inf  ;;  %v4155_v54 = vrot.slane %v4154_v34, 4  ;;  %v5046_v3 = vrot.slane %v5045_v19, 2 }
 0x3c5   : > { %v4137_v55 = vmax.f32 %v4135_v11, %v4136_v7  ;;  %v5064_v32 = vsel %vm3341_vm2, %v3331_v33, -inf  ;;  %v3332_v44 = vmax.f32 %v3076_v15, 0.0  ;;  %v4146_v51 = vmax.f32 %v4144_v4, %v4145_v36 }
 0x3c6   : > { %v5042_v12 = vmax.f32 %v5040_v18, %v5041_v29  ;;  %v5051_v20 = vrot.slane %v5050_v28, 4  ;;  %v4175_v58 = vsel %vm3341_vm2, %v3204_v41, -inf  ;;  %v4151_v42 = vmax.f32 %v4149_v17, %v4150_v46 }
 0x3c7   : > { %v5033_v40 = vmax.f32 %v5031_v38, %v5032_v53  ;;  %v4169_v16 = vrot.slane %v4168_v24, 4  ;;  %v5071_v2 = vsel %vm3341_vm2, %v3332_v44, -inf  ;;  %v5027_v47 = vrot.slane %v5026_v13, 1 }
 0x3c8   : > { %v5065_v56 = vrot.slane %v5064_v32, 4  ;;  %v4156_v5 = vmax.f32 %v4154_v34, %v4155_v54  ;;  %v4132_v57 = vmax.f32 %v4130_v43, %v4131_v37  ;;  %v5047_v1 = vmax.f32 %v5045_v19, %v5046_v3 }
 0x3c9   : > { %v4138_v6 = vrot.slane %v4137_v55, 1  ;;  %v4176_v35 = vrot.slane %v4175_v58, 4  ;;  %v7439_v62 = vpack.c.bf16 %v4146_v51, %v4146_v51  ;;  %v5052_v27 = vmax.f32 %v5050_v28, %v5051_v20  ;;  %v7965_v20 = vpop.f32.mrf.mxu1 }
 0x3ca   : > { %v5072_v10 = vrot.slane %v5071_v2, 4  ;;  %v7567_v8 = vpack.c.bf16 %v5042_v12, %v5042_v12  ;;  %v4152_v39 = vrot.slane %v4151_v42, 1  ;;  %v5034_v49 = vrot.slane %v5033_v40, 1 }
 0x3cb   : > { %v4170_v23 = vmax.f32 %v4168_v24, %v4169_v16  ;;  %v5028_v25 = vmax.f32 %v5026_v13, %v5027_v47  ;;  %v5066_v0 = vmax.f32 %v5064_v32, %v5065_v56  ;;  %v4157_v52 = vrot.slane %v4156_v5, 2  ;;  %v7837_v13 = vpop.f32.mrf.mxu0 }
 0x3cc   : > { %v7437_v31 = vpack.c.bf16 %v4132_v57, %v4132_v57  ;;  %v5048_v30 = vrot.slane %v5047_v1, 1  ;;  %v4139_v22 = vmax.f32 %v4137_v55, %v4138_v6  ;;  %v4177_v45 = vmax.f32 %v4175_v58, %v4176_v35 }
 0x3cd   : > { %v10027_v4 = vunpack.c.l.b16 %v7439_v62  ;;  %v5053_v18 = vrot.slane %v5052_v27, 2  ;;  %v5073_v17 = vmax.f32 %v5071_v2, %v5072_v10  ;;  %v2683_v11 = vmul.f32 %v9945_v14, %v2003_v59 }
 0x3ce   : > { %v10030_v21 = vunpack.c.l.b16 %v7567_v8  ;;  %v4153_v38 = vmax.f32 %v4151_v42, %v4152_v39  ;;  %v5035_v48 = vmax.f32 %v5033_v40, %v5034_v49  ;;  %v4171_v9 = vrot.slane %v4170_v23, 2  ;;  %v2016_v39 = vpop.f32.mrf.mxu0  ;;  %v2528_v49 = vpop.f32.mrf.mxu1 }
 0x3cf   : > { %v5067_v43 = vrot.slane %v5066_v0, 2  ;;  %v4158_v19 = vmax.f32 %v4156_v5, %v4157_v52  ;;  %v2946_v60 = vadd.f32 %v9952_v50, %v2683_v11  ;;  %v2811_v61 = vmul.f32 %v9945_v14, %v2515_v26 }
 0x3d0   : > { %v7565_v7 = vpack.c.bf16 %v5028_v25, %v5028_v25  ;;  %v5049_v33 = vmax.f32 %v5047_v1, %v5048_v30  ;;  %v7438_v34 = vpack.c.bf16 %v4139_v22, %v4139_v22  ;;  %v4178_v63 = vrot.slane %v4177_v45, 2 }
 0x3d1   : > { %v5054_v36 = vmax.f32 %v5052_v27, %v5053_v18  ;;  %v5074_v29 = vrot.slane %v5073_v17, 2  ;;  %v3202_v46 = vmax.f32 %v2946_v60, 0.0  ;;  %v3074_v53 = vadd.f32 %v9952_v50, %v2811_v61 }
 0x3d2   : > { %v6270_v28 = vunpack.c.l.b16 %v7437_v31  ;;  %v7440_v41 = vpack.c.bf16 %v4153_v38, %v4153_v38  ;;  %v7566_v15 = vpack.c.bf16 %v5035_v48, %v5035_v48  ;;  %v4172_v37 = vmax.f32 %v4170_v23, %v4171_v9 }
 0x3d3   : > { %v5068_v24 = vmax.f32 %v5066_v0, %v5067_v43  ;;  %v4159_v54 = vrot.slane %v4158_v19, 1  ;;  %v4161_v3 = vsel %vm3341_vm2, %v3202_v46, -inf  ;;  %v3330_v55 = vmax.f32 %v3074_v53, 0.0  ;;  %v7838_v43 = vpop.f32.mrf.mxu0 }
 0x3d4   : > { %v7568_v32 = vpack.c.bf16 %v5049_v33, %v5049_v33  ;;  %v6271_v44 = vunpack.c.l.b16 %v7438_v34  ;;  %v4179_v51 = vmax.f32 %v4177_v45, %v4178_v63  ;;  %v4162_v12 = vrot.slane %v4161_v3, 4 }
 0x3d5   : > { %v5055_v58 = vrot.slane %v5054_v36, 1  ;;  %v5075_v42 = vmax.f32 %v5073_v17, %v5074_v29  ;;  %v5057_v40 = vsel %vm3341_vm2, %v3330_v55, -inf  ;;  %v2688_v16 = vmul.f32 %v9945_v14, %v7837_v13 }
 0x3d6   : > { %v6398_v2 = vunpack.c.l.b16 %v7565_v7  ;;  %v6399_v47 = vunpack.c.l.b16 %v7566_v15  ;;  %v4163_v56 = vmax.f32 %v4161_v3, %v4162_v12  ;;  %v5058_v5 = vrot.slane %v5057_v40, 4 }
 0x3d7   : > { %v6273_v57 = vunpack.c.l.b16 %v7440_v41  ;;  %v4173_v1 = vrot.slane %v4172_v37, 1  ;;  %v5069_v6 = vrot.slane %v5068_v24, 1  ;;  %v4160_v35 = vmax.f32 %v4158_v19, %v4159_v54  ;;  %v7966_v19 = vpop.f32.mrf.mxu1 }
 0x3d8   : > { %v6401_v62 = vunpack.c.l.b16 %v7568_v32  ;;  %v4180_v27 = vrot.slane %v4179_v51, 1  ;;  %v4164_v10 = vrot.slane %v4163_v56, 2  ;;  %v5059_v8 = vmax.f32 %v5057_v40, %v5058_v5 }
 0x3d9   : > { %v6519_v23 = vsel %vm6414_vm3, %v6271_v44, %v6270_v28  ;;  %v5056_v59 = vmax.f32 %v5054_v36, %v5055_v58  ;;  %v5076_v25 = vrot.slane %v5075_v42, 1  ;;  %v2951_v0 = vadd.f32 %v9952_v50, %v2688_v16 }
 0x3da   : > { %v6631_v52 = vsel %vm6414_vm3, %v6399_v47, %v6398_v2  ;;  %v4165_v31 = vmax.f32 %v4163_v56, %v4164_v10  ;;  %v5060_v30 = vrot.slane %v5059_v8, 2  ;;  %v2816_v22 = vmul.f32 %v9945_v14, %v7965_v20 }
 0x3db   : > { %v4174_v45 = vmax.f32 %v4172_v37, %v4173_v1  ;;  %v5070_v26 = vmax.f32 %v5068_v24, %v5069_v6  ;;  %v7441_v18 = vpack.c.bf16 %v4160_v35, %v4160_v35  ;;  %v2686_v17 = vmul.f32 %v9945_v14, %v2016_v39  ;;  %v2531_v24 = vpop.f32.mrf.mxu1 }
 0x3dc   : > { %v6520_v11 = vsel %vm6416_vm4, %v10027_v4, %v6519_v23  ;;  %v4181_v38 = vmax.f32 %v4179_v51, %v4180_v27  ;;  %v4166_v48 = vrot.slane %v4165_v31, 1  ;;  %v5061_v9 = vmax.f32 %v5059_v8, %v5060_v30 }
 0x3dd   : > { %v6632_v60 = vsel %vm6416_vm4, %v10030_v21, %v6631_v52  ;;  %v7569_v61 = vpack.c.bf16 %v5056_v59, %v5056_v59  ;;  %v5077_v7 = vmax.f32 %v5075_v42, %v5076_v25  ;;  %v3207_v33 = vmax.f32 %v2951_v0, 0.0  ;;  %v2019_v21 = vpop.f32.mrf.mxu0 }
 0x3de   : > { %v4167_v34 = vmax.f32 %v4165_v31, %v4166_v48  ;;  %v5062_v63 = vrot.slane %v5061_v9, 1  ;;  %v3079_v36 = vadd.f32 %v9952_v50, %v2816_v22  ;;  %v2814_v29 = vmul.f32 %v9945_v14, %v2528_v49 }
 0x3df   : > { %v7443_v46 = vpack.c.bf16 %v4174_v45, %v4174_v45  ;;  %v7571_v53 = vpack.c.bf16 %v5070_v26, %v5070_v26  ;;  %v6274_v4 = vunpack.c.l.b16 %v7441_v18  ;;  %v2949_v28 = vadd.f32 %v9952_v50, %v2686_v17  ;;  %v7841_v5 = vpop.f32.mrf.mxu0 }
 0x3e0   : > { %v6521_v41 = vsel %vm6418_vm5, %v6273_v57, %v6520_v11  ;;  %v7444_v15 = vpack.c.bf16 %v4181_v38, %v4181_v38  ;;  %v7442_v37 = vpack.c.bf16 %v4167_v34, %v4167_v34  ;;  %v5063_v13 = vmax.f32 %v5061_v9, %v5062_v63  ;;  %v7969_v57 = vpop.f32.mrf.mxu1 }
 0x3e1   : > { %v6402_v54 = vunpack.c.l.b16 %v7569_v61  ;;  %v6633_v3 = vsel %vm6418_vm5, %v6401_v62, %v6632_v60  ;;  %v7572_v55 = vpack.c.bf16 %v5077_v7, %v5077_v7  ;;  %v4196_v32 = vsel %vm3341_vm2, %v3207_v33, -inf  ;;  %v2032_v22 = vpop.f32.mrf.mxu0 }
 0x3e2   : > { %v6275_v44 = vunpack.c.l.b16 %v7442_v37  ;;  %v7570_v51 = vpack.c.bf16 %v5063_v13, %v5063_v13  ;;  %v3335_v12 = vmax.f32 %v3079_v36, 0.0  ;;  %v3077_v20 = vadd.f32 %v9952_v50, %v2814_v29  ;;  %v2544_v45 = vpop.f32.mrf.mxu1 }
 0x3e3   : > { %v6276_v58 = vunpack.c.l.b16 %v7443_v46  ;;  %v6522_v42 = vsel %vm6420_vm6, %v6274_v4, %v6521_v41  ;;  %v3205_v40 = vmax.f32 %v2949_v28, 0.0  ;;  %v6277_v16 = vunpack.c.l.b16 %v7444_v15 }
 0x3e4   : > { %v6523_v2 = vsel %vm6422_vm7, %v6275_v44, %v6522_v42  ;;  %v6403_v47 = vunpack.c.l.b16 %v7570_v51  ;;  %v4197_v56 = vrot.slane %v4196_v32, 4  ;;  %v6404_v1 = vunpack.c.l.b16 %v7571_v53 }
 0x3e5   : > { %v6634_v6 = vsel %vm6420_vm6, %v6402_v54, %v6633_v3  ;;  %v6405_v35 = vunpack.c.l.b16 %v7572_v55  ;;  %v6524_v62 = vsel %vm6424_vm8, %v6276_v58, %v6523_v2  ;;  %v5092_v8 = vsel %vm3341_vm2, %v3335_v12, -inf }
 0x3e6   : > { %v6525_v27 = vsel %vm6426_vm9, %v6277_v16, %v6524_v62  ;;  %v6635_v10 = vsel %vm6422_vm7, %v6403_v47, %v6634_v6  ;;  %v3333_v39 = vmax.f32 %v3077_v20, 0.0  ;;  %v4182_v59 = vsel %vm3341_vm2, %v3205_v40, -inf }
 0x3e7   : > { %v6659_v49 = vpack.c.b16 %v6525_v27, %v6525_v27  ;;  %v6636_v23 = vsel %vm6424_vm8, %v6404_v1, %v6635_v10  ;;  %v2689_v25 = vmul.f32 %v9945_v14, %v7838_v43  ;;  %v4198_v52 = vmax.f32 %v4196_v32, %v4197_v56  ;;  %v7970_v32 = vpop.f32.mrf.mxu1 }
 0x3e8   : > { %v6637_v0 = vsel %vm6426_vm9, %v6405_v35, %v6636_v23  ;;  %v2817_v31 = vmul.f32 %v9945_v14, %v7966_v19  ;;  %v2687_v30 = vmul.f32 %v9945_v14, %v2019_v21  ;;  %v2815_v18 = vmul.f32 %v9945_v14, %v2531_v24  ;;  %v7842_v21 = vpop.f32.mrf.mxu0 }
 0x3e9   : > { %6724 = vst.msk [vmem:[%s8607_s8 + $0x38] sm:$0xf] %vm6709_vm10, %v6659_v49  ;;  %v6675_v26 = vpack.c.b16 %v6637_v0, %v6637_v0  ;;  %v5093_v17 = vrot.slane %v5092_v8, 4  ;;  %v4183_v11 = vrot.slane %v4182_v59, 4  ;;  %v5078_v38 = vsel %vm3341_vm2, %v3333_v39, -inf }
 0x3ea   : > { %v2950_v48 = vadd.f32 %v9952_v50, %v2687_v30  ;;  %v2952_v9 = vadd.f32 %v9952_v50, %v2689_v25  ;;  %v3078_v43 = vadd.f32 %v9952_v50, %v2815_v18  ;;  %v2690_v19 = vmul.f32 %v9945_v14, %v2032_v22 }
 0x3eb   : > { %6740 = vst.msk [vmem:[%s8607_s8 + $0x78] sm:$0xf] %vm6709_vm10, %v6675_v26  ;;  %v2818_v60 = vmul.f32 %v9945_v14, %v2544_v45  ;;  %v4199_v61 = vrot.slane %v4198_v52, 2  ;;  %v3080_v7 = vadd.f32 %v9952_v50, %v2817_v31  ;;  %v2692_v34 = vmul.f32 %v9945_v14, %v7841_v5 }
 0x3ec   : > { %v3206_v33 = vmax.f32 %v2950_v48, 0.0  ;;  %v3334_v63 = vmax.f32 %v3078_v43, 0.0  ;;  %v2820_v36 = vmul.f32 %v9945_v14, %v7969_v57  ;;  %v2953_v29 = vadd.f32 %v9952_v50, %v2690_v19 }
 0x3ed   : > { %v5094_v46 = vmax.f32 %v5092_v8, %v5093_v17  ;;  %v4184_v53 = vmax.f32 %v4182_v59, %v4183_v11  ;;  %v3081_v28 = vadd.f32 %v9952_v50, %v2818_v60  ;;  %v5079_v41 = vrot.slane %v5078_v38, 4 }
 0x3ee   : > { %v4189_v4 = vsel %vm3341_vm2, %v3206_v33, -inf  ;;  %v3208_v15 = vmax.f32 %v2952_v9, 0.0  ;;  %v5085_v13 = vsel %vm3341_vm2, %v3334_v63, -inf  ;;  %v4200_v24 = vmax.f32 %v4198_v52, %v4199_v61 }
 0x3ef   : > { %v4190_v37 = vrot.slane %v4189_v4, 4  ;;  %v3336_v54 = vmax.f32 %v3080_v7, 0.0  ;;  %v5086_v3 = vrot.slane %v5085_v13, 4  ;;  %v2955_v55 = vadd.f32 %v9952_v50, %v2692_v34 }
 0x3f0   : > { %v3083_v44 = vadd.f32 %v9952_v50, %v2820_v36  ;;  %v3209_v51 = vmax.f32 %v2953_v29, 0.0  ;;  %v5095_v12 = vrot.slane %v5094_v46, 2  ;;  %v4185_v20 = vrot.slane %v4184_v53, 2 }
 0x3f1   : > { %v3337_v58 = vmax.f32 %v3081_v28, 0.0  ;;  %v2693_v42 = vmul.f32 %v9945_v14, %v7842_v21  ;;  %v5080_v40 = vmax.f32 %v5078_v38, %v5079_v41  ;;  %v4203_v16 = vsel %vm3341_vm2, %v3208_v15, -inf }
 0x3f2   : > { %v4191_v2 = vmax.f32 %v4189_v4, %v4190_v37  ;;  %v2821_v47 = vmul.f32 %v9945_v14, %v7970_v32  ;;  %v4201_v56 = vrot.slane %v4200_v24, 1  ;;  %v5099_v5 = vsel %vm3341_vm2, %v3336_v54, -inf  ;;  %v2035_v37 = vpop.f32.mrf.mxu0 }
 0x3f3   : > { %v5087_v57 = vmax.f32 %v5085_v13, %v5086_v3  ;;  %v3211_v1 = vmax.f32 %v2955_v55, 0.0  ;;  %v3339_v6 = vmax.f32 %v3083_v44, 0.0  ;;  %v4210_v35 = vsel %vm3341_vm2, %v3209_v51, -inf  ;;  %v2547_v3 = vpop.f32.mrf.mxu1 }
 0x3f4   : > { %v2956_v62 = vadd.f32 %v9952_v50, %v2693_v42  ;;  %v3084_v27 = vadd.f32 %v9952_v50, %v2821_v47  ;;  %v5096_v10 = vmax.f32 %v5094_v46, %v5095_v12  ;;  %v4204_v8 = vrot.slane %v4203_v16, 4 }
 0x3f5   : > { %v5106_v39 = vsel %vm3341_vm2, %v3337_v58, -inf  ;;  %v5100_v49 = vrot.slane %v5099_v5, 4  ;;  %v4192_v23 = vrot.slane %v4191_v2, 2  ;;  %v4186_v0 = vmax.f32 %v4184_v53, %v4185_v20 }
 0x3f6   : > { %v3212_v59 = vmax.f32 %v2956_v62, 0.0  ;;  %v3340_v25 = vmax.f32 %v3084_v27, 0.0  ;;  %v5088_v52 = vrot.slane %v5087_v57, 2  ;;  %v4224_v31 = vsel %vm3341_vm2, %v3211_v1, -inf }
 0x3f7   : > { %v4211_v30 = vrot.slane %v4210_v35, 4  ;;  %v4202_v22 = vmax.f32 %v4200_v24, %v4201_v56  ;;  %v5081_v45 = vrot.slane %v5080_v40, 2  ;;  %v5120_v26 = vsel %vm3341_vm2, %v3339_v6, -inf }
 0x3f8   : > { %v5107_v18 = vrot.slane %v5106_v39, 4  ;;  %v5097_v17 = vrot.slane %v5096_v10, 1  ;;  %v4205_v11 = vmax.f32 %v4203_v16, %v4204_v8  ;;  %v4231_v38 = vsel %vm3341_vm2, %v3212_v59, -inf }
 0x3f9   : > { %v5101_v48 = vmax.f32 %v5099_v5, %v5100_v49  ;;  %v4193_v9 = vmax.f32 %v4191_v2, %v4192_v23  ;;  %v4225_v43 = vrot.slane %v4224_v31, 4  ;;  %v5127_v19 = vsel %vm3341_vm2, %v3340_v25, -inf }
 0x3fa   : > { %v4187_v60 = vrot.slane %v4186_v0, 1  ;;  %v5089_v61 = vmax.f32 %v5087_v57, %v5088_v52  ;;  %v5121_v7 = vrot.slane %v5120_v26, 4  ;;  %v4212_v33 = vmax.f32 %v4210_v35, %v4211_v30 }
 0x3fb   : > { %v7447_v34 = vpack.c.bf16 %v4202_v22, %v4202_v22  ;;  %v5082_v63 = vmax.f32 %v5080_v40, %v5081_v45  ;;  %v5108_v36 = vmax.f32 %v5106_v39, %v5107_v18  ;;  %v4232_v29 = vrot.slane %v4231_v38, 4 }
 0x3fc   : > { %v10099_v46 = vmax.f32 %v5096_v10, %v5097_v17  ;;  %v4206_v53 = vrot.slane %v4205_v11, 2  ;;  %v5128_v4 = vrot.slane %v5127_v19, 4  ;;  %v5102_v28 = vrot.slane %v5101_v48, 2 }
 0x3fd   : > { %v4194_v41 = vrot.slane %v4193_v9, 1  ;;  %v4226_v15 = vmax.f32 %v4224_v31, %v4225_v43  ;;  %v4188_v13 = vmax.f32 %v4186_v0, %v4187_v60  ;;  %v5090_v21 = vrot.slane %v5089_v61, 1 }
 0x3fe   : > { %v5122_v24 = vmax.f32 %v5120_v26, %v5121_v7  ;;  %v4213_v54 = vrot.slane %v4212_v33, 2  ;;  %v10101_v55 = vunpack.c.l.b16 %v7447_v34  ;;  %v5083_v32 = vrot.slane %v5082_v63, 1 }
 0x3ff   : > { %v5109_v44 = vrot.slane %v5108_v36, 2  ;;  %v4233_v51 = vmax.f32 %v4231_v38, %v4232_v29  ;;  %v7575_v12 = vpack.c.bf16 %v10099_v46, %v10099_v46  ;;  %v4207_v20 = vmax.f32 %v4205_v11, %v4206_v53 }
 0x400   : > { %v5129_v58 = vmax.f32 %v5127_v19, %v5128_v4  ;;  %v2691_v42 = vmul.f32 %v9945_v14, %v2035_v37  ;;  %v5103_v40 = vmax.f32 %v5101_v48, %v5102_v28  ;;  %v4195_v16 = vmax.f32 %v4193_v9, %v4194_v41 }
 0x401   : > { %v4227_v2 = vrot.slane %v4226_v15, 2  ;;  %v2819_v47 = vmul.f32 %v9945_v14, %v2547_v3  ;;  %v5091_v56 = vmax.f32 %v5089_v61, %v5090_v21  ;;  %v5123_v5 = vrot.slane %v5122_v24, 2 }
 0x402   : > { %v4214_v57 = vmax.f32 %v4212_v33, %v4213_v54  ;;  %v2954_v1 = vadd.f32 %v9952_v50, %v2691_v42  ;;  %v7445_v6 = vpack.c.bf16 %v4188_v13, %v4188_v13  ;;  %v5110_v35 = vmax.f32 %v5108_v36, %v5109_v44 }
 0x403   : > { %v4234_v62 = vrot.slane %v4233_v51, 2  ;;  %v3082_v27 = vadd.f32 %v9952_v50, %v2819_v47  ;;  %v5084_v10 = vmax.f32 %v5082_v63, %v5083_v32  ;;  %v4208_v8 = vrot.slane %v4207_v20, 1 }
 0x404   : > { %v5130_v39 = vrot.slane %v5129_v58, 2  ;;  %v3210_v49 = vmax.f32 %v2954_v1, 0.0  ;;  %v5104_v23 = vrot.slane %v5103_v40, 1  ;;  %v7446_v59 = vpack.c.bf16 %v4195_v16, %v4195_v16 }
 0x405   : > { %v4228_v25 = vmax.f32 %v4226_v15, %v4227_v2  ;;  %v3338_v0 = vmax.f32 %v3082_v27, 0.0  ;;  %v7574_v52 = vpack.c.bf16 %v5091_v56, %v5091_v56  ;;  %v5124_v14 = vmax.f32 %v5122_v24, %v5123_v5 }
 0x406   : > { %v4215_v31 = vrot.slane %v4214_v57, 1  ;;  %v4217_v30 = vsel %vm3341_vm2, %v3210_v49, -inf  ;;  %v5111_v22 = vrot.slane %v5110_v35, 1  ;;  %v4235_v45 = vmax.f32 %v4233_v51, %v4234_v62 }
 0x407   : > { %v4218_v26 = vrot.slane %v4217_v30, 4  ;;  %v5113_v18 = vsel %vm3341_vm2, %v3338_v0, -inf  ;;  %v7573_v17 = vpack.c.bf16 %v5084_v10, %v5084_v10  ;;  %v4209_v50 = vmax.f32 %v4207_v20, %v4208_v8 }
 0x408   : > { %v5131_v11 = vmax.f32 %v5129_v58, %v5130_v39  ;;  %v5114_v38 = vrot.slane %v5113_v18, 4  ;;  %v5105_v48 = vmax.f32 %v5103_v40, %v5104_v23  ;;  %v6279_v9 = vunpack.c.l.b16 %v7446_v59 }
 0x409   : > { %v4229_v43 = vrot.slane %v4228_v25, 1  ;;  %v4219_v19 = vmax.f32 %v4217_v30, %v4218_v26  ;;  %v6407_v60 = vunpack.c.l.b16 %v7574_v52  ;;  %v5125_v61 = vrot.slane %v5124_v14, 1 }
 0x40a   : > { %v4216_v7 = vmax.f32 %v4214_v57, %v4215_v31  ;;  %v5115_v33 = vmax.f32 %v5113_v18, %v5114_v38  ;;  %v6278_v34 = vunpack.c.l.b16 %v7445_v6  ;;  %v5112_v63 = vmax.f32 %v5110_v35, %v5111_v22 }
 0x40b   : > { %v4236_v36 = vrot.slane %v4235_v45, 1  ;;  %v4220_v29 = vrot.slane %v4219_v19, 2  ;;  %v6406_v46 = vunpack.c.l.b16 %v7573_v17  ;;  %v7448_v53 = vpack.c.bf16 %v4209_v50, %v4209_v50 }
 0x40c   : > { %v5132_v4 = vrot.slane %v5131_v11, 1  ;;  %v5116_v28 = vrot.slane %v5115_v33, 2  ;;  %v7576_v41 = vpack.c.bf16 %v5105_v48, %v5105_v48  ;;  %v6526_v15 = vsel %vm6414_vm3, %v6279_v9, %v6278_v34 }
 0x40d   : > { %v4230_v37 = vmax.f32 %v4228_v25, %v4229_v43  ;;  %v4221_v13 = vmax.f32 %v4219_v19, %v4220_v29  ;;  %v6638_v21 = vsel %vm6414_vm3, %v6407_v60, %v6406_v46  ;;  %v5126_v24 = vmax.f32 %v5124_v14, %v5125_v61 }
 0x40e   : > { %v7449_v54 = vpack.c.bf16 %v4216_v7, %v4216_v7  ;;  %v5117_v3 = vmax.f32 %v5115_v33, %v5116_v28  ;;  %v6408_v32 = vunpack.c.l.b16 %v7575_v12  ;;  %v7577_v44 = vpack.c.bf16 %v5112_v63, %v5112_v63 }
 0x40f   : > { %v4237_v51 = vmax.f32 %v4235_v45, %v4236_v36  ;;  %v4222_v20 = vrot.slane %v4221_v13, 1  ;;  %v6527_v58 = vsel %vm6416_vm4, %v10101_v55, %v6526_v15  ;;  %v5133_v42 = vmax.f32 %v5131_v11, %v5132_v4 }
 0x410   : > { %v5118_v40 = vrot.slane %v5117_v3, 1  ;;  %v6281_v16 = vunpack.c.l.b16 %v7448_v53  ;;  %v6409_v2 = vunpack.c.l.b16 %v7576_v41  ;;  %v6639_v47 = vsel %vm6416_vm4, %v6408_v32, %v6638_v21 }
 0x411   : > { %v4223_v56 = vmax.f32 %v4221_v13, %v4222_v20  ;;  %v7451_v5 = vpack.c.bf16 %v4230_v37, %v4230_v37  ;;  %v7579_v57 = vpack.c.bf16 %v5126_v24, %v5126_v24  ;;  %v6282_v1 = vunpack.c.l.b16 %v7449_v54 }
 0x412   : > { %v5119_v6 = vmax.f32 %v5117_v3, %v5118_v40  ;;  %v6528_v35 = vsel %vm6418_vm5, %v6281_v16, %v6527_v58  ;;  %v6410_v12 = vunpack.c.l.b16 %v7577_v44  ;;  %v7452_v62 = vpack.c.bf16 %v4237_v51, %v4237_v51 }
 0x413   : > { %v7450_v27 = vpack.c.bf16 %v4223_v56, %v4223_v56  ;;  %v6640_v10 = vsel %vm6418_vm5, %v6409_v2, %v6639_v47  ;;  %v7580_v8 = vpack.c.bf16 %v5133_v42, %v5133_v42  ;;  %v6284_v49 = vunpack.c.l.b16 %v7451_v5 }
 0x414   : > { %v7578_v55 = vpack.c.bf16 %v5119_v6, %v5119_v6  ;;  %v6529_v23 = vsel %vm6420_vm6, %v6282_v1, %v6528_v35  ;;  %v6412_v25 = vunpack.c.l.b16 %v7579_v57  ;;  %v6641_v0 = vsel %vm6420_vm6, %v6410_v12, %v6640_v10 }
 0x415   : > { %v6283_v39 = vunpack.c.l.b16 %v7450_v27  ;;  %v6285_v52 = vunpack.c.l.b16 %v7452_v62  ;;  %v6413_v31 = vunpack.c.l.b16 %v7580_v8 }
 0x416   : > { %v6411_v59 = vunpack.c.l.b16 %v7578_v55 }
 0x417   : > { %v6530_v14 = vsel %vm6422_vm7, %v6283_v39, %v6529_v23 }
 0x418   : > { %v6531_v30 = vsel %vm6424_vm8, %v6284_v49, %v6530_v14  ;;  %v6642_v22 = vsel %vm6422_vm7, %v6411_v59, %v6641_v0 }
 0x419   : > { %v6532_v45 = vsel %vm6426_vm9, %v6285_v52, %v6531_v30  ;;  %v6643_v26 = vsel %vm6424_vm8, %v6412_v25, %v6642_v22 }
 0x41a   : > { %v6660_v18 = vpack.c.b16 %v6532_v45, %v6532_v45  ;;  %v6644_v17 = vsel %vm6426_vm9, %v6413_v31, %v6643_v26 }
 0x41b   : > { %v6676_v50 = vpack.c.b16 %v6644_v17, %v6644_v17 }
 0x41c   : > { %6725 = vst.msk [vmem:[%s8607_s8 + $0x3c] sm:$0xf] %vm6709_vm10, %v6660_v18 }
 0x41d   : > { %6741 = vst.msk [vmem:[%s8607_s8 + $0x7c] sm:$0xf] %vm6709_vm10, %v6676_v50 }
 0x41e PF: > { %s14_s15 = sadd.s32 1, %s8133_s15  }
 0x41f   : > { %p11_p5 = scmp.ge.s32.totalorder %s14_s15, 6  }
 0x421   :  { %13 = sbr.rel (!%p11_p5) target bundleno = 1 (0x1), region = 66 }

// kernel: graph_lenet_forward.5
= control target key start
LH: loop header
LB: loop body
LE: loop exit
PB: predicated region body
PF: predicated region fallthrough
CT: control target
= control target key end

     0   :  { %v4384_v0 = vmov 0   ;;  %vm834_vm0 = vcmask 785408   ;;  %vm1970_vm1 = vcmask 523264   ;;  %vm3507_vm2 = vcmask 1041409   ;;  %s5908_s1 = inlined_call_operand.vmem [shape: bf16[224,64], index: 1, kind: input, shape index: {}]   ;;  %s5909_s0 = inlined_call_operand.vmem [shape: bf16[1024,224], index: 0, kind: input, shape index: {}]   ;;  %s5910_s2 = inlined_call_operand.vmem [shape: f32[1,64], index: 2, kind: input, shape index: {}]   ;;  %s5911_s3 = inlined_call_operand.vmem [shape: f32[1,64], index: 3, kind: input, shape index: {}]   ;;  %s5912_s4 = inlined_call_operand.vmem [shape: bf16[128,64], index: 4, kind: output, shape index: {}]  }
   0x1   :  { %1027 = vmatprep.subr.bf16.mxu0 %v4384_v0  ;;  %4143 = vmatprep.subr.bf16.mxu1 %v4384_v0  ;;  %v4172_v1 = vld [vmem:[%s5908_s1 + $0x38] sm:$0xff]   ;;  %v4173_v2 = vld [vmem:[%s5908_s1 + $0x30] sm:$0xff]   ;;  %v4174_v3 = vld [vmem:[%s5908_s1 + $0x28] sm:$0xff]   ;;  %vm3509_vm3 = vcmask 1042434   ;;  %vm3511_vm4 = vcmask 1043459   ;;  %vm3513_vm5 = vcmask 1044484  }
   0x2   :  { %1028 = vmatpush1.bf16.msra.mxu0 %v4172_v1  ;;  %4157 = vmatpush1.bf16.msra.mxu1 %v4172_v1  ;;  %v4175_v4 = vld [vmem:[%s5908_s1 + $0x20] sm:$0xff]   ;;  %v4176_v5 = vld [vmem:[%s5908_s1 + $0x18] sm:$0xff]   ;;  %v4177_v8 = vld [vmem:[%s5908_s1 + $0x10] sm:$0xff]   ;;  %vm3515_vm6 = vcmask 1045509   ;;  %vm3517_vm7 = vcmask 1046534   ;;  %vm3519_vm8 = vcmask 1047559  }
   0x3   :  { %1029 = vmatprep.subr.bf16.mxu0 %v4384_v0  ;;  %4144 = vmatprep.subr.bf16.mxu1 %v4384_v0  ;;  %v4188_v6 = vld [vmem:[%s5909_s0 + $0x4] ss:$8 sps:$4 sm:$0xff]   ;;  %v4182_v13 = vld [vmem:[%s5908_s1 + $0x58] sm:$0xff]   ;;  %v4183_v14 = vld [vmem:[%s5908_s1 + $0x50] sm:$0xff]   ;;  %vm3658_vm9 = vcmask 519168  }
   0x4   :  { %v4191_v7 = vld [vmem:[%s5909_s0 + $0x204] ss:$8 sps:$4 sm:$0xff]   ;;  %3821 = vmatprep.mubr.msk.bf16.mxu0 %vm834_vm0, %v4188_v6  ;;  %v4186_v17 = vld [vmem:[%s5909_s0] ss:$8 sps:$4 sm:$0xff]   ;;  %v4192_v19 = vld [vmem:[%s5909_s0 + $0x14] ss:$8 sps:$4 sm:$0xff]  }
   0x5   :  { %3853 = vmatprep.mubr.msk.bf16.mxu1 %vm834_vm0, %v4191_v7  ;;  %v4178_v9 = vld [vmem:[%s5908_s1 + $0x8] sm:$0xff]   ;;  %v4179_v10 = vld [vmem:[%s5908_s1] sm:$0xff]   ;;  %v4194_v20 = vld [vmem:[%s5909_s0 + $0x214] ss:$8 sps:$4 sm:$0xff]  }
   0x6   :  { %1030 = vmatpush1.bf16.msra.mxu0 %v4173_v2  ;;  %4158 = vmatpush1.bf16.msra.mxu1 %v4173_v2  ;;  %v4180_v11 = vld [vmem:[%s5908_s1 + $0x68] sm:$0xff]   ;;  %v4181_v12 = vld [vmem:[%s5908_s1 + $0x60] sm:$0xff]   ;;  %v4196_v21 = vld [vmem:[%s5909_s0 + $0x10] ss:$8 sps:$4 sm:$0xff]  }
   0x7   :  { %1031 = vmatprep.subr.bf16.mxu0 %v4384_v0  ;;  %4145 = vmatprep.subr.bf16.mxu1 %v4384_v0  ;;  %v4184_v15 = vld [vmem:[%s5908_s1 + $0x48] sm:$0xff]   ;;  %v4185_v16 = vld [vmem:[%s5908_s1 + $0x40] sm:$0xff]   ;;  %v4197_v22 = vld [vmem:[%s5909_s0 + $0x210] ss:$8 sps:$4 sm:$0xff]  }
   0x8   :  { %v4189_v18 = vld [vmem:[%s5909_s0 + $0x200] ss:$8 sps:$4 sm:$0xff]   ;;  %v4198_v23 = vld [vmem:[%s5909_s0 + $0x24] ss:$8 sps:$4 sm:$0xff]   ;;  %v4204_v27 = vld [vmem:[%s5909_s0 + $0x34] ss:$8 sps:$4 sm:$0xff]  }
   0x9   :  { %v4200_v24 = vld [vmem:[%s5909_s0 + $0x224] ss:$8 sps:$4 sm:$0xff]   ;;  %v4202_v25 = vld [vmem:[%s5909_s0 + $0x20] ss:$8 sps:$4 sm:$0xff]   ;;  %v4206_v28 = vld [vmem:[%s5909_s0 + $0x234] ss:$8 sps:$4 sm:$0xff]  }
   0xa   :  { %1032 = vmatpush1.bf16.msra.mxu0 %v4174_v3  ;;  %4159 = vmatpush1.bf16.msra.mxu1 %v4174_v3  ;;  %v4203_v26 = vld [vmem:[%s5909_s0 + $0x220] ss:$8 sps:$4 sm:$0xff]   ;;  %v4208_v29 = vld [vmem:[%s5909_s0 + $0x30] ss:$8 sps:$4 sm:$0xff]   ;;  %v4210_v31 = vld [vmem:[%s5909_s0 + $0x44] ss:$8 sps:$4 sm:$0xff]  }
   0xb   :  { %1033 = vmatprep.subr.bf16.mxu0 %v4384_v0  ;;  %4146 = vmatprep.subr.bf16.mxu1 %v4384_v0  ;;  %v4209_v30 = vld [vmem:[%s5909_s0 + $0x230] ss:$8 sps:$4 sm:$0xff]   ;;  %v4212_v32 = vld [vmem:[%s5909_s0 + $0x244] ss:$8 sps:$4 sm:$0xff]   ;;  %v4214_v33 = vld [vmem:[%s5909_s0 + $0x40] ss:$8 sps:$4 sm:$0xff]  }
   0xc   :  { %v4215_v34 = vld [vmem:[%s5909_s0 + $0x240] ss:$8 sps:$4 sm:$0xff]   ;;  %v4216_v35 = vld [vmem:[%s5909_s0 + $0x54] ss:$8 sps:$4 sm:$0xff]   ;;  %v4220_v37 = vld [vmem:[%s5909_s0 + $0x50] ss:$8 sps:$4 sm:$0xff]  }
   0xd   :  { %v4218_v36 = vld [vmem:[%s5909_s0 + $0x254] ss:$8 sps:$4 sm:$0xff]   ;;  %v4221_v38 = vld [vmem:[%s5909_s0 + $0x250] ss:$8 sps:$4 sm:$0xff]   ;;  %v4222_v39 = vld [vmem:[%s5909_s0 + $0x64] ss:$8 sps:$4 sm:$0xff]  }
   0xe   :  { %1034 = vmatpush1.bf16.msra.mxu0 %v4175_v4  ;;  %4160 = vmatpush1.bf16.msra.mxu1 %v4175_v4  ;;  %v4224_v40 = vld [vmem:[%s5909_s0 + $0x264] ss:$8 sps:$4 sm:$0xff]   ;;  %v4226_v41 = vld [vmem:[%s5909_s0 + $0x60] ss:$8 sps:$4 sm:$0xff]   ;;  %v4228_v43 = vld [vmem:[%s5909_s0 + $0x74] ss:$8 sps:$4 sm:$0xff]  }
   0xf   :  { %1035 = vmatprep.subr.bf16.mxu0 %v4384_v0  ;;  %4147 = vmatprep.subr.bf16.mxu1 %v4384_v0  ;;  %v4227_v42 = vld [vmem:[%s5909_s0 + $0x260] ss:$8 sps:$4 sm:$0xff]   ;;  %v4230_v44 = vld [vmem:[%s5909_s0 + $0x274] ss:$8 sps:$4 sm:$0xff]   ;;  %v4232_v45 = vld [vmem:[%s5909_s0 + $0x70] ss:$8 sps:$4 sm:$0xff]  }
  0x10   :  { %v4233_v46 = vld [vmem:[%s5909_s0 + $0x270] ss:$8 sps:$4 sm:$0xff]   ;;  %v4234_v47 = vld [vmem:[%s5909_s0 + $0x84] ss:$8 sps:$4 sm:$0xff]   ;;  %v4238_v49 = vld [vmem:[%s5909_s0 + $0x80] ss:$8 sps:$4 sm:$0xff]  }
  0x11   :  { %v4236_v48 = vld [vmem:[%s5909_s0 + $0x284] ss:$8 sps:$4 sm:$0xff]   ;;  %v4239_v50 = vld [vmem:[%s5909_s0 + $0x280] ss:$8 sps:$4 sm:$0xff]   ;;  %v4240_v51 = vld [vmem:[%s5909_s0 + $0x94] ss:$8 sps:$4 sm:$0xff]  }
  0x12   :  { %1036 = vmatpush1.bf16.msra.mxu0 %v4176_v5  ;;  %4161 = vmatpush1.bf16.msra.mxu1 %v4176_v5  ;;  %v4242_v52 = vld [vmem:[%s5909_s0 + $0x294] ss:$8 sps:$4 sm:$0xff]   ;;  %v4244_v53 = vld [vmem:[%s5909_s0 + $0x90] ss:$8 sps:$4 sm:$0xff]   ;;  %v4246_v55 = vld [vmem:[%s5909_s0 + $0xa4] ss:$8 sps:$4 sm:$0xff]  }
  0x13   :  { %1037 = vmatprep.subr.bf16.mxu0 %v4384_v0  ;;  %4148 = vmatprep.subr.bf16.mxu1 %v4384_v0  ;;  %v4245_v54 = vld [vmem:[%s5909_s0 + $0x290] ss:$8 sps:$4 sm:$0xff]   ;;  %v4248_v56 = vld [vmem:[%s5909_s0 + $0x2a4] ss:$8 sps:$4 sm:$0xff]   ;;  %v4250_v57 = vld [vmem:[%s5909_s0 + $0xa0] ss:$8 sps:$4 sm:$0xff]  }
  0x14   :  { %v4251_v58 = vld [vmem:[%s5909_s0 + $0x2a0] ss:$8 sps:$4 sm:$0xff]   ;;  %v4252_v59 = vld [vmem:[%s5909_s0 + $0xb4] ss:$8 sps:$4 sm:$0xff]   ;;  %v4256_v61 = vld [vmem:[%s5909_s0 + $0xb0] ss:$8 sps:$4 sm:$0xff]  }
  0x15   :  { %v4254_v60 = vld [vmem:[%s5909_s0 + $0x2b4] ss:$8 sps:$4 sm:$0xff]   ;;  %v4257_v62 = vld [vmem:[%s5909_s0 + $0x2b0] ss:$8 sps:$4 sm:$0xff]   ;;  %v4258_v63 = vld [vmem:[%s5909_s0 + $0xc4] ss:$8 sps:$4 sm:$0xff]  }
  0x16   :  { %1038 = vmatpush1.bf16.msra.mxu0 %v4177_v8  ;;  %4162 = vmatpush1.bf16.msra.mxu1 %v4177_v8  ;;  %v4262_v1 = vld [vmem:[%s5909_s0 + $0xc0] ss:$8 sps:$4 sm:$0xff]   ;;  %v4264_v3 = vld [vmem:[%s5909_s0 + $0xd4] ss:$8 sps:$4 sm:$0xff]   ;;  %v4268_v5 = vld [vmem:[%s5909_s0 + $0xd0] ss:$8 sps:$4 sm:$0xff]  }
  0x17   :  { %1039 = vmatprep.subr.bf16.mxu0 %v4384_v0  ;;  %4149 = vmatprep.subr.bf16.mxu1 %v4384_v0  ;;  %v4263_v2 = vld [vmem:[%s5909_s0 + $0x2c0] ss:$8 sps:$4 sm:$0xff]   ;;  %v4266_v4 = vld [vmem:[%s5909_s0 + $0x2d4] ss:$8 sps:$4 sm:$0xff]   ;;  %v4269_v6 = vld [vmem:[%s5909_s0 + $0x2d0] ss:$8 sps:$4 sm:$0xff]  }
  0x18   :  { %v4270_v7 = vld [vmem:[%s5909_s0 + $0xe4] ss:$8 sps:$4 sm:$0xff]  }
  0x19   :  { %v4272_v8 = vld [vmem:[%s5909_s0 + $0x2e4] ss:$8 sps:$4 sm:$0xff]  }
  0x1a   :  { %1040 = vmatpush1.bf16.msra.mxu0 %v4178_v9  ;;  %4163 = vmatpush1.bf16.msra.mxu1 %v4178_v9  ;;  %v4274_v9 = vld [vmem:[%s5909_s0 + $0xe0] ss:$8 sps:$4 sm:$0xff]  }
  0x1b   :  { %1041 = vmatprep.subr.bf16.mxu0 %v4384_v0  ;;  %4150 = vmatprep.subr.bf16.mxu1 %v4384_v0 }
  0x1e   :  { %1042 = vmatpush1.bf16.msra.mxu0 %v4179_v10  ;;  %4164 = vmatpush1.bf16.msra.mxu1 %v4179_v10  ;;  %v4275_v10 = vld [vmem:[%s5909_s0 + $0x2e0] ss:$8 sps:$4 sm:$0xff]  }
  0x1f   :  { %1047 = vmatprep.subr.bf16.mxu0 %v4384_v0  ;;  %4151 = vmatprep.subr.bf16.mxu1 %v4384_v0 }
  0x22   :  { %1048 = vmatpush2.bf16.msra.mxu0 %v4180_v11  ;;  %4165 = vmatpush2.bf16.msra.mxu1 %v4180_v11  ;;  %v4276_v11 = vld [vmem:[%s5909_s0 + $0xf4] ss:$8 sps:$4 sm:$0xff]  }
  0x23   :  { %1049 = vmatprep.subr.bf16.mxu0 %v4384_v0  ;;  %4152 = vmatprep.subr.bf16.mxu1 %v4384_v0 }
  0x26   :  { %1050 = vmatpush2.bf16.msra.mxu0 %v4181_v12  ;;  %4166 = vmatpush2.bf16.msra.mxu1 %v4181_v12  ;;  %v4278_v12 = vld [vmem:[%s5909_s0 + $0x2f4] ss:$8 sps:$4 sm:$0xff]  }
  0x27   :  { %1051 = vmatprep.subr.bf16.mxu0 %v4384_v0  ;;  %4153 = vmatprep.subr.bf16.mxu1 %v4384_v0 }
  0x2a   :  { %1052 = vmatpush2.bf16.msra.mxu0 %v4182_v13  ;;  %4167 = vmatpush2.bf16.msra.mxu1 %v4182_v13  ;;  %v4280_v13 = vld [vmem:[%s5909_s0 + $0xf0] ss:$8 sps:$4 sm:$0xff]  }
  0x2b   :  { %1053 = vmatprep.subr.bf16.mxu0 %v4384_v0  ;;  %4154 = vmatprep.subr.bf16.mxu1 %v4384_v0 }
  0x2e   :  { %1054 = vmatpush2.bf16.msra.mxu0 %v4183_v14  ;;  %4168 = vmatpush2.bf16.msra.mxu1 %v4183_v14  ;;  %v4281_v14 = vld [vmem:[%s5909_s0 + $0x2f0] ss:$8 sps:$4 sm:$0xff]  }
  0x2f   :  { %1055 = vmatprep.subr.bf16.mxu0 %v4384_v0  ;;  %4155 = vmatprep.subr.bf16.mxu1 %v4384_v0 }
  0x32   :  { %1056 = vmatpush2.bf16.msra.mxu0 %v4184_v15  ;;  %4169 = vmatpush2.bf16.msra.mxu1 %v4184_v15  ;;  %v4282_v15 = vld [vmem:[%s5909_s0 + $0x104] ss:$8 sps:$4 sm:$0xff]  }
  0x33   :  { %1057 = vmatprep.subr.bf16.mxu0 %v4384_v0  ;;  %4156 = vmatprep.subr.bf16.mxu1 %v4384_v0  ;;  %v4260_v0 = vld [vmem:[%s5909_s0 + $0x2c4] ss:$8 sps:$4 sm:$0xff]  }
  0x36   :  { %1058 = vmatpush2.bf16.msra.mxu0 %v4185_v16  ;;  %4170 = vmatpush2.bf16.msra.mxu1 %v4185_v16  ;;  %v4284_v16 = vld [vmem:[%s5909_s0 + $0x304] ss:$8 sps:$4 sm:$0xff]  }
  0x39   :  { %1060 = vmatmul.mubr.bf16.vlgmr.msra.gmra.mxu0 %v4186_v17  ;;  %1316 = vmatmul.mubr.bf16.vlgmr.msra.gmra.mxu1 %v4189_v18  ;;  %v4286_v17 = vld [vmem:[%s5909_s0 + $0x100] ss:$8 sps:$4 sm:$0xff]  }
  0x3a   :  { %3822 = vmatprep.mubr.msk.bf16.mxu0 %vm834_vm0, %v4192_v19  ;;  %3854 = vmatprep.mubr.msk.bf16.mxu1 %vm834_vm0, %v4194_v20  ;;  %v4287_v18 = vld [vmem:[%s5909_s0 + $0x300] ss:$8 sps:$4 sm:$0xff]   ;;  %v4288_v19 = vld [vmem:[%s5909_s0 + $0x114] ss:$8 sps:$4 sm:$0xff]  }
  0x3b   :  { %v4290_v20 = vld [vmem:[%s5909_s0 + $0x314] ss:$8 sps:$4 sm:$0xff]  }
  0x41   :  { %1068 = vmatmul.mubr.bf16.gmra.mxu0 %v4196_v21  ;;  %1324 = vmatmul.mubr.bf16.gmra.mxu1 %v4197_v22  ;;  %v4292_v21 = vld [vmem:[%s5909_s0 + $0x110] ss:$8 sps:$4 sm:$0xff]  }
  0x42   :  { %3823 = vmatprep.mubr.msk.bf16.mxu0 %vm834_vm0, %v4198_v23  ;;  %3855 = vmatprep.mubr.msk.bf16.mxu1 %vm834_vm0, %v4200_v24  ;;  %v4293_v22 = vld [vmem:[%s5909_s0 + $0x310] ss:$8 sps:$4 sm:$0xff]   ;;  %v4294_v23 = vld [vmem:[%s5909_s0 + $0x124] ss:$8 sps:$4 sm:$0xff]  }
  0x43   :  { %v4296_v24 = vld [vmem:[%s5909_s0 + $0x324] ss:$8 sps:$4 sm:$0xff]  }
  0x49   :  { %1076 = vmatmul.mubr.bf16.gmra.mxu0 %v4202_v25  ;;  %1332 = vmatmul.mubr.bf16.gmra.mxu1 %v4203_v26  ;;  %v4298_v25 = vld [vmem:[%s5909_s0 + $0x120] ss:$8 sps:$4 sm:$0xff]  }
  0x4a   :  { %3824 = vmatprep.mubr.msk.bf16.mxu0 %vm834_vm0, %v4204_v27  ;;  %3856 = vmatprep.mubr.msk.bf16.mxu1 %vm834_vm0, %v4206_v28  ;;  %v4299_v26 = vld [vmem:[%s5909_s0 + $0x320] ss:$8 sps:$4 sm:$0xff]   ;;  %v4300_v27 = vld [vmem:[%s5909_s0 + $0x134] ss:$8 sps:$4 sm:$0xff]  }
  0x4b   :  { %v4302_v28 = vld [vmem:[%s5909_s0 + $0x334] ss:$8 sps:$4 sm:$0xff]  }
  0x51   :  { %1084 = vmatmul.mubr.bf16.gmra.mxu0 %v4208_v29  ;;  %1340 = vmatmul.mubr.bf16.gmra.mxu1 %v4209_v30  ;;  %v4304_v29 = vld [vmem:[%s5909_s0 + $0x130] ss:$8 sps:$4 sm:$0xff]  }
  0x52   :  { %3825 = vmatprep.mubr.msk.bf16.mxu0 %vm834_vm0, %v4210_v31  ;;  %3857 = vmatprep.mubr.msk.bf16.mxu1 %vm834_vm0, %v4212_v32  ;;  %v4305_v30 = vld [vmem:[%s5909_s0 + $0x330] ss:$8 sps:$4 sm:$0xff]   ;;  %v4306_v31 = vld [vmem:[%s5909_s0 + $0x144] ss:$8 sps:$4 sm:$0xff]  }
  0x53   :  { %v4308_v32 = vld [vmem:[%s5909_s0 + $0x344] ss:$8 sps:$4 sm:$0xff]  }
  0x59   :  { %1092 = vmatmul.mubr.bf16.gmra.mxu0 %v4214_v33  ;;  %1348 = vmatmul.mubr.bf16.gmra.mxu1 %v4215_v34  ;;  %v4310_v33 = vld [vmem:[%s5909_s0 + $0x140] ss:$8 sps:$4 sm:$0xff]  }
  0x5a   :  { %3826 = vmatprep.mubr.msk.bf16.mxu0 %vm834_vm0, %v4216_v35  ;;  %3858 = vmatprep.mubr.msk.bf16.mxu1 %vm834_vm0, %v4218_v36  ;;  %v4311_v34 = vld [vmem:[%s5909_s0 + $0x340] ss:$8 sps:$4 sm:$0xff]   ;;  %v4312_v35 = vld [vmem:[%s5909_s0 + $0x154] ss:$8 sps:$4 sm:$0xff]  }
  0x5b   :  { %v4314_v36 = vld [vmem:[%s5909_s0 + $0x354] ss:$8 sps:$4 sm:$0xff]  }
  0x61   :  { %1100 = vmatmul.mubr.bf16.gmra.mxu0 %v4220_v37  ;;  %1356 = vmatmul.mubr.bf16.gmra.mxu1 %v4221_v38  ;;  %v4316_v37 = vld [vmem:[%s5909_s0 + $0x150] ss:$8 sps:$4 sm:$0xff]  }
  0x62   :  { %3827 = vmatprep.mubr.msk.bf16.mxu0 %vm834_vm0, %v4222_v39  ;;  %3859 = vmatprep.mubr.msk.bf16.mxu1 %vm834_vm0, %v4224_v40  ;;  %v4317_v38 = vld [vmem:[%s5909_s0 + $0x350] ss:$8 sps:$4 sm:$0xff]   ;;  %v4318_v39 = vld [vmem:[%s5909_s0 + $0x164] ss:$8 sps:$4 sm:$0xff]  }
  0x63   :  { %v4320_v40 = vld [vmem:[%s5909_s0 + $0x364] ss:$8 sps:$4 sm:$0xff]  }
  0x69   :  { %1108 = vmatmul.mubr.bf16.gmra.mxu0 %v4226_v41  ;;  %1364 = vmatmul.mubr.bf16.gmra.mxu1 %v4227_v42  ;;  %v4322_v41 = vld [vmem:[%s5909_s0 + $0x160] ss:$8 sps:$4 sm:$0xff]  }
  0x6a   :  { %3828 = vmatprep.mubr.msk.bf16.mxu0 %vm834_vm0, %v4228_v43  ;;  %3860 = vmatprep.mubr.msk.bf16.mxu1 %vm834_vm0, %v4230_v44  ;;  %v4323_v42 = vld [vmem:[%s5909_s0 + $0x360] ss:$8 sps:$4 sm:$0xff]   ;;  %v4324_v43 = vld [vmem:[%s5909_s0 + $0x174] ss:$8 sps:$4 sm:$0xff]  }
  0x6b   :  { %v4326_v44 = vld [vmem:[%s5909_s0 + $0x374] ss:$8 sps:$4 sm:$0xff]  }
  0x71   :  { %1116 = vmatmul.mubr.bf16.gmra.mxu0 %v4232_v45  ;;  %1372 = vmatmul.mubr.bf16.gmra.mxu1 %v4233_v46  ;;  %v4328_v45 = vld [vmem:[%s5909_s0 + $0x170] ss:$8 sps:$4 sm:$0xff]  }
  0x72   :  { %3829 = vmatprep.mubr.msk.bf16.mxu0 %vm834_vm0, %v4234_v47  ;;  %3861 = vmatprep.mubr.msk.bf16.mxu1 %vm834_vm0, %v4236_v48  ;;  %v4329_v46 = vld [vmem:[%s5909_s0 + $0x370] ss:$8 sps:$4 sm:$0xff]   ;;  %v4330_v47 = vld [vmem:[%s5909_s0 + $0x184] ss:$8 sps:$4 sm:$0xff]  }
  0x73   :  { %v4332_v48 = vld [vmem:[%s5909_s0 + $0x384] ss:$8 sps:$4 sm:$0xff]  }
  0x79   :  { %1124 = vmatmul.mubr.bf16.gmra.mxu0 %v4238_v49  ;;  %1380 = vmatmul.mubr.bf16.gmra.mxu1 %v4239_v50  ;;  %v4334_v49 = vld [vmem:[%s5909_s0 + $0x180] ss:$8 sps:$4 sm:$0xff]  }
  0x7a   :  { %3830 = vmatprep.mubr.msk.bf16.mxu0 %vm834_vm0, %v4240_v51  ;;  %3862 = vmatprep.mubr.msk.bf16.mxu1 %vm834_vm0, %v4242_v52  ;;  %v4335_v50 = vld [vmem:[%s5909_s0 + $0x380] ss:$8 sps:$4 sm:$0xff]   ;;  %v4336_v51 = vld [vmem:[%s5909_s0 + $0x194] ss:$8 sps:$4 sm:$0xff]  }
  0x7b   :  { %v4338_v52 = vld [vmem:[%s5909_s0 + $0x394] ss:$8 sps:$4 sm:$0xff]  }
  0x81   :  { %1132 = vmatmul.mubr.bf16.gmra.mxu0 %v4244_v53  ;;  %1388 = vmatmul.mubr.bf16.gmra.mxu1 %v4245_v54  ;;  %v4839_v53 = vld [vmem:[%s5910_s2] ss:$0 sm:$0xff] }
  0x82   :  { %3831 = vmatprep.mubr.msk.bf16.mxu0 %vm834_vm0, %v4246_v55  ;;  %3863 = vmatprep.mubr.msk.bf16.mxu1 %vm834_vm0, %v4248_v56  ;;  %v4844_v55 = vld [vmem:[%s5911_s3] ss:$0 sm:$0xff] }
  0x89   :  { %1140 = vmatmul.mubr.bf16.gmra.mxu0 %v4250_v57  ;;  %1396 = vmatmul.mubr.bf16.gmra.mxu1 %v4251_v58 }
  0x8a   :  { %3832 = vmatprep.mubr.msk.bf16.mxu0 %vm834_vm0, %v4252_v59  ;;  %3864 = vmatprep.mubr.msk.bf16.mxu1 %vm834_vm0, %v4254_v60 }
  0x91   :  { %1148 = vmatmul.mubr.bf16.gmra.mxu0 %v4256_v61  ;;  %1404 = vmatmul.mubr.bf16.gmra.mxu1 %v4257_v62 }
  0x92   :  { %3833 = vmatprep.mubr.msk.bf16.mxu0 %vm834_vm0, %v4258_v63  ;;  %3865 = vmatprep.mubr.msk.bf16.mxu1 %vm834_vm0, %v4260_v0 }
  0x99   :  { %1156 = vmatmul.mubr.bf16.gmra.mxu0 %v4262_v1  ;;  %1412 = vmatmul.mubr.bf16.gmra.mxu1 %v4263_v2  ;;  %v4340_v1 = vld [vmem:[%s5909_s0 + $0x190] ss:$8 sps:$4 sm:$0xff]  }
  0x9a   :  { %3834 = vmatprep.mubr.msk.bf16.mxu0 %vm834_vm0, %v4264_v3  ;;  %3866 = vmatprep.mubr.msk.bf16.mxu1 %vm834_vm0, %v4266_v4  ;;  %v4341_v2 = vld [vmem:[%s5909_s0 + $0x390] ss:$8 sps:$4 sm:$0xff]  }
  0xa1   :  { %1164 = vmatmul.mubr.bf16.gmra.mxu0 %v4268_v5  ;;  %1420 = vmatmul.mubr.bf16.gmra.mxu1 %v4269_v6 }
  0xa2   :  { %3835 = vmatprep.mubr.msk.bf16.mxu0 %vm834_vm0, %v4270_v7  ;;  %3867 = vmatprep.mubr.msk.bf16.mxu1 %vm834_vm0, %v4272_v8  ;;  %v4342_v7 = vld [vmem:[%s5909_s0 + $0x1a4] ss:$8 sps:$4 sm:$0xff]  }
  0xa3   :  { %v4344_v8 = vld [vmem:[%s5909_s0 + $0x3a4] ss:$8 sps:$4 sm:$0xff]  }
  0xa9   :  { %1172 = vmatmul.mubr.bf16.gmra.mxu0 %v4274_v9  ;;  %1428 = vmatmul.mubr.bf16.gmra.mxu1 %v4275_v10 }
  0xaa   :  { %3836 = vmatprep.mubr.msk.bf16.mxu0 %vm834_vm0, %v4276_v11  ;;  %3868 = vmatprep.mubr.msk.bf16.mxu1 %vm834_vm0, %v4278_v12 }
  0xb1   :  { %1180 = vmatmul.mubr.bf16.gmra.mxu0 %v4280_v13  ;;  %1436 = vmatmul.mubr.bf16.gmra.mxu1 %v4281_v14 }
  0xb2   :  { %3837 = vmatprep.mubr.msk.bf16.mxu0 %vm834_vm0, %v4282_v15  ;;  %3869 = vmatprep.mubr.msk.bf16.mxu1 %vm834_vm0, %v4284_v16 }
  0xb9   :  { %1188 = vmatmul.mubr.bf16.gmra.mxu0 %v4286_v17  ;;  %1444 = vmatmul.mubr.bf16.gmra.mxu1 %v4287_v18 }
  0xba   :  { %3838 = vmatprep.mubr.msk.bf16.mxu0 %vm834_vm0, %v4288_v19  ;;  %3870 = vmatprep.mubr.msk.bf16.mxu1 %vm834_vm0, %v4290_v20 }
  0xc1   :  { %1196 = vmatmul.mubr.bf16.gmra.mxu0 %v4292_v21  ;;  %1452 = vmatmul.mubr.bf16.gmra.mxu1 %v4293_v22 }
  0xc2   :  { %3839 = vmatprep.mubr.msk.bf16.mxu0 %vm834_vm0, %v4294_v23  ;;  %3871 = vmatprep.mubr.msk.bf16.mxu1 %vm834_vm0, %v4296_v24 }
  0xc9   :  { %1204 = vmatmul.mubr.bf16.gmra.mxu0 %v4298_v25  ;;  %1460 = vmatmul.mubr.bf16.gmra.mxu1 %v4299_v26 }
  0xca   :  { %3840 = vmatprep.mubr.msk.bf16.mxu0 %vm834_vm0, %v4300_v27  ;;  %3872 = vmatprep.mubr.msk.bf16.mxu1 %vm834_vm0, %v4302_v28 }
  0xd1   :  { %1212 = vmatmul.mubr.bf16.gmra.mxu0 %v4304_v29  ;;  %1468 = vmatmul.mubr.bf16.gmra.mxu1 %v4305_v30 }
  0xd2   :  { %3841 = vmatprep.mubr.msk.bf16.mxu0 %vm834_vm0, %v4306_v31  ;;  %3873 = vmatprep.mubr.msk.bf16.mxu1 %vm834_vm0, %v4308_v32  ;;  %v4346_v31 = vld [vmem:[%s5909_s0 + $0x1a0] ss:$8 sps:$4 sm:$0xff]  }
  0xd9   :  { %1220 = vmatmul.mubr.bf16.gmra.mxu0 %v4310_v33  ;;  %1476 = vmatmul.mubr.bf16.gmra.mxu1 %v4311_v34 }
  0xda   :  { %3842 = vmatprep.mubr.msk.bf16.mxu0 %vm834_vm0, %v4312_v35  ;;  %3874 = vmatprep.mubr.msk.bf16.mxu1 %vm834_vm0, %v4314_v36 }
  0xe1   :  { %1228 = vmatmul.mubr.bf16.gmra.mxu0 %v4316_v37  ;;  %1484 = vmatmul.mubr.bf16.gmra.mxu1 %v4317_v38  ;;  %v4347_v38 = vld [vmem:[%s5909_s0 + $0x3a0] ss:$8 sps:$4 sm:$0xff]  }
  0xe2   :  { %3843 = vmatprep.mubr.msk.bf16.mxu0 %vm834_vm0, %v4318_v39  ;;  %3875 = vmatprep.mubr.msk.bf16.mxu1 %vm834_vm0, %v4320_v40 }
  0xe9   :  { %1236 = vmatmul.mubr.bf16.gmra.mxu0 %v4322_v41  ;;  %1492 = vmatmul.mubr.bf16.gmra.mxu1 %v4323_v42 }
  0xea   :  { %3844 = vmatprep.mubr.msk.bf16.mxu0 %vm834_vm0, %v4324_v43  ;;  %3876 = vmatprep.mubr.msk.bf16.mxu1 %vm834_vm0, %v4326_v44  ;;  %v4348_v43 = vld [vmem:[%s5909_s0 + $0x1b4] ss:$8 sps:$4 sm:$0xff]  }
  0xeb   :  { %v4350_v44 = vld [vmem:[%s5909_s0 + $0x3b4] ss:$8 sps:$4 sm:$0xff]  }
  0xf1   :  { %1244 = vmatmul.mubr.bf16.gmra.mxu0 %v4328_v45  ;;  %1500 = vmatmul.mubr.bf16.gmra.mxu1 %v4329_v46 }
  0xf2   :  { %3845 = vmatprep.mubr.msk.bf16.mxu0 %vm834_vm0, %v4330_v47  ;;  %3877 = vmatprep.mubr.msk.bf16.mxu1 %vm834_vm0, %v4332_v48 }
  0xf9   :  { %v1061_v54 = vpop.f32.mrf.mxu0  ;;  %1252 = vmatmul.mubr.bf16.gmra.mxu0 %v4334_v49  ;;  %v1317_v56 = vpop.f32.mrf.mxu1  ;;  %1508 = vmatmul.mubr.bf16.gmra.mxu1 %v4335_v50 }
  0xfa   :  { %v1579_v57 = vmul.f32 %v4839_v53, %v1061_v54  ;;  %v1643_v58 = vmul.f32 %v4839_v53, %v1317_v56  ;;  %3846 = vmatprep.mubr.msk.bf16.mxu0 %vm834_vm0, %v4336_v51  ;;  %3878 = vmatprep.mubr.msk.bf16.mxu1 %vm834_vm0, %v4338_v52 }
  0xfb   :  { %v1063_v59 = vpop.f32.mrf.mxu0  ;;  %v1319_v60 = vpop.f32.mrf.mxu1 }
  0xfc   :  { %v1714_v61 = vadd.f32 %v4844_v55, %v1579_v57  ;;  %v1778_v62 = vadd.f32 %v4844_v55, %v1643_v58 }
  0xfd   :  { %v1064_v63 = vpop.f32.mrf.mxu0  ;;  %v1320_v0 = vpop.f32.mrf.mxu1 }
  0xfe   :  { %v1842_v3 = vmax.f32 %v1714_v61, 0.0  ;;  %v1906_v4 = vmax.f32 %v1778_v62, 0.0  ;;  %v1580_v5 = vmul.f32 %v4839_v53, %v1064_v63  ;;  %v1644_v6 = vmul.f32 %v4839_v53, %v1320_v0 }
  0xff   :  { %v1066_v9 = vpop.f32.mrf.mxu0  ;;  %v1322_v10 = vpop.f32.mrf.mxu1 }
 0x100   :  { %v1971_v11 = vsel %vm1970_vm1, %v1842_v3, -inf  ;;  %v2419_v12 = vsel %vm1970_vm1, %v1906_v4, -inf  ;;  %v1715_v13 = vadd.f32 %v4844_v55, %v1580_v5  ;;  %v1779_v14 = vadd.f32 %v4844_v55, %v1644_v6 }
 0x101   :  { %v1972_v15 = vrot.slane %v1971_v11, 4  ;;  %v2420_v16 = vrot.slane %v2419_v12, 4  ;;  %v1069_v17 = vpop.f32.mrf.mxu0  ;;  %1260 = vmatmul.mubr.bf16.gmra.mxu0 %v4340_v1  ;;  %v1325_v18 = vpop.f32.mrf.mxu1  ;;  %1516 = vmatmul.mubr.bf16.gmra.mxu1 %v4341_v2 }
 0x102   :  { %v1843_v19 = vmax.f32 %v1715_v13, 0.0  ;;  %v1907_v20 = vmax.f32 %v1779_v14, 0.0  ;;  %v1581_v21 = vmul.f32 %v4839_v53, %v1069_v17  ;;  %v1645_v22 = vmul.f32 %v4839_v53, %v1325_v18  ;;  %3847 = vmatprep.mubr.msk.bf16.mxu0 %vm834_vm0, %v4342_v7  ;;  %3879 = vmatprep.mubr.msk.bf16.mxu1 %vm834_vm0, %v4344_v8 }
 0x103   :  { %v1973_v23 = vmax.f32 %v1971_v11, %v1972_v15  ;;  %v2421_v24 = vmax.f32 %v2419_v12, %v2420_v16  ;;  %v1071_v25 = vpop.f32.mrf.mxu0  ;;  %v1327_v26 = vpop.f32.mrf.mxu1 }
 0x104   :  { %v1978_v27 = vsel %vm1970_vm1, %v1843_v19, -inf  ;;  %v2426_v28 = vsel %vm1970_vm1, %v1907_v20, -inf  ;;  %v1716_v29 = vadd.f32 %v4844_v55, %v1581_v21  ;;  %v1780_v30 = vadd.f32 %v4844_v55, %v1645_v22  ;;  %v4352_v19 = vld [vmem:[%s5909_s0 + $0x1b0] ss:$8 sps:$4 sm:$0xff]   ;;  %v4354_v25 = vld [vmem:[%s5909_s0 + $0x1c4] ss:$8 sps:$4 sm:$0xff]  }
 0x105   :  { %v1974_v32 = vrot.slane %v1973_v23, 2  ;;  %v2422_v33 = vrot.slane %v2421_v24, 2  ;;  %v1979_v34 = vrot.slane %v1978_v27, 4  ;;  %v2427_v35 = vrot.slane %v2426_v28, 4  ;;  %v1072_v36 = vpop.f32.mrf.mxu0  ;;  %v1328_v37 = vpop.f32.mrf.mxu1  ;;  %v4353_v20 = vld [vmem:[%s5909_s0 + $0x3b0] ss:$8 sps:$4 sm:$0xff]  }
 0x106   :  { %v1844_v39 = vmax.f32 %v1716_v29, 0.0  ;;  %v1908_v40 = vmax.f32 %v1780_v30, 0.0  ;;  %v1582_v41 = vmul.f32 %v4839_v53, %v1072_v36  ;;  %v1646_v42 = vmul.f32 %v4839_v53, %v1328_v37 }
 0x107   :  { %v1975_v45 = vmax.f32 %v1973_v23, %v1974_v32  ;;  %v2423_v46 = vmax.f32 %v2421_v24, %v2422_v33  ;;  %v1980_v47 = vmax.f32 %v1978_v27, %v1979_v34  ;;  %v2428_v48 = vmax.f32 %v2426_v28, %v2427_v35  ;;  %v1074_v49 = vpop.f32.mrf.mxu0  ;;  %v1330_v50 = vpop.f32.mrf.mxu1  ;;  %v4356_v32 = vld [vmem:[%s5909_s0 + $0x3c4] ss:$8 sps:$4 sm:$0xff]  }
 0x108   :  { %v1985_v51 = vsel %vm1970_vm1, %v1844_v39, -inf  ;;  %v2433_v52 = vsel %vm1970_vm1, %v1908_v40, -inf  ;;  %v1717_v54 = vadd.f32 %v4844_v55, %v1582_v41  ;;  %v1781_v56 = vadd.f32 %v4844_v55, %v1646_v42 }
 0x109   :  { %v1976_v57 = vrot.slane %v1975_v45, 1  ;;  %v2424_v58 = vrot.slane %v2423_v46, 1  ;;  %v1981_v59 = vrot.slane %v1980_v47, 2  ;;  %v2429_v60 = vrot.slane %v2428_v48, 2  ;;  %v1077_v61 = vpop.f32.mrf.mxu0  ;;  %1268 = vmatmul.mubr.bf16.gmra.mxu0 %v4346_v31  ;;  %v1333_v62 = vpop.f32.mrf.mxu1  ;;  %1524 = vmatmul.mubr.bf16.gmra.mxu1 %v4347_v38 }
 0x10a   :  { %v1986_v63 = vrot.slane %v1985_v51, 4  ;;  %v2434_v0 = vrot.slane %v2433_v52, 4  ;;  %v1845_v1 = vmax.f32 %v1717_v54, 0.0  ;;  %v1909_v2 = vmax.f32 %v1781_v56, 0.0  ;;  %3848 = vmatprep.mubr.msk.bf16.mxu0 %vm834_vm0, %v4348_v43  ;;  %3880 = vmatprep.mubr.msk.bf16.mxu1 %vm834_vm0, %v4350_v44 }
 0x10b   :  { %v1977_v3 = vmax.f32 %v1975_v45, %v1976_v57  ;;  %v2425_v4 = vmax.f32 %v2423_v46, %v2424_v58  ;;  %v1982_v5 = vmax.f32 %v1980_v47, %v1981_v59  ;;  %v2430_v6 = vmax.f32 %v2428_v48, %v2429_v60  ;;  %v1079_v7 = vpop.f32.mrf.mxu0  ;;  %v1335_v8 = vpop.f32.mrf.mxu1 }
 0x10c   :  { %v1987_v9 = vmax.f32 %v1985_v51, %v1986_v63  ;;  %v2435_v10 = vmax.f32 %v2433_v52, %v2434_v0  ;;  %v1992_v11 = vsel %vm1970_vm1, %v1845_v1, -inf  ;;  %v2440_v12 = vsel %vm1970_vm1, %v1909_v2, -inf  ;;  %v4358_v1 = vld [vmem:[%s5909_s0 + $0x1c0] ss:$8 sps:$4 sm:$0xff]  }
 0x10d   :  { %v4015_v13 = vpack.c.bf16 %v1977_v3, %v1977_v3  ;;  %v4079_v14 = vpack.c.bf16 %v2425_v4, %v2425_v4  ;;  %v1983_v15 = vrot.slane %v1982_v5, 1  ;;  %v2431_v16 = vrot.slane %v2430_v6, 1  ;;  %v1080_v17 = vpop.f32.mrf.mxu0  ;;  %v1336_v18 = vpop.f32.mrf.mxu1 }
 0x10e   :  { %v1988_v21 = vrot.slane %v1987_v9, 2  ;;  %v2436_v22 = vrot.slane %v2435_v10, 2  ;;  %v1993_v23 = vrot.slane %v1992_v11, 4  ;;  %v2441_v24 = vrot.slane %v2440_v12, 4 }
 0x10f   :  { %v3379_v26 = vunpack.c.l.b16 %v4015_v13  ;;  %v3443_v27 = vunpack.c.l.b16 %v4079_v14  ;;  %v1984_v28 = vmax.f32 %v1982_v5, %v1983_v15  ;;  %v2432_v29 = vmax.f32 %v2430_v6, %v2431_v16  ;;  %v1082_v30 = vpop.f32.mrf.mxu0  ;;  %v1338_v31 = vpop.f32.mrf.mxu1  ;;  %v4359_v6 = vld [vmem:[%s5909_s0 + $0x3c0] ss:$8 sps:$4 sm:$0xff]   ;;  %v4360_v13 = vld [vmem:[%s5909_s0 + $0x1d4] ss:$8 sps:$4 sm:$0xff]  }
 0x110   :  { %v1989_v33 = vmax.f32 %v1987_v9, %v1988_v21  ;;  %v2437_v34 = vmax.f32 %v2435_v10, %v2436_v22  ;;  %v1994_v35 = vmax.f32 %v1992_v11, %v1993_v23  ;;  %v2442_v36 = vmax.f32 %v2440_v12, %v2441_v24  ;;  %v4362_v14 = vld [vmem:[%s5909_s0 + $0x3d4] ss:$8 sps:$4 sm:$0xff]  }
 0x111   :  { %v4016_v37 = vpack.c.bf16 %v1984_v28, %v1984_v28  ;;  %v4080_v38 = vpack.c.bf16 %v2432_v29, %v2432_v29  ;;  %v1583_v39 = vmul.f32 %v4839_v53, %v1077_v61  ;;  %v1647_v40 = vmul.f32 %v4839_v53, %v1333_v62  ;;  %v4914_v41 = vpop.f32.mrf.mxu0  ;;  %1276 = vmatmul.mubr.bf16.gmra.mxu0 %v4352_v19  ;;  %v4916_v42 = vpop.f32.mrf.mxu1 }
 0x112   :  { %v1990_v43 = vrot.slane %v1989_v33, 1  ;;  %v2438_v44 = vrot.slane %v2437_v34, 1  ;;  %v1995_v45 = vrot.slane %v1994_v35, 2  ;;  %v2443_v46 = vrot.slane %v2442_v36, 2  ;;  %1532 = vmatmul.mubr.bf16.gmra.mxu1 %v4353_v20  ;;  %3849 = vmatprep.mubr.msk.bf16.mxu0 %vm834_vm0, %v4354_v25 }
 0x113   :  { %v3380_v47 = vunpack.c.l.b16 %v4016_v37  ;;  %v3444_v48 = vunpack.c.l.b16 %v4080_v38  ;;  %v1718_v49 = vadd.f32 %v4844_v55, %v1583_v39  ;;  %v1782_v50 = vadd.f32 %v4844_v55, %v1647_v40  ;;  %v1087_v51 = vpop.f32.mrf.mxu0  ;;  %v1343_v52 = vpop.f32.mrf.mxu1  ;;  %3881 = vmatprep.mubr.msk.bf16.mxu1 %vm834_vm0, %v4356_v32 }
 0x114   :  { %v1991_v54 = vmax.f32 %v1989_v33, %v1990_v43  ;;  %v2439_v56 = vmax.f32 %v2437_v34, %v2438_v44  ;;  %v1996_v57 = vmax.f32 %v1994_v35, %v1995_v45  ;;  %v2444_v58 = vmax.f32 %v2442_v36, %v2443_v46  ;;  %v4366_v51 = vld [vmem:[%s5909_s0 + $0x1e4] ss:$8 sps:$4 sm:$0xff]  }
 0x115   :  { %v3508_v59 = vsel %vm3507_vm2, %v3380_v47, %v3379_v26  ;;  %v3570_v60 = vsel %vm3507_vm2, %v3444_v48, %v3443_v27  ;;  %v1846_v61 = vmax.f32 %v1718_v49, 0.0  ;;  %v1910_v62 = vmax.f32 %v1782_v50, 0.0  ;;  %v4924_v63 = vpop.f32.mrf.mxu0  ;;  %v4926_v0 = vpop.f32.mrf.mxu1  ;;  %v4364_v47 = vld [vmem:[%s5909_s0 + $0x1d0] ss:$8 sps:$4 sm:$0xff]  }
 0x116   :  { %v4017_v2 = vpack.c.bf16 %v1991_v54, %v1991_v54  ;;  %v4081_v3 = vpack.c.bf16 %v2439_v56, %v2439_v56  ;;  %v1997_v4 = vrot.slane %v1996_v57, 1  ;;  %v2445_v5 = vrot.slane %v2444_v58, 1  ;;  %v4365_v50 = vld [vmem:[%s5909_s0 + $0x3d0] ss:$8 sps:$4 sm:$0xff]  }
 0x117   :  { %v1999_v7 = vsel %vm1970_vm1, %v1846_v61, -inf  ;;  %v2447_v8 = vsel %vm1970_vm1, %v1910_v62, -inf  ;;  %v1584_v9 = vmul.f32 %v4839_v53, %v1080_v17  ;;  %v1648_v10 = vmul.f32 %v4839_v53, %v1336_v18  ;;  %v1090_v11 = vpop.f32.mrf.mxu0  ;;  %v1346_v12 = vpop.f32.mrf.mxu1 }
 0x118   :  { %v3381_v15 = vunpack.c.l.b16 %v4017_v2  ;;  %v3445_v16 = vunpack.c.l.b16 %v4081_v3  ;;  %v1998_v19 = vmax.f32 %v1996_v57, %v1997_v4  ;;  %v2446_v20 = vmax.f32 %v2444_v58, %v2445_v5 }
 0x119   :  { %v2000_v21 = vrot.slane %v1999_v7, 4  ;;  %v2448_v22 = vrot.slane %v2447_v8, 4  ;;  %v1719_v17 = vadd.f32 %v4844_v55, %v1584_v9  ;;  %v1783_v18 = vadd.f32 %v4844_v55, %v1648_v10  ;;  %v4946_v23 = vpop.f32.mrf.mxu0  ;;  %1284 = vmatmul.mubr.bf16.gmra.mxu0 %v4358_v1  ;;  %v4948_v24 = vpop.f32.mrf.mxu1 }
 0x11a   :  { %v3510_v25 = vsel %vm3509_vm3, %v3381_v15, %v3508_v59  ;;  %v3571_v26 = vsel %vm3509_vm3, %v3445_v16, %v3570_v60  ;;  %v4018_v27 = vpack.c.bf16 %v1998_v19, %v1998_v19  ;;  %v4082_v28 = vpack.c.bf16 %v2446_v20, %v2446_v20  ;;  %1540 = vmatmul.mubr.bf16.gmra.mxu1 %v4359_v6  ;;  %v4368_v60 = vld [vmem:[%s5909_s0 + $0x3e4] ss:$8 sps:$4 sm:$0xff]  }
 0x11b   :  { %v2001_v29 = vmax.f32 %v1999_v7, %v2000_v21  ;;  %v2449_v30 = vmax.f32 %v2447_v8, %v2448_v22  ;;  %v1847_v31 = vmax.f32 %v1719_v17, 0.0  ;;  %v1911_v32 = vmax.f32 %v1783_v18, 0.0  ;;  %v1095_v33 = vpop.f32.mrf.mxu0  ;;  %v1351_v34 = vpop.f32.mrf.mxu1  ;;  %3850 = vmatprep.mubr.msk.bf16.mxu0 %vm834_vm0, %v4360_v13  ;;  %3882 = vmatprep.mubr.msk.bf16.mxu1 %vm834_vm0, %v4362_v14 }
 0x11c   :  { %v3382_v35 = vunpack.c.l.b16 %v4018_v27  ;;  %v3446_v36 = vunpack.c.l.b16 %v4082_v28  ;;  %v1585_v37 = vmul.f32 %v4839_v53, %v4914_v41  ;;  %v1649_v38 = vmul.f32 %v4839_v53, %v4916_v42  ;;  %v4371_v34 = vld [vmem:[%s5909_s0 + $0x3e0] ss:$8 sps:$4 sm:$0xff]  }
 0x11d   :  { %v2002_v39 = vrot.slane %v2001_v29, 2  ;;  %v2450_v40 = vrot.slane %v2449_v30, 2  ;;  %v2006_v43 = vsel %vm1970_vm1, %v1847_v31, -inf  ;;  %v2454_v44 = vsel %vm1970_vm1, %v1911_v32, -inf  ;;  %v4960_v45 = vpop.f32.mrf.mxu0  ;;  %v4962_v46 = vpop.f32.mrf.mxu1 }
 0x11e   :  { %v4968_v48 = vsel %vm3511_vm4, %v3382_v35, %v3510_v25  ;;  %v4971_v41 = vsel %vm3511_vm4, %v3446_v36, %v3571_v26  ;;  %v2007_v42 = vrot.slane %v2006_v43, 4  ;;  %v2455_v49 = vrot.slane %v2454_v44, 4 }
 0x11f   :  { %v2003_v52 = vmax.f32 %v2001_v29, %v2002_v39  ;;  %v2451_v54 = vmax.f32 %v2449_v30, %v2450_v40  ;;  %v1720_v56 = vadd.f32 %v4844_v55, %v1585_v37  ;;  %v1784_v57 = vadd.f32 %v4844_v55, %v1649_v38  ;;  %v1098_v58 = vpop.f32.mrf.mxu0  ;;  %v1354_v59 = vpop.f32.mrf.mxu1  ;;  %v4370_v29 = vld [vmem:[%s5909_s0 + $0x1e0] ss:$8 sps:$4 sm:$0xff]  }
 0x120   :  { %v2008_v61 = vmax.f32 %v2006_v43, %v2007_v42  ;;  %v2456_v62 = vmax.f32 %v2454_v44, %v2455_v49  ;;  %v1586_v1 = vmul.f32 %v4839_v53, %v4924_v63  ;;  %v1650_v2 = vmul.f32 %v4839_v53, %v4926_v0  ;;  %v4372_v43 = vld [vmem:[%s5909_s0 + $0x1f4] ss:$8 sps:$4 sm:$0xff]  }
 0x121   :  { %v2004_v3 = vrot.slane %v2003_v52, 1  ;;  %v2452_v4 = vrot.slane %v2451_v54, 1  ;;  %v1848_v5 = vmax.f32 %v1720_v56, 0.0  ;;  %v1912_v6 = vmax.f32 %v1784_v57, 0.0  ;;  %v4988_v7 = vpop.f32.mrf.mxu0  ;;  %1292 = vmatmul.mubr.bf16.gmra.mxu0 %v4364_v47  ;;  %v4990_v8 = vpop.f32.mrf.mxu1 }
 0x122   :  { %v2009_v9 = vrot.slane %v2008_v61, 2  ;;  %v2457_v10 = vrot.slane %v2456_v62, 2  ;;  %v1721_v11 = vadd.f32 %v4844_v55, %v1586_v1  ;;  %v1785_v12 = vadd.f32 %v4844_v55, %v1650_v2  ;;  %1548 = vmatmul.mubr.bf16.gmra.mxu1 %v4365_v50  ;;  %3851 = vmatprep.mubr.msk.bf16.mxu0 %vm834_vm0, %v4366_v51  ;;  %v4374_v50 = vld [vmem:[%s5909_s0 + $0x3f4] ss:$8 sps:$4 sm:$0xff]  }
 0x123   :  { %v2005_v63 = vmax.f32 %v2003_v52, %v2004_v3  ;;  %v2453_v0 = vmax.f32 %v2451_v54, %v2452_v4  ;;  %v2013_v13 = vsel %vm1970_vm1, %v1848_v5, -inf  ;;  %v2461_v14 = vsel %vm1970_vm1, %v1912_v6, -inf  ;;  %v1103_v15 = vpop.f32.mrf.mxu0  ;;  %v1359_v16 = vpop.f32.mrf.mxu1  ;;  %3883 = vmatprep.mubr.msk.bf16.mxu1 %vm834_vm0, %v4368_v60 }
 0x124   :  { %v2010_v19 = vmax.f32 %v2008_v61, %v2009_v9  ;;  %v2458_v20 = vmax.f32 %v2456_v62, %v2457_v10  ;;  %v2014_v21 = vrot.slane %v2013_v13, 4  ;;  %v2462_v22 = vrot.slane %v2461_v14, 4 }
 0x125   :  { %v4019_v17 = vpack.c.bf16 %v2005_v63, %v2005_v63  ;;  %v4083_v18 = vpack.c.bf16 %v2453_v0, %v2453_v0  ;;  %v1849_v25 = vmax.f32 %v1721_v11, 0.0  ;;  %v1913_v26 = vmax.f32 %v1785_v12, 0.0  ;;  %v4998_v27 = vpop.f32.mrf.mxu0  ;;  %v5000_v28 = vpop.f32.mrf.mxu1 }
 0x126   :  { %v2011_v30 = vrot.slane %v2010_v19, 1  ;;  %v2459_v31 = vrot.slane %v2458_v20, 1  ;;  %v2015_v32 = vmax.f32 %v2013_v13, %v2014_v21  ;;  %v2463_v33 = vmax.f32 %v2461_v14, %v2462_v22 }
 0x127   :  { %v3383_v35 = vunpack.c.l.b16 %v4019_v17  ;;  %v3447_v36 = vunpack.c.l.b16 %v4083_v18  ;;  %v2020_v37 = vsel %vm1970_vm1, %v1849_v25, -inf  ;;  %v2468_v38 = vsel %vm1970_vm1, %v1913_v26, -inf  ;;  %v1106_v39 = vpop.f32.mrf.mxu0  ;;  %v1362_v40 = vpop.f32.mrf.mxu1 }
 0x128   :  { %v2012_v44 = vmax.f32 %v2010_v19, %v2011_v30  ;;  %v2460_v47 = vmax.f32 %v2458_v20, %v2459_v31  ;;  %v2016_v42 = vrot.slane %v2015_v32, 2  ;;  %v2464_v49 = vrot.slane %v2463_v33, 2  ;;  %v4377_v20 = vld [vmem:[%s5909_s0 + $0x3f0] ss:$8 sps:$4 sm:$0xff]  }
 0x129   :  { %v3514_v51 = vsel %vm3513_vm5, %v3383_v35, %v4968_v48  ;;  %v3573_v52 = vsel %vm3513_vm5, %v3447_v36, %v4971_v41  ;;  %v2021_v54 = vrot.slane %v2020_v37, 4  ;;  %v2469_v56 = vrot.slane %v2468_v38, 4  ;;  %v5020_v57 = vpop.f32.mrf.mxu0  ;;  %1300 = vmatmul.mubr.bf16.gmra.mxu0 %v4370_v29  ;;  %v5022_v58 = vpop.f32.mrf.mxu1 }
 0x12a   :  { %v4020_v59 = vpack.c.bf16 %v2012_v44, %v2012_v44  ;;  %v4084_v60 = vpack.c.bf16 %v2460_v47, %v2460_v47  ;;  %v2017_v61 = vmax.f32 %v2015_v32, %v2016_v42  ;;  %v2465_v62 = vmax.f32 %v2463_v33, %v2464_v49  ;;  %1556 = vmatmul.mubr.bf16.gmra.mxu1 %v4371_v34 }
 0x12b   :  { %v2022_v1 = vmax.f32 %v2020_v37, %v2021_v54  ;;  %v2470_v2 = vmax.f32 %v2468_v38, %v2469_v56  ;;  %v1587_v48 = vmul.f32 %v4839_v53, %v4946_v23  ;;  %v1651_v41 = vmul.f32 %v4839_v53, %v4948_v24  ;;  %v1111_v3 = vpop.f32.mrf.mxu0  ;;  %v1367_v4 = vpop.f32.mrf.mxu1  ;;  %3852 = vmatprep.mubr.msk.bf16.mxu0 %vm834_vm0, %v4372_v43  ;;  %v4376_v24 = vld [vmem:[%s5909_s0 + $0x1f0] ss:$8 sps:$4 sm:$0xff]  }
 0x12c   :  { %v3384_v5 = vunpack.c.l.b16 %v4020_v59  ;;  %v3448_v6 = vunpack.c.l.b16 %v4084_v60  ;;  %v2018_v9 = vrot.slane %v2017_v61, 1  ;;  %v2466_v10 = vrot.slane %v2465_v62, 1  ;;  %3884 = vmatprep.mubr.msk.bf16.mxu1 %vm834_vm0, %v4374_v50 }
 0x12d   :  { %v2023_v11 = vrot.slane %v2022_v1, 2  ;;  %v2471_v12 = vrot.slane %v2470_v2, 2  ;;  %v1722_v63 = vadd.f32 %v4844_v55, %v1587_v48  ;;  %v1786_v0 = vadd.f32 %v4844_v55, %v1651_v41  ;;  %v5032_v23 = vpop.f32.mrf.mxu0  ;;  %v5034_v13 = vpop.f32.mrf.mxu1 }
 0x12e   :  { %v3516_v14 = vsel %vm3515_vm6, %v3384_v5, %v3514_v51  ;;  %v3574_v15 = vsel %vm3515_vm6, %v3448_v6, %v3573_v52  ;;  %v2019_v16 = vmax.f32 %v2017_v61, %v2018_v9  ;;  %v2467_v19 = vmax.f32 %v2465_v62, %v2466_v10 }
 0x12f   :  { %v2024_v21 = vmax.f32 %v2022_v1, %v2023_v11  ;;  %v2472_v22 = vmax.f32 %v2470_v2, %v2471_v12  ;;  %v1850_v17 = vmax.f32 %v1722_v63, 0.0  ;;  %v1914_v18 = vmax.f32 %v1786_v0, 0.0  ;;  %v1114_v25 = vpop.f32.mrf.mxu0  ;;  %v1370_v26 = vpop.f32.mrf.mxu1 }
 0x130   :  { %v4021_v29 = vpack.c.bf16 %v2019_v16, %v2019_v16  ;;  %v4085_v30 = vpack.c.bf16 %v2467_v19, %v2467_v19  ;;  %v1588_v31 = vmul.f32 %v4839_v53, %v4960_v45  ;;  %v1652_v32 = vmul.f32 %v4839_v53, %v4962_v46 }
 0x131   :  { %v2025_v33 = vrot.slane %v2024_v21, 1  ;;  %v2473_v34 = vrot.slane %v2472_v22, 1  ;;  %v2027_v35 = vsel %vm1970_vm1, %v1850_v17, -inf  ;;  %v2475_v36 = vsel %vm1970_vm1, %v1914_v18, -inf  ;;  %v5050_v37 = vpop.f32.mrf.mxu0  ;;  %1308 = vmatmul.mubr.bf16.gmra.mxu0 %v4376_v24  ;;  %v5052_v38 = vpop.f32.mrf.mxu1 }
 0x132   :  { %v3385_v39 = vunpack.c.l.b16 %v4021_v29  ;;  %v3449_v40 = vunpack.c.l.b16 %v4085_v30  ;;  %v2028_v43 = vrot.slane %v2027_v35, 4  ;;  %v2476_v44 = vrot.slane %v2475_v36, 4  ;;  %1564 = vmatmul.mubr.bf16.gmra.mxu1 %v4377_v20 }
 0x133   :  { %v2026_v45 = vmax.f32 %v2024_v21, %v2025_v33  ;;  %v2474_v47 = vmax.f32 %v2472_v22, %v2473_v34  ;;  %v1723_v46 = vadd.f32 %v4844_v55, %v1588_v31  ;;  %v1787_v42 = vadd.f32 %v4844_v55, %v1652_v32  ;;  %v1119_v49 = vpop.f32.mrf.mxu0  ;;  %v1375_v50 = vpop.f32.mrf.mxu1 }
 0x134   :  { %v3518_v51 = vsel %vm3517_vm7, %v3385_v39, %v3516_v14  ;;  %v3575_v52 = vsel %vm3517_vm7, %v3449_v40, %v3574_v15  ;;  %v2029_v54 = vmax.f32 %v2027_v35, %v2028_v43  ;;  %v2477_v56 = vmax.f32 %v2475_v36, %v2476_v44 }
 0x135   :  { %v4022_v59 = vpack.c.bf16 %v2026_v45, %v2026_v45  ;;  %v4086_v60 = vpack.c.bf16 %v2474_v47, %v2474_v47  ;;  %v1851_v61 = vmax.f32 %v1723_v46, 0.0  ;;  %v1915_v62 = vmax.f32 %v1787_v42, 0.0  ;;  %v5058_v1 = vpop.f32.mrf.mxu0  ;;  %v5060_v2 = vpop.f32.mrf.mxu1 }
 0x136   :  { %v2030_v48 = vrot.slane %v2029_v54, 2  ;;  %v2478_v41 = vrot.slane %v2477_v56, 2  ;;  %v1589_v3 = vmul.f32 %v4839_v53, %v4988_v7  ;;  %v1653_v4 = vmul.f32 %v4839_v53, %v4990_v8 }
 0x137   :  { %v3386_v5 = vunpack.c.l.b16 %v4022_v59  ;;  %v3450_v6 = vunpack.c.l.b16 %v4086_v60  ;;  %v2034_v9 = vsel %vm1970_vm1, %v1851_v61, -inf  ;;  %v2482_v10 = vsel %vm1970_vm1, %v1915_v62, -inf  ;;  %v1122_v11 = vpop.f32.mrf.mxu0  ;;  %v1378_v12 = vpop.f32.mrf.mxu1 }
 0x138   :  { %v2031_v63 = vmax.f32 %v2029_v54, %v2030_v48  ;;  %v2479_v0 = vmax.f32 %v2477_v56, %v2478_v41  ;;  %v2035_v24 = vrot.slane %v2034_v9, 4  ;;  %v2483_v14 = vrot.slane %v2482_v10, 4 }
 0x139   :  { %v3520_v15 = vsel %vm3519_vm8, %v3386_v5, %v3518_v51  ;;  %v3576_v16 = vsel %vm3519_vm8, %v3450_v6, %v3575_v52  ;;  %v1724_v7 = vadd.f32 %v4844_v55, %v1589_v3  ;;  %v1788_v8 = vadd.f32 %v4844_v55, %v1653_v4  ;;  %v5072_v19 = vpop.f32.mrf.mxu0  ;;  %v5074_v20 = vpop.f32.mrf.mxu1 }
 0x13a   :  { %v3626_v21 = vpack.c.b16 %v3520_v15, %v3520_v15  ;;  %v3634_v22 = vpack.c.b16 %v3576_v16, %v3576_v16  ;;  %v2032_v17 = vrot.slane %v2031_v63, 1  ;;  %v2480_v18 = vrot.slane %v2479_v0, 1 }
 0x13b   :  { %v2036_v25 = vmax.f32 %v2034_v9, %v2035_v24  ;;  %v2484_v26 = vmax.f32 %v2482_v10, %v2483_v14  ;;  %v1852_v29 = vmax.f32 %v1724_v7, 0.0  ;;  %v1916_v30 = vmax.f32 %v1788_v8, 0.0  ;;  %v1127_v31 = vpop.f32.mrf.mxu0  ;;  %v1383_v32 = vpop.f32.mrf.mxu1 }
 0x13c   :  { %3659 = vst.msk [vmem:[%s5912_s4] sm:$0xf] %vm3658_vm9, %v3626_v21  ;;  %3667 = vst.msk [vmem:[%s5912_s4 + $0x20] sm:$0xf] %vm3658_vm9, %v3634_v22  ;;  %v2033_v33 = vmax.f32 %v2031_v63, %v2032_v17  ;;  %v2481_v34 = vmax.f32 %v2479_v0, %v2480_v18  ;;  %v1590_v35 = vmul.f32 %v4839_v53, %v4998_v27 }
 0x13d   :  { %v1654_v36 = vmul.f32 %v4839_v53, %v5000_v28  ;;  %v2037_v39 = vrot.slane %v2036_v25, 2  ;;  %v2485_v40 = vrot.slane %v2484_v26, 2  ;;  %v2041_v43 = vsel %vm1970_vm1, %v1852_v29, -inf  ;;  %v5090_v45 = vpop.f32.mrf.mxu0  ;;  %v5092_v47 = vpop.f32.mrf.mxu1 }
 0x13e   :  { %v2489_v44 = vsel %vm1970_vm1, %v1916_v30, -inf  ;;  %v4023_v46 = vpack.c.bf16 %v2033_v33, %v2033_v33  ;;  %v4087_v42 = vpack.c.bf16 %v2481_v34, %v2481_v34  ;;  %v2042_v49 = vrot.slane %v2041_v43, 4 }
 0x13f   :  { %v2490_v50 = vrot.slane %v2489_v44, 4  ;;  %v2038_v51 = vmax.f32 %v2036_v25, %v2037_v39  ;;  %v2486_v52 = vmax.f32 %v2484_v26, %v2485_v40  ;;  %v1725_v27 = vadd.f32 %v4844_v55, %v1590_v35  ;;  %v1130_v54 = vpop.f32.mrf.mxu0  ;;  %v1386_v56 = vpop.f32.mrf.mxu1 }
 0x140   :  { %v1789_v28 = vadd.f32 %v4844_v55, %v1654_v36  ;;  %v3387_v59 = vunpack.c.l.b16 %v4023_v46  ;;  %v3451_v60 = vunpack.c.l.b16 %v4087_v42  ;;  %v2043_v61 = vmax.f32 %v2041_v43, %v2042_v49 }
 0x141   :  { %v2491_v62 = vmax.f32 %v2489_v44, %v2490_v50  ;;  %v2039_v48 = vrot.slane %v2038_v51, 1  ;;  %v2487_v41 = vrot.slane %v2486_v52, 1  ;;  %v1853_v3 = vmax.f32 %v1725_v27, 0.0  ;;  %v5096_v5 = vpop.f32.mrf.mxu0  ;;  %v5098_v6 = vpop.f32.mrf.mxu1 }
 0x142   :  { %v1917_v4 = vmax.f32 %v1789_v28, 0.0  ;;  %v2044_v9 = vrot.slane %v2043_v61, 2  ;;  %v1591_v11 = vmul.f32 %v4839_v53, %v5020_v57  ;;  %v1655_v12 = vmul.f32 %v4839_v53, %v5022_v58 }
 0x143   :  { %v2492_v10 = vrot.slane %v2491_v62, 2  ;;  %v2040_v63 = vmax.f32 %v2038_v51, %v2039_v48  ;;  %v2488_v0 = vmax.f32 %v2486_v52, %v2487_v41  ;;  %v2048_v24 = vsel %vm1970_vm1, %v1853_v3, -inf  ;;  %v1135_v15 = vpop.f32.mrf.mxu0  ;;  %v1391_v16 = vpop.f32.mrf.mxu1 }
 0x144   :  { %v2496_v14 = vsel %vm1970_vm1, %v1917_v4, -inf  ;;  %v2045_v7 = vmax.f32 %v2043_v61, %v2044_v9  ;;  %v2049_v21 = vrot.slane %v2048_v24, 4  ;;  %v1726_v25 = vadd.f32 %v4844_v55, %v1591_v11 }
 0x145   :  { %v2493_v8 = vmax.f32 %v2491_v62, %v2492_v10  ;;  %v2497_v22 = vrot.slane %v2496_v14, 4  ;;  %v4024_v17 = vpack.c.bf16 %v2040_v63, %v2040_v63  ;;  %v4088_v18 = vpack.c.bf16 %v2488_v0, %v2488_v0  ;;  %v5108_v26 = vpop.f32.mrf.mxu0  ;;  %v5110_v58 = vpop.f32.mrf.mxu1 }
 0x146   :  { %v1790_v57 = vadd.f32 %v4844_v55, %v1655_v12  ;;  %v2046_v29 = vrot.slane %v2045_v7, 1  ;;  %v2050_v31 = vmax.f32 %v2048_v24, %v2049_v21  ;;  %v1854_v35 = vmax.f32 %v1726_v25, 0.0 }
 0x147   :  { %v2494_v30 = vrot.slane %v2493_v8, 1  ;;  %v2498_v32 = vmax.f32 %v2496_v14, %v2497_v22  ;;  %v3388_v33 = vunpack.c.l.b16 %v4024_v17  ;;  %v3452_v34 = vunpack.c.l.b16 %v4088_v18  ;;  %v1138_v39 = vpop.f32.mrf.mxu0  ;;  %v1394_v40 = vpop.f32.mrf.mxu1 }
 0x148   :  { %v1918_v36 = vmax.f32 %v1790_v57, 0.0  ;;  %v2047_v43 = vmax.f32 %v2045_v7, %v2046_v29  ;;  %v2051_v46 = vrot.slane %v2050_v31, 2  ;;  %v2055_v51 = vsel %vm1970_vm1, %v1854_v35, -inf }
 0x149   :  { %v2495_v44 = vmax.f32 %v2493_v8, %v2494_v30  ;;  %v2499_v42 = vrot.slane %v2498_v32, 2  ;;  %v3521_v49 = vsel %vm3507_vm2, %v3388_v33, %v3387_v59  ;;  %v3577_v50 = vsel %vm3507_vm2, %v3452_v34, %v3451_v60  ;;  %v5116_v27 = vpop.f32.mrf.mxu0  ;;  %v5118_v28 = vpop.f32.mrf.mxu1 }
 0x14a   :  { %v2503_v52 = vsel %vm1970_vm1, %v1918_v36, -inf  ;;  %v4025_v54 = vpack.c.bf16 %v2047_v43, %v2047_v43  ;;  %v2052_v61 = vmax.f32 %v2050_v31, %v2051_v46  ;;  %v2056_v48 = vrot.slane %v2055_v51, 4 }
 0x14b   :  { %v4089_v56 = vpack.c.bf16 %v2495_v44, %v2495_v44  ;;  %v2500_v62 = vmax.f32 %v2498_v32, %v2499_v42  ;;  %v2504_v41 = vrot.slane %v2503_v52, 4  ;;  %v1592_v3 = vmul.f32 %v4839_v53, %v5032_v23  ;;  %v1143_v60 = vpop.f32.mrf.mxu0  ;;  %v1399_v4 = vpop.f32.mrf.mxu1 }
 0x14c   :  { %v1656_v59 = vmul.f32 %v4839_v53, %v5034_v13  ;;  %v3389_v9 = vunpack.c.l.b16 %v4025_v54  ;;  %v2053_v11 = vrot.slane %v2052_v61, 1  ;;  %v2057_v63 = vmax.f32 %v2055_v51, %v2056_v48 }
 0x14d   :  { %v3453_v10 = vunpack.c.l.b16 %v4089_v56  ;;  %v2501_v12 = vrot.slane %v2500_v62, 1  ;;  %v2505_v0 = vmax.f32 %v2503_v52, %v2504_v41  ;;  %v1727_v24 = vadd.f32 %v4844_v55, %v1592_v3  ;;  %v5126_v15 = vpop.f32.mrf.mxu0  ;;  %v5128_v16 = vpop.f32.mrf.mxu1 }
 0x14e   :  { %v1791_v14 = vadd.f32 %v4844_v55, %v1656_v59  ;;  %v3522_v23 = vsel %vm3509_vm3, %v3389_v9, %v3521_v49  ;;  %v2054_v7 = vmax.f32 %v2052_v61, %v2053_v11  ;;  %v2058_v21 = vrot.slane %v2057_v63, 2 }
 0x14f   :  { %v3578_v13 = vsel %vm3509_vm3, %v3453_v10, %v3577_v50  ;;  %v2502_v8 = vmax.f32 %v2500_v62, %v2501_v12  ;;  %v2506_v22 = vrot.slane %v2505_v0, 2  ;;  %v1855_v17 = vmax.f32 %v1727_v24, 0.0  ;;  %v1146_v25 = vpop.f32.mrf.mxu0  ;;  %v1402_v57 = vpop.f32.mrf.mxu1 }
 0x150   :  { %v1919_v18 = vmax.f32 %v1791_v14, 0.0  ;;  %v4026_v29 = vpack.c.bf16 %v2054_v7, %v2054_v7  ;;  %v1593_v31 = vmul.f32 %v4839_v53, %v5050_v37  ;;  %v1657_v32 = vmul.f32 %v4839_v53, %v5052_v38 }
 0x151   :  { %v4090_v30 = vpack.c.bf16 %v2502_v8, %v2502_v8  ;;  %v2059_v33 = vmax.f32 %v2057_v63, %v2058_v21  ;;  %v2507_v34 = vmax.f32 %v2505_v0, %v2506_v22  ;;  %v2062_v35 = vsel %vm1970_vm1, %v1855_v17, -inf  ;;  %v5138_v39 = vpop.f32.mrf.mxu0  ;;  %v5140_v40 = vpop.f32.mrf.mxu1 }
 0x152   :  { %v2510_v36 = vsel %vm1970_vm1, %v1919_v18, -inf  ;;  %v3390_v43 = vunpack.c.l.b16 %v4026_v29  ;;  %v2063_v46 = vrot.slane %v2062_v35, 4  ;;  %v1728_v37 = vadd.f32 %v4844_v55, %v1593_v31 }
 0x153   :  { %v3454_v44 = vunpack.c.l.b16 %v4090_v30  ;;  %v2511_v42 = vrot.slane %v2510_v36, 4  ;;  %v2060_v49 = vrot.slane %v2059_v33, 1  ;;  %v2508_v50 = vrot.slane %v2507_v34, 1  ;;  %v1151_v38 = vpop.f32.mrf.mxu0  ;;  %v1407_v51 = vpop.f32.mrf.mxu1 }
 0x154   :  { %v1792_v53 = vadd.f32 %v4844_v55, %v1657_v32  ;;  %v3523_v52 = vsel %vm3511_vm4, %v3390_v43, %v3522_v23  ;;  %v2064_v56 = vmax.f32 %v2062_v35, %v2063_v46  ;;  %v1856_v41 = vmax.f32 %v1728_v37, 0.0  ;;  %v5153_v55 = vld [vmem:[%s5910_s2] ss:$0 sm:$0xff] }
 0x155   :  { %v3579_v54 = vsel %vm3511_vm4, %v3454_v44, %v3578_v13  ;;  %v2512_v61 = vmax.f32 %v2510_v36, %v2511_v42  ;;  %v2061_v62 = vmax.f32 %v2059_v33, %v2060_v49  ;;  %v2509_v48 = vmax.f32 %v2507_v34, %v2508_v50  ;;  %v5146_v59 = vpop.f32.mrf.mxu0  ;;  %v5148_v60 = vpop.f32.mrf.mxu1 }
 0x156   :  { %v1920_v3 = vmax.f32 %v1792_v53, 0.0  ;;  %v2065_v4 = vrot.slane %v2064_v56, 2  ;;  %v1594_v10 = vmul.f32 %v5153_v55, %v5058_v1  ;;  %v1658_v11 = vmul.f32 %v5153_v55, %v5060_v2  ;;  %v5164_v1 = vld [vmem:[%s5911_s3] ss:$0 sm:$0xff] }
 0x157   :  { %v2513_v9 = vrot.slane %v2512_v61, 2  ;;  %v4027_v12 = vpack.c.bf16 %v2061_v62, %v2061_v62  ;;  %v4091_v63 = vpack.c.bf16 %v2509_v48, %v2509_v48  ;;  %v2069_v0 = vsel %vm1970_vm1, %v1856_v41, -inf  ;;  %v1154_v14 = vpop.f32.mrf.mxu0  ;;  %v1410_v23 = vpop.f32.mrf.mxu1 }
 0x158   :  { %v2517_v24 = vsel %vm1970_vm1, %v1920_v3, -inf  ;;  %v2066_v13 = vmax.f32 %v2064_v56, %v2065_v4  ;;  %v2070_v8 = vrot.slane %v2069_v0, 4  ;;  %v1729_v2 = vadd.f32 %v5164_v1, %v1594_v10 }
 0x159   :  { %v2514_v7 = vmax.f32 %v2512_v61, %v2513_v9  ;;  %v2518_v21 = vrot.slane %v2517_v24, 4  ;;  %v3391_v22 = vunpack.c.l.b16 %v4027_v12  ;;  %v3455_v17 = vunpack.c.l.b16 %v4091_v63  ;;  %v5168_v25 = vpop.f32.mrf.mxu0  ;;  %v5170_v57 = vpop.f32.mrf.mxu1 }
 0x15a   :  { %v1793_v18 = vadd.f32 %v5164_v1, %v1658_v11  ;;  %v2067_v29 = vrot.slane %v2066_v13, 1  ;;  %v2071_v31 = vmax.f32 %v2069_v0, %v2070_v8  ;;  %v1857_v35 = vmax.f32 %v1729_v2, 0.0 }
 0x15b   :  { %v2515_v30 = vrot.slane %v2514_v7, 1  ;;  %v2519_v32 = vmax.f32 %v2517_v24, %v2518_v21  ;;  %v3524_v33 = vsel %vm3513_vm5, %v3391_v22, %v3523_v52  ;;  %v3580_v34 = vsel %vm3513_vm5, %v3455_v17, %v3579_v54  ;;  %v1159_v43 = vpop.f32.mrf.mxu0  ;;  %v1415_v44 = vpop.f32.mrf.mxu1 }
 0x15c   :  { %v1921_v36 = vmax.f32 %v1793_v18, 0.0  ;;  %v2068_v46 = vmax.f32 %v2066_v13, %v2067_v29  ;;  %v2072_v49 = vrot.slane %v2071_v31, 2  ;;  %v2076_v37 = vsel %vm1970_vm1, %v1857_v35, -inf }
 0x15d   :  { %v2516_v42 = vmax.f32 %v2514_v7, %v2515_v30  ;;  %v2520_v50 = vrot.slane %v2519_v32, 2  ;;  %v1595_v38 = vmul.f32 %v5153_v55, %v5072_v19  ;;  %v1659_v51 = vmul.f32 %v5153_v55, %v5074_v20  ;;  %v5180_v52 = vpop.f32.mrf.mxu0  ;;  %v5182_v54 = vpop.f32.mrf.mxu1 }
 0x15e   :  { %v2524_v53 = vsel %vm1970_vm1, %v1921_v36, -inf  ;;  %v4028_v56 = vpack.c.bf16 %v2068_v46, %v2068_v46  ;;  %v2073_v62 = vmax.f32 %v2071_v31, %v2072_v49  ;;  %v2077_v41 = vrot.slane %v2076_v37, 4 }
 0x15f   :  { %v4092_v61 = vpack.c.bf16 %v2516_v42, %v2516_v42  ;;  %v2521_v48 = vmax.f32 %v2519_v32, %v2520_v50  ;;  %v2525_v3 = vrot.slane %v2524_v53, 4  ;;  %v1730_v4 = vadd.f32 %v5164_v1, %v1595_v38  ;;  %v1162_v10 = vpop.f32.mrf.mxu0  ;;  %v1418_v11 = vpop.f32.mrf.mxu1 }
 0x160   :  { %v1794_v9 = vadd.f32 %v5164_v1, %v1659_v51  ;;  %v3392_v19 = vunpack.c.l.b16 %v4028_v56  ;;  %v2074_v63 = vrot.slane %v2073_v62, 1  ;;  %v2078_v0 = vmax.f32 %v2076_v37, %v2077_v41 }
 0x161   :  { %v3456_v12 = vunpack.c.l.b16 %v4092_v61  ;;  %v2522_v20 = vrot.slane %v2521_v48, 1  ;;  %v2526_v24 = vmax.f32 %v2524_v53, %v2525_v3  ;;  %v1858_v14 = vmax.f32 %v1730_v4, 0.0  ;;  %v5186_v13 = vpop.f32.mrf.mxu0  ;;  %v5188_v7 = vpop.f32.mrf.mxu1 }
 0x162   :  { %v1922_v23 = vmax.f32 %v1794_v9, 0.0  ;;  %v3525_v8 = vsel %vm3515_vm6, %v3392_v19, %v3524_v33  ;;  %v2075_v22 = vmax.f32 %v2073_v62, %v2074_v63  ;;  %v2079_v2 = vrot.slane %v2078_v0, 2 }
 0x163   :  { %v3581_v21 = vsel %vm3515_vm6, %v3456_v12, %v3580_v34  ;;  %v2523_v17 = vmax.f32 %v2521_v48, %v2522_v20  ;;  %v2527_v18 = vrot.slane %v2526_v24, 2  ;;  %v2083_v29 = vsel %vm1970_vm1, %v1858_v14, -inf  ;;  %v1167_v31 = vpop.f32.mrf.mxu0  ;;  %v1423_v32 = vpop.f32.mrf.mxu1 }
 0x164   :  { %v2531_v30 = vsel %vm1970_vm1, %v1922_v23, -inf  ;;  %v4029_v35 = vpack.c.bf16 %v2075_v22, %v2075_v22  ;;  %v2084_v43 = vrot.slane %v2083_v29, 4  ;;  %v2080_v46 = vmax.f32 %v2078_v0, %v2079_v2 }
 0x165   :  { %v4093_v36 = vpack.c.bf16 %v2523_v17, %v2523_v17  ;;  %v2532_v44 = vrot.slane %v2531_v30, 4  ;;  %v2528_v42 = vmax.f32 %v2526_v24, %v2527_v18  ;;  %v1596_v33 = vmul.f32 %v5153_v55, %v5090_v45  ;;  %v5198_v49 = vpop.f32.mrf.mxu0  ;;  %v5200_v50 = vpop.f32.mrf.mxu1 }
 0x166   :  { %v1660_v34 = vmul.f32 %v5153_v55, %v5092_v47  ;;  %v3393_v37 = vunpack.c.l.b16 %v4029_v35  ;;  %v2085_v38 = vmax.f32 %v2083_v29, %v2084_v43  ;;  %v2081_v56 = vrot.slane %v2080_v46, 1 }
 0x167   :  { %v3457_v53 = vunpack.c.l.b16 %v4093_v36  ;;  %v2533_v51 = vmax.f32 %v2531_v30, %v2532_v44  ;;  %v2529_v61 = vrot.slane %v2528_v42, 1  ;;  %v1731_v62 = vadd.f32 %v5164_v1, %v1596_v33  ;;  %v1170_v41 = vpop.f32.mrf.mxu0  ;;  %v1426_v3 = vpop.f32.mrf.mxu1 }
 0x168   :  { %v1795_v48 = vadd.f32 %v5164_v1, %v1660_v34  ;;  %v3526_v45 = vsel %vm3517_vm7, %v3393_v37, %v3525_v8  ;;  %v2086_v4 = vrot.slane %v2085_v38, 2  ;;  %v2082_v10 = vmax.f32 %v2080_v46, %v2081_v56 }
 0x169   :  { %v3582_v47 = vsel %vm3517_vm7, %v3457_v53, %v3581_v21  ;;  %v2534_v9 = vrot.slane %v2533_v51, 2  ;;  %v2530_v11 = vmax.f32 %v2528_v42, %v2529_v61  ;;  %v1859_v19 = vmax.f32 %v1731_v62, 0.0  ;;  %v5206_v63 = vpop.f32.mrf.mxu0  ;;  %v5208_v20 = vpop.f32.mrf.mxu1 }
 0x16a   :  { %v1923_v12 = vmax.f32 %v1795_v48, 0.0  ;;  %v2087_v0 = vmax.f32 %v2085_v38, %v2086_v4  ;;  %v1597_v14 = vmul.f32 %v5153_v55, %v5096_v5  ;;  %v1661_v23 = vmul.f32 %v5153_v55, %v5098_v6 }
 0x16b   :  { %v2535_v24 = vmax.f32 %v2533_v51, %v2534_v9  ;;  %v4030_v8 = vpack.c.bf16 %v2082_v10, %v2082_v10  ;;  %v4094_v21 = vpack.c.bf16 %v2530_v11, %v2530_v11  ;;  %v2090_v22 = vsel %vm1970_vm1, %v1859_v19, -inf  ;;  %v1175_v2 = vpop.f32.mrf.mxu0  ;;  %v1431_v18 = vpop.f32.mrf.mxu1 }
 0x16c   :  { %v2538_v17 = vsel %vm1970_vm1, %v1923_v12, -inf  ;;  %v2088_v29 = vrot.slane %v2087_v0, 1  ;;  %v2091_v31 = vrot.slane %v2090_v22, 4  ;;  %v1732_v43 = vadd.f32 %v5164_v1, %v1597_v14 }
 0x16d   :  { %v2536_v30 = vrot.slane %v2535_v24, 1  ;;  %v2539_v32 = vrot.slane %v2538_v17, 4  ;;  %v3394_v35 = vunpack.c.l.b16 %v4030_v8  ;;  %v3458_v36 = vunpack.c.l.b16 %v4094_v21  ;;  %v5218_v44 = vpop.f32.mrf.mxu0  ;;  %v5220_v6 = vpop.f32.mrf.mxu1 }
 0x16e   :  { %v1796_v5 = vadd.f32 %v5164_v1, %v1661_v23  ;;  %v2089_v46 = vmax.f32 %v2087_v0, %v2088_v29  ;;  %v2092_v33 = vmax.f32 %v2090_v22, %v2091_v31  ;;  %v1860_v38 = vmax.f32 %v1732_v43, 0.0 }
 0x16f   :  { %v2537_v42 = vmax.f32 %v2535_v24, %v2536_v30  ;;  %v2540_v34 = vmax.f32 %v2538_v17, %v2539_v32  ;;  %v3527_v37 = vsel %vm3519_vm8, %v3394_v35, %v3526_v45  ;;  %v3583_v53 = vsel %vm3519_vm8, %v3458_v36, %v3582_v47  ;;  %v1178_v56 = vpop.f32.mrf.mxu0  ;;  %v1434_v61 = vpop.f32.mrf.mxu1 }
 0x170   :  { %v1924_v51 = vmax.f32 %v1796_v5, 0.0  ;;  %v3627_v62 = vpack.c.b16 %v3527_v37, %v3527_v37  ;;  %v3635_v48 = vpack.c.b16 %v3583_v53, %v3583_v53  ;;  %v4031_v41 = vpack.c.bf16 %v2089_v46, %v2089_v46 }
 0x171   :  { %v4095_v3 = vpack.c.bf16 %v2537_v42, %v2537_v42  ;;  %v2093_v4 = vrot.slane %v2092_v33, 2  ;;  %v2541_v9 = vrot.slane %v2540_v34, 2  ;;  %v2097_v10 = vsel %vm1970_vm1, %v1860_v38, -inf  ;;  %v5226_v19 = vpop.f32.mrf.mxu0  ;;  %v5228_v12 = vpop.f32.mrf.mxu1 }
 0x172   :  { %v2545_v11 = vsel %vm1970_vm1, %v1924_v51, -inf  ;;  %3660 = vst.msk [vmem:[%s5912_s4 + $0x4] sm:$0xf] %vm3658_vm9, %v3627_v62  ;;  %3668 = vst.msk [vmem:[%s5912_s4 + $0x24] sm:$0xf] %vm3658_vm9, %v3635_v48  ;;  %v3395_v45 = vunpack.c.l.b16 %v4031_v41  ;;  %v2098_v0 = vrot.slane %v2097_v10, 4  ;;  %v1598_v8 = vmul.f32 %v5153_v55, %v5108_v26 }
 0x173   :  { %v3459_v47 = vunpack.c.l.b16 %v4095_v3  ;;  %v2546_v24 = vrot.slane %v2545_v11, 4  ;;  %v2094_v14 = vmax.f32 %v2092_v33, %v2093_v4  ;;  %v2542_v23 = vmax.f32 %v2540_v34, %v2541_v9  ;;  %v1183_v22 = vpop.f32.mrf.mxu0  ;;  %v1439_v17 = vpop.f32.mrf.mxu1 }
 0x174   :  { %v1662_v21 = vmul.f32 %v5153_v55, %v5110_v58  ;;  %v2099_v2 = vmax.f32 %v2097_v10, %v2098_v0  ;;  %v1599_v29 = vmul.f32 %v5153_v55, %v5116_v27  ;;  %v1663_v30 = vmul.f32 %v5153_v55, %v5118_v28 }
 0x175   :  { %v2547_v18 = vmax.f32 %v2545_v11, %v2546_v24  ;;  %v2095_v31 = vrot.slane %v2094_v14, 1  ;;  %v2543_v32 = vrot.slane %v2542_v23, 1  ;;  %v1733_v35 = vadd.f32 %v5164_v1, %v1598_v8  ;;  %v5248_v26 = vpop.f32.mrf.mxu0  ;;  %v5250_v43 = vpop.f32.mrf.mxu1 }
 0x176   :  { %v1797_v36 = vadd.f32 %v5164_v1, %v1662_v21  ;;  %v2100_v58 = vrot.slane %v2099_v2, 2  ;;  %v1734_v46 = vadd.f32 %v5164_v1, %v1599_v29  ;;  %v1798_v42 = vadd.f32 %v5164_v1, %v1663_v30 }
 0x177   :  { %v2548_v5 = vrot.slane %v2547_v18, 2  ;;  %v2096_v27 = vmax.f32 %v2094_v14, %v2095_v31  ;;  %v2544_v33 = vmax.f32 %v2542_v23, %v2543_v32  ;;  %v1861_v34 = vmax.f32 %v1733_v35, 0.0  ;;  %v1186_v37 = vpop.f32.mrf.mxu0  ;;  %v1442_v53 = vpop.f32.mrf.mxu1 }
 0x178   :  { %v1925_v28 = vmax.f32 %v1797_v36, 0.0  ;;  %v2101_v38 = vmax.f32 %v2099_v2, %v2100_v58  ;;  %v1862_v56 = vmax.f32 %v1734_v46, 0.0  ;;  %v1926_v61 = vmax.f32 %v1798_v42, 0.0 }
 0x179   :  { %v2549_v51 = vmax.f32 %v2547_v18, %v2548_v5  ;;  %v4032_v62 = vpack.c.bf16 %v2096_v27, %v2096_v27  ;;  %v4096_v48 = vpack.c.bf16 %v2544_v33, %v2544_v33  ;;  %v2104_v41 = vsel %vm1970_vm1, %v1861_v34, -inf  ;;  %v5256_v4 = vpop.f32.mrf.mxu0  ;;  %v5258_v9 = vpop.f32.mrf.mxu1 }
 0x17a   :  { %v2552_v3 = vsel %vm1970_vm1, %v1925_v28, -inf  ;;  %v2102_v10 = vrot.slane %v2101_v38, 1  ;;  %v2105_v0 = vrot.slane %v2104_v41, 4  ;;  %v2111_v8 = vsel %vm1970_vm1, %v1862_v56, -inf }
 0x17b   :  { %v2550_v11 = vrot.slane %v2549_v51, 1  ;;  %v2553_v24 = vrot.slane %v2552_v3, 4  ;;  %v3396_v14 = vunpack.c.l.b16 %v4032_v62  ;;  %v3460_v23 = vunpack.c.l.b16 %v4096_v48  ;;  %v1191_v22 = vpop.f32.mrf.mxu0  ;;  %v1447_v17 = vpop.f32.mrf.mxu1 }
 0x17c   :  { %v2559_v21 = vsel %vm1970_vm1, %v1926_v61, -inf  ;;  %v2103_v2 = vmax.f32 %v2101_v38, %v2102_v10  ;;  %v2106_v29 = vmax.f32 %v2104_v41, %v2105_v0  ;;  %v2112_v35 = vrot.slane %v2111_v8, 4 }
 0x17d   :  { %v2551_v18 = vmax.f32 %v2549_v51, %v2550_v11  ;;  %v2554_v30 = vmax.f32 %v2552_v3, %v2553_v24  ;;  %v3528_v31 = vsel %vm3507_vm2, %v3396_v14, %v3395_v45  ;;  %v3584_v32 = vsel %vm3507_vm2, %v3460_v23, %v3459_v47  ;;  %v5264_v58 = vpop.f32.mrf.mxu0  ;;  %v5266_v5 = vpop.f32.mrf.mxu1 }
 0x17e   :  { %v2560_v36 = vrot.slane %v2559_v21, 4  ;;  %v4033_v46 = vpack.c.bf16 %v2103_v2, %v2103_v2  ;;  %v2107_v27 = vrot.slane %v2106_v29, 2  ;;  %v2113_v34 = vmax.f32 %v2111_v8, %v2112_v35 }
 0x17f   :  { %v4097_v42 = vpack.c.bf16 %v2551_v18, %v2551_v18  ;;  %v2555_v33 = vrot.slane %v2554_v30, 2  ;;  %v1600_v37 = vmul.f32 %v5153_v55, %v5126_v15  ;;  %v1664_v45 = vmul.f32 %v5153_v55, %v5128_v16  ;;  %v1194_v53 = vpop.f32.mrf.mxu0  ;;  %v1450_v47 = vpop.f32.mrf.mxu1 }
 0x180   :  { %v2561_v28 = vmax.f32 %v2559_v21, %v2560_v36  ;;  %v3397_v38 = vunpack.c.l.b16 %v4033_v46  ;;  %v2108_v56 = vmax.f32 %v2106_v29, %v2107_v27  ;;  %v2114_v62 = vrot.slane %v2113_v34, 2 }
 0x181   :  { %v3461_v51 = vunpack.c.l.b16 %v4097_v42  ;;  %v2556_v61 = vmax.f32 %v2554_v30, %v2555_v33  ;;  %v1735_v41 = vadd.f32 %v5164_v1, %v1600_v37  ;;  %v1799_v3 = vadd.f32 %v5164_v1, %v1664_v45  ;;  %v5274_v10 = vpop.f32.mrf.mxu0  ;;  %v5276_v11 = vpop.f32.mrf.mxu1 }
 0x182   :  { %v2562_v48 = vrot.slane %v2561_v28, 2  ;;  %v3529_v15 = vsel %vm3509_vm3, %v3397_v38, %v3528_v31  ;;  %v2109_v0 = vrot.slane %v2108_v56, 1  ;;  %v2115_v14 = vmax.f32 %v2113_v34, %v2114_v62 }
 0x183   :  { %v3585_v16 = vsel %vm3509_vm3, %v3461_v51, %v3584_v32  ;;  %v2557_v24 = vrot.slane %v2556_v61, 1  ;;  %v1863_v8 = vmax.f32 %v1735_v41, 0.0  ;;  %v1927_v21 = vmax.f32 %v1799_v3, 0.0  ;;  %v1199_v22 = vpop.f32.mrf.mxu0  ;;  %v1455_v17 = vpop.f32.mrf.mxu1 }
 0x184   :  { %v2563_v23 = vmax.f32 %v2561_v28, %v2562_v48  ;;  %v2110_v2 = vmax.f32 %v2108_v56, %v2109_v0  ;;  %v1601_v29 = vmul.f32 %v5153_v55, %v5138_v39  ;;  %v1665_v30 = vmul.f32 %v5153_v55, %v5140_v40 }
 0x185   :  { %v2558_v18 = vmax.f32 %v2556_v61, %v2557_v24  ;;  %v2116_v35 = vrot.slane %v2115_v14, 1  ;;  %v2118_v32 = vsel %vm1970_vm1, %v1863_v8, -inf  ;;  %v2566_v36 = vsel %vm1970_vm1, %v1927_v21, -inf  ;;  %v5286_v46 = vpop.f32.mrf.mxu0  ;;  %v5288_v42 = vpop.f32.mrf.mxu1 }
 0x186   :  { %v2564_v31 = vrot.slane %v2563_v23, 1  ;;  %v4034_v27 = vpack.c.bf16 %v2110_v2, %v2110_v2  ;;  %v2119_v34 = vrot.slane %v2118_v32, 4  ;;  %v2567_v28 = vrot.slane %v2566_v36, 4 }
 0x187   :  { %v4098_v33 = vpack.c.bf16 %v2558_v18, %v2558_v18  ;;  %v2117_v37 = vmax.f32 %v2115_v14, %v2116_v35  ;;  %v1736_v39 = vadd.f32 %v5164_v1, %v1601_v29  ;;  %v1800_v40 = vadd.f32 %v5164_v1, %v1665_v30  ;;  %v1202_v53 = vpop.f32.mrf.mxu0  ;;  %v1458_v47 = vpop.f32.mrf.mxu1 }
 0x188   :  { %v2565_v45 = vmax.f32 %v2563_v23, %v2564_v31  ;;  %v3398_v38 = vunpack.c.l.b16 %v4034_v27  ;;  %v2120_v56 = vmax.f32 %v2118_v32, %v2119_v34  ;;  %v2568_v61 = vmax.f32 %v2566_v36, %v2567_v28 }
 0x189   :  { %v3462_v51 = vunpack.c.l.b16 %v4098_v33  ;;  %v4035_v62 = vpack.c.bf16 %v2117_v37, %v2117_v37  ;;  %v1864_v41 = vmax.f32 %v1736_v39, 0.0  ;;  %v1928_v3 = vmax.f32 %v1800_v40, 0.0  ;;  %v5292_v0 = vpop.f32.mrf.mxu0  ;;  %v5294_v24 = vpop.f32.mrf.mxu1 }
 0x18a   :  { %v4099_v48 = vpack.c.bf16 %v2565_v45, %v2565_v45  ;;  %v3530_v14 = vsel %vm3511_vm4, %v3398_v38, %v3529_v15  ;;  %v2121_v8 = vrot.slane %v2120_v56, 2  ;;  %v2569_v21 = vrot.slane %v2568_v61, 2 }
 0x18b   :  { %v3586_v23 = vsel %vm3511_vm4, %v3462_v51, %v3585_v16  ;;  %v3399_v22 = vunpack.c.l.b16 %v4035_v62  ;;  %v2125_v2 = vsel %vm1970_vm1, %v1864_v41, -inf  ;;  %v2573_v18 = vsel %vm1970_vm1, %v1928_v3, -inf  ;;  %v1207_v29 = vpop.f32.mrf.mxu0  ;;  %v1463_v30 = vpop.f32.mrf.mxu1 }
 0x18c   :  { %v3463_v17 = vunpack.c.l.b16 %v4099_v48  ;;  %v2122_v35 = vmax.f32 %v2120_v56, %v2121_v8  ;;  %v2570_v31 = vmax.f32 %v2568_v61, %v2569_v21  ;;  %v2126_v32 = vrot.slane %v2125_v2, 4 }
 0x18d   :  { %v2574_v36 = vrot.slane %v2573_v18, 4  ;;  %v3531_v27 = vsel %vm3513_vm5, %v3399_v22, %v3530_v14  ;;  %v1602_v16 = vmul.f32 %v5153_v55, %v5146_v59  ;;  %v1666_v33 = vmul.f32 %v5153_v55, %v5148_v60  ;;  %v5306_v34 = vpop.f32.mrf.mxu0  ;;  %v5308_v28 = vpop.f32.mrf.mxu1 }
 0x18e   :  { %v3587_v15 = vsel %vm3513_vm5, %v3463_v17, %v3586_v23  ;;  %v2123_v37 = vrot.slane %v2122_v35, 1  ;;  %v2571_v45 = vrot.slane %v2570_v31, 1  ;;  %v2127_v39 = vmax.f32 %v2125_v2, %v2126_v32 }
 0x18f   :  { %v2575_v40 = vmax.f32 %v2573_v18, %v2574_v36  ;;  %v1737_v53 = vadd.f32 %v5164_v1, %v1602_v16  ;;  %v1801_v47 = vadd.f32 %v5164_v1, %v1666_v33  ;;  %v1603_v38 = vmul.f32 %v5153_v55, %v5168_v25  ;;  %v1210_v51 = vpop.f32.mrf.mxu0  ;;  %v1466_v60 = vpop.f32.mrf.mxu1 }
 0x190   :  { %v1667_v59 = vmul.f32 %v5153_v55, %v5170_v57  ;;  %v2124_v56 = vmax.f32 %v2122_v35, %v2123_v37  ;;  %v2572_v61 = vmax.f32 %v2570_v31, %v2571_v45  ;;  %v2128_v62 = vrot.slane %v2127_v39, 2 }
 0x191   :  { %v2576_v48 = vrot.slane %v2575_v40, 2  ;;  %v1865_v41 = vmax.f32 %v1737_v53, 0.0  ;;  %v1929_v3 = vmax.f32 %v1801_v47, 0.0  ;;  %v1738_v14 = vadd.f32 %v5164_v1, %v1603_v38  ;;  %v5318_v8 = vpop.f32.mrf.mxu0  ;;  %v5320_v21 = vpop.f32.mrf.mxu1 }
 0x192   :  { %v1802_v23 = vadd.f32 %v5164_v1, %v1667_v59  ;;  %v4036_v25 = vpack.c.bf16 %v2124_v56, %v2124_v56  ;;  %v4100_v22 = vpack.c.bf16 %v2572_v61, %v2572_v61  ;;  %v2129_v17 = vmax.f32 %v2127_v39, %v2128_v62 }
 0x193   :  { %v2577_v57 = vmax.f32 %v2575_v40, %v2576_v48  ;;  %v2132_v2 = vsel %vm1970_vm1, %v1865_v41, -inf  ;;  %v2580_v18 = vsel %vm1970_vm1, %v1929_v3, -inf  ;;  %v1866_v29 = vmax.f32 %v1738_v14, 0.0  ;;  %v1215_v35 = vpop.f32.mrf.mxu0  ;;  %v1471_v31 = vpop.f32.mrf.mxu1 }
 0x194   :  { %v1930_v30 = vmax.f32 %v1802_v23, 0.0  ;;  %v3400_v32 = vunpack.c.l.b16 %v4036_v25  ;;  %v3464_v36 = vunpack.c.l.b16 %v4100_v22  ;;  %v2130_v16 = vrot.slane %v2129_v17, 1 }
 0x195   :  { %v2578_v33 = vrot.slane %v2577_v57, 1  ;;  %v2133_v37 = vrot.slane %v2132_v2, 4  ;;  %v2581_v45 = vrot.slane %v2580_v18, 4  ;;  %v2139_v53 = vsel %vm1970_vm1, %v1866_v29, -inf  ;;  %v5326_v39 = vpop.f32.mrf.mxu0  ;;  %v5328_v40 = vpop.f32.mrf.mxu1 }
 0x196   :  { %v2587_v47 = vsel %vm1970_vm1, %v1930_v30, -inf  ;;  %v3532_v38 = vsel %vm3515_vm6, %v3400_v32, %v3531_v27  ;;  %v3588_v59 = vsel %vm3515_vm6, %v3464_v36, %v3587_v15  ;;  %v2131_v51 = vmax.f32 %v2129_v17, %v2130_v16 }
 0x197   :  { %v2579_v60 = vmax.f32 %v2577_v57, %v2578_v33  ;;  %v2134_v56 = vmax.f32 %v2132_v2, %v2133_v37  ;;  %v2582_v61 = vmax.f32 %v2580_v18, %v2581_v45  ;;  %v2140_v62 = vrot.slane %v2139_v53, 4  ;;  %v1218_v41 = vpop.f32.mrf.mxu0  ;;  %v1474_v3 = vpop.f32.mrf.mxu1 }
 0x198   :  { %v2588_v48 = vrot.slane %v2587_v47, 4  ;;  %v4037_v14 = vpack.c.bf16 %v2131_v51, %v2131_v51  ;;  %v1604_v25 = vmul.f32 %v5153_v55, %v5180_v52  ;;  %v1668_v22 = vmul.f32 %v5153_v55, %v5182_v54 }
 0x199   :  { %v4101_v23 = vpack.c.bf16 %v2579_v60, %v2579_v60  ;;  %v2135_v29 = vrot.slane %v2134_v56, 2  ;;  %v2583_v27 = vrot.slane %v2582_v61, 2  ;;  %v2141_v30 = vmax.f32 %v2139_v53, %v2140_v62  ;;  %v5336_v17 = vpop.f32.mrf.mxu0  ;;  %v5338_v57 = vpop.f32.mrf.mxu1 }
 0x19a   :  { %v2589_v15 = vmax.f32 %v2587_v47, %v2588_v48  ;;  %v3401_v2 = vunpack.c.l.b16 %v4037_v14  ;;  %v1739_v35 = vadd.f32 %v5164_v1, %v1604_v25  ;;  %v1803_v31 = vadd.f32 %v5164_v1, %v1668_v22 }
 0x19b   :  { %v3465_v18 = vunpack.c.l.b16 %v4101_v23  ;;  %v2136_v32 = vmax.f32 %v2134_v56, %v2135_v29  ;;  %v2584_v36 = vmax.f32 %v2582_v61, %v2583_v27  ;;  %v2142_v52 = vrot.slane %v2141_v30, 2  ;;  %v1223_v33 = vpop.f32.mrf.mxu0  ;;  %v1479_v54 = vpop.f32.mrf.mxu1 }
 0x19c   :  { %v2590_v16 = vrot.slane %v2589_v15, 2  ;;  %v3533_v37 = vsel %vm3517_vm7, %v3401_v2, %v3532_v38  ;;  %v1867_v53 = vmax.f32 %v1739_v35, 0.0  ;;  %v1931_v47 = vmax.f32 %v1803_v31, 0.0 }
 0x19d   :  { %v3589_v45 = vsel %vm3517_vm7, %v3465_v18, %v3588_v59  ;;  %v2137_v51 = vrot.slane %v2136_v32, 1  ;;  %v2585_v60 = vrot.slane %v2584_v36, 1  ;;  %v2143_v62 = vmax.f32 %v2141_v30, %v2142_v52  ;;  %v5344_v41 = vpop.f32.mrf.mxu0  ;;  %v5346_v3 = vpop.f32.mrf.mxu1 }
 0x19e   :  { %v2591_v48 = vmax.f32 %v2589_v15, %v2590_v16  ;;  %v2146_v56 = vsel %vm1970_vm1, %v1867_v53, -inf  ;;  %v2594_v61 = vsel %vm1970_vm1, %v1931_v47, -inf  ;;  %v1605_v14 = vmul.f32 %v5153_v55, %v5186_v13 }
 0x19f   :  { %v1669_v38 = vmul.f32 %v5153_v55, %v5188_v7  ;;  %v2138_v59 = vmax.f32 %v2136_v32, %v2137_v51  ;;  %v2586_v23 = vmax.f32 %v2584_v36, %v2585_v60  ;;  %v2144_v25 = vrot.slane %v2143_v62, 1  ;;  %v1226_v29 = vpop.f32.mrf.mxu0  ;;  %v1482_v27 = vpop.f32.mrf.mxu1 }
 0x1a0   :  { %v2592_v22 = vrot.slane %v2591_v48, 1  ;;  %v2147_v30 = vrot.slane %v2146_v56, 4  ;;  %v2595_v15 = vrot.slane %v2594_v61, 4  ;;  %v1740_v2 = vadd.f32 %v5164_v1, %v1605_v14 }
 0x1a1   :  { %v1804_v18 = vadd.f32 %v5164_v1, %v1669_v38  ;;  %v4038_v35 = vpack.c.bf16 %v2138_v59, %v2138_v59  ;;  %v4102_v31 = vpack.c.bf16 %v2586_v23, %v2586_v23  ;;  %v2145_v52 = vmax.f32 %v2143_v62, %v2144_v25  ;;  %v5356_v13 = vpop.f32.mrf.mxu0  ;;  %v5358_v33 = vpop.f32.mrf.mxu1 }
 0x1a2   :  { %v2593_v16 = vmax.f32 %v2591_v48, %v2592_v22  ;;  %v2148_v7 = vmax.f32 %v2146_v56, %v2147_v30  ;;  %v2596_v32 = vmax.f32 %v2594_v61, %v2595_v15  ;;  %v1868_v36 = vmax.f32 %v1740_v2, 0.0 }
 0x1a3   :  { %v1932_v54 = vmax.f32 %v1804_v18, 0.0  ;;  %v3402_v53 = vunpack.c.l.b16 %v4038_v35  ;;  %v3466_v47 = vunpack.c.l.b16 %v4102_v31  ;;  %v4039_v51 = vpack.c.bf16 %v2145_v52, %v2145_v52  ;;  %v1231_v29 = vpop.f32.mrf.mxu0  ;;  %v1487_v14 = vpop.f32.mrf.mxu1 }
 0x1a4   :  { %v4103_v60 = vpack.c.bf16 %v2593_v16, %v2593_v16  ;;  %v2149_v27 = vrot.slane %v2148_v7, 2  ;;  %v2597_v38 = vrot.slane %v2596_v32, 2  ;;  %v2153_v59 = vsel %vm1970_vm1, %v1868_v36, -inf }
 0x1a5   :  { %v2601_v62 = vsel %vm1970_vm1, %v1932_v54, -inf  ;;  %v3534_v48 = vsel %vm3519_vm8, %v3402_v53, %v3533_v37  ;;  %v3590_v23 = vsel %vm3519_vm8, %v3466_v47, %v3589_v45  ;;  %v3403_v56 = vunpack.c.l.b16 %v4039_v51  ;;  %v5364_v25 = vpop.f32.mrf.mxu0  ;;  %v5366_v22 = vpop.f32.mrf.mxu1 }
 0x1a6   :  { %v3467_v61 = vunpack.c.l.b16 %v4103_v60  ;;  %v3628_v30 = vpack.c.b16 %v3534_v48, %v3534_v48  ;;  %v3636_v15 = vpack.c.b16 %v3590_v23, %v3590_v23  ;;  %v2150_v2 = vmax.f32 %v2148_v7, %v2149_v27 }
 0x1a7   :  { %v2598_v18 = vmax.f32 %v2596_v32, %v2597_v38  ;;  %v2154_v35 = vrot.slane %v2153_v59, 4  ;;  %v2602_v31 = vrot.slane %v2601_v62, 4  ;;  %v1606_v52 = vmul.f32 %v5153_v55, %v5198_v49  ;;  %v1234_v16 = vpop.f32.mrf.mxu0  ;;  %v1490_v45 = vpop.f32.mrf.mxu1 }
 0x1a8   :  { %v1670_v37 = vmul.f32 %v5153_v55, %v5200_v50  ;;  %3661 = vst.msk [vmem:[%s5912_s4 + $0x8] sm:$0xf] %vm3658_vm9, %v3628_v30  ;;  %3669 = vst.msk [vmem:[%s5912_s4 + $0x28] sm:$0xf] %vm3658_vm9, %v3636_v15  ;;  %v2151_v7 = vrot.slane %v2150_v2, 1  ;;  %v1607_v49 = vmul.f32 %v5153_v55, %v5206_v63  ;;  %v1671_v50 = vmul.f32 %v5153_v55, %v5208_v20 }
 0x1a9   :  { %v2599_v32 = vrot.slane %v2598_v18, 1  ;;  %v2155_v36 = vmax.f32 %v2153_v59, %v2154_v35  ;;  %v2603_v54 = vmax.f32 %v2601_v62, %v2602_v31  ;;  %v1741_v53 = vadd.f32 %v5164_v1, %v1606_v52  ;;  %v5386_v51 = vpop.f32.mrf.mxu0  ;;  %v5388_v60 = vpop.f32.mrf.mxu1 }
 0x1aa   :  { %v1805_v47 = vadd.f32 %v5164_v1, %v1670_v37  ;;  %v2152_v29 = vmax.f32 %v2150_v2, %v2151_v7  ;;  %v1742_v27 = vadd.f32 %v5164_v1, %v1607_v49  ;;  %v1806_v38 = vadd.f32 %v5164_v1, %v1671_v50 }
 0x1ab   :  { %v2600_v14 = vmax.f32 %v2598_v18, %v2599_v32  ;;  %v2156_v63 = vrot.slane %v2155_v36, 2  ;;  %v2604_v48 = vrot.slane %v2603_v54, 2  ;;  %v1869_v23 = vmax.f32 %v1741_v53, 0.0  ;;  %v1239_v59 = vpop.f32.mrf.mxu0  ;;  %v1495_v62 = vpop.f32.mrf.mxu1 }
 0x1ac   :  { %v1933_v20 = vmax.f32 %v1805_v47, 0.0  ;;  %v4040_v30 = vpack.c.bf16 %v2152_v29, %v2152_v29  ;;  %v1870_v35 = vmax.f32 %v1742_v27, 0.0  ;;  %v1934_v31 = vmax.f32 %v1806_v38, 0.0 }
 0x1ad   :  { %v4104_v15 = vpack.c.bf16 %v2600_v14, %v2600_v14  ;;  %v2157_v52 = vmax.f32 %v2155_v36, %v2156_v63  ;;  %v2605_v37 = vmax.f32 %v2603_v54, %v2604_v48  ;;  %v2160_v16 = vsel %vm1970_vm1, %v1869_v23, -inf  ;;  %v5394_v18 = vpop.f32.mrf.mxu0  ;;  %v5396_v45 = vpop.f32.mrf.mxu1 }
 0x1ae   :  { %v2608_v2 = vsel %vm1970_vm1, %v1933_v20, -inf  ;;  %5913 = vst [vmem:[#allocation2_spill] sm:$0xff] %v5396_v45  ;;  %v3404_v7 = vunpack.c.l.b16 %v4040_v30  ;;  %v2161_v49 = vrot.slane %v2160_v16, 4  ;;  %v2167_v29 = vsel %vm1970_vm1, %v1870_v35, -inf }
 0x1af   :  { %v3468_v32 = vunpack.c.l.b16 %v4104_v15  ;;  %v2609_v50 = vrot.slane %v2608_v2, 4  ;;  %v2158_v53 = vrot.slane %v2157_v52, 1  ;;  %v2606_v47 = vrot.slane %v2605_v37, 1  ;;  %v1242_v36 = vpop.f32.mrf.mxu0  ;;  %v1498_v54 = vpop.f32.mrf.mxu1 }
 0x1b0   :  { %v2615_v14 = vsel %vm1970_vm1, %v1934_v31, -inf  ;;  %v3535_v27 = vsel %vm3507_vm2, %v3404_v7, %v3403_v56  ;;  %v2162_v63 = vmax.f32 %v2160_v16, %v2161_v49  ;;  %v2168_v59 = vrot.slane %v2167_v29, 4 }
 0x1b1   :  { %v3591_v38 = vsel %vm3507_vm2, %v3468_v32, %v3467_v61  ;;  %v2610_v48 = vmax.f32 %v2608_v2, %v2609_v50  ;;  %v2159_v23 = vmax.f32 %v2157_v52, %v2158_v53  ;;  %v2607_v20 = vmax.f32 %v2605_v37, %v2606_v47  ;;  %v5402_v30 = vpop.f32.mrf.mxu0  ;;  %v5404_v15 = vpop.f32.mrf.mxu1 }
 0x1b2   :  { %v2616_v62 = vrot.slane %v2615_v14, 4  ;;  %5914 = vst [vmem:[#allocation3_spill] sm:$0xff] %v5402_v30  ;;  %5915 = vst [vmem:[#allocation4_spill] sm:$0xff] %v5404_v15  ;;  %v2163_v45 = vrot.slane %v2162_v63, 2  ;;  %v1608_v31 = vmul.f32 %v5153_v55, %v5218_v44  ;;  %v1672_v56 = vmul.f32 %v5153_v55, %v5220_v6 }
 0x1b3   :  { %v2611_v35 = vrot.slane %v2610_v48, 2  ;;  %v4041_v7 = vpack.c.bf16 %v2159_v23, %v2159_v23  ;;  %v4105_v61 = vpack.c.bf16 %v2607_v20, %v2607_v20  ;;  %v2169_v16 = vmax.f32 %v2167_v29, %v2168_v59  ;;  %v1247_v52 = vpop.f32.mrf.mxu0  ;;  %v1503_v37 = vpop.f32.mrf.mxu1 }
 0x1b4   :  { %v2617_v2 = vmax.f32 %v2615_v14, %v2616_v62  ;;  %v2164_v32 = vmax.f32 %v2162_v63, %v2163_v45  ;;  %v1743_v50 = vadd.f32 %v5164_v1, %v1608_v31  ;;  %v1807_v53 = vadd.f32 %v5164_v1, %v1672_v56 }
 0x1b5   :  { %v2612_v49 = vmax.f32 %v2610_v48, %v2611_v35  ;;  %v3405_v47 = vunpack.c.l.b16 %v4041_v7  ;;  %v3469_v36 = vunpack.c.l.b16 %v4105_v61  ;;  %v2170_v54 = vrot.slane %v2169_v16, 2  ;;  %v5412_v44 = vpop.f32.mrf.mxu0  ;;  %v5414_v30 = vpop.f32.mrf.mxu1 }
 0x1b6   :  { %v2618_v15 = vrot.slane %v2617_v2, 2  ;;  %5916 = vst [vmem:[#allocation5_spill] sm:$0xff] %v5414_v30  ;;  %v2165_v6 = vrot.slane %v2164_v32, 1  ;;  %v1871_v29 = vmax.f32 %v1743_v50, 0.0  ;;  %v1935_v14 = vmax.f32 %v1807_v53, 0.0 }
 0x1b7   :  { %v2613_v23 = vrot.slane %v2612_v49, 1  ;;  %v3536_v20 = vsel %vm3509_vm3, %v3405_v47, %v3535_v27  ;;  %v3592_v45 = vsel %vm3509_vm3, %v3469_v36, %v3591_v38  ;;  %v2171_v63 = vmax.f32 %v2169_v16, %v2170_v54  ;;  %v1250_v59 = vpop.f32.mrf.mxu0  ;;  %v1506_v62 = vpop.f32.mrf.mxu1 }
 0x1b8   :  { %v2619_v48 = vmax.f32 %v2617_v2, %v2618_v15  ;;  %v2166_v35 = vmax.f32 %v2164_v32, %v2165_v6  ;;  %v2174_v56 = vsel %vm1970_vm1, %v1871_v29, -inf  ;;  %v2622_v7 = vsel %vm1970_vm1, %v1935_v14, -inf }
 0x1b9   :  { %v2614_v31 = vmax.f32 %v2612_v49, %v2613_v23  ;;  %v2172_v61 = vrot.slane %v2171_v63, 1  ;;  %v2175_v37 = vrot.slane %v2174_v56, 4  ;;  %v2623_v30 = vrot.slane %v2622_v7, 4  ;;  %v5420_v50 = vpop.f32.mrf.mxu0  ;;  %v5422_v53 = vpop.f32.mrf.mxu1 }
 0x1ba   :  { %v2620_v52 = vrot.slane %v2619_v48, 1  ;;  %5917 = vst [vmem:[#allocation6_spill] sm:$0xff] %v5422_v53  ;;  %v4042_v27 = vpack.c.bf16 %v2166_v35, %v2166_v35  ;;  %v1609_v15 = vmul.f32 %v5153_v55, %v5226_v19  ;;  %v1673_v16 = vmul.f32 %v5153_v55, %v5228_v12 }
 0x1bb   :  { %v4106_v38 = vpack.c.bf16 %v2614_v31, %v2614_v31  ;;  %v2173_v2 = vmax.f32 %v2171_v63, %v2172_v61  ;;  %v2176_v49 = vmax.f32 %v2174_v56, %v2175_v37  ;;  %v2624_v47 = vmax.f32 %v2622_v7, %v2623_v30  ;;  %v1255_v36 = vpop.f32.mrf.mxu0  ;;  %v1511_v54 = vpop.f32.mrf.mxu1 }
 0x1bc   :  { %v2621_v32 = vmax.f32 %v2619_v48, %v2620_v52  ;;  %v3406_v6 = vunpack.c.l.b16 %v4042_v27  ;;  %v1744_v29 = vadd.f32 %v5164_v1, %v1609_v15  ;;  %v1808_v14 = vadd.f32 %v5164_v1, %v1673_v16 }
 0x1bd   :  { %v3470_v23 = vunpack.c.l.b16 %v4106_v38  ;;  %v4043_v59 = vpack.c.bf16 %v2173_v2, %v2173_v2  ;;  %v2177_v35 = vrot.slane %v2176_v49, 2  ;;  %v2625_v31 = vrot.slane %v2624_v47, 2  ;;  %v5430_v19 = vpop.f32.mrf.mxu0  ;;  %v5432_v53 = vpop.f32.mrf.mxu1  ;;  %v5441_v38 = vld [vmem:[%s5910_s2] ss:$0 sm:$0xff] }
 0x1be   :  { %v4107_v62 = vpack.c.bf16 %v2621_v32, %v2621_v32  ;;  %v3537_v55 = vsel %vm3511_vm4, %v3406_v6, %v3536_v20  ;;  %v1872_v30 = vmax.f32 %v1744_v29, 0.0  ;;  %v1936_v63 = vmax.f32 %v1808_v14, 0.0  ;;  %v5456_v6 = vld [vmem:[%s5911_s3] ss:$0 sm:$0xff] }
 0x1bf   :  { %v3593_v12 = vsel %vm3511_vm4, %v3470_v23, %v3592_v45  ;;  %v3407_v48 = vunpack.c.l.b16 %v4043_v59  ;;  %v2178_v7 = vmax.f32 %v2176_v49, %v2177_v35  ;;  %v2626_v61 = vmax.f32 %v2624_v47, %v2625_v31  ;;  %v1258_v52 = vpop.f32.mrf.mxu0  ;;  %v1514_v1 = vpop.f32.mrf.mxu1 }
 0x1c0   :  { %v3471_v56 = vunpack.c.l.b16 %v4107_v62  ;;  %v2181_v37 = vsel %vm1970_vm1, %v1872_v30, -inf  ;;  %v2629_v27 = vsel %vm1970_vm1, %v1936_v63, -inf  ;;  %v1610_v20 = vmul.f32 %v5441_v38, %v5248_v26 }
 0x1c1   :  { %v1674_v45 = vmul.f32 %v5441_v38, %v5250_v43  ;;  %v3538_v15 = vsel %vm3513_vm5, %v3407_v48, %v3537_v55  ;;  %v2179_v2 = vrot.slane %v2178_v7, 1  ;;  %v2627_v32 = vrot.slane %v2626_v61, 1  ;;  %v5449_v49 = vpop.f32.mrf.mxu0  ;;  %v5451_v47 = vpop.f32.mrf.mxu1 }
 0x1c2   :  { %v3594_v16 = vsel %vm3513_vm5, %v3471_v56, %v3593_v12  ;;  %v2182_v36 = vrot.slane %v2181_v37, 4  ;;  %v2630_v54 = vrot.slane %v2629_v27, 4  ;;  %v1745_v26 = vadd.f32 %v5456_v6, %v1610_v20 }
 0x1c3   :  { %v1809_v43 = vadd.f32 %v5456_v6, %v1674_v45  ;;  %v2180_v23 = vmax.f32 %v2178_v7, %v2179_v2  ;;  %v2628_v29 = vmax.f32 %v2626_v61, %v2627_v32  ;;  %v1611_v14 = vmul.f32 %v5441_v38, %v5256_v4  ;;  %v1263_v62 = vpop.f32.mrf.mxu0  ;;  %v1519_v35 = vpop.f32.mrf.mxu1 }
 0x1c4   :  { %v1675_v59 = vmul.f32 %v5441_v38, %v5258_v9  ;;  %v2183_v31 = vmax.f32 %v2181_v37, %v2182_v36  ;;  %v2631_v55 = vmax.f32 %v2629_v27, %v2630_v54  ;;  %v1873_v12 = vmax.f32 %v1745_v26, 0.0 }
 0x1c5   :  { %v1937_v30 = vmax.f32 %v1809_v43, 0.0  ;;  %v4044_v63 = vpack.c.bf16 %v2180_v23, %v2180_v23  ;;  %v4108_v48 = vpack.c.bf16 %v2628_v29, %v2628_v29  ;;  %v1746_v56 = vadd.f32 %v5456_v6, %v1611_v14  ;;  %v5466_v7 = vpop.f32.mrf.mxu0  ;;  %v5468_v61 = vpop.f32.mrf.mxu1 }
 0x1c6   :  { %v1810_v52 = vadd.f32 %v5456_v6, %v1675_v59  ;;  %v2184_v4 = vrot.slane %v2183_v31, 2  ;;  %v2632_v1 = vrot.slane %v2631_v55, 2  ;;  %v2188_v9 = vsel %vm1970_vm1, %v1873_v12, -inf }
 0x1c7   :  { %v2636_v20 = vsel %vm1970_vm1, %v1937_v30, -inf  ;;  %v3408_v37 = vunpack.c.l.b16 %v4044_v63  ;;  %v3472_v27 = vunpack.c.l.b16 %v4108_v48  ;;  %v2189_v45 = vrot.slane %v2188_v9, 4  ;;  %v1266_v32 = vpop.f32.mrf.mxu0  ;;  %v1522_v36 = vpop.f32.mrf.mxu1 }
 0x1c8   :  { %v2637_v2 = vrot.slane %v2636_v20, 4  ;;  %v2185_v54 = vmax.f32 %v2183_v31, %v2184_v4  ;;  %v2633_v26 = vmax.f32 %v2631_v55, %v2632_v1  ;;  %v1874_v43 = vmax.f32 %v1746_v56, 0.0 }
 0x1c9   :  { %v1938_v23 = vmax.f32 %v1810_v52, 0.0  ;;  %v3539_v29 = vsel %vm3515_vm6, %v3408_v37, %v3538_v15  ;;  %v3595_v14 = vsel %vm3515_vm6, %v3472_v27, %v3594_v16  ;;  %v2190_v59 = vmax.f32 %v2188_v9, %v2189_v45  ;;  %v5474_v35 = vpop.f32.mrf.mxu0  ;;  %v5476_v12 = vpop.f32.mrf.mxu1 }
 0x1ca   :  { %v2638_v62 = vmax.f32 %v2636_v20, %v2637_v2  ;;  %5918 = vst [vmem:[#allocation7_spill] sm:$0xff] %v5476_v12  ;;  %v2186_v30 = vrot.slane %v2185_v54, 1  ;;  %v2634_v63 = vrot.slane %v2633_v26, 1  ;;  %v2195_v48 = vsel %vm1970_vm1, %v1874_v43, -inf }
 0x1cb   :  { %v2643_v32 = vsel %vm1970_vm1, %v1938_v23, -inf  ;;  %v2191_v31 = vrot.slane %v2190_v59, 2  ;;  %v2196_v56 = vrot.slane %v2195_v48, 4  ;;  %v1271_v4 = vpop.f32.mrf.mxu0  ;;  %v1527_v15 = vpop.f32.mrf.mxu1  ;;  %v1612_v9 = vmul.f32 %v5441_v38, %v5264_v58 }
 0x1cc   :  { %v2639_v55 = vrot.slane %v2638_v62, 2  ;;  %v2644_v52 = vrot.slane %v2643_v32, 4  ;;  %v2187_v1 = vmax.f32 %v2185_v54, %v2186_v30  ;;  %v2635_v16 = vmax.f32 %v2633_v26, %v2634_v63 }
 0x1cd   :  { %v1676_v20 = vmul.f32 %v5441_v38, %v5266_v5  ;;  %v2192_v37 = vmax.f32 %v2190_v59, %v2191_v31  ;;  %v2197_v45 = vmax.f32 %v2195_v48, %v2196_v56  ;;  %v5484_v36 = vpop.f32.mrf.mxu0  ;;  %v1747_v12 = vadd.f32 %v5456_v6, %v1612_v9  ;;  %v5488_v54 = vpop.f32.mrf.mxu1 }
 0x1ce   :  { %v2640_v27 = vmax.f32 %v2638_v62, %v2639_v55  ;;  %v2645_v2 = vmax.f32 %v2643_v32, %v2644_v52  ;;  %v4045_v43 = vpack.c.bf16 %v2187_v1, %v2187_v1  ;;  %v4109_v23 = vpack.c.bf16 %v2635_v16, %v2635_v16  ;;  %5919 = vst [vmem:[#allocation8_spill] sm:$0xff] %v5488_v54 }
 0x1cf   :  { %v1811_v4 = vadd.f32 %v5456_v6, %v1676_v20  ;;  %v2193_v26 = vrot.slane %v2192_v37, 1  ;;  %v2198_v58 = vrot.slane %v2197_v45, 2  ;;  %v1274_v15 = vpop.f32.mrf.mxu0  ;;  %v1875_v62 = vmax.f32 %v1747_v12, 0.0  ;;  %v1530_v32 = vpop.f32.mrf.mxu1 }
 0x1d0   :  { %v2641_v30 = vrot.slane %v2640_v27, 1  ;;  %v2646_v63 = vrot.slane %v2645_v2, 2  ;;  %v3409_v5 = vunpack.c.l.b16 %v4045_v43  ;;  %v3473_v59 = vunpack.c.l.b16 %v4109_v23 }
 0x1d1   :  { %v1939_v48 = vmax.f32 %v1811_v4, 0.0  ;;  %v2194_v31 = vmax.f32 %v2192_v37, %v2193_v26  ;;  %v2199_v56 = vmax.f32 %v2197_v45, %v2198_v58  ;;  %v2202_v9 = vsel %vm1970_vm1, %v1875_v62, -inf  ;;  %v5494_v54 = vpop.f32.mrf.mxu0 }
 0x1d2   :  { %v2642_v55 = vmax.f32 %v2640_v27, %v2641_v30  ;;  %v2647_v52 = vmax.f32 %v2645_v2, %v2646_v63  ;;  %v3540_v1 = vsel %vm3517_vm7, %v3409_v5, %v3539_v29  ;;  %v3596_v16 = vsel %vm3517_vm7, %v3473_v59, %v3595_v14  ;;  %v5502_v59 = vpop.f32.mrf.mxu1 }
 0x1d3   :  { %v2650_v20 = vsel %vm1970_vm1, %v1939_v48, -inf  ;;  %v4046_v15 = vpack.c.bf16 %v2194_v31, %v2194_v31  ;;  %v2200_v23 = vrot.slane %v2199_v56, 1  ;;  %v2203_v4 = vrot.slane %v2202_v9, 4  ;;  %v1279_v27 = vpop.f32.mrf.mxu0 }
 0x1d4   :  { %v4110_v43 = vpack.c.bf16 %v2642_v55, %v2642_v55  ;;  %v2648_v12 = vrot.slane %v2647_v52, 1  ;;  %v2651_v32 = vrot.slane %v2650_v20, 4  ;;  %v1613_v37 = vmul.f32 %v5441_v38, %v5274_v10 }
 0x1d5   :  { %v1677_v29 = vmul.f32 %v5441_v38, %v5276_v11  ;;  %v3410_v14 = vunpack.c.l.b16 %v4046_v15  ;;  %v2201_v2 = vmax.f32 %v2199_v56, %v2200_v23  ;;  %v2204_v30 = vmax.f32 %v2202_v9, %v2203_v4  ;;  %v1535_v15 = vpop.f32.mrf.mxu1 }
 0x1d6   :  { %v3474_v45 = vunpack.c.l.b16 %v4110_v43  ;;  %v2649_v26 = vmax.f32 %v2647_v52, %v2648_v12  ;;  %v2652_v58 = vmax.f32 %v2650_v20, %v2651_v32  ;;  %v1748_v63 = vadd.f32 %v5456_v6, %v1613_v37  ;;  %v5518_v12 = vpop.f32.mrf.mxu0 }
 0x1d7   :  { %v1812_v5 = vadd.f32 %v5456_v6, %v1677_v29  ;;  %v3541_v62 = vsel %vm3519_vm8, %v3410_v14, %v3540_v1  ;;  %v2205_v11 = vrot.slane %v2204_v30, 2  ;;  %v4047_v43 = vpack.c.bf16 %v2201_v2, %v2201_v2  ;;  %v5526_v27 = vpop.f32.mrf.mxu1 }
 0x1d8   :  { %v3597_v10 = vsel %vm3519_vm8, %v3474_v45, %v3596_v16  ;;  %v3629_v48 = vpack.c.b16 %v3541_v62, %v3541_v62  ;;  %v2653_v55 = vrot.slane %v2652_v58, 2  ;;  %v4111_v56 = vpack.c.bf16 %v2649_v26, %v2649_v26  ;;  %v1282_v26 = vpop.f32.mrf.mxu0 }
 0x1d9   :  { %v3637_v31 = vpack.c.b16 %v3597_v10, %v3597_v10  ;;  %v1876_v52 = vmax.f32 %v1748_v63, 0.0  ;;  %v1940_v9 = vmax.f32 %v1812_v5, 0.0  ;;  %v2206_v1 = vmax.f32 %v2204_v30, %v2205_v11  ;;  %v1538_v5 = vpop.f32.mrf.mxu1 }
 0x1da   :  { %3662 = vst.msk [vmem:[%s5912_s4 + $0xc] sm:$0xf] %vm3658_vm9, %v3629_v48  ;;  %v2654_v16 = vmax.f32 %v2652_v58, %v2653_v55  ;;  %v1614_v20 = vmul.f32 %v5441_v38, %v5286_v46  ;;  %v1678_v23 = vmul.f32 %v5441_v38, %v5288_v42  ;;  %v1615_v37 = vmul.f32 %v5441_v38, %v5292_v0  ;;  %v5532_v15 = vpop.f32.mrf.mxu0 }
 0x1db   :  { %3670 = vst.msk [vmem:[%s5912_s4 + $0x2c] sm:$0xf] %vm3658_vm9, %v3637_v31  ;;  %v2209_v4 = vsel %vm1970_vm1, %v1876_v52, -inf  ;;  %v2657_v32 = vsel %vm1970_vm1, %v1940_v9, -inf  ;;  %v1679_v29 = vmul.f32 %v5441_v38, %v5294_v24  ;;  %v2207_v14 = vrot.slane %v2206_v1, 1  ;;  %5920 = vst [vmem:[#allocation9_spill] sm:$0xff] %v5532_v15  ;;  %v5534_v52 = vpop.f32.mrf.mxu1 }
 0x1dc   :  { %v2655_v45 = vrot.slane %v2654_v16, 1  ;;  %v2210_v46 = vrot.slane %v2209_v4, 4  ;;  %v2658_v2 = vrot.slane %v2657_v32, 4  ;;  %v1749_v42 = vadd.f32 %v5456_v6, %v1614_v20  ;;  %5921 = vst [vmem:[#allocation10_spill] sm:$0xff] %v5534_v52 }
 0x1dd   :  { %v1813_v30 = vadd.f32 %v5456_v6, %v1678_v23  ;;  %v1750_v58 = vadd.f32 %v5456_v6, %v1615_v37  ;;  %v1814_v63 = vadd.f32 %v5456_v6, %v1679_v29  ;;  %v2208_v0 = vmax.f32 %v2206_v1, %v2207_v14 }
 0x1de   :  { %v2656_v62 = vmax.f32 %v2654_v16, %v2655_v45  ;;  %v2211_v10 = vmax.f32 %v2209_v4, %v2210_v46  ;;  %v2659_v24 = vmax.f32 %v2657_v32, %v2658_v2  ;;  %v1877_v48 = vmax.f32 %v1749_v42, 0.0  ;;  %v1287_v4 = vpop.f32.mrf.mxu0  ;;  %v1543_v32 = vpop.f32.mrf.mxu1 }
 0x1df   :  { %v1941_v31 = vmax.f32 %v1813_v30, 0.0  ;;  %v1878_v11 = vmax.f32 %v1750_v58, 0.0  ;;  %v1942_v55 = vmax.f32 %v1814_v63, 0.0  ;;  %v4048_v9 = vpack.c.bf16 %v2208_v0, %v2208_v0 }
 0x1e0   :  { %v4112_v20 = vpack.c.bf16 %v2656_v62, %v2656_v62  ;;  %v2212_v23 = vrot.slane %v2211_v10, 2  ;;  %v2660_v26 = vrot.slane %v2659_v24, 2  ;;  %v2216_v37 = vsel %vm1970_vm1, %v1877_v48, -inf  ;;  %v5540_v5 = vpop.f32.mrf.mxu0 }
 0x1e1   :  { %v2664_v29 = vsel %vm1970_vm1, %v1941_v31, -inf  ;;  %v2223_v1 = vsel %vm1970_vm1, %v1878_v11, -inf  ;;  %v2671_v16 = vsel %vm1970_vm1, %v1942_v55, -inf  ;;  %v3411_v14 = vunpack.c.l.b16 %v4047_v43  ;;  %5922 = vst [vmem:[#allocation11_spill] sm:$0xff] %v5540_v5 }
 0x1e2   :  { %v3475_v45 = vunpack.c.l.b16 %v4111_v56  ;;  %v2213_v46 = vmax.f32 %v2211_v10, %v2212_v23  ;;  %v2661_v2 = vmax.f32 %v2659_v24, %v2660_v26  ;;  %v2217_v42 = vrot.slane %v2216_v37, 4  ;;  %v1290_v4 = vpop.f32.mrf.mxu0 }
 0x1e3   :  { %v2665_v30 = vrot.slane %v2664_v29, 4  ;;  %v2224_v58 = vrot.slane %v2223_v1, 4  ;;  %v2672_v63 = vrot.slane %v2671_v16, 4  ;;  %v3412_v0 = vunpack.c.l.b16 %v4048_v9 }
 0x1e4   :  { %v3476_v62 = vunpack.c.l.b16 %v4112_v20  ;;  %v2214_v48 = vrot.slane %v2213_v46, 1  ;;  %v2662_v31 = vrot.slane %v2661_v2, 1  ;;  %v2218_v52 = vmax.f32 %v2216_v37, %v2217_v42 }
 0x1e5   :  { %v2666_v11 = vmax.f32 %v2664_v29, %v2665_v30  ;;  %v2225_v15 = vmax.f32 %v2223_v1, %v2224_v58  ;;  %v2673_v55 = vmax.f32 %v2671_v16, %v2672_v63  ;;  %v1616_v56 = vmul.f32 %v5441_v38, %v5306_v34  ;;  %v5548_v1 = vpop.f32.mrf.mxu1 }
 0x1e6   :  { %v2215_v32 = vmax.f32 %v2213_v46, %v2214_v48  ;;  %v2663_v43 = vmax.f32 %v2661_v2, %v2662_v31  ;;  %v1680_v10 = vmul.f32 %v5441_v38, %v5308_v28  ;;  %v2219_v24 = vrot.slane %v2218_v52, 2 }
 0x1e7   :  { %v2667_v23 = vrot.slane %v2666_v11, 2  ;;  %v2226_v26 = vrot.slane %v2225_v15, 2  ;;  %v2674_v9 = vrot.slane %v2673_v55, 2  ;;  %v1751_v37 = vadd.f32 %v5456_v6, %v1616_v56  ;;  %v1546_v63 = vpop.f32.mrf.mxu1 }
 0x1e8   :  { %v4049_v20 = vpack.c.bf16 %v2215_v32, %v2215_v32  ;;  %v4113_v5 = vpack.c.bf16 %v2663_v43, %v2663_v43  ;;  %v1815_v29 = vadd.f32 %v5456_v6, %v1680_v10  ;;  %v2220_v16 = vmax.f32 %v2218_v52, %v2219_v24 }
 0x1e9   :  { %v2668_v46 = vmax.f32 %v2666_v11, %v2667_v23  ;;  %v2227_v2 = vmax.f32 %v2225_v15, %v2226_v26  ;;  %v2675_v42 = vmax.f32 %v2673_v55, %v2674_v9  ;;  %v3542_v34 = vsel %vm3507_vm2, %v3412_v0, %v3411_v14  ;;  %v5554_v11 = vpop.f32.mrf.mxu0 }
 0x1ea   :  { %v3598_v28 = vsel %vm3507_vm2, %v3476_v62, %v3475_v45  ;;  %v1879_v30 = vmax.f32 %v1751_v37, 0.0  ;;  %v1943_v58 = vmax.f32 %v1815_v29, 0.0  ;;  %v2221_v48 = vrot.slane %v2220_v16, 1 }
 0x1eb   :  { %v2669_v31 = vrot.slane %v2668_v46, 1  ;;  %v2228_v4 = vrot.slane %v2227_v2, 1  ;;  %v2676_v32 = vrot.slane %v2675_v42, 1  ;;  %v3413_v43 = vunpack.c.l.b16 %v4049_v20  ;;  %v1295_v26 = vpop.f32.mrf.mxu0 }
 0x1ec   :  { %v3477_v56 = vunpack.c.l.b16 %v4113_v5  ;;  %v2230_v10 = vsel %vm1970_vm1, %v1879_v30, -inf  ;;  %v2678_v52 = vsel %vm1970_vm1, %v1943_v58, -inf  ;;  %v2222_v15 = vmax.f32 %v2220_v16, %v2221_v48 }
 0x1ed   :  { %v2670_v55 = vmax.f32 %v2668_v46, %v2669_v31  ;;  %v2229_v14 = vmax.f32 %v2227_v2, %v2228_v4  ;;  %v2677_v0 = vmax.f32 %v2675_v42, %v2676_v32  ;;  %v2231_v45 = vrot.slane %v2230_v10, 4  ;;  %v5562_v2 = vpop.f32.mrf.mxu1 }
 0x1ee   :  { %v2679_v62 = vrot.slane %v2678_v52, 4  ;;  %v1617_v24 = vmul.f32 %v5441_v38, %v5318_v8  ;;  %v1681_v23 = vmul.f32 %v5441_v38, %v5320_v21  ;;  %v4050_v5 = vpack.c.bf16 %v2222_v15, %v2222_v15 }
 0x1ef   :  { %v4114_v9 = vpack.c.bf16 %v2670_v55, %v2670_v55  ;;  %v4051_v20 = vpack.c.bf16 %v2229_v14, %v2229_v14  ;;  %v4115_v37 = vpack.c.bf16 %v2677_v0, %v2677_v0  ;;  %v2232_v29 = vmax.f32 %v2230_v10, %v2231_v45  ;;  %v1551_v32 = vpop.f32.mrf.mxu1 }
 0x1f0   :  { %v2680_v30 = vmax.f32 %v2678_v52, %v2679_v62  ;;  %v1752_v16 = vadd.f32 %v5456_v6, %v1617_v24  ;;  %v1816_v46 = vadd.f32 %v5456_v6, %v1681_v23  ;;  %v3543_v42 = vsel %vm3509_vm3, %v3413_v43, %v3542_v34 }
 0x1f1   :  { %v3599_v8 = vsel %vm3509_vm3, %v3477_v56, %v3598_v28  ;;  %v3414_v58 = vunpack.c.l.b16 %v4050_v5  ;;  %v3478_v63 = vunpack.c.l.b16 %v4114_v9  ;;  %v2233_v21 = vrot.slane %v2232_v29, 2  ;;  %v5572_v56 = vpop.f32.mrf.mxu0 }
 0x1f2   :  { %v2681_v48 = vrot.slane %v2680_v30, 2  ;;  %v1880_v31 = vmax.f32 %v1752_v16, 0.0  ;;  %v1944_v4 = vmax.f32 %v1816_v46, 0.0  ;;  %v3415_v15 = vunpack.c.l.b16 %v4051_v20 }
 0x1f3   :  { %v3479_v10 = vunpack.c.l.b16 %v4115_v37  ;;  %v1618_v52 = vmul.f32 %v5441_v38, %v5326_v39  ;;  %v1682_v55 = vmul.f32 %v5441_v38, %v5328_v40  ;;  %v3544_v14 = vsel %vm3511_vm4, %v3414_v58, %v3543_v42  ;;  %v1298_v5 = vpop.f32.mrf.mxu0 }
 0x1f4   :  { %v3600_v34 = vsel %vm3511_vm4, %v3478_v63, %v3599_v8  ;;  %v2234_v28 = vmax.f32 %v2232_v29, %v2233_v21  ;;  %v2682_v43 = vmax.f32 %v2680_v30, %v2681_v48  ;;  %v2237_v0 = vsel %vm1970_vm1, %v1880_v31, -inf  ;;  %v5582_v30 = vpop.f32.mrf.mxu1 }
 0x1f5   :  { %v2685_v45 = vsel %vm1970_vm1, %v1944_v4, -inf  ;;  %v1753_v62 = vadd.f32 %v5456_v6, %v1618_v52  ;;  %v1817_v24 = vadd.f32 %v5456_v6, %v1682_v55  ;;  %v2238_v26 = vrot.slane %v2237_v0, 4 }
 0x1f6   :  { %v2235_v39 = vrot.slane %v2234_v28, 1  ;;  %v2683_v23 = vrot.slane %v2682_v43, 1  ;;  %v2686_v40 = vrot.slane %v2685_v45, 4  ;;  %v1619_v37 = vmul.f32 %v5441_v38, %v5336_v17  ;;  %v1554_v31 = vpop.f32.mrf.mxu1 }
 0x1f7   :  { %v1881_v9 = vmax.f32 %v1753_v62, 0.0  ;;  %v1945_v20 = vmax.f32 %v1817_v24, 0.0  ;;  %v1683_v29 = vmul.f32 %v5441_v38, %v5338_v57  ;;  %v2239_v42 = vmax.f32 %v2237_v0, %v2238_v26 }
 0x1f8   :  { %v2236_v16 = vmax.f32 %v2234_v28, %v2235_v39  ;;  %v2684_v46 = vmax.f32 %v2682_v43, %v2683_v23  ;;  %v2687_v8 = vmax.f32 %v2685_v45, %v2686_v40  ;;  %v1754_v21 = vadd.f32 %v5456_v6, %v1619_v37  ;;  %v5588_v43 = vpop.f32.mrf.mxu0  ;;  %v5590_v0 = vpop.f32.mrf.mxu1 }
 0x1f9   :  { %v2244_v58 = vsel %vm1970_vm1, %v1881_v9, -inf  ;;  %v2692_v63 = vsel %vm1970_vm1, %v1945_v20, -inf  ;;  %v1818_v48 = vadd.f32 %v5456_v6, %v1683_v29  ;;  %v2240_v32 = vrot.slane %v2239_v42, 2  ;;  %5923 = vst [vmem:[#allocation12_spill] sm:$0xff] %v5590_v0 }
 0x1fa   :  { %v4052_v4 = vpack.c.bf16 %v2236_v16, %v2236_v16  ;;  %v4116_v17 = vpack.c.bf16 %v2684_v46, %v2684_v46  ;;  %v2688_v52 = vrot.slane %v2687_v8, 2  ;;  %v2245_v57 = vrot.slane %v2244_v58, 4  ;;  %v1303_v20 = vpop.f32.mrf.mxu0  ;;  %v1559_v37 = vpop.f32.mrf.mxu1 }
 0x1fb   :  { %v2693_v55 = vrot.slane %v2692_v63, 4  ;;  %v1882_v62 = vmax.f32 %v1754_v21, 0.0  ;;  %v1946_v28 = vmax.f32 %v1818_v48, 0.0  ;;  %v3545_v45 = vsel %vm3513_vm5, %v3415_v15, %v3544_v14 }
 0x1fc   :  { %v3601_v24 = vsel %vm3513_vm5, %v3479_v10, %v3600_v34  ;;  %v2241_v39 = vmax.f32 %v2239_v42, %v2240_v32  ;;  %v2689_v23 = vmax.f32 %v2687_v8, %v2688_v52  ;;  %v2246_v26 = vmax.f32 %v2244_v58, %v2245_v57  ;;  %v5596_v14 = vpop.f32.mrf.mxu0 }
 0x1fd   :  { %v2694_v40 = vmax.f32 %v2692_v63, %v2693_v55  ;;  %v2251_v5 = vsel %vm1970_vm1, %v1882_v62, -inf  ;;  %v2699_v9 = vsel %vm1970_vm1, %v1946_v28, -inf  ;;  %v3416_v29 = vunpack.c.l.b16 %v4052_v4  ;;  %v5604_v28 = vpop.f32.mrf.mxu1 }
 0x1fe   :  { %v3480_v16 = vunpack.c.l.b16 %v4116_v17  ;;  %v2242_v46 = vrot.slane %v2241_v39, 1  ;;  %v2690_v21 = vrot.slane %v2689_v23, 1  ;;  %v2247_v48 = vrot.slane %v2246_v26, 2  ;;  %v1306_v32 = vpop.f32.mrf.mxu0 }
 0x1ff   :  { %v2695_v31 = vrot.slane %v2694_v40, 2  ;;  %v2252_v0 = vrot.slane %v2251_v5, 4  ;;  %v2700_v15 = vrot.slane %v2699_v9, 4  ;;  %v1620_v42 = vmul.f32 %v5441_v38, %v5344_v41 }
 0x200   :  { %v2243_v10 = vmax.f32 %v2241_v39, %v2242_v46  ;;  %v2691_v34 = vmax.f32 %v2689_v23, %v2690_v21  ;;  %v1684_v8 = vmul.f32 %v5441_v38, %v5346_v3  ;;  %v2248_v58 = vmax.f32 %v2246_v26, %v2247_v48 }
 0x201   :  { %v2696_v63 = vmax.f32 %v2694_v40, %v2695_v31  ;;  %v2253_v4 = vmax.f32 %v2251_v5, %v2252_v0  ;;  %v2701_v17 = vmax.f32 %v2699_v9, %v2700_v15  ;;  %v1755_v55 = vadd.f32 %v5456_v6, %v1620_v42  ;;  %v1562_v40 = vpop.f32.mrf.mxu1 }
 0x202   :  { %v4053_v52 = vpack.c.bf16 %v2243_v10, %v2243_v10  ;;  %v4117_v57 = vpack.c.bf16 %v2691_v34, %v2691_v34  ;;  %v1819_v62 = vadd.f32 %v5456_v6, %v1684_v8  ;;  %v2249_v39 = vrot.slane %v2248_v58, 1  ;;  %v5610_v34 = vpop.f32.mrf.mxu0 }
 0x203   :  { %v2697_v23 = vrot.slane %v2696_v63, 1  ;;  %v2254_v20 = vrot.slane %v2253_v4, 2  ;;  %v2702_v41 = vrot.slane %v2701_v17, 2  ;;  %v1883_v3 = vmax.f32 %v1755_v55, 0.0 }
 0x204   :  { %v3417_v37 = vunpack.c.l.b16 %v4053_v52  ;;  %v3481_v46 = vunpack.c.l.b16 %v4117_v57  ;;  %v1947_v26 = vmax.f32 %v1819_v62, 0.0  ;;  %v2250_v0 = vmax.f32 %v2248_v58, %v2249_v39 }
 0x205   :  { %v2698_v5 = vmax.f32 %v2696_v63, %v2697_v23  ;;  %v2255_v9 = vmax.f32 %v2253_v4, %v2254_v20  ;;  %v2703_v21 = vmax.f32 %v2701_v17, %v2702_v41  ;;  %v3546_v48 = vsel %vm3515_vm6, %v3416_v29, %v3545_v45  ;;  %v5620_v20 = vpop.f32.mrf.mxu1 }
 0x206   :  { %v3602_v31 = vsel %vm3515_vm6, %v3480_v16, %v3601_v24  ;;  %v2258_v15 = vsel %vm1970_vm1, %v1883_v3, -inf  ;;  %v2706_v10 = vsel %vm1970_vm1, %v1947_v26, -inf  ;;  %v3547_v42 = vsel %vm3517_vm7, %v3417_v37, %v3546_v48  ;;  %v1311_v24 = vpop.f32.mrf.mxu0 }
 0x207   :  { %v3603_v8 = vsel %vm3517_vm7, %v3481_v46, %v3602_v31  ;;  %v4054_v32 = vpack.c.bf16 %v2250_v0, %v2250_v0  ;;  %v4118_v52 = vpack.c.bf16 %v2698_v5, %v2698_v5  ;;  %v2259_v58 = vrot.slane %v2258_v15, 4  ;;  %v1567_v26 = vpop.f32.mrf.mxu1 }
 0x208   :  { %v2707_v63 = vrot.slane %v2706_v10, 4  ;;  %v1621_v4 = vmul.f32 %v5441_v38, %v5356_v13  ;;  %v1685_v45 = vmul.f32 %v5441_v38, %v5358_v33  ;;  %v2256_v17 = vrot.slane %v2255_v9, 1 }
 0x209   :  { %v3418_v29 = vunpack.c.l.b16 %v4054_v32  ;;  %v3482_v16 = vunpack.c.l.b16 %v4118_v52  ;;  %v2704_v57 = vrot.slane %v2703_v21, 1  ;;  %v2260_v55 = vmax.f32 %v2258_v15, %v2259_v58  ;;  %v5648_v58 = vpop.f32.mrf.mxu1 }
 0x20a   :  { %v2708_v62 = vmax.f32 %v2706_v10, %v2707_v63  ;;  %v1756_v39 = vadd.f32 %v5456_v6, %v1621_v4  ;;  %v1820_v23 = vadd.f32 %v5456_v6, %v1685_v45  ;;  %v5624_v40 = vmax.f32 %v2255_v9, %v2256_v17  ;;  %v5640_v10 = vpop.f32.mrf.mxu0 }
 0x20b   :  { %v3548_v41 = vsel %vm3519_vm8, %v3418_v29, %v3547_v42  ;;  %v3604_v13 = vsel %vm3519_vm8, %v3482_v16, %v3603_v8  ;;  %v2261_v33 = vrot.slane %v2260_v55, 2  ;;  %v5626_v0 = vmax.f32 %v2703_v21, %v2704_v57  ;;  %v1570_v57 = vpop.f32.mrf.mxu1 }
 0x20c   :  { %v3630_v37 = vpack.c.b16 %v3548_v41, %v3548_v41  ;;  %v3638_v46 = vpack.c.b16 %v3604_v13, %v3604_v13  ;;  %v2709_v3 = vrot.slane %v2708_v62, 2  ;;  %v1884_v5 = vmax.f32 %v1756_v39, 0.0  ;;  %v1314_v24 = vpop.f32.mrf.mxu0 }
 0x20d   :  { %v1948_v48 = vmax.f32 %v1820_v23, 0.0  ;;  %v2262_v31 = vmax.f32 %v2260_v55, %v2261_v33  ;;  %v1622_v9 = vmul.f32 %v5441_v38, %v5364_v25  ;;  %v1686_v21 = vmul.f32 %v5441_v38, %v5366_v22 }
 0x20e   :  { %3663 = vst.msk [vmem:[%s5912_s4 + $0x10] sm:$0xf] %vm3658_vm9, %v3630_v37  ;;  %3671 = vst.msk [vmem:[%s5912_s4 + $0x30] sm:$0xf] %vm3658_vm9, %v3638_v46  ;;  %v2710_v15 = vmax.f32 %v2708_v62, %v2709_v3  ;;  %v2265_v42 = vsel %vm1970_vm1, %v1884_v5, -inf  ;;  %v1623_v32 = vmul.f32 %v5441_v38, %v5386_v51  ;;  %v1687_v52 = vmul.f32 %v5441_v38, %v5388_v60 }
 0x20f   :  { %v2713_v8 = vsel %vm1970_vm1, %v1948_v48, -inf  ;;  %v2263_v63 = vrot.slane %v2262_v31, 1  ;;  %v2266_v25 = vrot.slane %v2265_v42, 4  ;;  %v1757_v22 = vadd.f32 %v5456_v6, %v1622_v9 }
 0x210   :  { %v2711_v4 = vrot.slane %v2710_v15, 1  ;;  %v2714_v45 = vrot.slane %v2713_v8, 4  ;;  %v1821_v29 = vadd.f32 %v5456_v6, %v1686_v21  ;;  %v1758_v16 = vadd.f32 %v5456_v6, %v1623_v32 }
 0x211   :  { %v1822_v17 = vadd.f32 %v5456_v6, %v1687_v52  ;;  %v2264_v51 = vmax.f32 %v2262_v31, %v2263_v63  ;;  %v2267_v62 = vmax.f32 %v2265_v42, %v2266_v25  ;;  %v1885_v39 = vmax.f32 %v1757_v22, 0.0 }
 0x212   :  { %v2712_v55 = vmax.f32 %v2710_v15, %v2711_v4  ;;  %v2715_v60 = vmax.f32 %v2713_v8, %v2714_v45  ;;  %v1949_v23 = vmax.f32 %v1821_v29, 0.0  ;;  %v1886_v41 = vmax.f32 %v1758_v16, 0.0 }
 0x213   :  { %v1950_v13 = vmax.f32 %v1822_v17, 0.0  ;;  %v4056_v37 = vpack.c.bf16 %v2264_v51, %v2264_v51  ;;  %v2268_v33 = vrot.slane %v2267_v62, 2  ;;  %v2272_v26 = vsel %vm1970_vm1, %v1885_v39, -inf }
 0x214   :  { %v4120_v46 = vpack.c.bf16 %v2712_v55, %v2712_v55  ;;  %v2716_v3 = vrot.slane %v2715_v60, 2  ;;  %v2720_v5 = vsel %vm1970_vm1, %v1949_v23, -inf  ;;  %v2279_v48 = vsel %vm1970_vm1, %v1886_v41, -inf }
 0x215   :  { %v2727_v9 = vsel %vm1970_vm1, %v1950_v13, -inf  ;;  %v4055_v31 = vpack.c.bf16 %v5624_v40, %v5624_v40  ;;  %v4119_v15 = vpack.c.bf16 %v5626_v0, %v5626_v0  ;;  %v2269_v21 = vmax.f32 %v2267_v62, %v2268_v33  ;;  %v5924_v0 = vld [vmem:[#allocation2_spill] sm:$0xff] }
 0x216   :  { %v2717_v42 = vmax.f32 %v2715_v60, %v2716_v3  ;;  %v2273_v8 = vrot.slane %v2272_v26, 4  ;;  %v2721_v32 = vrot.slane %v2720_v5, 4  ;;  %v2280_v52 = vrot.slane %v2279_v48, 4 }
 0x217   :  { %v2728_v63 = vrot.slane %v2727_v9, 4  ;;  %v3420_v4 = vunpack.c.l.b16 %v4056_v37  ;;  %v3484_v25 = vunpack.c.l.b16 %v4120_v46  ;;  %v2270_v45 = vrot.slane %v2269_v21, 1 }
 0x218   :  { %v2718_v24 = vrot.slane %v2717_v42, 1  ;;  %v2274_v22 = vmax.f32 %v2272_v26, %v2273_v8  ;;  %v2722_v29 = vmax.f32 %v2720_v5, %v2721_v32  ;;  %v2281_v16 = vmax.f32 %v2279_v48, %v2280_v52 }
 0x219   :  { %v2729_v17 = vmax.f32 %v2727_v9, %v2728_v63  ;;  %v2271_v57 = vmax.f32 %v2269_v21, %v2270_v45  ;;  %v1624_v40 = vmul.f32 %v5441_v38, %v5394_v18  ;;  %v1688_v55 = vmul.f32 %v5441_v38, %v5924_v0  ;;  %v5926_v0 = vld [vmem:[#allocation4_spill] sm:$0xff] }
 0x21a   :  { %v2719_v51 = vmax.f32 %v2717_v42, %v2718_v24  ;;  %v2275_v62 = vrot.slane %v2274_v22, 2  ;;  %v2723_v60 = vrot.slane %v2722_v29, 2  ;;  %v2282_v39 = vrot.slane %v2281_v16, 2 }
 0x21b   :  { %v2730_v23 = vrot.slane %v2729_v17, 2  ;;  %v4057_v41 = vpack.c.bf16 %v2271_v57, %v2271_v57  ;;  %v1759_v37 = vadd.f32 %v5456_v6, %v1624_v40  ;;  %v1823_v46 = vadd.f32 %v5456_v6, %v1688_v55 }
 0x21c   :  { %v4121_v13 = vpack.c.bf16 %v2719_v51, %v2719_v51  ;;  %v2276_v33 = vmax.f32 %v2274_v22, %v2275_v62  ;;  %v2724_v3 = vmax.f32 %v2722_v29, %v2723_v60  ;;  %v2283_v26 = vmax.f32 %v2281_v16, %v2282_v39  ;;  %v5925_v51 = vld [vmem:[#allocation3_spill] sm:$0xff] }
 0x21d   :  { %v2731_v5 = vmax.f32 %v2729_v17, %v2730_v23  ;;  %v3419_v48 = vunpack.c.l.b16 %v4055_v31  ;;  %v3483_v9 = vunpack.c.l.b16 %v4119_v15  ;;  %v1887_v18 = vmax.f32 %v1759_v37, 0.0 }
 0x21e   :  { %v1951_v21 = vmax.f32 %v1823_v46, 0.0  ;;  %v2277_v42 = vrot.slane %v2276_v33, 1  ;;  %v2725_v8 = vrot.slane %v2724_v3, 1  ;;  %v2284_v32 = vrot.slane %v2283_v26, 1 }
 0x21f   :  { %v2732_v52 = vrot.slane %v2731_v5, 1  ;;  %v3549_v63 = vsel %vm3507_vm2, %v3420_v4, %v3419_v48  ;;  %v3605_v45 = vsel %vm3507_vm2, %v3484_v25, %v3483_v9  ;;  %v2286_v24 = vsel %vm1970_vm1, %v1887_v18, -inf }
 0x220   :  { %v2734_v57 = vsel %vm1970_vm1, %v1951_v21, -inf  ;;  %v3421_v22 = vunpack.c.l.b16 %v4057_v41  ;;  %v3485_v29 = vunpack.c.l.b16 %v4121_v13  ;;  %v2278_v16 = vmax.f32 %v2276_v33, %v2277_v42 }
 0x221   :  { %v2726_v17 = vmax.f32 %v2724_v3, %v2725_v8  ;;  %v2287_v31 = vrot.slane %v2286_v24, 4  ;;  %v2735_v15 = vrot.slane %v2734_v57, 4  ;;  %v1625_v40 = vmul.f32 %v5441_v38, %v5925_v51 }
 0x222   :  { %v1689_v55 = vmul.f32 %v5441_v38, %v5926_v0  ;;  %v4058_v62 = vpack.c.bf16 %v2278_v16, %v2278_v16  ;;  %v2285_v60 = vmax.f32 %v2283_v26, %v2284_v32  ;;  %v2733_v25 = vmax.f32 %v2731_v5, %v2732_v52  ;;  %v5927_v5 = vld [vmem:[#allocation5_spill] sm:$0xff] }
 0x223   :  { %v4122_v4 = vpack.c.bf16 %v2726_v17, %v2726_v17  ;;  %v2288_v39 = vmax.f32 %v2286_v24, %v2287_v31  ;;  %v2736_v23 = vmax.f32 %v2734_v57, %v2735_v15  ;;  %v1760_v37 = vadd.f32 %v5456_v6, %v1625_v40  ;;  %v5928_v40 = vld [vmem:[#allocation6_spill] sm:$0xff] }
 0x224   :  { %v1824_v41 = vadd.f32 %v5456_v6, %v1689_v55  ;;  %v3550_v13 = vsel %vm3509_vm3, %v3421_v22, %v3549_v63  ;;  %v3606_v46 = vsel %vm3509_vm3, %v3485_v29, %v3605_v45  ;;  %v4059_v18 = vpack.c.bf16 %v2285_v60, %v2285_v60 }
 0x225   :  { %v2289_v33 = vrot.slane %v2288_v39, 2  ;;  %v2737_v3 = vrot.slane %v2736_v23, 2  ;;  %v1888_v48 = vmax.f32 %v1760_v37, 0.0  ;;  %v4123_v21 = vpack.c.bf16 %v2733_v25, %v2733_v25 }
 0x226   :  { %v1952_v9 = vmax.f32 %v1824_v41, 0.0  ;;  %v1626_v26 = vmul.f32 %v5441_v38, %v5412_v44  ;;  %v1690_v42 = vmul.f32 %v5441_v38, %v5927_v5  ;;  %v3422_v8 = vunpack.c.l.b16 %v4058_v62 }
 0x227   :  { %v3486_v32 = vunpack.c.l.b16 %v4122_v4  ;;  %v2290_v52 = vmax.f32 %v2288_v39, %v2289_v33  ;;  %v2738_v24 = vmax.f32 %v2736_v23, %v2737_v3  ;;  %v2293_v63 = vsel %vm1970_vm1, %v1888_v48, -inf }
 0x228   :  { %v2741_v45 = vsel %vm1970_vm1, %v1952_v9, -inf  ;;  %v1761_v57 = vadd.f32 %v5456_v6, %v1626_v26  ;;  %v1825_v22 = vadd.f32 %v5456_v6, %v1690_v42  ;;  %v2294_v17 = vrot.slane %v2293_v63, 4 }
 0x229   :  { %v2291_v29 = vrot.slane %v2290_v52, 1  ;;  %v2739_v16 = vrot.slane %v2738_v24, 1  ;;  %v2742_v31 = vrot.slane %v2741_v45, 4  ;;  %v1627_v51 = vmul.f32 %v5441_v38, %v5420_v50 }
 0x22a   :  { %v1889_v44 = vmax.f32 %v1761_v57, 0.0  ;;  %v1953_v15 = vmax.f32 %v1825_v22, 0.0  ;;  %v1691_v0 = vmul.f32 %v5441_v38, %v5928_v40  ;;  %v2295_v4 = vmax.f32 %v2293_v63, %v2294_v17  ;;  %v5703_v40 = vld [vmem:[%s5910_s2] ss:$0 sm:$0xff] }
 0x22b   :  { %v2292_v55 = vmax.f32 %v2290_v52, %v2291_v29  ;;  %v2740_v62 = vmax.f32 %v2738_v24, %v2739_v16  ;;  %v2743_v60 = vmax.f32 %v2741_v45, %v2742_v31  ;;  %v1762_v23 = vadd.f32 %v5456_v6, %v1627_v51 }
 0x22c   :  { %v2300_v25 = vsel %vm1970_vm1, %v1889_v44, -inf  ;;  %v2748_v39 = vsel %vm1970_vm1, %v1953_v15, -inf  ;;  %v1826_v37 = vadd.f32 %v5456_v6, %v1691_v0  ;;  %v3423_v41 = vunpack.c.l.b16 %v4059_v18 }
 0x22d   :  { %v3487_v33 = vunpack.c.l.b16 %v4123_v21  ;;  %v2296_v3 = vrot.slane %v2295_v4, 2  ;;  %v2744_v48 = vrot.slane %v2743_v60, 2  ;;  %v2301_v50 = vrot.slane %v2300_v25, 4 }
 0x22e   :  { %v2749_v9 = vrot.slane %v2748_v39, 4  ;;  %v1890_v26 = vmax.f32 %v1762_v23, 0.0  ;;  %v1954_v38 = vmax.f32 %v1826_v37, 0.0  ;;  %v4060_v5 = vpack.c.bf16 %v2292_v55, %v2292_v55 }
 0x22f   :  { %v4124_v42 = vpack.c.bf16 %v2740_v62, %v2740_v62  ;;  %v2297_v52 = vmax.f32 %v2295_v4, %v2296_v3  ;;  %v2745_v24 = vmax.f32 %v2743_v60, %v2744_v48  ;;  %v2302_v63 = vmax.f32 %v2300_v25, %v2301_v50  ;;  %v5712_v60 = vld [vmem:[%s5911_s3] ss:$0 sm:$0xff] }
 0x230   :  { %v2750_v45 = vmax.f32 %v2748_v39, %v2749_v9  ;;  %v2307_v57 = vsel %vm1970_vm1, %v1890_v26, -inf  ;;  %v2755_v22 = vsel %vm1970_vm1, %v1954_v38, -inf  ;;  %v3551_v6 = vsel %vm3511_vm4, %v3422_v8, %v3550_v13 }
 0x231   :  { %v3607_v18 = vsel %vm3511_vm4, %v3486_v32, %v3606_v46  ;;  %v2298_v21 = vrot.slane %v2297_v52, 1  ;;  %v2746_v29 = vrot.slane %v2745_v24, 1  ;;  %v2303_v16 = vrot.slane %v2302_v63, 2 }
 0x232   :  { %v2751_v17 = vrot.slane %v2750_v45, 2  ;;  %v2308_v31 = vrot.slane %v2307_v57, 4  ;;  %v2756_v44 = vrot.slane %v2755_v22, 4  ;;  %v1628_v0 = vmul.f32 %v5703_v40, %v5430_v19 }
 0x233   :  { %v2299_v15 = vmax.f32 %v2297_v52, %v2298_v21  ;;  %v2747_v51 = vmax.f32 %v2745_v24, %v2746_v29  ;;  %v1692_v13 = vmul.f32 %v5703_v40, %v5432_v53  ;;  %v3424_v46 = vunpack.c.l.b16 %v4060_v5 }
 0x234   :  { %v3488_v8 = vunpack.c.l.b16 %v4124_v42  ;;  %v2304_v32 = vmax.f32 %v2302_v63, %v2303_v16  ;;  %v2752_v55 = vmax.f32 %v2750_v45, %v2751_v17  ;;  %v1763_v25 = vadd.f32 %v5712_v60, %v1628_v0 }
 0x235   :  { %v4061_v62 = vpack.c.bf16 %v2299_v15, %v2299_v15  ;;  %v4125_v4 = vpack.c.bf16 %v2747_v51, %v2747_v51  ;;  %v1827_v39 = vadd.f32 %v5712_v60, %v1692_v13  ;;  %v2309_v37 = vmax.f32 %v2307_v57, %v2308_v31 }
 0x236   :  { %v2305_v23 = vrot.slane %v2304_v32, 1  ;;  %v2753_v19 = vrot.slane %v2752_v55, 1  ;;  %v2757_v3 = vmax.f32 %v2755_v22, %v2756_v44  ;;  %v3552_v53 = vsel %vm3513_vm5, %v3423_v41, %v3551_v6 }
 0x237   :  { %v3608_v48 = vsel %vm3513_vm5, %v3487_v33, %v3607_v18  ;;  %v1891_v50 = vmax.f32 %v1763_v25, 0.0  ;;  %v1955_v9 = vmax.f32 %v1827_v39, 0.0  ;;  %v3425_v26 = vunpack.c.l.b16 %v4061_v62 }
 0x238   :  { %v3489_v38 = vunpack.c.l.b16 %v4125_v4  ;;  %v2306_v5 = vmax.f32 %v2304_v32, %v2305_v23  ;;  %v2754_v42 = vmax.f32 %v2752_v55, %v2753_v19  ;;  %v3553_v52 = vsel %vm3515_vm6, %v3424_v46, %v3552_v53 }
 0x239   :  { %v3609_v24 = vsel %vm3515_vm6, %v3488_v8, %v3608_v48  ;;  %v2314_v63 = vsel %vm1970_vm1, %v1891_v50, -inf  ;;  %v2762_v45 = vsel %vm1970_vm1, %v1955_v9, -inf  ;;  %v2310_v21 = vrot.slane %v2309_v37, 2  ;;  %v5929_v9 = vld [vmem:[#allocation7_spill] sm:$0xff] }
 0x23a   :  { %v4062_v57 = vpack.c.bf16 %v2306_v5, %v2306_v5  ;;  %v4126_v22 = vpack.c.bf16 %v2754_v42, %v2754_v42  ;;  %v2758_v41 = vrot.slane %v2757_v3, 2  ;;  %v2315_v6 = vrot.slane %v2314_v63, 4 }
 0x23b   :  { %v2763_v33 = vrot.slane %v2762_v45, 4  ;;  %v1629_v18 = vmul.f32 %v5703_v40, %v5449_v49  ;;  %v1693_v29 = vmul.f32 %v5703_v40, %v5451_v47  ;;  %v3554_v16 = vsel %vm3517_vm7, %v3425_v26, %v3553_v52 }
 0x23c   :  { %v3610_v17 = vsel %vm3517_vm7, %v3489_v38, %v3609_v24  ;;  %v3426_v31 = vunpack.c.l.b16 %v4062_v57  ;;  %v3490_v44 = vunpack.c.l.b16 %v4126_v22  ;;  %v2316_v15 = vmax.f32 %v2314_v63, %v2315_v6 }
 0x23d   :  { %v2764_v51 = vmax.f32 %v2762_v45, %v2763_v33  ;;  %v1764_v0 = vadd.f32 %v5712_v60, %v1629_v18  ;;  %v1828_v13 = vadd.f32 %v5712_v60, %v1693_v29  ;;  %v2311_v25 = vmax.f32 %v2309_v37, %v2310_v21 }
 0x23e   :  { %v3555_v46 = vsel %vm3519_vm8, %v3426_v31, %v3554_v16  ;;  %v3611_v8 = vsel %vm3519_vm8, %v3490_v44, %v3610_v17  ;;  %v2317_v55 = vrot.slane %v2316_v15, 2  ;;  %v2759_v39 = vmax.f32 %v2757_v3, %v2758_v41 }
 0x23f   :  { %v3631_v49 = vpack.c.b16 %v3555_v46, %v3555_v46  ;;  %v3639_v32 = vpack.c.b16 %v3611_v8, %v3611_v8  ;;  %v2765_v47 = vrot.slane %v2764_v51, 2  ;;  %v1892_v62 = vmax.f32 %v1764_v0, 0.0 }
 0x240   :  { %v1956_v4 = vmax.f32 %v1828_v13, 0.0  ;;  %v1630_v23 = vmul.f32 %v5703_v40, %v5466_v7  ;;  %v1694_v19 = vmul.f32 %v5703_v40, %v5468_v61  ;;  %v1631_v50 = vmul.f32 %v5703_v40, %v5474_v35 }
 0x241   :  { %3664 = vst.msk [vmem:[%s5912_s4 + $0x14] sm:$0xf] %vm3658_vm9, %v3631_v49  ;;  %3672 = vst.msk [vmem:[%s5912_s4 + $0x34] sm:$0xf] %vm3658_vm9, %v3639_v32  ;;  %v2321_v53 = vsel %vm1970_vm1, %v1892_v62, -inf  ;;  %v1695_v26 = vmul.f32 %v5703_v40, %v5929_v9  ;;  %v2318_v38 = vmax.f32 %v2316_v15, %v2317_v55  ;;  %v2766_v5 = vmax.f32 %v2764_v51, %v2765_v47 }
 0x242   :  { %v2769_v48 = vsel %vm1970_vm1, %v1956_v4, -inf  ;;  %v2322_v37 = vrot.slane %v2321_v53, 4  ;;  %v1765_v42 = vadd.f32 %v5712_v60, %v1630_v23  ;;  %v1829_v7 = vadd.f32 %v5712_v60, %v1694_v19 }
 0x243   :  { %v2770_v3 = vrot.slane %v2769_v48, 4  ;;  %v1766_v61 = vadd.f32 %v5712_v60, %v1631_v50  ;;  %v1830_v52 = vadd.f32 %v5712_v60, %v1695_v26  ;;  %v2312_v24 = vrot.slane %v2311_v25, 1 }
 0x244   :  { %v2760_v63 = vrot.slane %v2759_v39, 1  ;;  %v2323_v45 = vmax.f32 %v2321_v53, %v2322_v37  ;;  %v1893_v35 = vmax.f32 %v1765_v42, 0.0  ;;  %v1957_v22 = vmax.f32 %v1829_v7, 0.0 }
 0x245   :  { %v2771_v57 = vmax.f32 %v2769_v48, %v2770_v3  ;;  %v1894_v21 = vmax.f32 %v1766_v61, 0.0  ;;  %v1958_v41 = vmax.f32 %v1830_v52, 0.0  ;;  %v2319_v6 = vrot.slane %v2318_v38, 1 }
 0x246   :  { %v2767_v33 = vrot.slane %v2766_v5, 1  ;;  %v2324_v18 = vrot.slane %v2323_v45, 2  ;;  %v2328_v16 = vsel %vm1970_vm1, %v1893_v35, -inf  ;;  %v2776_v17 = vsel %vm1970_vm1, %v1957_v22, -inf }
 0x247   :  { %v2772_v29 = vrot.slane %v2771_v57, 2  ;;  %v2335_v31 = vsel %vm1970_vm1, %v1894_v21, -inf  ;;  %v2783_v44 = vsel %vm1970_vm1, %v1958_v41, -inf  ;;  %v2313_v15 = vmax.f32 %v2311_v25, %v2312_v24 }
 0x248   :  { %v2761_v51 = vmax.f32 %v2759_v39, %v2760_v63  ;;  %v2325_v0 = vmax.f32 %v2323_v45, %v2324_v18  ;;  %v2329_v46 = vrot.slane %v2328_v16, 4  ;;  %v2777_v8 = vrot.slane %v2776_v17, 4  ;;  %v5930_v39 = vld [vmem:[#allocation8_spill] sm:$0xff] }
 0x249   :  { %v2773_v13 = vmax.f32 %v2771_v57, %v2772_v29  ;;  %v2336_v49 = vrot.slane %v2335_v31, 4  ;;  %v2784_v32 = vrot.slane %v2783_v44, 4  ;;  %v2320_v55 = vmax.f32 %v2318_v38, %v2319_v6 }
 0x24a   :  { %v2768_v47 = vmax.f32 %v2766_v5, %v2767_v33  ;;  %v2326_v62 = vrot.slane %v2325_v0, 1  ;;  %v2330_v23 = vmax.f32 %v2328_v16, %v2329_v46  ;;  %v2778_v19 = vmax.f32 %v2776_v17, %v2777_v8 }
 0x24b   :  { %v2774_v4 = vrot.slane %v2773_v13, 1  ;;  %v2337_v53 = vmax.f32 %v2335_v31, %v2336_v49  ;;  %v2785_v48 = vmax.f32 %v2783_v44, %v2784_v32  ;;  %v1632_v25 = vmul.f32 %v5703_v40, %v5484_v36 }
 0x24c   :  { %v2327_v50 = vmax.f32 %v2325_v0, %v2326_v62  ;;  %v1696_v26 = vmul.f32 %v5703_v40, %v5930_v39  ;;  %v2331_v37 = vrot.slane %v2330_v23, 2  ;;  %v2779_v3 = vrot.slane %v2778_v19, 2 }
 0x24d   :  { %v2775_v9 = vmax.f32 %v2773_v13, %v2774_v4  ;;  %v2338_v42 = vrot.slane %v2337_v53, 2  ;;  %v2786_v7 = vrot.slane %v2785_v48, 2  ;;  %v4063_v38 = vpack.c.bf16 %v2313_v15, %v2313_v15 }
 0x24e   :  { %v4127_v5 = vpack.c.bf16 %v2761_v51, %v2761_v51  ;;  %v1767_v61 = vadd.f32 %v5712_v60, %v1632_v25  ;;  %v1831_v52 = vadd.f32 %v5712_v60, %v1696_v26  ;;  %v4064_v24 = vpack.c.bf16 %v2320_v55, %v2320_v55 }
 0x24f   :  { %v4128_v63 = vpack.c.bf16 %v2768_v47, %v2768_v47  ;;  %v2332_v45 = vmax.f32 %v2330_v23, %v2331_v37  ;;  %v2780_v57 = vmax.f32 %v2778_v19, %v2779_v3  ;;  %v4065_v36 = vpack.c.bf16 %v2327_v50, %v2327_v50 }
 0x250   :  { %v1895_v35 = vmax.f32 %v1767_v61, 0.0  ;;  %v1959_v22 = vmax.f32 %v1831_v52, 0.0  ;;  %v4129_v21 = vpack.c.bf16 %v2775_v9, %v2775_v9  ;;  %v2339_v41 = vmax.f32 %v2337_v53, %v2338_v42 }
 0x251   :  { %v2787_v6 = vmax.f32 %v2785_v48, %v2786_v7  ;;  %v3427_v33 = vunpack.c.l.b16 %v4063_v38  ;;  %v3491_v18 = vunpack.c.l.b16 %v4127_v5  ;;  %v3428_v17 = vunpack.c.l.b16 %v4064_v24 }
 0x252   :  { %v2342_v29 = vsel %vm1970_vm1, %v1895_v35, -inf  ;;  %v2790_v16 = vsel %vm1970_vm1, %v1959_v22, -inf  ;;  %v3492_v31 = vunpack.c.l.b16 %v4128_v63  ;;  %v2333_v44 = vrot.slane %v2332_v45, 1 }
 0x253   :  { %v2781_v15 = vrot.slane %v2780_v57, 1  ;;  %v2343_v51 = vrot.slane %v2342_v29, 4  ;;  %v2791_v0 = vrot.slane %v2790_v16, 4  ;;  %v1633_v13 = vmul.f32 %v5703_v40, %v5494_v54 }
 0x254   :  { %v1697_v46 = vmul.f32 %v5703_v40, %v5502_v59  ;;  %v3429_v8 = vunpack.c.l.b16 %v4065_v36  ;;  %v3493_v49 = vunpack.c.l.b16 %v4129_v21  ;;  %v2340_v32 = vrot.slane %v2339_v41, 1  ;;  %v5931_v21 = vld [vmem:[#allocation9_spill] sm:$0xff] }
 0x255   :  { %v2788_v55 = vrot.slane %v2787_v6, 1  ;;  %v2344_v47 = vmax.f32 %v2342_v29, %v2343_v51  ;;  %v2792_v62 = vmax.f32 %v2790_v16, %v2791_v0  ;;  %v1768_v4 = vadd.f32 %v5712_v60, %v1633_v13 }
 0x256   :  { %v1832_v23 = vadd.f32 %v5712_v60, %v1697_v46  ;;  %v3556_v19 = vsel %vm3507_vm2, %v3428_v17, %v3427_v33  ;;  %v3612_v53 = vsel %vm3507_vm2, %v3492_v31, %v3491_v18  ;;  %v2334_v48 = vmax.f32 %v2332_v45, %v2333_v44 }
 0x257   :  { %v2782_v50 = vmax.f32 %v2780_v57, %v2781_v15  ;;  %v2345_v54 = vrot.slane %v2344_v47, 2  ;;  %v2793_v9 = vrot.slane %v2792_v62, 2  ;;  %v1896_v25 = vmax.f32 %v1768_v4, 0.0 }
 0x258   :  { %v1960_v59 = vmax.f32 %v1832_v23, 0.0  ;;  %v5775_v39 = vsel %vm3509_vm3, %v3429_v8, %v3556_v19  ;;  %v5778_v26 = vsel %vm3509_vm3, %v3493_v49, %v3612_v53  ;;  %v1634_v37 = vmul.f32 %v5703_v40, %v5518_v12 }
 0x259   :  { %v1698_v3 = vmul.f32 %v5703_v40, %v5526_v27  ;;  %v2341_v42 = vmax.f32 %v2339_v41, %v2340_v32  ;;  %v2789_v7 = vmax.f32 %v2787_v6, %v2788_v55  ;;  %v2346_v38 = vmax.f32 %v2344_v47, %v2345_v54  ;;  %v5932_v41 = vld [vmem:[#allocation10_spill] sm:$0xff] }
 0x25a   :  { %v2794_v5 = vmax.f32 %v2792_v62, %v2793_v9  ;;  %v2349_v61 = vsel %vm1970_vm1, %v1896_v25, -inf  ;;  %v2797_v52 = vsel %vm1970_vm1, %v1960_v59, -inf  ;;  %v1769_v24 = vadd.f32 %v5712_v60, %v1634_v37 }
 0x25b   :  { %v1833_v63 = vadd.f32 %v5712_v60, %v1698_v3  ;;  %v4066_v45 = vpack.c.bf16 %v2334_v48, %v2334_v48  ;;  %v4130_v57 = vpack.c.bf16 %v2782_v50, %v2782_v50  ;;  %v2350_v35 = vrot.slane %v2349_v61, 4 }
 0x25c   :  { %v2798_v22 = vrot.slane %v2797_v52, 4  ;;  %v1897_v12 = vmax.f32 %v1769_v24, 0.0  ;;  %v1635_v27 = vmul.f32 %v5703_v40, %v5931_v21  ;;  %v1699_v6 = vmul.f32 %v5703_v40, %v5932_v41  ;;  %v5933_v24 = vld [vmem:[#allocation11_spill] sm:$0xff] }
 0x25d   :  { %v1961_v36 = vmax.f32 %v1833_v63, 0.0  ;;  %v2347_v33 = vrot.slane %v2346_v38, 1  ;;  %v2795_v18 = vrot.slane %v2794_v5, 1  ;;  %v2351_v29 = vmax.f32 %v2349_v61, %v2350_v35 }
 0x25e   :  { %v2799_v16 = vmax.f32 %v2797_v52, %v2798_v22  ;;  %v2356_v17 = vsel %vm1970_vm1, %v1897_v12, -inf  ;;  %v1770_v44 = vadd.f32 %v5712_v60, %v1635_v27  ;;  %v1834_v15 = vadd.f32 %v5712_v60, %v1699_v6 }
 0x25f   :  { %v2804_v31 = vsel %vm1970_vm1, %v1961_v36, -inf  ;;  %v4067_v51 = vpack.c.bf16 %v2341_v42, %v2341_v42  ;;  %v4131_v0 = vpack.c.bf16 %v2789_v7, %v2789_v7  ;;  %v2352_v13 = vrot.slane %v2351_v29, 2 }
 0x260   :  { %v2800_v46 = vrot.slane %v2799_v16, 2  ;;  %v2357_v8 = vrot.slane %v2356_v17, 4  ;;  %v2805_v49 = vrot.slane %v2804_v31, 4  ;;  %v1898_v32 = vmax.f32 %v1770_v44, 0.0 }
 0x261   :  { %v1962_v55 = vmax.f32 %v1834_v15, 0.0  ;;  %v3430_v47 = vunpack.c.l.b16 %v4066_v45  ;;  %v3494_v62 = vunpack.c.l.b16 %v4130_v57  ;;  %v2353_v4 = vmax.f32 %v2351_v29, %v2352_v13 }
 0x262   :  { %v2801_v23 = vmax.f32 %v2799_v16, %v2800_v46  ;;  %v2348_v19 = vmax.f32 %v2346_v38, %v2347_v33  ;;  %v2796_v53 = vmax.f32 %v2794_v5, %v2795_v18  ;;  %v2358_v48 = vmax.f32 %v2356_v17, %v2357_v8 }
 0x263   :  { %v2806_v50 = vmax.f32 %v2804_v31, %v2805_v49  ;;  %v3431_v54 = vunpack.c.l.b16 %v4067_v51  ;;  %v3495_v9 = vunpack.c.l.b16 %v4131_v0  ;;  %v2354_v25 = vrot.slane %v2353_v4, 1 }
 0x264   :  { %v2802_v59 = vrot.slane %v2801_v23, 1  ;;  %v2359_v37 = vrot.slane %v2358_v48, 2  ;;  %v2363_v42 = vsel %vm1970_vm1, %v1898_v32, -inf  ;;  %v2811_v7 = vsel %vm1970_vm1, %v1962_v55, -inf }
 0x265   :  { %v2807_v3 = vrot.slane %v2806_v50, 2  ;;  %v2355_v61 = vmax.f32 %v2353_v4, %v2354_v25  ;;  %v1636_v63 = vmul.f32 %v5703_v40, %v5933_v24  ;;  %v1700_v38 = vmul.f32 %v5703_v40, %v5548_v1 }
 0x266   :  { %v2803_v52 = vmax.f32 %v2801_v23, %v2802_v59  ;;  %v4068_v5 = vpack.c.bf16 %v2348_v19, %v2348_v19  ;;  %v4132_v45 = vpack.c.bf16 %v2796_v53, %v2796_v53  ;;  %v2360_v57 = vmax.f32 %v2358_v48, %v2359_v37 }
 0x267   :  { %v2808_v35 = vmax.f32 %v2806_v50, %v2807_v3  ;;  %v4069_v22 = vpack.c.bf16 %v2355_v61, %v2355_v61  ;;  %v1771_v36 = vadd.f32 %v5712_v60, %v1636_v63  ;;  %v1835_v21 = vadd.f32 %v5712_v60, %v1700_v38 }
 0x268   :  { %v4133_v12 = vpack.c.bf16 %v2803_v52, %v2803_v52  ;;  %v2361_v27 = vrot.slane %v2360_v57, 1  ;;  %v2364_v6 = vrot.slane %v2363_v42, 4  ;;  %v2812_v33 = vrot.slane %v2811_v7, 4 }
 0x269   :  { %v2809_v41 = vrot.slane %v2808_v35, 1  ;;  %v3558_v18 = vsel %vm3511_vm4, %v3430_v47, %v5775_v39  ;;  %v3614_v1 = vsel %vm3511_vm4, %v3494_v62, %v5778_v26  ;;  %v1899_v29 = vmax.f32 %v1771_v36, 0.0 }
 0x26a   :  { %v1963_v16 = vmax.f32 %v1835_v21, 0.0  ;;  %v3432_v17 = vunpack.c.l.b16 %v4068_v5  ;;  %v3496_v31 = vunpack.c.l.b16 %v4132_v45  ;;  %v2362_v44 = vmax.f32 %v2360_v57, %v2361_v27  ;;  %v5934_v57 = vld [vmem:[#allocation12_spill] sm:$0xff] }
 0x26b   :  { %v2810_v15 = vmax.f32 %v2808_v35, %v2809_v41  ;;  %v3433_v51 = vunpack.c.l.b16 %v4069_v22  ;;  %v3497_v0 = vunpack.c.l.b16 %v4133_v12  ;;  %v2370_v13 = vsel %vm1970_vm1, %v1899_v29, -inf }
 0x26c   :  { %v2818_v46 = vsel %vm1970_vm1, %v1963_v16, -inf  ;;  %v4070_v8 = vpack.c.bf16 %v2362_v44, %v2362_v44  ;;  %v2365_v32 = vmax.f32 %v2363_v42, %v2364_v6  ;;  %v2813_v55 = vmax.f32 %v2811_v7, %v2812_v33 }
 0x26d   :  { %v4134_v49 = vpack.c.bf16 %v2810_v15, %v2810_v15  ;;  %v3559_v39 = vsel %vm3513_vm5, %v3431_v54, %v3558_v18  ;;  %v3615_v26 = vsel %vm3513_vm5, %v3495_v9, %v3614_v1  ;;  %v2371_v47 = vrot.slane %v2370_v13, 4 }
 0x26e   :  { %v2819_v62 = vrot.slane %v2818_v46, 4  ;;  %v3560_v4 = vsel %vm3515_vm6, %v3432_v17, %v3559_v39  ;;  %v3616_v23 = vsel %vm3515_vm6, %v3496_v31, %v3615_v26  ;;  %v3434_v19 = vunpack.c.l.b16 %v4070_v8 }
 0x26f   :  { %v3498_v53 = vunpack.c.l.b16 %v4134_v49  ;;  %v3561_v48 = vsel %vm3517_vm7, %v3433_v51, %v3560_v4  ;;  %v3617_v50 = vsel %vm3517_vm7, %v3497_v0, %v3616_v23  ;;  %v1637_v25 = vmul.f32 %v5703_v40, %v5554_v11 }
 0x270   :  { %v1701_v54 = vmul.f32 %v5703_v40, %v5562_v2  ;;  %v3562_v9 = vsel %vm3519_vm8, %v3434_v19, %v3561_v48  ;;  %v2366_v37 = vrot.slane %v2365_v32, 2  ;;  %v2814_v3 = vrot.slane %v2813_v55, 2 }
 0x271   :  { %v3618_v59 = vsel %vm3519_vm8, %v3498_v53, %v3617_v50  ;;  %v3632_v42 = vpack.c.b16 %v3562_v9, %v3562_v9  ;;  %v2372_v61 = vmax.f32 %v2370_v13, %v2371_v47  ;;  %v2820_v52 = vmax.f32 %v2818_v46, %v2819_v62 }
 0x272   :  { %v3640_v7 = vpack.c.b16 %v3618_v59, %v3618_v59  ;;  %v1772_v11 = vadd.f32 %v5712_v60, %v1637_v25  ;;  %v1836_v2 = vadd.f32 %v5712_v60, %v1701_v54  ;;  %v1638_v24 = vmul.f32 %v5703_v40, %v5572_v56 }
 0x273   :  { %3665 = vst.msk [vmem:[%s5912_s4 + $0x18] sm:$0xf] %vm3658_vm9, %v3632_v42  ;;  %v1702_v63 = vmul.f32 %v5703_v40, %v5582_v30  ;;  %v2367_v38 = vmax.f32 %v2365_v32, %v2366_v37  ;;  %v2815_v5 = vmax.f32 %v2813_v55, %v2814_v3  ;;  %v1639_v45 = vmul.f32 %v5703_v40, %v5588_v43 }
 0x274   :  { %3673 = vst.msk [vmem:[%s5912_s4 + $0x38] sm:$0xf] %vm3658_vm9, %v3640_v7  ;;  %v1703_v35 = vmul.f32 %v5703_v40, %v5934_v57  ;;  %v2373_v22 = vrot.slane %v2372_v61, 2  ;;  %v2821_v12 = vrot.slane %v2820_v52, 2  ;;  %v1773_v36 = vadd.f32 %v5712_v60, %v1638_v24 }
 0x275   :  { %v1837_v21 = vadd.f32 %v5712_v60, %v1702_v63  ;;  %v1774_v27 = vadd.f32 %v5712_v60, %v1639_v45  ;;  %v1900_v41 = vmax.f32 %v1772_v11, 0.0  ;;  %v1964_v30 = vmax.f32 %v1836_v2, 0.0 }
 0x276   :  { %v1838_v56 = vadd.f32 %v5712_v60, %v1703_v35  ;;  %v2368_v6 = vrot.slane %v2367_v38, 1  ;;  %v2816_v33 = vrot.slane %v2815_v5, 1  ;;  %v1901_v18 = vmax.f32 %v1773_v36, 0.0 }
 0x277   :  { %v1965_v1 = vmax.f32 %v1837_v21, 0.0  ;;  %v1902_v43 = vmax.f32 %v1774_v27, 0.0  ;;  %v2374_v16 = vmax.f32 %v2372_v61, %v2373_v22  ;;  %v2822_v17 = vmax.f32 %v2820_v52, %v2821_v12 }
 0x278   :  { %v1966_v29 = vmax.f32 %v1838_v56, 0.0  ;;  %v2377_v31 = vsel %vm1970_vm1, %v1900_v41, -inf  ;;  %v2825_v44 = vsel %vm1970_vm1, %v1964_v30, -inf  ;;  %v2369_v15 = vmax.f32 %v2367_v38, %v2368_v6 }
 0x279   :  { %v2817_v51 = vmax.f32 %v2815_v5, %v2816_v33  ;;  %v2384_v0 = vsel %vm1970_vm1, %v1901_v18, -inf  ;;  %v2832_v13 = vsel %vm1970_vm1, %v1965_v1, -inf  ;;  %v2391_v46 = vsel %vm1970_vm1, %v1902_v43, -inf }
 0x27a   :  { %v2839_v8 = vsel %vm1970_vm1, %v1966_v29, -inf  ;;  %v2375_v49 = vrot.slane %v2374_v16, 1  ;;  %v2823_v32 = vrot.slane %v2822_v17, 1  ;;  %v2378_v55 = vrot.slane %v2377_v31, 4 }
 0x27b   :  { %v2826_v39 = vrot.slane %v2825_v44, 4  ;;  %v1640_v26 = vmul.f32 %v5703_v40, %v5596_v14  ;;  %v1704_v47 = vmul.f32 %v5703_v40, %v5604_v28  ;;  %v2385_v62 = vrot.slane %v2384_v0, 4 }
 0x27c   :  { %v2833_v4 = vrot.slane %v2832_v13, 4  ;;  %v2392_v23 = vrot.slane %v2391_v46, 4  ;;  %v2840_v19 = vrot.slane %v2839_v8, 4  ;;  %v4071_v53 = vpack.c.bf16 %v2369_v15, %v2369_v15 }
 0x27d   :  { %v4135_v48 = vpack.c.bf16 %v2817_v51, %v2817_v51  ;;  %v1775_v50 = vadd.f32 %v5712_v60, %v1640_v26  ;;  %v1839_v25 = vadd.f32 %v5712_v60, %v1704_v47  ;;  %v2376_v54 = vmax.f32 %v2374_v16, %v2375_v49 }
 0x27e   :  { %v2824_v9 = vmax.f32 %v2822_v17, %v2823_v32  ;;  %v2379_v59 = vmax.f32 %v2377_v31, %v2378_v55  ;;  %v2827_v37 = vmax.f32 %v2825_v44, %v2826_v39  ;;  %v2386_v14 = vmax.f32 %v2384_v0, %v2385_v62 }
 0x27f   :  { %v1903_v3 = vmax.f32 %v1775_v50, 0.0  ;;  %v1967_v42 = vmax.f32 %v1839_v25, 0.0  ;;  %v2834_v7 = vmax.f32 %v2832_v13, %v2833_v4  ;;  %v2393_v61 = vmax.f32 %v2391_v46, %v2392_v23 }
 0x280   :  { %v2841_v28 = vmax.f32 %v2839_v8, %v2840_v19  ;;  %v5856_v52 = vunpack.c.l.b16 %v4071_v53  ;;  %v5858_v11 = vunpack.c.l.b16 %v4135_v48  ;;  %v4072_v63 = vpack.c.bf16 %v2376_v54, %v2376_v54 }
 0x281   :  { %v2398_v2 = vsel %vm1970_vm1, %v1903_v3, -inf  ;;  %v2846_v24 = vsel %vm1970_vm1, %v1967_v42, -inf  ;;  %v4136_v38 = vpack.c.bf16 %v2824_v9, %v2824_v9  ;;  %v2380_v5 = vrot.slane %v2379_v59, 2 }
 0x282   :  { %v2828_v45 = vrot.slane %v2827_v37, 2  ;;  %v2399_v57 = vrot.slane %v2398_v2, 4  ;;  %v2847_v35 = vrot.slane %v2846_v24, 4  ;;  %v1641_v22 = vmul.f32 %v5703_v40, %v5610_v34 }
 0x283   :  { %v1705_v12 = vmul.f32 %v5703_v40, %v5620_v20  ;;  %v2387_v36 = vrot.slane %v2386_v14, 2  ;;  %v2835_v21 = vrot.slane %v2834_v7, 2  ;;  %v2394_v27 = vrot.slane %v2393_v61, 2 }
 0x284   :  { %v2842_v56 = vrot.slane %v2841_v28, 2  ;;  %v2400_v41 = vmax.f32 %v2398_v2, %v2399_v57  ;;  %v2848_v30 = vmax.f32 %v2846_v24, %v2847_v35  ;;  %v1776_v6 = vadd.f32 %v5712_v60, %v1641_v22 }
 0x285   :  { %v1840_v33 = vadd.f32 %v5712_v60, %v1705_v12  ;;  %v5868_v18 = vunpack.c.l.b16 %v4072_v63  ;;  %v5870_v1 = vunpack.c.l.b16 %v4136_v38  ;;  %v2381_v43 = vmax.f32 %v2379_v59, %v2380_v5 }
 0x286   :  { %v2829_v29 = vmax.f32 %v2827_v37, %v2828_v45  ;;  %v2401_v34 = vrot.slane %v2400_v41, 2  ;;  %v2849_v16 = vrot.slane %v2848_v30, 2  ;;  %v1904_v17 = vmax.f32 %v1776_v6, 0.0 }
 0x287   :  { %v1968_v20 = vmax.f32 %v1840_v33, 0.0  ;;  %v2388_v31 = vmax.f32 %v2386_v14, %v2387_v36  ;;  %v2836_v44 = vmax.f32 %v2834_v7, %v2835_v21  ;;  %v1642_v15 = vmul.f32 %v5703_v40, %v5640_v10 }
 0x288   :  { %v1706_v51 = vmul.f32 %v5703_v40, %v5648_v58  ;;  %v2395_v0 = vmax.f32 %v2393_v61, %v2394_v27  ;;  %v2843_v13 = vmax.f32 %v2841_v28, %v2842_v56  ;;  %v2402_v46 = vmax.f32 %v2400_v41, %v2401_v34 }
 0x289   :  { %v2850_v8 = vmax.f32 %v2848_v30, %v2849_v16  ;;  %v2405_v49 = vsel %vm1970_vm1, %v1904_v17, -inf  ;;  %v2853_v32 = vsel %vm1970_vm1, %v1968_v20, -inf  ;;  %v1777_v55 = vadd.f32 %v5712_v60, %v1642_v15 }
 0x28a   :  { %v1841_v39 = vadd.f32 %v5712_v60, %v1706_v51  ;;  %v2382_v26 = vrot.slane %v2381_v43, 1  ;;  %v2830_v47 = vrot.slane %v2829_v29, 1  ;;  %v2406_v62 = vrot.slane %v2405_v49, 4 }
 0x28b   :  { %v2854_v4 = vrot.slane %v2853_v32, 4  ;;  %v2389_v10 = vrot.slane %v2388_v31, 1  ;;  %v2837_v23 = vrot.slane %v2836_v44, 1  ;;  %v1905_v19 = vmax.f32 %v1777_v55, 0.0 }
 0x28c   :  { %v1969_v58 = vmax.f32 %v1841_v39, 0.0  ;;  %v2396_v40 = vrot.slane %v2395_v0, 1  ;;  %v2844_v53 = vrot.slane %v2843_v13, 1  ;;  %v2407_v48 = vmax.f32 %v2405_v49, %v2406_v62 }
 0x28d   :  { %v2855_v50 = vmax.f32 %v2853_v32, %v2854_v4  ;;  %v2403_v25 = vrot.slane %v2402_v46, 1  ;;  %v2851_v54 = vrot.slane %v2850_v8, 1  ;;  %v2412_v9 = vsel %vm1970_vm1, %v1905_v19, -inf }
 0x28e   :  { %v2860_v59 = vsel %vm1970_vm1, %v1969_v58, -inf  ;;  %v2383_v37 = vmax.f32 %v2381_v43, %v2382_v26  ;;  %v2831_v60 = vmax.f32 %v2829_v29, %v2830_v47  ;;  %v2408_v3 = vrot.slane %v2407_v48, 2 }
 0x28f   :  { %v2856_v42 = vrot.slane %v2855_v50, 2  ;;  %v2390_v14 = vmax.f32 %v2388_v31, %v2389_v10  ;;  %v2838_v7 = vmax.f32 %v2836_v44, %v2837_v23  ;;  %v2413_v61 = vrot.slane %v2412_v9, 4 }
 0x290   :  { %v2861_v28 = vrot.slane %v2860_v59, 4  ;;  %v2397_v2 = vmax.f32 %v2395_v0, %v2396_v40  ;;  %v2845_v24 = vmax.f32 %v2843_v13, %v2844_v53  ;;  %v2409_v63 = vmax.f32 %v2407_v48, %v2408_v3 }
 0x291   :  { %v2857_v38 = vmax.f32 %v2855_v50, %v2856_v42  ;;  %v2404_v5 = vmax.f32 %v2402_v46, %v2403_v25  ;;  %v2852_v45 = vmax.f32 %v2850_v8, %v2851_v54  ;;  %v2414_v57 = vmax.f32 %v2412_v9, %v2413_v61 }
 0x292   :  { %v2862_v35 = vmax.f32 %v2860_v59, %v2861_v28  ;;  %v4073_v22 = vpack.c.bf16 %v2383_v37, %v2383_v37  ;;  %v4137_v12 = vpack.c.bf16 %v2831_v60, %v2831_v60  ;;  %v2410_v36 = vrot.slane %v2409_v63, 1 }
 0x293   :  { %v2858_v21 = vrot.slane %v2857_v38, 1  ;;  %v4074_v27 = vpack.c.bf16 %v2390_v14, %v2390_v14  ;;  %v4138_v56 = vpack.c.bf16 %v2838_v7, %v2838_v7  ;;  %v2415_v41 = vrot.slane %v2414_v57, 2 }
 0x294   :  { %v2863_v30 = vrot.slane %v2862_v35, 2  ;;  %v4075_v6 = vpack.c.bf16 %v2397_v2, %v2397_v2  ;;  %v4139_v33 = vpack.c.bf16 %v2845_v24, %v2845_v24  ;;  %v2411_v43 = vmax.f32 %v2409_v63, %v2410_v36 }
 0x295   :  { %v2859_v29 = vmax.f32 %v2857_v38, %v2858_v21  ;;  %v4076_v34 = vpack.c.bf16 %v2404_v5, %v2404_v5  ;;  %v4140_v16 = vpack.c.bf16 %v2852_v45, %v2852_v45  ;;  %v2416_v17 = vmax.f32 %v2414_v57, %v2415_v41 }
 0x296   :  { %v2864_v20 = vmax.f32 %v2862_v35, %v2863_v30  ;;  %v3437_v31 = vunpack.c.l.b16 %v4073_v22  ;;  %v3501_v44 = vunpack.c.l.b16 %v4137_v12  ;;  %v4077_v15 = vpack.c.bf16 %v2411_v43, %v2411_v43 }
 0x297   :  { %v4141_v51 = vpack.c.bf16 %v2859_v29, %v2859_v29  ;;  %v3438_v0 = vunpack.c.l.b16 %v4074_v27  ;;  %v3502_v13 = vunpack.c.l.b16 %v4138_v56  ;;  %v2417_v46 = vrot.slane %v2416_v17, 1 }
 0x298   :  { %v2865_v8 = vrot.slane %v2864_v20, 1  ;;  %v3563_v49 = vsel %vm3507_vm2, %v5868_v18, %v5856_v52  ;;  %v3619_v32 = vsel %vm3507_vm2, %v5870_v1, %v5858_v11  ;;  %v3439_v55 = vunpack.c.l.b16 %v4075_v6 }
 0x299   :  { %v3503_v39 = vunpack.c.l.b16 %v4139_v33  ;;  %v3440_v26 = vunpack.c.l.b16 %v4076_v34  ;;  %v3504_v47 = vunpack.c.l.b16 %v4140_v16  ;;  %v2418_v62 = vmax.f32 %v2416_v17, %v2417_v46 }
 0x29a   :  { %v2866_v4 = vmax.f32 %v2864_v20, %v2865_v8  ;;  %v3564_v10 = vsel %vm3509_vm3, %v3437_v31, %v3563_v49  ;;  %v3620_v23 = vsel %vm3509_vm3, %v3501_v44, %v3619_v32  ;;  %v3441_v19 = vunpack.c.l.b16 %v4077_v15 }
 0x29b   :  { %v3505_v58 = vunpack.c.l.b16 %v4141_v51  ;;  %v3565_v40 = vsel %vm3511_vm4, %v3438_v0, %v3564_v10  ;;  %v3621_v52 = vsel %vm3511_vm4, %v3502_v13, %v3620_v23  ;;  %v4078_v18 = vpack.c.bf16 %v2418_v62, %v2418_v62 }
 0x29c   :  { %v4142_v53 = vpack.c.bf16 %v2866_v4, %v2866_v4  ;;  %v3566_v11 = vsel %vm3513_vm5, %v3439_v55, %v3565_v40  ;;  %v3622_v1 = vsel %vm3513_vm5, %v3503_v39, %v3621_v52 }
 0x29d   :  { %v3567_v48 = vsel %vm3515_vm6, %v3440_v26, %v3566_v11  ;;  %v3623_v50 = vsel %vm3515_vm6, %v3504_v47, %v3622_v1  ;;  %v3442_v25 = vunpack.c.l.b16 %v4078_v18 }
 0x29e   :  { %v3506_v54 = vunpack.c.l.b16 %v4142_v53  ;;  %v3568_v9 = vsel %vm3517_vm7, %v3441_v19, %v3567_v48  ;;  %v3624_v59 = vsel %vm3517_vm7, %v3505_v58, %v3623_v50 }
 0x29f   :  { %v3569_v37 = vsel %vm3519_vm8, %v3442_v25, %v3568_v9 }
 0x2a0   :  { %v3625_v60 = vsel %vm3519_vm8, %v3506_v54, %v3624_v59  ;;  %v3633_v3 = vpack.c.b16 %v3569_v37, %v3569_v37 }
 0x2a1   :  { %v3641_v42 = vpack.c.b16 %v3625_v60, %v3625_v60 }
 0x2a2   :  { %3666 = vst.msk [vmem:[%s5912_s4 + $0x1c] sm:$0xf] %vm3658_vm9, %v3633_v3 }
 0x2a3   :  { %3674 = vst.msk [vmem:[%s5912_s4 + $0x3c] sm:$0xf] %vm3658_vm9, %v3641_v42 }

// kernel: graph_lenet_forward.7
= control target key start
LH: loop header
LB: loop body
LE: loop exit
PB: predicated region body
PF: predicated region fallthrough
CT: control target
= control target key end

     0   :  { %v228_v1 = vmov 0.0   ;;  %vm229_vm0 = vmmov 0   ;;  %s292_s0 = inlined_call_operand.vmem [shape: bf16[2,128], index: 0, kind: input, shape index: {}]   ;;  %s293_s1 = inlined_call_operand.vmem [shape: bf16[128,8], index: 1, kind: input, shape index: {}]   ;;  %s294_s2 = inlined_call_operand.vmem [shape: f32[1,8], index: 2, kind: input, shape index: {}]   ;;  %s295_s3 = inlined_call_operand.vmem [shape: f32[1,8], index: 3, kind: input, shape index: {}]   ;;  %s296_s4 = inlined_call_operand.hbm [shape: f32[2,8], index: 4, kind: output, shape index: {}]  }
   0x1   :  { %v198_v0 = vld [vmem:[%s293_s1 + $0x38] sm:$0xff]   ;;  %175 = vmatprep.subr.bf16.mxu0 %v228_v1  ;;  %v199_v2 = vld [vmem:[%s293_s1 + $0x30] sm:$0xff]   ;;  %191 = vmatprep.mubr.msk.bf16.mxu0 %vm229_vm0, %v228_v1  ;;  %v200_v3 = vld [vmem:[%s293_s1 + $0x28] sm:$0xff]  }
   0x2   :  { %176 = vmatpush3.bf16.msra.mxu0 %v198_v0 }
   0x3   :  { %177 = vmatprep.subr.bf16.mxu0 %v228_v1 }
   0x6   :  { %178 = vmatpush3.bf16.msra.mxu0 %v199_v2 }
   0x7   :  { %179 = vmatprep.subr.bf16.mxu0 %v228_v1 }
   0x8   :  { %9 = vsyncpa [#allocation3], 0  ;;  %v201_v4 = vld [vmem:[%s293_s1 + $0x20] sm:$0xff]   ;;  %v202_v5 = vld [vmem:[%s293_s1 + $0x18] sm:$0xff]   ;;  %s230_s11 = smov [#allocation2]   ;;  %vm140_vm1 = vcmask 58368  }
   0x9   :  { %v203_v6 = vld [vmem:[%s293_s1 + $0x10] sm:$0xff]   ;;  %v204_v7 = vld [vmem:[%s293_s1 + $0x8] sm:$0xff]   ;;  %v205_v8 = vld [vmem:[%s293_s1] sm:$0xff]   ;;  %s148_s12 = sshll.u32 %s230_s11, 4  ;;  %s149_s12 = int_to_ptr.vmem [resolvable:$true] %s148_s12 }
   0xa   :  { %180 = vmatpush3.bf16.msra.mxu0 %v200_v3  ;;  %v19_v9 = vld [vmem:[%s292_s0] sm:$0x1]  ;;  %s206_s0 = scalar_lea.vmem %s149_s12, 32  ;;  %p211_p1 = scmp.lt.s32.totalorder %s149_s12, %s149_s12 }
   0xb   :  { %181 = vmatprep.subr.bf16.mxu0 %v228_v1  ;;  %v164_v10 = vld [vmem:[%s294_s2] ss:$0 sm:$0xff]  ;;  %p207_p0 = scmp.ne.s32.totalorder %s149_s12, %s206_s0  ;;  %p212_p2 = scmp.lt.s32.totalorder %s206_s0, %s206_s0 }
   0xc   :  { %v165_v12 = vld [vmem:[%s295_s3] ss:$0 sm:$0xff] }
   0xd   :  { %p213_p3 = por %p212_p2, %p211_p1 }
   0xe   :  { %182 = vmatpush3.bf16.msra.mxu0 %v201_v4 }
   0xf   :  { %183 = vmatprep.subr.bf16.mxu0 %v228_v1  ;;  %p214_p4 = pnand %p213_p3, %p207_p0 }
  0x12   :  { %184 = vmatpush3.bf16.msra.mxu0 %v202_v5 }
  0x13   :  { %185 = vmatprep.subr.bf16.mxu0 %v228_v1 }
  0x16   :  { %186 = vmatpush3.bf16.msra.mxu0 %v203_v6 }
  0x17   :  { %187 = vmatprep.subr.bf16.mxu0 %v228_v1 }
  0x1a   :  { %188 = vmatpush3.bf16.msra.mxu0 %v204_v7 }
  0x1b   :  { %189 = vmatprep.subr.bf16.mxu0 %v228_v1 }
  0x1e   :  { %190 = vmatpush3.bf16.msra.mxu0 %v205_v8 }
  0x21   :  { %192 = vmatmul.mubr.bf16.vlgmr.msra.gmra.mxu0 %v19_v9 }
  0xe1   :  { %v118_v11 = vpop.f32.mrf.mxu0 }
  0xe2   :  { %v131_v13 = vmul.f32 %v164_v10, %v118_v11 }
  0xe3   :  { %v193_v14 = vpop.f32.mrf.mxu0 }
  0xe4   :  { %v139_v15 = vadd.f32 %v165_v12, %v131_v13 }
  0xe5   :  { %v121_v16 = vpop.f32.mrf.mxu0 }
  0xe6   :  { %141 = vst.msk [vmem:[#allocation2] sm:$0x3] %vm140_vm1, %v139_v15 }
  0xe7   :  { %v194_v17 = vpop.f32.mrf.mxu0 }
  0xe8   :  { %217 = shalt.err (!%p214_p4)
}
  0xe9   :  { %151 = dma.vmem_to_hbm [thread:$0]  %s149_s12, 32, %s296_s4, [#allocation3]  }
  0xea   :  { %226 = dma.done.wait [#allocation3], 32  }
  0xeb   :  { %227 = vsyncadd [#allocation3], 4294967264 }
  0xec   :  { %155 = vsyncpa [#allocation3], 1 }

// kernel: graph_lenet_forward.6
= control target key start
LH: loop header
LB: loop body
LE: loop exit
PB: predicated region body
PF: predicated region fallthrough
CT: control target
= control target key end

     0   :  { %v3836_v22 = vmov 1966171168   ;;  %v542_v24 = vlaneseq  ;;  %s4697_s1 = inlined_call_operand.vmem [shape: bf16[4096,128], index: 1, kind: input, shape index: {}]   ;;  %s4698_s0 = inlined_call_operand.vmem [shape: bf16[2,4096], index: 0, kind: input, shape index: {}]   ;;  %s4699_s2 = inlined_call_operand.vmem [shape: f32[1,128], index: 2, kind: input, shape index: {}]   ;;  %s4700_s3 = inlined_call_operand.vmem [shape: f32[1,128], index: 3, kind: input, shape index: {}]   ;;  %s4701_s4 = inlined_call_operand.vmem [shape: bf16[2,128], index: 4, kind: output, shape index: {}]  }
   0x1   :  { %v3576_v0 = vld [vmem:[%s4697_s1 + $0x78] sm:$0xff]   ;;  %v3580_v4 = vld [vmem:[%s4697_s1 + $0x70] sm:$0xff]   ;;  %v3584_v8 = vld [vmem:[%s4697_s1 + $0x68] sm:$0xff]   ;;  %v540_v23 = vunpack.c.l.s4 %v3836_v22 }
   0x2   :  { %v3577_v1 = vld [vmem:[%s4697_s1 + $0xf8] sm:$0xff]   ;;  %3223 = vmatprep.subr.bf16.mxu0 %v3576_v0  ;;  %v3581_v5 = vld [vmem:[%s4697_s1 + $0xf0] sm:$0xff]   ;;  %v3585_v9 = vld [vmem:[%s4697_s1 + $0xe8] sm:$0xff]   ;;  %v543_v30 = vshrl.u32 %v542_v24, 7 }
   0x3   :  { %v3578_v2 = vld [vmem:[%s4697_s1 + $0x38] sm:$0xff]   ;;  %3245 = vmatprep.subr.bf16.mxu1 %v3577_v1  ;;  %v3582_v6 = vld [vmem:[%s4697_s1 + $0x30] sm:$0xff]   ;;  %v3586_v10 = vld [vmem:[%s4697_s1 + $0x28] sm:$0xff]   ;;  %v541_v29 = vunpack.c.0.s8 %v540_v23 }
   0x4   :  { %v3579_v3 = vld [vmem:[%s4697_s1 + $0xb8] sm:$0xff]   ;;  %3224 = vmatpush3.bf16.msra.mxu0 %v3578_v2  ;;  %v3583_v7 = vld [vmem:[%s4697_s1 + $0xb0] sm:$0xff]   ;;  %v3587_v11 = vld [vmem:[%s4697_s1 + $0xa8] sm:$0xff]  }
   0x5   :  { %3246 = vmatpush3.bf16.msra.mxu1 %v3579_v3  ;;  %3225 = vmatprep.subr.bf16.mxu0 %v3580_v4  ;;  %v3588_v12 = vld [vmem:[%s4697_s1 + $0x60] sm:$0xff]   ;;  %v3592_v16 = vld [vmem:[%s4697_s1 + $0x58] sm:$0xff]   ;;  %v3596_v20 = vld [vmem:[%s4697_s1 + $0x50] sm:$0xff]   ;;  %v3952_v35 = vsub.s32 %v541_v29, %v543_v30 }
   0x6   :  { %3247 = vmatprep.subr.bf16.mxu1 %v3581_v5  ;;  %v3589_v13 = vld [vmem:[%s4697_s1 + $0xe0] sm:$0xff]   ;;  %v3593_v17 = vld [vmem:[%s4697_s1 + $0xd8] sm:$0xff]   ;;  %v3597_v21 = vld [vmem:[%s4697_s1 + $0xd0] sm:$0xff]  }
   0x7   :  { %v3590_v14 = vld [vmem:[%s4697_s1 + $0x20] sm:$0xff]   ;;  %v3594_v18 = vld [vmem:[%s4697_s1 + $0x18] sm:$0xff]   ;;  %v3598_v25 = vld [vmem:[%s4697_s1 + $0x10] sm:$0xff]  }
   0x8   :  { %3226 = vmatpush3.bf16.msra.mxu0 %v3582_v6  ;;  %v3591_v15 = vld [vmem:[%s4697_s1 + $0xa0] sm:$0xff]   ;;  %v3595_v19 = vld [vmem:[%s4697_s1 + $0x98] sm:$0xff]   ;;  %v3599_v26 = vld [vmem:[%s4697_s1 + $0x90] sm:$0xff]  }
   0x9   :  { %3248 = vmatpush3.bf16.msra.mxu1 %v3583_v7  ;;  %3227 = vmatprep.subr.bf16.mxu0 %v3584_v8  ;;  %v3600_v27 = vld [vmem:[%s4697_s1 + $0x48] sm:$0xff]   ;;  %v3604_v33 = vld [vmem:[%s4697_s1 + $0x40] sm:$0xff]   ;;  %v3609_v41 = vld [vmem:[%s4697_s1 + $0x178] sm:$0xff]  }
   0xa   :  { %3249 = vmatprep.subr.bf16.mxu1 %v3585_v9  ;;  %v3601_v28 = vld [vmem:[%s4697_s1 + $0xc8] sm:$0xff]   ;;  %v3605_v34 = vld [vmem:[%s4697_s1 + $0xc0] sm:$0xff]   ;;  %v3610_v42 = vld [vmem:[%s4697_s1 + $0x1f8] sm:$0xff]  }
   0xb   :  { %v3602_v31 = vld [vmem:[%s4697_s1 + $0x8] sm:$0xff]   ;;  %v3606_v36 = vld [vmem:[%s4697_s1] sm:$0xff]   ;;  %v3611_v46 = vld [vmem:[%s4697_s1 + $0x138] sm:$0xff]  }
   0xc   :  { %3228 = vmatpush3.bf16.msra.mxu0 %v3586_v10  ;;  %v3603_v32 = vld [vmem:[%s4697_s1 + $0x88] sm:$0xff]   ;;  %v3607_v37 = vld [vmem:[%s4697_s1 + $0x80] sm:$0xff]   ;;  %v3612_v48 = vld [vmem:[%s4697_s1 + $0x1b8] sm:$0xff]  }
   0xd   :  { %3250 = vmatpush3.bf16.msra.mxu1 %v3587_v11  ;;  %3229 = vmatprep.subr.bf16.mxu0 %v3588_v12  ;;  %v18_v38 = vld [vmem:[%s4698_s0] sm:$0xff]  ;;  %v3613_v51 = vld [vmem:[%s4697_s1 + $0x170] sm:$0xff]   ;;  %v3617_v58 = vld [vmem:[%s4697_s1 + $0x168] sm:$0xff]  }
   0xe   :  { %3251 = vmatprep.subr.bf16.mxu1 %v3589_v13  ;;  %v538_v39 = vcombine.high %v18_v38, %v18_v38  ;;  %v545_v40 = vrot.slane %v18_v38, %v3952_v35  ;;  %v3614_v53 = vld [vmem:[%s4697_s1 + $0x1f0] sm:$0xff]   ;;  %v3618_v59 = vld [vmem:[%s4697_s1 + $0x1e8] sm:$0xff]   ;;  %v3621_v62 = vld [vmem:[%s4697_s1 + $0x160] sm:$0xff]  }
   0xf   :  { %v3615_v55 = vld [vmem:[%s4697_s1 + $0x130] sm:$0xff]   ;;  %v3619_v60 = vld [vmem:[%s4697_s1 + $0x128] sm:$0xff]   ;;  %v3622_v63 = vld [vmem:[%s4697_s1 + $0x1e0] sm:$0xff]  }
  0x10   :  { %3230 = vmatpush3.bf16.msra.mxu0 %v3590_v14  ;;  %v553_v43 = vcombine.high %v545_v40, %v545_v40  ;;  %v561_v44 = vrot.slane %v545_v40, %v3952_v35  ;;  %v3972_v45 = vrot.slane %v538_v39, %v3952_v35  ;;  %v3616_v56 = vld [vmem:[%s4697_s1 + $0x1b0] sm:$0xff]   ;;  %v3620_v61 = vld [vmem:[%s4697_s1 + $0x1a8] sm:$0xff]   ;;  %v3623_v0 = vld [vmem:[%s4697_s1 + $0x120] sm:$0xff]  }
  0x11   :  { %3252 = vmatpush3.bf16.msra.mxu1 %v3591_v15  ;;  %3231 = vmatprep.subr.bf16.mxu0 %v3592_v16  ;;  %v3624_v1 = vld [vmem:[%s4697_s1 + $0x1a0] sm:$0xff]   ;;  %v3625_v2 = vld [vmem:[%s4697_s1 + $0x158] sm:$0xff]   ;;  %v3629_v6 = vld [vmem:[%s4697_s1 + $0x150] sm:$0xff]  }
  0x12   :  { %3253 = vmatprep.subr.bf16.mxu1 %v3593_v17  ;;  %v575_v47 = vrot.slane %v553_v43, %v3952_v35  ;;  %v554_v49 = vcombine.high %v3972_v45, %v3972_v45  ;;  %v583_v50 = vcombine.high %v561_v44, %v561_v44  ;;  %v3626_v3 = vld [vmem:[%s4697_s1 + $0x1d8] sm:$0xff]   ;;  %v3630_v7 = vld [vmem:[%s4697_s1 + $0x1d0] sm:$0xff]   ;;  %v3633_v10 = vld [vmem:[%s4697_s1 + $0x148] sm:$0xff]  }
  0x13   :  { %v3627_v4 = vld [vmem:[%s4697_s1 + $0x118] sm:$0xff]   ;;  %v3631_v8 = vld [vmem:[%s4697_s1 + $0x110] sm:$0xff]   ;;  %v3634_v11 = vld [vmem:[%s4697_s1 + $0x1c8] sm:$0xff]  }
  0x14   :  { %3232 = vmatpush3.bf16.msra.mxu0 %v3594_v18  ;;  %2334 = vmatprep.mubr.bf16.mxu0 %v575_v47  ;;  %v585_v52 = vcombine.high %v575_v47, %v575_v47  ;;  %v582_v54 = vrot.slane %v554_v49, %v3952_v35  ;;  %v3628_v5 = vld [vmem:[%s4697_s1 + $0x198] sm:$0xff]   ;;  %v3632_v9 = vld [vmem:[%s4697_s1 + $0x190] sm:$0xff]   ;;  %v3635_v12 = vld [vmem:[%s4697_s1 + $0x108] sm:$0xff]   ;;  %v568_v18 = vrot.slane %v3972_v45, %v3952_v35 }
  0x15   :  { %3254 = vmatpush3.bf16.msra.mxu1 %v3595_v19  ;;  %3233 = vmatprep.subr.bf16.mxu0 %v3596_v20  ;;  %v3636_v13 = vld [vmem:[%s4697_s1 + $0x188] sm:$0xff]   ;;  %v3637_v14 = vld [vmem:[%s4697_s1 + $0x140] sm:$0xff]   ;;  %v3641_v19 = vld [vmem:[%s4697_s1 + $0x278] sm:$0xff]  }
  0x16   :  { %3255 = vmatprep.subr.bf16.mxu1 %v3597_v21  ;;  %2374 = vmatprep.mubr.bf16.mxu1 %v585_v52  ;;  %v586_v57 = vcombine.high %v582_v54, %v582_v54  ;;  %v3638_v15 = vld [vmem:[%s4697_s1 + $0x1c0] sm:$0xff]   ;;  %v3642_v20 = vld [vmem:[%s4697_s1 + $0x2f8] sm:$0xff]   ;;  %v584_v23 = vcombine.high %v568_v18, %v568_v18  ;;  %v3645_v24 = vld [vmem:[%s4697_s1 + $0x270] sm:$0xff]  }
  0x17   :  { %v3639_v16 = vld [vmem:[%s4697_s1 + $0x100] sm:$0xff]   ;;  %v3643_v21 = vld [vmem:[%s4697_s1 + $0x238] sm:$0xff]   ;;  %v3650_v29 = vld [vmem:[%s4697_s1 + $0x2e8] sm:$0xff]  }
  0x18   :  { %3234 = vmatpush3.bf16.msra.mxu0 %v3598_v25  ;;  %v3640_v17 = vld [vmem:[%s4697_s1 + $0x180] sm:$0xff]   ;;  %v3644_v22 = vld [vmem:[%s4697_s1 + $0x2b8] sm:$0xff]   ;;  %v3646_v25 = vld [vmem:[%s4697_s1 + $0x2f0] sm:$0xff]  }
  0x19   :  { %3256 = vmatpush3.bf16.msra.mxu1 %v3599_v26  ;;  %3235 = vmatprep.subr.bf16.mxu0 %v3600_v27  ;;  %v3647_v26 = vld [vmem:[%s4697_s1 + $0x230] sm:$0xff]   ;;  %v3651_v30 = vld [vmem:[%s4697_s1 + $0x228] sm:$0xff]   ;;  %v3658_v38 = vld [vmem:[%s4697_s1 + $0x2d8] sm:$0xff]  }
  0x1a   :  { %3257 = vmatprep.subr.bf16.mxu1 %v3601_v28  ;;  %v3648_v27 = vld [vmem:[%s4697_s1 + $0x2b0] sm:$0xff]   ;;  %v3649_v28 = vld [vmem:[%s4697_s1 + $0x268] sm:$0xff]   ;;  %v3659_v39 = vld [vmem:[%s4697_s1 + $0x218] sm:$0xff]  }
  0x1b   :  { %v3660_v40 = vld [vmem:[%s4697_s1 + $0x298] sm:$0xff]   ;;  %v3663_v43 = vld [vmem:[%s4697_s1 + $0x210] sm:$0xff]   ;;  %v3665_v45 = vld [vmem:[%s4697_s1 + $0x248] sm:$0xff]  }
  0x1c   :  { %3236 = vmatpush3.bf16.msra.mxu0 %v3602_v31  ;;  %v3652_v31 = vld [vmem:[%s4697_s1 + $0x2a8] sm:$0xff]   ;;  %v3669_v49 = vld [vmem:[%s4697_s1 + $0x240] sm:$0xff]  }
  0x1d   :  { %3258 = vmatpush3.bf16.msra.mxu1 %v3603_v32  ;;  %3237 = vmatprep.subr.bf16.mxu0 %v3604_v33  ;;  %v3653_v32 = vld [vmem:[%s4697_s1 + $0x260] sm:$0xff]   ;;  %v3667_v47 = vld [vmem:[%s4697_s1 + $0x208] sm:$0xff]  }
  0x1e   :  { %3259 = vmatprep.subr.bf16.mxu1 %v3605_v34  ;;  %v3654_v33 = vld [vmem:[%s4697_s1 + $0x2e0] sm:$0xff]   ;;  %v19_v52 = vld [vmem:[%s4698_s0 + $0x8] sm:$0xff] }
  0x1f   :  { %v3655_v34 = vld [vmem:[%s4697_s1 + $0x220] sm:$0xff]  }
  0x20   :  { %3238 = vmatpush3.bf16.msra.mxu0 %v3606_v36  ;;  %v3656_v36 = vld [vmem:[%s4697_s1 + $0x2a0] sm:$0xff]  }
  0x21   :  { %3260 = vmatpush3.bf16.msra.mxu1 %v3607_v37  ;;  %3267 = vmatprep.subr.bf16.mxu0 %v3609_v41  ;;  %v3657_v37 = vld [vmem:[%s4697_s1 + $0x258] sm:$0xff]   ;;  %v3661_v41 = vld [vmem:[%s4697_s1 + $0x250] sm:$0xff]  }
  0x22   :  { %3289 = vmatprep.subr.bf16.mxu1 %v3610_v42  ;;  %v3662_v42 = vld [vmem:[%s4697_s1 + $0x2d0] sm:$0xff]  }
  0x23   :  { %2335 = vmatmul.mubr.bf16.vlgmr.msra.gmra.mxu0 %v561_v44  ;;  %v3664_v44 = vld [vmem:[%s4697_s1 + $0x290] sm:$0xff]  }
  0x24   :  { %3268 = vmatpush3.bf16.msra.mxu0 %v3611_v46  ;;  %2375 = vmatmul.mubr.bf16.vlgmr.msra.gmra.mxu1 %v583_v50  ;;  %v3666_v46 = vld [vmem:[%s4697_s1 + $0x2c8] sm:$0xff]   ;;  %v3670_v50 = vld [vmem:[%s4697_s1 + $0x2c0] sm:$0xff]  }
  0x25   :  { %3269 = vmatprep.subr.bf16.mxu0 %v3613_v51  ;;  %3290 = vmatpush3.bf16.msra.mxu1 %v3612_v48  ;;  %v3668_v48 = vld [vmem:[%s4697_s1 + $0x288] sm:$0xff]   ;;  %v3671_v51 = vld [vmem:[%s4697_s1 + $0x200] sm:$0xff]  }
  0x26   :  { %2414 = vmatprep.mubr.bf16.mxu0 %v582_v54  ;;  %3291 = vmatprep.subr.bf16.mxu1 %v3614_v53  ;;  %v3672_v53 = vld [vmem:[%s4697_s1 + $0x280] sm:$0xff]   ;;  %v594_v54 = vrot.slane %v19_v52, %v3952_v35 }
  0x27   :  { %2454 = vmatprep.mubr.bf16.mxu1 %v586_v57 }
  0x28   :  { %3270 = vmatpush3.bf16.msra.mxu0 %v3615_v55  ;;  %v587_v55 = vcombine.high %v19_v52, %v19_v52  ;;  %v602_v57 = vcombine.high %v594_v54, %v594_v54  ;;  %v3722_v52 = vld [vmem:[%s4697_s1 + $0x458] sm:$0xff]  }
  0x29   :  { %3271 = vmatprep.subr.bf16.mxu0 %v3617_v58  ;;  %3292 = vmatpush3.bf16.msra.mxu1 %v3616_v56  ;;  %v3673_v56 = vld [vmem:[%s4697_s1 + $0x378] sm:$0xff]   ;;  %v610_v58 = vrot.slane %v594_v54, %v3952_v35 }
  0x2a   :  { %3293 = vmatprep.subr.bf16.mxu1 %v3618_v59  ;;  %v3674_v59 = vld [vmem:[%s4697_s1 + $0x3f8] sm:$0xff]  }
  0x2b   :  { %v3724_v54 = vld [vmem:[%s4697_s1 + $0x418] sm:$0xff]  }
  0x2c   :  { %3272 = vmatpush3.bf16.msra.mxu0 %v3619_v60  ;;  %v4178_v60 = vrot.slane %v587_v55, %v3952_v35  ;;  %v3725_v55 = vld [vmem:[%s4697_s1 + $0x498] sm:$0xff]  }
  0x2d   :  { %3273 = vmatprep.subr.bf16.mxu0 %v3621_v62  ;;  %3294 = vmatpush3.bf16.msra.mxu1 %v3620_v61  ;;  %v3675_v61 = vld [vmem:[%s4697_s1 + $0x338] sm:$0xff]   ;;  %v624_v62 = vrot.slane %v602_v57, %v3952_v35  ;;  %v3727_v57 = vld [vmem:[%s4697_s1 + $0x4d0] sm:$0xff]  }
  0x2e   :  { %3295 = vmatprep.subr.bf16.mxu1 %v3622_v63  ;;  %v3676_v63 = vld [vmem:[%s4697_s1 + $0x3b8] sm:$0xff]  }
  0x30   :  { %3274 = vmatpush3.bf16.msra.mxu0 %v3623_v0  ;;  %v603_v0 = vcombine.high %v4178_v60, %v4178_v60 }
  0x31   :  { %3275 = vmatprep.subr.bf16.mxu0 %v3625_v2  ;;  %3296 = vmatpush3.bf16.msra.mxu1 %v3624_v1  ;;  %v632_v1 = vcombine.high %v610_v58, %v610_v58  ;;  %v3677_v2 = vld [vmem:[%s4697_s1 + $0x370] sm:$0xff]  }
  0x32   :  { %3297 = vmatprep.subr.bf16.mxu1 %v3626_v3  ;;  %v634_v3 = vcombine.high %v624_v62, %v624_v62 }
  0x34   :  { %3276 = vmatpush3.bf16.msra.mxu0 %v3627_v4  ;;  %v3678_v4 = vld [vmem:[%s4697_s1 + $0x3f0] sm:$0xff]  }
  0x35   :  { %3277 = vmatprep.subr.bf16.mxu0 %v3629_v6  ;;  %3298 = vmatpush3.bf16.msra.mxu1 %v3628_v5  ;;  %v631_v5 = vrot.slane %v603_v0, %v3952_v35  ;;  %v3679_v6 = vld [vmem:[%s4697_s1 + $0x330] sm:$0xff]   ;;  %v3734_v0 = vld [vmem:[%s4697_s1 + $0x440] sm:$0xff]  }
  0x36   :  { %3299 = vmatprep.subr.bf16.mxu1 %v3630_v7  ;;  %v3680_v7 = vld [vmem:[%s4697_s1 + $0x3b0] sm:$0xff]  }
  0x38   :  { %3278 = vmatpush3.bf16.msra.mxu0 %v3631_v8  ;;  %v635_v8 = vcombine.high %v631_v5, %v631_v5 }
  0x39   :  { %3279 = vmatprep.subr.bf16.mxu0 %v3633_v10  ;;  %3300 = vmatpush3.bf16.msra.mxu1 %v3632_v9  ;;  %v3681_v9 = vld [vmem:[%s4697_s1 + $0x368] sm:$0xff]  }
  0x3a   :  { %3301 = vmatprep.subr.bf16.mxu1 %v3634_v11  ;;  %v3682_v10 = vld [vmem:[%s4697_s1 + $0x3e8] sm:$0xff]  }
  0x3b   :  { %v3683_v11 = vld [vmem:[%s4697_s1 + $0x328] sm:$0xff]  }
  0x3c   :  { %3280 = vmatpush3.bf16.msra.mxu0 %v3635_v12  ;;  %v3684_v12 = vld [vmem:[%s4697_s1 + $0x3a8] sm:$0xff]  }
  0x3d   :  { %3281 = vmatprep.subr.bf16.mxu0 %v3637_v14  ;;  %3302 = vmatpush3.bf16.msra.mxu1 %v3636_v13  ;;  %v3685_v13 = vld [vmem:[%s4697_s1 + $0x360] sm:$0xff]  }
  0x3e   :  { %3303 = vmatprep.subr.bf16.mxu1 %v3638_v15  ;;  %v3686_v14 = vld [vmem:[%s4697_s1 + $0x3e0] sm:$0xff]  }
  0x3f   :  { %v3687_v15 = vld [vmem:[%s4697_s1 + $0x320] sm:$0xff]  }
  0x40   :  { %3282 = vmatpush3.bf16.msra.mxu0 %v3639_v16  ;;  %v3688_v16 = vld [vmem:[%s4697_s1 + $0x3a0] sm:$0xff]  }
  0x41   :  { %3311 = vmatprep.subr.bf16.mxu0 %v3641_v19  ;;  %3304 = vmatpush3.bf16.msra.mxu1 %v3640_v17  ;;  %v3689_v17 = vld [vmem:[%s4697_s1 + $0x358] sm:$0xff]  }
  0x42   :  { %3333 = vmatprep.subr.bf16.mxu1 %v3642_v20  ;;  %v3691_v19 = vld [vmem:[%s4697_s1 + $0x318] sm:$0xff]  }
  0x43   :  { %2415 = vmatmul.mubr.bf16.vlgmr.msra.gmra.mxu0 %v568_v18  ;;  %v3690_v18 = vld [vmem:[%s4697_s1 + $0x3d8] sm:$0xff]  }
  0x44   :  { %3312 = vmatpush3.bf16.msra.mxu0 %v3643_v21  ;;  %2455 = vmatmul.mubr.bf16.vlgmr.msra.gmra.mxu1 %v584_v23  ;;  %v3692_v20 = vld [vmem:[%s4697_s1 + $0x398] sm:$0xff]   ;;  %v3693_v21 = vld [vmem:[%s4697_s1 + $0x350] sm:$0xff]  }
  0x45   :  { %3313 = vmatprep.subr.bf16.mxu0 %v3645_v24  ;;  %3334 = vmatpush3.bf16.msra.mxu1 %v3644_v22  ;;  %v3694_v22 = vld [vmem:[%s4697_s1 + $0x3d0] sm:$0xff]  }
  0x46   :  { %3335 = vmatprep.subr.bf16.mxu1 %v3646_v25  ;;  %2494 = vmatprep.mubr.bf16.mxu0 %v624_v62  ;;  %v3695_v23 = vld [vmem:[%s4697_s1 + $0x310] sm:$0xff]   ;;  %v3697_v25 = vld [vmem:[%s4697_s1 + $0x348] sm:$0xff]  }
  0x47   :  { %2534 = vmatprep.mubr.bf16.mxu1 %v634_v3  ;;  %v3696_v24 = vld [vmem:[%s4697_s1 + $0x390] sm:$0xff]   ;;  %v3732_v62 = vld [vmem:[%s4697_s1 + $0x408] sm:$0xff]  }
  0x48   :  { %3314 = vmatpush3.bf16.msra.mxu0 %v3647_v26  ;;  %v3698_v26 = vld [vmem:[%s4697_s1 + $0x3c8] sm:$0xff]   ;;  %v20_v3 = vld [vmem:[%s4698_s0 + $0x10] sm:$0xff] }
  0x49   :  { %3315 = vmatprep.subr.bf16.mxu0 %v3649_v28  ;;  %3336 = vmatpush3.bf16.msra.mxu1 %v3648_v27  ;;  %v3699_v27 = vld [vmem:[%s4697_s1 + $0x308] sm:$0xff]  }
  0x4a   :  { %3337 = vmatprep.subr.bf16.mxu1 %v3650_v29  ;;  %v3700_v28 = vld [vmem:[%s4697_s1 + $0x388] sm:$0xff]   ;;  %v3701_v29 = vld [vmem:[%s4697_s1 + $0x340] sm:$0xff]  }
  0x4c   :  { %3316 = vmatpush3.bf16.msra.mxu0 %v3651_v30  ;;  %v3702_v30 = vld [vmem:[%s4697_s1 + $0x3c0] sm:$0xff]  }
  0x4d   :  { %3317 = vmatprep.subr.bf16.mxu0 %v3653_v32  ;;  %3338 = vmatpush3.bf16.msra.mxu1 %v3652_v31  ;;  %v3703_v31 = vld [vmem:[%s4697_s1 + $0x300] sm:$0xff]  }
  0x4e   :  { %3339 = vmatprep.subr.bf16.mxu1 %v3654_v33  ;;  %v3704_v32 = vld [vmem:[%s4697_s1 + $0x380] sm:$0xff]   ;;  %v617_v33 = vrot.slane %v4178_v60, %v3952_v35  ;;  %v3730_v60 = vld [vmem:[%s4697_s1 + $0x448] sm:$0xff]  }
  0x50   :  { %3318 = vmatpush3.bf16.msra.mxu0 %v3655_v34  ;;  %v3706_v34 = vld [vmem:[%s4697_s1 + $0x478] sm:$0xff]  }
  0x51   :  { %3319 = vmatprep.subr.bf16.mxu0 %v3657_v37  ;;  %3340 = vmatpush3.bf16.msra.mxu1 %v3656_v36  ;;  %v3707_v36 = vld [vmem:[%s4697_s1 + $0x4f8] sm:$0xff]  }
  0x52   :  { %3341 = vmatprep.subr.bf16.mxu1 %v3658_v38  ;;  %v3708_v37 = vld [vmem:[%s4697_s1 + $0x438] sm:$0xff]  }
  0x53   :  { %v3709_v38 = vld [vmem:[%s4697_s1 + $0x4b8] sm:$0xff]  }
  0x54   :  { %3320 = vmatpush3.bf16.msra.mxu0 %v3659_v39  ;;  %v633_v39 = vcombine.high %v617_v33, %v617_v33 }
  0x55   :  { %3321 = vmatprep.subr.bf16.mxu0 %v3661_v41  ;;  %3342 = vmatpush3.bf16.msra.mxu1 %v3660_v40  ;;  %v3710_v40 = vld [vmem:[%s4697_s1 + $0x470] sm:$0xff]  }
  0x56   :  { %3343 = vmatprep.subr.bf16.mxu1 %v3662_v42  ;;  %v3711_v41 = vld [vmem:[%s4697_s1 + $0x4f0] sm:$0xff]  }
  0x57   :  { %v3712_v42 = vld [vmem:[%s4697_s1 + $0x430] sm:$0xff]  }
  0x58   :  { %3322 = vmatpush3.bf16.msra.mxu0 %v3663_v43  ;;  %v3713_v43 = vld [vmem:[%s4697_s1 + $0x4b0] sm:$0xff]  }
  0x59   :  { %3323 = vmatprep.subr.bf16.mxu0 %v3665_v45  ;;  %3344 = vmatpush3.bf16.msra.mxu1 %v3664_v44  ;;  %v3714_v44 = vld [vmem:[%s4697_s1 + $0x468] sm:$0xff]  }
  0x5a   :  { %3345 = vmatprep.subr.bf16.mxu1 %v3666_v46  ;;  %v3715_v45 = vld [vmem:[%s4697_s1 + $0x4e8] sm:$0xff]  }
  0x5b   :  { %v3716_v46 = vld [vmem:[%s4697_s1 + $0x428] sm:$0xff]  }
  0x5c   :  { %3324 = vmatpush3.bf16.msra.mxu0 %v3667_v47  ;;  %v3717_v47 = vld [vmem:[%s4697_s1 + $0x4a8] sm:$0xff]  }
  0x5d   :  { %3325 = vmatprep.subr.bf16.mxu0 %v3669_v49  ;;  %3346 = vmatpush3.bf16.msra.mxu1 %v3668_v48  ;;  %v3718_v48 = vld [vmem:[%s4697_s1 + $0x460] sm:$0xff]  }
  0x5e   :  { %3347 = vmatprep.subr.bf16.mxu1 %v3670_v50  ;;  %v3719_v49 = vld [vmem:[%s4697_s1 + $0x4e0] sm:$0xff]  }
  0x5f   :  { %v3720_v50 = vld [vmem:[%s4697_s1 + $0x420] sm:$0xff]  }
  0x60   :  { %3326 = vmatpush3.bf16.msra.mxu0 %v3671_v51  ;;  %v3721_v51 = vld [vmem:[%s4697_s1 + $0x4a0] sm:$0xff]  }
  0x61   :  { %3355 = vmatprep.subr.bf16.mxu0 %v3673_v56  ;;  %3348 = vmatpush3.bf16.msra.mxu1 %v3672_v53  ;;  %v3723_v53 = vld [vmem:[%s4697_s1 + $0x4d8] sm:$0xff]   ;;  %v3726_v56 = vld [vmem:[%s4697_s1 + $0x450] sm:$0xff]  }
  0x62   :  { %3377 = vmatprep.subr.bf16.mxu1 %v3674_v59  ;;  %v3729_v59 = vld [vmem:[%s4697_s1 + $0x490] sm:$0xff]  }
  0x63   :  { %2495 = vmatmul.mubr.bf16.vlgmr.msra.gmra.mxu0 %v610_v58  ;;  %v3728_v58 = vld [vmem:[%s4697_s1 + $0x410] sm:$0xff]  }
  0x64   :  { %3356 = vmatpush3.bf16.msra.mxu0 %v3675_v61  ;;  %2535 = vmatmul.mubr.bf16.vlgmr.msra.gmra.mxu1 %v632_v1  ;;  %v3731_v61 = vld [vmem:[%s4697_s1 + $0x4c8] sm:$0xff]   ;;  %v3735_v1 = vld [vmem:[%s4697_s1 + $0x4c0] sm:$0xff]  }
  0x65   :  { %3357 = vmatprep.subr.bf16.mxu0 %v3677_v2  ;;  %3378 = vmatpush3.bf16.msra.mxu1 %v3676_v63  ;;  %v3733_v63 = vld [vmem:[%s4697_s1 + $0x488] sm:$0xff]   ;;  %v3736_v2 = vld [vmem:[%s4697_s1 + $0x400] sm:$0xff]  }
  0x66   :  { %2574 = vmatprep.mubr.bf16.mxu0 %v631_v5  ;;  %3379 = vmatprep.subr.bf16.mxu1 %v3678_v4  ;;  %v3737_v4 = vld [vmem:[%s4697_s1 + $0x480] sm:$0xff]   ;;  %v643_v5 = vrot.slane %v20_v3, %v3952_v35 }
  0x67   :  { %2614 = vmatprep.mubr.bf16.mxu1 %v635_v8 }
  0x68   :  { %3358 = vmatpush3.bf16.msra.mxu0 %v3679_v6  ;;  %v636_v6 = vcombine.high %v20_v3, %v20_v3  ;;  %v651_v8 = vcombine.high %v643_v5, %v643_v5  ;;  %v3787_v3 = vld [vmem:[%s4697_s1 + $0x658] sm:$0xff]  }
  0x69   :  { %3359 = vmatprep.subr.bf16.mxu0 %v3681_v9  ;;  %3380 = vmatpush3.bf16.msra.mxu1 %v3680_v7  ;;  %v3738_v7 = vld [vmem:[%s4697_s1 + $0x578] sm:$0xff]   ;;  %v659_v9 = vrot.slane %v643_v5, %v3952_v35 }
  0x6a   :  { %3381 = vmatprep.subr.bf16.mxu1 %v3682_v10  ;;  %v3739_v10 = vld [vmem:[%s4697_s1 + $0x5f8] sm:$0xff]  }
  0x6b   :  { %v3789_v5 = vld [vmem:[%s4697_s1 + $0x618] sm:$0xff]  }
  0x6c   :  { %3360 = vmatpush3.bf16.msra.mxu0 %v3683_v11  ;;  %v4384_v11 = vrot.slane %v636_v6, %v3952_v35  ;;  %v3790_v6 = vld [vmem:[%s4697_s1 + $0x698] sm:$0xff]  }
  0x6d   :  { %3361 = vmatprep.subr.bf16.mxu0 %v3685_v13  ;;  %3382 = vmatpush3.bf16.msra.mxu1 %v3684_v12  ;;  %v3740_v12 = vld [vmem:[%s4697_s1 + $0x538] sm:$0xff]   ;;  %v673_v13 = vrot.slane %v651_v8, %v3952_v35  ;;  %v3792_v8 = vld [vmem:[%s4697_s1 + $0x6d0] sm:$0xff]  }
  0x6e   :  { %3383 = vmatprep.subr.bf16.mxu1 %v3686_v14  ;;  %v3741_v14 = vld [vmem:[%s4697_s1 + $0x5b8] sm:$0xff]  }
  0x70   :  { %3362 = vmatpush3.bf16.msra.mxu0 %v3687_v15  ;;  %v652_v15 = vcombine.high %v4384_v11, %v4384_v11 }
  0x71   :  { %3363 = vmatprep.subr.bf16.mxu0 %v3689_v17  ;;  %3384 = vmatpush3.bf16.msra.mxu1 %v3688_v16  ;;  %v681_v16 = vcombine.high %v659_v9, %v659_v9  ;;  %v3742_v17 = vld [vmem:[%s4697_s1 + $0x570] sm:$0xff]  }
  0x72   :  { %3385 = vmatprep.subr.bf16.mxu1 %v3690_v18  ;;  %v683_v18 = vcombine.high %v673_v13, %v673_v13 }
  0x74   :  { %3364 = vmatpush3.bf16.msra.mxu0 %v3691_v19  ;;  %v3743_v19 = vld [vmem:[%s4697_s1 + $0x5f0] sm:$0xff]  }
  0x75   :  { %3365 = vmatprep.subr.bf16.mxu0 %v3693_v21  ;;  %3386 = vmatpush3.bf16.msra.mxu1 %v3692_v20  ;;  %v680_v20 = vrot.slane %v652_v15, %v3952_v35  ;;  %v3744_v21 = vld [vmem:[%s4697_s1 + $0x530] sm:$0xff]   ;;  %v3799_v15 = vld [vmem:[%s4697_s1 + $0x640] sm:$0xff]  }
  0x76   :  { %3387 = vmatprep.subr.bf16.mxu1 %v3694_v22  ;;  %v3745_v22 = vld [vmem:[%s4697_s1 + $0x5b0] sm:$0xff]  }
  0x78   :  { %3366 = vmatpush3.bf16.msra.mxu0 %v3695_v23  ;;  %v684_v23 = vcombine.high %v680_v20, %v680_v20 }
  0x79   :  { %3367 = vmatprep.subr.bf16.mxu0 %v3697_v25  ;;  %3388 = vmatpush3.bf16.msra.mxu1 %v3696_v24  ;;  %v3746_v24 = vld [vmem:[%s4697_s1 + $0x568] sm:$0xff]  }
  0x7a   :  { %3389 = vmatprep.subr.bf16.mxu1 %v3698_v26  ;;  %v3747_v25 = vld [vmem:[%s4697_s1 + $0x5e8] sm:$0xff]  }
  0x7b   :  { %v3748_v26 = vld [vmem:[%s4697_s1 + $0x528] sm:$0xff]  }
  0x7c   :  { %3368 = vmatpush3.bf16.msra.mxu0 %v3699_v27  ;;  %v3749_v27 = vld [vmem:[%s4697_s1 + $0x5a8] sm:$0xff]  }
  0x7d   :  { %3369 = vmatprep.subr.bf16.mxu0 %v3701_v29  ;;  %3390 = vmatpush3.bf16.msra.mxu1 %v3700_v28  ;;  %v3750_v28 = vld [vmem:[%s4697_s1 + $0x560] sm:$0xff]  }
  0x7e   :  { %3391 = vmatprep.subr.bf16.mxu1 %v3702_v30  ;;  %v3751_v29 = vld [vmem:[%s4697_s1 + $0x5e0] sm:$0xff]  }
  0x7f   :  { %v3752_v30 = vld [vmem:[%s4697_s1 + $0x520] sm:$0xff]  }
  0x80   :  { %3370 = vmatpush3.bf16.msra.mxu0 %v3703_v31  ;;  %v3753_v31 = vld [vmem:[%s4697_s1 + $0x5a0] sm:$0xff]  }
  0x81   :  { %3399 = vmatprep.subr.bf16.mxu0 %v3706_v34  ;;  %3392 = vmatpush3.bf16.msra.mxu1 %v3704_v32  ;;  %v3754_v32 = vld [vmem:[%s4697_s1 + $0x558] sm:$0xff]  }
  0x82   :  { %3421 = vmatprep.subr.bf16.mxu1 %v3707_v36  ;;  %v3756_v34 = vld [vmem:[%s4697_s1 + $0x518] sm:$0xff]  }
  0x83   :  { %2575 = vmatmul.mubr.bf16.vlgmr.msra.gmra.mxu0 %v617_v33  ;;  %v3755_v33 = vld [vmem:[%s4697_s1 + $0x5d8] sm:$0xff]  }
  0x84   :  { %3400 = vmatpush3.bf16.msra.mxu0 %v3708_v37  ;;  %2615 = vmatmul.mubr.bf16.vlgmr.msra.gmra.mxu1 %v633_v39  ;;  %v3757_v36 = vld [vmem:[%s4697_s1 + $0x598] sm:$0xff]   ;;  %v3758_v37 = vld [vmem:[%s4697_s1 + $0x550] sm:$0xff]  }
  0x85   :  { %3401 = vmatprep.subr.bf16.mxu0 %v3710_v40  ;;  %3422 = vmatpush3.bf16.msra.mxu1 %v3709_v38  ;;  %v3759_v38 = vld [vmem:[%s4697_s1 + $0x5d0] sm:$0xff]  }
  0x86   :  { %3423 = vmatprep.subr.bf16.mxu1 %v3711_v41  ;;  %2654 = vmatprep.mubr.bf16.mxu0 %v673_v13  ;;  %v3760_v39 = vld [vmem:[%s4697_s1 + $0x510] sm:$0xff]   ;;  %v3762_v41 = vld [vmem:[%s4697_s1 + $0x548] sm:$0xff]  }
  0x87   :  { %2694 = vmatprep.mubr.bf16.mxu1 %v683_v18  ;;  %v3761_v40 = vld [vmem:[%s4697_s1 + $0x590] sm:$0xff]   ;;  %v3797_v13 = vld [vmem:[%s4697_s1 + $0x608] sm:$0xff]   ;;  %v21_v18 = vld [vmem:[%s4698_s0 + $0x18] sm:$0xff] }
  0x88   :  { %3402 = vmatpush3.bf16.msra.mxu0 %v3712_v42  ;;  %v3763_v42 = vld [vmem:[%s4697_s1 + $0x5c8] sm:$0xff]  }
  0x89   :  { %3403 = vmatprep.subr.bf16.mxu0 %v3714_v44  ;;  %3424 = vmatpush3.bf16.msra.mxu1 %v3713_v43  ;;  %v3764_v43 = vld [vmem:[%s4697_s1 + $0x508] sm:$0xff]  }
  0x8a   :  { %3425 = vmatprep.subr.bf16.mxu1 %v3715_v45  ;;  %v3765_v44 = vld [vmem:[%s4697_s1 + $0x588] sm:$0xff]   ;;  %v3766_v45 = vld [vmem:[%s4697_s1 + $0x540] sm:$0xff]  }
  0x8c   :  { %3404 = vmatpush3.bf16.msra.mxu0 %v3716_v46  ;;  %v3767_v46 = vld [vmem:[%s4697_s1 + $0x5c0] sm:$0xff]  }
  0x8d   :  { %3405 = vmatprep.subr.bf16.mxu0 %v3718_v48  ;;  %3426 = vmatpush3.bf16.msra.mxu1 %v3717_v47  ;;  %v3768_v47 = vld [vmem:[%s4697_s1 + $0x500] sm:$0xff]  }
  0x8e   :  { %3427 = vmatprep.subr.bf16.mxu1 %v3719_v49  ;;  %v3769_v48 = vld [vmem:[%s4697_s1 + $0x580] sm:$0xff]   ;;  %v666_v49 = vrot.slane %v4384_v11, %v3952_v35  ;;  %v3795_v11 = vld [vmem:[%s4697_s1 + $0x648] sm:$0xff]  }
  0x90   :  { %3406 = vmatpush3.bf16.msra.mxu0 %v3720_v50  ;;  %v3771_v50 = vld [vmem:[%s4697_s1 + $0x678] sm:$0xff]  }
  0x91   :  { %3407 = vmatprep.subr.bf16.mxu0 %v3722_v52  ;;  %3428 = vmatpush3.bf16.msra.mxu1 %v3721_v51  ;;  %v3772_v51 = vld [vmem:[%s4697_s1 + $0x6f8] sm:$0xff]  }
  0x92   :  { %3429 = vmatprep.subr.bf16.mxu1 %v3723_v53  ;;  %v3773_v52 = vld [vmem:[%s4697_s1 + $0x638] sm:$0xff]  }
  0x93   :  { %v3774_v53 = vld [vmem:[%s4697_s1 + $0x6b8] sm:$0xff]  }
  0x94   :  { %3408 = vmatpush3.bf16.msra.mxu0 %v3724_v54  ;;  %v682_v54 = vcombine.high %v666_v49, %v666_v49 }
  0x95   :  { %3409 = vmatprep.subr.bf16.mxu0 %v3726_v56  ;;  %3430 = vmatpush3.bf16.msra.mxu1 %v3725_v55  ;;  %v3775_v55 = vld [vmem:[%s4697_s1 + $0x670] sm:$0xff]  }
  0x96   :  { %3431 = vmatprep.subr.bf16.mxu1 %v3727_v57  ;;  %v3776_v56 = vld [vmem:[%s4697_s1 + $0x6f0] sm:$0xff]  }
  0x97   :  { %v3777_v57 = vld [vmem:[%s4697_s1 + $0x630] sm:$0xff]  }
  0x98   :  { %3410 = vmatpush3.bf16.msra.mxu0 %v3728_v58  ;;  %v3778_v58 = vld [vmem:[%s4697_s1 + $0x6b0] sm:$0xff]  }
  0x99   :  { %3411 = vmatprep.subr.bf16.mxu0 %v3730_v60  ;;  %3432 = vmatpush3.bf16.msra.mxu1 %v3729_v59  ;;  %v3779_v59 = vld [vmem:[%s4697_s1 + $0x668] sm:$0xff]  }
  0x9a   :  { %3433 = vmatprep.subr.bf16.mxu1 %v3731_v61  ;;  %v3780_v60 = vld [vmem:[%s4697_s1 + $0x6e8] sm:$0xff]  }
  0x9b   :  { %v3781_v61 = vld [vmem:[%s4697_s1 + $0x628] sm:$0xff]  }
  0x9c   :  { %3412 = vmatpush3.bf16.msra.mxu0 %v3732_v62  ;;  %v3782_v62 = vld [vmem:[%s4697_s1 + $0x6a8] sm:$0xff]  }
  0x9d   :  { %3413 = vmatprep.subr.bf16.mxu0 %v3734_v0  ;;  %3434 = vmatpush3.bf16.msra.mxu1 %v3733_v63  ;;  %v3783_v63 = vld [vmem:[%s4697_s1 + $0x660] sm:$0xff]  }
  0x9e   :  { %3435 = vmatprep.subr.bf16.mxu1 %v3735_v1  ;;  %v3784_v0 = vld [vmem:[%s4697_s1 + $0x6e0] sm:$0xff]  }
  0x9f   :  { %v3785_v1 = vld [vmem:[%s4697_s1 + $0x620] sm:$0xff]  }
  0xa0   :  { %3414 = vmatpush3.bf16.msra.mxu0 %v3736_v2  ;;  %v3786_v2 = vld [vmem:[%s4697_s1 + $0x6a0] sm:$0xff]  }
  0xa1   :  { %3443 = vmatprep.subr.bf16.mxu0 %v3738_v7  ;;  %3436 = vmatpush3.bf16.msra.mxu1 %v3737_v4  ;;  %v3788_v4 = vld [vmem:[%s4697_s1 + $0x6d8] sm:$0xff]   ;;  %v3791_v7 = vld [vmem:[%s4697_s1 + $0x650] sm:$0xff]  }
  0xa2   :  { %3465 = vmatprep.subr.bf16.mxu1 %v3739_v10  ;;  %v3794_v10 = vld [vmem:[%s4697_s1 + $0x690] sm:$0xff]  }
  0xa3   :  { %2655 = vmatmul.mubr.bf16.vlgmr.msra.gmra.mxu0 %v659_v9  ;;  %v3793_v9 = vld [vmem:[%s4697_s1 + $0x610] sm:$0xff]  }
  0xa4   :  { %3444 = vmatpush3.bf16.msra.mxu0 %v3740_v12  ;;  %2695 = vmatmul.mubr.bf16.vlgmr.msra.gmra.mxu1 %v681_v16  ;;  %v3796_v12 = vld [vmem:[%s4697_s1 + $0x6c8] sm:$0xff]   ;;  %v3800_v16 = vld [vmem:[%s4697_s1 + $0x6c0] sm:$0xff]  }
  0xa5   :  { %3445 = vmatprep.subr.bf16.mxu0 %v3742_v17  ;;  %3466 = vmatpush3.bf16.msra.mxu1 %v3741_v14  ;;  %v3798_v14 = vld [vmem:[%s4697_s1 + $0x688] sm:$0xff]   ;;  %v3801_v17 = vld [vmem:[%s4697_s1 + $0x600] sm:$0xff]  }
  0xa6   :  { %2734 = vmatprep.mubr.bf16.mxu0 %v680_v20  ;;  %3467 = vmatprep.subr.bf16.mxu1 %v3743_v19  ;;  %v692_v19 = vrot.slane %v21_v18, %v3952_v35  ;;  %v3803_v20 = vld [vmem:[%s4697_s1 + $0x778] sm:$0xff]  }
  0xa7   :  { %2774 = vmatprep.mubr.bf16.mxu1 %v684_v23 }
  0xa8   :  { %3446 = vmatpush3.bf16.msra.mxu0 %v3744_v21  ;;  %v685_v21 = vcombine.high %v21_v18, %v21_v18  ;;  %v700_v23 = vcombine.high %v692_v19, %v692_v19 }
  0xa9   :  { %3447 = vmatprep.subr.bf16.mxu0 %v3746_v24  ;;  %3468 = vmatpush3.bf16.msra.mxu1 %v3745_v22  ;;  %v3802_v22 = vld [vmem:[%s4697_s1 + $0x680] sm:$0xff]   ;;  %v708_v24 = vrot.slane %v692_v19, %v3952_v35 }
  0xaa   :  { %3469 = vmatprep.subr.bf16.mxu1 %v3747_v25  ;;  %v3804_v25 = vld [vmem:[%s4697_s1 + $0x7f8] sm:$0xff]  }
  0xac   :  { %3448 = vmatpush3.bf16.msra.mxu0 %v3748_v26  ;;  %v4590_v26 = vrot.slane %v685_v21, %v3952_v35 }
  0xad   :  { %3449 = vmatprep.subr.bf16.mxu0 %v3750_v28  ;;  %3470 = vmatpush3.bf16.msra.mxu1 %v3749_v27  ;;  %v722_v27 = vrot.slane %v700_v23, %v3952_v35  ;;  %v3805_v28 = vld [vmem:[%s4697_s1 + $0x738] sm:$0xff]  }
  0xae   :  { %3471 = vmatprep.subr.bf16.mxu1 %v3751_v29  ;;  %v701_v29 = vcombine.high %v4590_v26, %v4590_v26 }
  0xb0   :  { %3450 = vmatpush3.bf16.msra.mxu0 %v3752_v30  ;;  %v730_v30 = vcombine.high %v708_v24, %v708_v24 }
  0xb1   :  { %3451 = vmatprep.subr.bf16.mxu0 %v3754_v32  ;;  %3472 = vmatpush3.bf16.msra.mxu1 %v3753_v31  ;;  %v3807_v31 = vld [vmem:[%s4697_s1 + $0x770] sm:$0xff]   ;;  %v732_v32 = vcombine.high %v722_v27, %v722_v27 }
  0xb2   :  { %3473 = vmatprep.subr.bf16.mxu1 %v3755_v33 }
  0xb4   :  { %3452 = vmatpush3.bf16.msra.mxu0 %v3756_v34  ;;  %v3806_v34 = vld [vmem:[%s4697_s1 + $0x7b8] sm:$0xff]  }
  0xb5   :  { %3453 = vmatprep.subr.bf16.mxu0 %v3758_v37  ;;  %3474 = vmatpush3.bf16.msra.mxu1 %v3757_v36  ;;  %v729_v36 = vrot.slane %v701_v29, %v3952_v35  ;;  %v3808_v37 = vld [vmem:[%s4697_s1 + $0x7f0] sm:$0xff]  }
  0xb6   :  { %3475 = vmatprep.subr.bf16.mxu1 %v3759_v38 }
  0xb8   :  { %3454 = vmatpush3.bf16.msra.mxu0 %v3760_v39 }
  0xb9   :  { %3455 = vmatprep.subr.bf16.mxu0 %v3762_v41  ;;  %3476 = vmatpush3.bf16.msra.mxu1 %v3761_v40  ;;  %v3809_v40 = vld [vmem:[%s4697_s1 + $0x730] sm:$0xff]   ;;  %v733_v41 = vcombine.high %v729_v36, %v729_v36 }
  0xba   :  { %3477 = vmatprep.subr.bf16.mxu1 %v3763_v42 }
  0xbc   :  { %3456 = vmatpush3.bf16.msra.mxu0 %v3764_v43  ;;  %v3811_v43 = vld [vmem:[%s4697_s1 + $0x768] sm:$0xff]  }
  0xbd   :  { %3457 = vmatprep.subr.bf16.mxu0 %v3766_v45  ;;  %3478 = vmatpush3.bf16.msra.mxu1 %v3765_v44 }
  0xbe   :  { %3479 = vmatprep.subr.bf16.mxu1 %v3767_v46  ;;  %v3810_v46 = vld [vmem:[%s4697_s1 + $0x7b0] sm:$0xff]  }
  0xc0   :  { %3458 = vmatpush3.bf16.msra.mxu0 %v3768_v47 }
  0xc1   :  { %3487 = vmatprep.subr.bf16.mxu0 %v3771_v50  ;;  %3480 = vmatpush3.bf16.msra.mxu1 %v3769_v48  ;;  %v3812_v48 = vld [vmem:[%s4697_s1 + $0x7e8] sm:$0xff]  }
  0xc2   :  { %3509 = vmatprep.subr.bf16.mxu1 %v3772_v51  ;;  %v3813_v51 = vld [vmem:[%s4697_s1 + $0x728] sm:$0xff]  }
  0xc3   :  { %2735 = vmatmul.mubr.bf16.vlgmr.msra.gmra.mxu0 %v666_v49 }
  0xc4   :  { %3488 = vmatpush3.bf16.msra.mxu0 %v3773_v52  ;;  %2775 = vmatmul.mubr.bf16.vlgmr.msra.gmra.mxu1 %v682_v54 }
  0xc5   :  { %3489 = vmatprep.subr.bf16.mxu0 %v3775_v55  ;;  %3510 = vmatpush3.bf16.msra.mxu1 %v3774_v53  ;;  %v3815_v53 = vld [vmem:[%s4697_s1 + $0x760] sm:$0xff]   ;;  %v3814_v55 = vld [vmem:[%s4697_s1 + $0x7a8] sm:$0xff]  }
  0xc6   :  { %3511 = vmatprep.subr.bf16.mxu1 %v3776_v56  ;;  %2814 = vmatprep.mubr.bf16.mxu0 %v722_v27  ;;  %v3816_v56 = vld [vmem:[%s4697_s1 + $0x7e0] sm:$0xff]  }
  0xc7   :  { %2854 = vmatprep.mubr.bf16.mxu1 %v732_v32 }
  0xc8   :  { %3490 = vmatpush3.bf16.msra.mxu0 %v3777_v57  ;;  %v3817_v57 = vld [vmem:[%s4697_s1 + $0x720] sm:$0xff]  }
  0xc9   :  { %3491 = vmatprep.subr.bf16.mxu0 %v3779_v59  ;;  %3512 = vmatpush3.bf16.msra.mxu1 %v3778_v58  ;;  %v3819_v58 = vld [vmem:[%s4697_s1 + $0x758] sm:$0xff]   ;;  %v3818_v59 = vld [vmem:[%s4697_s1 + $0x7a0] sm:$0xff]  }
  0xca   :  { %3513 = vmatprep.subr.bf16.mxu1 %v3780_v60  ;;  %v3820_v60 = vld [vmem:[%s4697_s1 + $0x7d8] sm:$0xff]  }
  0xcc   :  { %3492 = vmatpush3.bf16.msra.mxu0 %v3781_v61  ;;  %v3821_v61 = vld [vmem:[%s4697_s1 + $0x718] sm:$0xff]  }
  0xcd   :  { %3493 = vmatprep.subr.bf16.mxu0 %v3783_v63  ;;  %3514 = vmatpush3.bf16.msra.mxu1 %v3782_v62  ;;  %v3823_v62 = vld [vmem:[%s4697_s1 + $0x750] sm:$0xff]   ;;  %v3822_v63 = vld [vmem:[%s4697_s1 + $0x798] sm:$0xff]  }
  0xce   :  { %3515 = vmatprep.subr.bf16.mxu1 %v3784_v0  ;;  %v3824_v0 = vld [vmem:[%s4697_s1 + $0x7d0] sm:$0xff]  }
  0xd0   :  { %3494 = vmatpush3.bf16.msra.mxu0 %v3785_v1  ;;  %v3825_v1 = vld [vmem:[%s4697_s1 + $0x710] sm:$0xff]  }
  0xd1   :  { %3495 = vmatprep.subr.bf16.mxu0 %v3787_v3  ;;  %3516 = vmatpush3.bf16.msra.mxu1 %v3786_v2  ;;  %v3827_v2 = vld [vmem:[%s4697_s1 + $0x748] sm:$0xff]   ;;  %v3826_v3 = vld [vmem:[%s4697_s1 + $0x790] sm:$0xff]  }
  0xd2   :  { %3517 = vmatprep.subr.bf16.mxu1 %v3788_v4  ;;  %v3828_v4 = vld [vmem:[%s4697_s1 + $0x7c8] sm:$0xff]  }
  0xd4   :  { %3496 = vmatpush3.bf16.msra.mxu0 %v3789_v5  ;;  %v3829_v5 = vld [vmem:[%s4697_s1 + $0x708] sm:$0xff]  }
  0xd5   :  { %3497 = vmatprep.subr.bf16.mxu0 %v3791_v7  ;;  %3518 = vmatpush3.bf16.msra.mxu1 %v3790_v6  ;;  %v3831_v6 = vld [vmem:[%s4697_s1 + $0x740] sm:$0xff]   ;;  %v3830_v7 = vld [vmem:[%s4697_s1 + $0x788] sm:$0xff]  }
  0xd6   :  { %3519 = vmatprep.subr.bf16.mxu1 %v3792_v8  ;;  %v3832_v8 = vld [vmem:[%s4697_s1 + $0x7c0] sm:$0xff]  }
  0xd8   :  { %3498 = vmatpush3.bf16.msra.mxu0 %v3793_v9  ;;  %v3833_v9 = vld [vmem:[%s4697_s1 + $0x700] sm:$0xff]  }
  0xd9   :  { %3499 = vmatprep.subr.bf16.mxu0 %v3795_v11  ;;  %3520 = vmatpush3.bf16.msra.mxu1 %v3794_v10  ;;  %v715_v10 = vrot.slane %v4590_v26, %v3952_v35  ;;  %v3834_v11 = vld [vmem:[%s4697_s1 + $0x780] sm:$0xff]  }
  0xda   :  { %3521 = vmatprep.subr.bf16.mxu1 %v3796_v12 }
  0xdb   :  { %v731_v12 = vcombine.high %v715_v10, %v715_v10 }
  0xdc   :  { %3500 = vmatpush3.bf16.msra.mxu0 %v3797_v13 }
  0xdd   :  { %3501 = vmatprep.subr.bf16.mxu0 %v3799_v15  ;;  %3522 = vmatpush3.bf16.msra.mxu1 %v3798_v14 }
  0xde   :  { %3523 = vmatprep.subr.bf16.mxu1 %v3800_v16 }
  0xe0   :  { %3502 = vmatpush3.bf16.msra.mxu0 %v3801_v17 }
  0xe1   :  { %3531 = vmatprep.subr.bf16.mxu0 %v3803_v20  ;;  %3524 = vmatpush3.bf16.msra.mxu1 %v3802_v22 }
  0xe2   :  { %3553 = vmatprep.subr.bf16.mxu1 %v3804_v25 }
  0xe3   :  { %v3239_v33 = vpop.f32.mrf.mxu0  ;;  %2815 = vmatmul.mubr.bf16.vlgmr.msra.gmra.mxu0 %v708_v24 }
  0xe4   :  { %v3261_v38 = vpop.f32.mrf.mxu1  ;;  %3532 = vmatpush3.bf16.msra.mxu0 %v3805_v28  ;;  %2855 = vmatmul.mubr.bf16.vlgmr.msra.gmra.mxu1 %v730_v30 }
  0xe5   :  { %v3240_v39 = vpop.f32.mrf.mxu0  ;;  %3533 = vmatprep.subr.bf16.mxu0 %v3807_v31  ;;  %3554 = vmatpush3.bf16.msra.mxu1 %v3806_v34 }
  0xe6   :  { %v3241_v42 = vadd.f32 %v3240_v39, %v3239_v33  ;;  %v3262_v44 = vpop.f32.mrf.mxu1  ;;  %2894 = vmatprep.mubr.bf16.mxu0 %v729_v36  ;;  %3555 = vmatprep.subr.bf16.mxu1 %v3808_v37 }
  0xe7   :  { %v3242_v45 = vpop.f32.mrf.mxu0  ;;  %v3263_v47 = vadd.f32 %v3262_v44, %v3261_v38  ;;  %2934 = vmatprep.mubr.bf16.mxu1 %v733_v41 }
  0xe8   :  { %v3264_v49 = vpop.f32.mrf.mxu1  ;;  %3534 = vmatpush3.bf16.msra.mxu0 %v3809_v40 }
  0xe9   :  { %v3243_v50 = vpop.f32.mrf.mxu0  ;;  %v2377_v52 = vadd.f32 %v3263_v47, %v3241_v42  ;;  %3535 = vmatprep.subr.bf16.mxu0 %v3811_v43  ;;  %3556 = vmatpush3.bf16.msra.mxu1 %v3810_v46 }
  0xea   :  { %v3265_v54 = vpop.f32.mrf.mxu1  ;;  %3557 = vmatprep.subr.bf16.mxu1 %v3812_v48 }
  0xec   :  { %3536 = vmatpush3.bf16.msra.mxu0 %v3813_v51 }
  0xed   :  { %3537 = vmatprep.subr.bf16.mxu0 %v3815_v53  ;;  %3558 = vmatpush3.bf16.msra.mxu1 %v3814_v55 }
  0xee   :  { %3559 = vmatprep.subr.bf16.mxu1 %v3816_v56 }
  0xf0   :  { %3538 = vmatpush3.bf16.msra.mxu0 %v3817_v57 }
  0xf1   :  { %3539 = vmatprep.subr.bf16.mxu0 %v3819_v58  ;;  %3560 = vmatpush3.bf16.msra.mxu1 %v3818_v59 }
  0xf2   :  { %3561 = vmatprep.subr.bf16.mxu1 %v3820_v60 }
  0xf4   :  { %3540 = vmatpush3.bf16.msra.mxu0 %v3821_v61 }
  0xf5   :  { %3541 = vmatprep.subr.bf16.mxu0 %v3823_v62  ;;  %3562 = vmatpush3.bf16.msra.mxu1 %v3822_v63 }
  0xf6   :  { %3563 = vmatprep.subr.bf16.mxu1 %v3824_v0 }
  0xf8   :  { %3542 = vmatpush3.bf16.msra.mxu0 %v3825_v1 }
  0xf9   :  { %3543 = vmatprep.subr.bf16.mxu0 %v3827_v2  ;;  %3564 = vmatpush3.bf16.msra.mxu1 %v3826_v3 }
  0xfa   :  { %3565 = vmatprep.subr.bf16.mxu1 %v3828_v4 }
  0xfc   :  { %3544 = vmatpush3.bf16.msra.mxu0 %v3829_v5 }
  0xfd   :  { %3545 = vmatprep.subr.bf16.mxu0 %v3831_v6  ;;  %3566 = vmatpush3.bf16.msra.mxu1 %v3830_v7 }
  0xfe   :  { %3567 = vmatprep.subr.bf16.mxu1 %v3832_v8 }
 0x100   :  { %3546 = vmatpush3.bf16.msra.mxu0 %v3833_v9 }
 0x101   :  { %3568 = vmatpush3.bf16.msra.mxu1 %v3834_v11 }
 0x103   :  { %v3283_v13 = vpop.f32.mrf.mxu0  ;;  %2895 = vmatmul.mubr.bf16.vlgmr.msra.gmra.mxu0 %v715_v10 }
 0x104   :  { %v3305_v14 = vpop.f32.mrf.mxu1  ;;  %2935 = vmatmul.mubr.bf16.vlgmr.msra.gmra.mxu1 %v731_v12 }
 0x105   :  { %v3284_v15 = vpop.f32.mrf.mxu0 }
 0x106   :  { %v3285_v16 = vadd.f32 %v3284_v15, %v3283_v13  ;;  %v3306_v17 = vpop.f32.mrf.mxu1 }
 0x107   :  { %v3286_v18 = vpop.f32.mrf.mxu0  ;;  %v3307_v20 = vadd.f32 %v3306_v17, %v3305_v14 }
 0x108   :  { %v2417_v19 = vadd.f32 %v3285_v16, %v2377_v52  ;;  %v3308_v35 = vpop.f32.mrf.mxu1 }
 0x109   :  { %v3287_v21 = vpop.f32.mrf.mxu0 }
 0x10a   :  { %v2457_v22 = vadd.f32 %v3307_v20, %v2417_v19  ;;  %v3309_v23 = vpop.f32.mrf.mxu1 }
 0x123   :  { %v3327_v24 = vpop.f32.mrf.mxu0 }
 0x124   :  { %v3349_v25 = vpop.f32.mrf.mxu1 }
 0x125   :  { %v3328_v26 = vpop.f32.mrf.mxu0 }
 0x126   :  { %v3329_v27 = vadd.f32 %v3328_v26, %v3327_v24  ;;  %v3350_v28 = vpop.f32.mrf.mxu1 }
 0x127   :  { %v3330_v29 = vpop.f32.mrf.mxu0  ;;  %v3351_v31 = vadd.f32 %v3350_v28, %v3349_v25  ;;  %v3221_v28 = vld [vmem:[%s4699_s2] ss:$0 sm:$0xff] }
 0x128   :  { %v2497_v30 = vadd.f32 %v3329_v27, %v2457_v22  ;;  %v3352_v32 = vpop.f32.mrf.mxu1 }
 0x129   :  { %v3331_v33 = vpop.f32.mrf.mxu0  ;;  %v3222_v32 = vld [vmem:[%s4700_s3] ss:$0 sm:$0xff] }
 0x12a   :  { %v2537_v34 = vadd.f32 %v3351_v31, %v2497_v30  ;;  %v3353_v36 = vpop.f32.mrf.mxu1 }
 0x143   :  { %v3371_v37 = vpop.f32.mrf.mxu0 }
 0x144   :  { %v3393_v38 = vpop.f32.mrf.mxu1 }
 0x145   :  { %v3372_v39 = vpop.f32.mrf.mxu0 }
 0x146   :  { %v3373_v40 = vadd.f32 %v3372_v39, %v3371_v37  ;;  %v3394_v41 = vpop.f32.mrf.mxu1 }
 0x147   :  { %v3374_v42 = vpop.f32.mrf.mxu0  ;;  %v3395_v44 = vadd.f32 %v3394_v41, %v3393_v38 }
 0x148   :  { %v2577_v43 = vadd.f32 %v3373_v40, %v2537_v34  ;;  %v3396_v45 = vpop.f32.mrf.mxu1 }
 0x149   :  { %v3375_v46 = vpop.f32.mrf.mxu0 }
 0x14a   :  { %v2617_v47 = vadd.f32 %v3395_v44, %v2577_v43  ;;  %v3397_v48 = vpop.f32.mrf.mxu1 }
 0x163   :  { %v3415_v49 = vpop.f32.mrf.mxu0 }
 0x164   :  { %v3437_v50 = vpop.f32.mrf.mxu1 }
 0x165   :  { %v3416_v51 = vpop.f32.mrf.mxu0 }
 0x166   :  { %v3417_v52 = vadd.f32 %v3416_v51, %v3415_v49  ;;  %v3438_v53 = vpop.f32.mrf.mxu1 }
 0x167   :  { %v3418_v54 = vpop.f32.mrf.mxu0  ;;  %v3439_v56 = vadd.f32 %v3438_v53, %v3437_v50 }
 0x168   :  { %v2657_v55 = vadd.f32 %v3417_v52, %v2617_v47  ;;  %v3440_v57 = vpop.f32.mrf.mxu1 }
 0x169   :  { %v3419_v58 = vpop.f32.mrf.mxu0 }
 0x16a   :  { %v2697_v59 = vadd.f32 %v3439_v56, %v2657_v55  ;;  %v3441_v60 = vpop.f32.mrf.mxu1 }
 0x183   :  { %v3459_v61 = vpop.f32.mrf.mxu0 }
 0x184   :  { %v3481_v62 = vpop.f32.mrf.mxu1 }
 0x185   :  { %v3460_v63 = vpop.f32.mrf.mxu0 }
 0x186   :  { %v3482_v0 = vpop.f32.mrf.mxu1  ;;  %v3461_v13 = vadd.f32 %v3460_v63, %v3459_v61 }
 0x187   :  { %v3462_v1 = vpop.f32.mrf.mxu0  ;;  %v3483_v15 = vadd.f32 %v3482_v0, %v3481_v62 }
 0x188   :  { %v3484_v2 = vpop.f32.mrf.mxu1  ;;  %v2737_v14 = vadd.f32 %v3461_v13, %v2697_v59 }
 0x189   :  { %v3463_v3 = vpop.f32.mrf.mxu0 }
 0x18a   :  { %v3485_v4 = vpop.f32.mrf.mxu1  ;;  %v2777_v17 = vadd.f32 %v3483_v15, %v2737_v14 }
 0x1a3   :  { %v3503_v5 = vpop.f32.mrf.mxu0 }
 0x1a4   :  { %v3525_v6 = vpop.f32.mrf.mxu1 }
 0x1a5   :  { %v3504_v7 = vpop.f32.mrf.mxu0 }
 0x1a6   :  { %v3526_v8 = vpop.f32.mrf.mxu1  ;;  %v3505_v16 = vadd.f32 %v3504_v7, %v3503_v5 }
 0x1a7   :  { %v3506_v9 = vpop.f32.mrf.mxu0  ;;  %v3527_v19 = vadd.f32 %v3526_v8, %v3525_v6 }
 0x1a8   :  { %v3528_v10 = vpop.f32.mrf.mxu1  ;;  %v2817_v18 = vadd.f32 %v3505_v16, %v2777_v17 }
 0x1a9   :  { %v3507_v11 = vpop.f32.mrf.mxu0 }
 0x1aa   :  { %v3529_v12 = vpop.f32.mrf.mxu1  ;;  %v2857_v22 = vadd.f32 %v3527_v19, %v2817_v18 }
 0x1c3   :  { %v3547_v20 = vpop.f32.mrf.mxu0 }
 0x1c4   :  { %v3569_v35 = vpop.f32.mrf.mxu1 }
 0x1c5   :  { %v3548_v21 = vpop.f32.mrf.mxu0 }
 0x1c6   :  { %v3549_v23 = vadd.f32 %v3548_v21, %v3547_v20  ;;  %v3570_v24 = vpop.f32.mrf.mxu1 }
 0x1c7   :  { %v3550_v25 = vpop.f32.mrf.mxu0  ;;  %v3571_v27 = vadd.f32 %v3570_v24, %v3569_v35 }
 0x1c8   :  { %v2897_v26 = vadd.f32 %v3549_v23, %v2857_v22  ;;  %v3572_v29 = vpop.f32.mrf.mxu1 }
 0x1c9   :  { %v3551_v30 = vpop.f32.mrf.mxu0 }
 0x1ca   :  { %v2937_v31 = vadd.f32 %v3571_v27, %v2897_v26  ;;  %v3573_v33 = vpop.f32.mrf.mxu1 }
 0x1cc   :  { %v2949_v34 = vmul.f32 %v3221_v28, %v2937_v31 }
 0x1ce   :  { %v2957_v36 = vadd.f32 %v3222_v32, %v2949_v34 }
 0x1d0   :  { %v2958_v37 = vmax.f32 %v2957_v36, 0.0 }
 0x1d2   :  { %v2959_v38 = vpack.c.bf16 %v2958_v37, %v2958_v37 }
 0x1d4   :  { %2960 = vst [vmem:[%s4701_s4] sm:$0x1] %v2959_v38 }

</bundles_post_ra>
